<compile_context>
chip_gen: v7x
topology: tpu7x:2x2x1
jax: 0.10.0
libtpu: 0.0.40
codegen_flags: <defaults>
</compile_context>

<pallas_src>
import functools
from math import sqrt

import jax
import jax.numpy as jnp
from jax.experimental import pallas as pl
from jax.experimental.pallas import tpu as pltpu


def _round_up(x, m):
    return (x + m - 1) // m * m


def _pick_block_h(h, max_block=32):
    """Largest divisor of h that is <= max_block (row-tile height)."""
    for d in range(min(h, max_block), 0, -1):
        if h % d == 0:
            return d
    return h


# ----------------------------------------------------------------------------
# Pallas kernel: one row-block of  conv3x3( act(scale*x + shift) )
# plus per-tile partial BatchNorm statistics of the raw conv output.
# ----------------------------------------------------------------------------
def _conv3x3_kernel(x_ref, w_ref, scale_ref, shift_ref,   # inputs
                    o_ref, stats_ref,                      # outputs
                    xpad_ref,                              # VMEM scratch
                    *, relu_in):
    # x_ref:     (1, H, W, Cin)   bf16  full image for this batch element
    # w_ref:     (9*Cin, Cout)    bf16  im2col-flattened HWIO weights
    # scale_ref: (1, Cin)         f32   per-channel scale (prev BN folded)
    # shift_ref: (1, Cin)         f32   per-channel shift (prev BN folded)
    # o_ref:     (1, TH, W, Cout)       raw (pre-activation) conv output tile
    # stats_ref: (1, 1, 2, Cout)  f32   per-tile [sum, sum_of_squares]
    # xpad_ref:  (TH+2, W+2, Cin) bf16  zero-padded, activated input tile
    TH = o_ref.shape[1]
    W = o_ref.shape[2]
    Cout = o_ref.shape[3]
    Cin = x_ref.shape[3]

    hb = pl.program_id(1)
    num_hb = pl.num_programs(1)

    scale = scale_ref[...].reshape(1, 1, Cin)
    shift = shift_ref[...].reshape(1, 1, Cin)

    def activate(rows):                       # bf16 -> bf16, math in f32
        v = rows.astype(jnp.float32) * scale + shift
        if relu_in:
            v = jnp.maximum(v, 0.0)
        return v.astype(jnp.bfloat16)

    # ---- build the zero-padded, activated input tile in VMEM ---------------
    zero_col = jnp.zeros((TH + 2, 1, Cin), jnp.bfloat16)
    zero_row = jnp.zeros((1, W, Cin), jnp.bfloat16)
    xpad_ref[:, 0:1, :] = zero_col                       # left  pad column
    xpad_ref[:, W + 1:W + 2, :] = zero_col               # right pad column
    xpad_ref[1:TH + 1, 1:W + 1, :] = activate(x_ref[0, pl.ds(hb * TH, TH), :, :])

    @pl.when(hb == 0)                                    # top halo row
    def _():
        xpad_ref[0:1, 1:W + 1, :] = zero_row

    @pl.when(hb > 0)
    def _():
        xpad_ref[0:1, 1:W + 1, :] = activate(
            x_ref[0, pl.ds(hb * TH - 1, 1), :, :])

    @pl.when(hb == num_hb - 1)                           # bottom halo row
    def _():
        xpad_ref[TH + 1:TH + 2, 1:W + 1, :] = zero_row

    @pl.when(hb < num_hb - 1)
    def _():
        xpad_ref[TH + 1:TH + 2, 1:W + 1, :] = activate(
            x_ref[0, pl.ds(hb * TH + TH, 1), :, :])

    # ---- im2col: fold all 9 taps into one deep-K bf16 MXU matmul -----------
    xpad = xpad_ref[...]
    cols = []
    for dh in range(3):
        for dw in range(3):
            cols.append(xpad[dh:dh + TH, dw:dw + W, :].reshape(TH * W, Cin))
    col = jnp.concatenate(cols, axis=-1)                 # (TH*W, 9*Cin) bf16
    acc = jnp.dot(col, w_ref[...], preferred_element_type=jnp.float32)

    o_ref[...] = acc.reshape(1, TH, W, Cout).astype(o_ref.dtype)

    s = jnp.sum(acc, axis=0, keepdims=True)              # (1, Cout) f32
    ss = jnp.sum(acc * acc, axis=0, keepdims=True)       # (1, Cout) f32
    stats_ref[0, 0, :, :] = jnp.concatenate([s, ss], axis=0)


def conv3x3_layer(x, w_flat, in_scale, in_shift, relu_in, out_dtype):
    """x: (N,H,W,Cin) bf16, w_flat: (9*Cin,Cout) bf16 -> (preact, stats)."""
    N, H, W, Cin = x.shape
    Cout = w_flat.shape[-1]
    TH = _pick_block_h(H)
    HB = H // TH

    kernel = functools.partial(_conv3x3_kernel, relu_in=relu_in)
    out_bytes = N * H * W * Cout * jnp.dtype(out_dtype).itemsize
    cost = pl.CostEstimate(
        flops=2 * N * H * W * 9 * Cin * Cout,
        transcendentals=0,
        bytes_accessed=(x.size * x.dtype.itemsize
                        + w_flat.size * w_flat.dtype.itemsize
                        + out_bytes + N * HB * 2 * Cout * 4))

    return pl.pallas_call(
        kernel,
        out_shape=(jax.ShapeDtypeStruct((N, H, W, Cout), out_dtype),
                   jax.ShapeDtypeStruct((N, HB, 2, Cout), jnp.float32)),
        grid_spec=pltpu.PrefetchScalarGridSpec(
            num_scalar_prefetch=0,
            grid=(N, HB),
            in_specs=[
                pl.BlockSpec((1, H, W, Cin), lambda n, hb: (n, 0, 0, 0)),
                pl.BlockSpec((9 * Cin, Cout), lambda n, hb: (0, 0)),
                pl.BlockSpec((1, Cin), lambda n, hb: (0, 0)),
                pl.BlockSpec((1, Cin), lambda n, hb: (0, 0)),
            ],
            out_specs=[
                pl.BlockSpec((1, TH, W, Cout), lambda n, hb: (n, hb, 0, 0)),
                pl.BlockSpec((1, 1, 2, Cout), lambda n, hb: (n, hb, 0, 0)),
            ],
            scratch_shapes=[pltpu.VMEM((TH + 2, W + 2, Cin), jnp.bfloat16)],
        ),
        compiler_params=pltpu.CompilerParams(
            dimension_semantics=("parallel", "parallel"),
            vmem_limit_bytes=64 * 1024 * 1024),
        cost_estimate=cost,
    )(x, w_flat, in_scale, in_shift)


# ----------------------------------------------------------------------------
# DnCNN model (parameters built deterministically in-script)
# ----------------------------------------------------------------------------
def init_dncnn_params(key, channels, num_of_layers=17, features=64):
    """Conv weights ~ N(0, sqrt(2/(k*k*out_ch))) as in the PyTorch __init__,
    no bias; BatchNorm gamma=1, beta=0 (PyTorch default init).  Weights are
    stored im2col-flattened (9*Cin, Cout) in bf16 for the MXU."""
    k = 3
    keys = jax.random.split(key, num_of_layers)
    cin0 = _round_up(channels, 8)   # lane/packing friendly first-layer input

    def conv_w(kk, cin, cout, cin_pad=None):
        std = sqrt(2.0 / (k * k * cout))
        w = std * jax.random.normal(kk, (k, k, cin, cout), jnp.float32)
        if cin_pad is not None and cin_pad > cin:
            w = jnp.pad(w, ((0, 0), (0, 0), (0, cin_pad - cin), (0, 0)))
            cin = cin_pad
        return w.reshape(k * k * cin, cout).astype(jnp.bfloat16)

    params = [dict(w=conv_w(keys[0], channels, features, cin_pad=cin0),
                   gamma=None, beta=None, has_bn=False)]
    for i in range(1, num_of_layers - 1):
        params.append(dict(w=conv_w(keys[i], features, features),
                           gamma=jnp.ones((features,), jnp.float32),
                           beta=jnp.zeros((features,), jnp.float32),
                           has_bn=True))
    params.append(dict(w=conv_w(keys[-1], features, channels),
                       gamma=None, beta=None, has_bn=False))
    return params


def dncnn_forward(x_nchw, params):
    """DnCNN forward.  Input/output NCHW float32 (PyTorch convention)."""
    eps = 1e-5
    x = jnp.transpose(x_nchw, (0, 2, 3, 1)).astype(jnp.bfloat16)   # -> NHWC
    N, H, W, C = x.shape
    cin0 = params[0]["w"].shape[0] // 9
    if cin0 > C:                                 # zero-pad first-layer channels
        x = jnp.pad(x, ((0, 0), (0, 0), (0, 0), (0, cin0 - C)))
    M = N * H * W

    preact = x
    in_scale = jnp.ones((1, cin0), jnp.float32)
    in_shift = jnp.zeros((1, cin0), jnp.float32)
    relu_in = False                              # raw image feeds layer 0

    num_layers = len(params)
    for idx, p in enumerate(params):
        is_last = idx == num_layers - 1
        out_dtype = jnp.float32 if is_last else jnp.bfloat16
        preact, stats = conv3x3_layer(preact, p["w"], in_scale, in_shift,
                                      relu_in, out_dtype)
        if is_last:
            break
        cout = p["w"].shape[-1]
        if p["has_bn"]:
            # Training-mode BatchNorm2d: batch stats over (N,H,W), biased var,
            # eps=1e-5, affine -> folded to a per-channel scale/shift that the
            # next layer's kernel applies (together with ReLU) on its input.
            total = jnp.sum(stats, axis=(0, 1))          # (2, Cout) f32
            mean = total[0] / M
            var = total[1] / M - mean * mean
            inv_std = jax.lax.rsqrt(var + eps)
            scale = p["gamma"] * inv_std
            shift = p["beta"] - mean * scale
        else:
            scale = jnp.ones((cout,), jnp.float32)
            shift = jnp.zeros((cout,), jnp.float32)
        in_scale = scale.reshape(1, cout)
        in_shift = shift.reshape(1, cout)
        relu_in = True                           # ReLU fused into next conv

    return jnp.transpose(preact, (0, 3, 1, 2))   # NHWC -> NCHW, float32


if __name__ == "__main__":
    key = jax.random.PRNGKey(0)
    k_params, k_x = jax.random.split(key)

    # small shapes: batch=2, channels=4, spatial=16x16, shallow 5-layer DnCNN
    CHANNELS = 4
    NUM_LAYERS = 5
    x = jax.random.normal(k_x, (2, CHANNELS, 16, 16), jnp.float32)

    params = init_dncnn_params(k_params, CHANNELS, num_of_layers=NUM_LAYERS)
    fwd = jax.jit(lambda xx: dncnn_forward(xx, params))
    out = fwd(x)
    jax.block_until_ready(out)

    assert out.shape == x.shape and out.dtype == jnp.float32
    assert bool(jnp.all(jnp.isfinite(out)))
    print("KERNEL_OK")
</pallas_src>

<mosaic_0001>
module attributes {stable_mosaic.version = 11 : i64} {
  func.func @_conv3x3_kernel(%arg0: i32, %arg1: i32, %arg2: memref<1x16x16x8xbf16, #tpu.memory_space<vmem>>, %arg3: memref<72x64xbf16, #tpu.memory_space<vmem>>, %arg4: memref<1x8xf32, #tpu.memory_space<vmem>>, %arg5: memref<1x8xf32, #tpu.memory_space<vmem>>, %arg6: memref<1x16x16x64xbf16, #tpu.memory_space<vmem>>, %arg7: memref<1x1x2x64xf32, #tpu.memory_space<vmem>>, %arg8: memref<18x18x8xbf16, #tpu.memory_space<vmem>>) attributes {dimension_semantics = [#tpu.dimension_semantics<parallel>, #tpu.dimension_semantics<parallel>], iteration_bounds = array<i64: 2, 1>, scalar_prefetch = 0 : i64, scratch_operands = 1 : i64, tpu.core_type = #tpu.core_type<tc>, window_params = [{transform_indices = @transform_0, window_bounds = array<i64: 1, 16, 16, 8>}, {pipeline_mode = #tpu.pipeline_mode<synchronous>, transform_indices = @transform_1, window_bounds = array<i64: 72, 64>}, {pipeline_mode = #tpu.pipeline_mode<synchronous>, transform_indices = @transform_2, window_bounds = array<i64: 1, 8>}, {pipeline_mode = #tpu.pipeline_mode<synchronous>, transform_indices = @transform_3, window_bounds = array<i64: 1, 8>}, {transform_indices = @transform_4, window_bounds = array<i64: 1, 16, 16, 64>}, {transform_indices = @transform_5, window_bounds = array<i64: 1, 1, 2, 64>}]} {
    %c0 = arith.constant 0 : index
    %c0_0 = arith.constant 0 : index
    %0 = vector.load %arg4[%c0, %c0_0] : memref<1x8xf32, #tpu.memory_space<vmem>>, vector<1x8xf32>
    %1 = vector.shape_cast %0 : vector<1x8xf32> to vector<1x1x8xf32>
    %c0_1 = arith.constant 0 : index
    %c0_2 = arith.constant 0 : index
    %2 = vector.load %arg5[%c0_1, %c0_2] : memref<1x8xf32, #tpu.memory_space<vmem>>, vector<1x8xf32>
    %3 = vector.shape_cast %2 : vector<1x8xf32> to vector<1x1x8xf32>
    %cst = arith.constant 0.000000e+00 : bf16
    %4 = vector.broadcast %cst : bf16 to vector<18x1x8xbf16>
    %cst_3 = arith.constant 0.000000e+00 : bf16
    %5 = vector.broadcast %cst_3 : bf16 to vector<1x16x8xbf16>
    %c0_4 = arith.constant 0 : index
    %c0_5 = arith.constant 0 : index
    %c0_6 = arith.constant 0 : index
    %6 = vector.load %arg8[%c0_4, %c0_5, %c0_6] : memref<18x18x8xbf16, #tpu.memory_space<vmem>>, vector<18x1x8xbf16>
    tpu.vector_store %arg8[%c0_4, %c0_5, %c0_6], %4 {strides = array<i32>} : memref<18x18x8xbf16, #tpu.memory_space<vmem>>, vector<18x1x8xbf16>,
    %c0_7 = arith.constant 0 : index
    %c17 = arith.constant 17 : index
    %c0_8 = arith.constant 0 : index
    %7 = vector.load %arg8[%c0_7, %c17, %c0_8] : memref<18x18x8xbf16, #tpu.memory_space<vmem>>, vector<18x1x8xbf16>
    tpu.vector_store %arg8[%c0_7, %c17, %c0_8], %4 {strides = array<i32>} : memref<18x18x8xbf16, #tpu.memory_space<vmem>>, vector<18x1x8xbf16>,
    %c16_i32 = arith.constant 16 : i32
    %8 = arith.muli %arg1, %c16_i32 : i32
    %c0_9 = arith.constant 0 : index
    %9 = arith.index_cast %8 : i32 to index
    %c0_10 = arith.constant 0 : index
    %c0_11 = arith.constant 0 : index
    %10 = vector.load %arg2[%c0_9, %9, %c0_10, %c0_11] : memref<1x16x16x8xbf16, #tpu.memory_space<vmem>>, vector<1x16x16x8xbf16>
    %11 = vector.shape_cast %10 : vector<1x16x16x8xbf16> to vector<16x16x8xbf16>
    %12 = arith.extf %11 : vector<16x16x8xbf16> to vector<16x16x8xf32>
    %13 = vector.broadcast %1 : vector<1x1x8xf32> to vector<16x16x8xf32>
    %14 = arith.mulf %12, %13 : vector<16x16x8xf32>
    %15 = vector.broadcast %3 : vector<1x1x8xf32> to vector<16x16x8xf32>
    %16 = arith.addf %14, %15 : vector<16x16x8xf32>
    %17 = arith.truncf %16 : vector<16x16x8xf32> to vector<16x16x8xbf16>
    %c1 = arith.constant 1 : index
    %c1_12 = arith.constant 1 : index
    %c0_13 = arith.constant 0 : index
    %18 = vector.load %arg8[%c1, %c1_12, %c0_13] : memref<18x18x8xbf16, #tpu.memory_space<vmem>>, vector<16x16x8xbf16>
    tpu.vector_store %arg8[%c1, %c1_12, %c0_13], %17 {strides = array<i32>} : memref<18x18x8xbf16, #tpu.memory_space<vmem>>, vector<16x16x8xbf16>,
    %c0_i32 = arith.constant 0 : i32
    %19 = arith.cmpi eq, %arg1, %c0_i32 : i32
    %20 = arith.extui %19 : i1 to i32
    %c0_i32_14 = arith.constant 0 : i32
    %21 = arith.cmpi ne, %20, %c0_i32_14 : i32
    scf.if %21 {
      %c0_37 = arith.constant 0 : index
      %c1_38 = arith.constant 1 : index
      %c0_39 = arith.constant 0 : index
      %65 = vector.load %arg8[%c0_37, %c1_38, %c0_39] : memref<18x18x8xbf16, #tpu.memory_space<vmem>>, vector<1x16x8xbf16>
      tpu.vector_store %arg8[%c0_37, %c1_38, %c0_39], %5 {strides = array<i32>} : memref<18x18x8xbf16, #tpu.memory_space<vmem>>, vector<1x16x8xbf16>,
    } else {
    }
    %c0_i32_15 = arith.constant 0 : i32
    %22 = arith.cmpi sgt, %arg1, %c0_i32_15 : i32
    %23 = arith.extui %22 : i1 to i32
    %c0_i32_16 = arith.constant 0 : i32
    %24 = arith.cmpi ne, %23, %c0_i32_16 : i32
    scf.if %24 {
      %c16_i32_37 = arith.constant 16 : i32
      %65 = arith.muli %arg1, %c16_i32_37 : i32
      %c1_i32 = arith.constant 1 : i32
      %66 = arith.subi %65, %c1_i32 : i32
      %c0_38 = arith.constant 0 : index
      %67 = arith.index_cast %66 : i32 to index
      %c0_39 = arith.constant 0 : index
      %c0_40 = arith.constant 0 : index
      %68 = vector.load %arg2[%c0_38, %67, %c0_39, %c0_40] : memref<1x16x16x8xbf16, #tpu.memory_space<vmem>>, vector<1x1x16x8xbf16>
      %69 = vector.shape_cast %68 : vector<1x1x16x8xbf16> to vector<1x16x8xbf16>
      %70 = arith.extf %69 : vector<1x16x8xbf16> to vector<1x16x8xf32>
      %71 = vector.broadcast %1 : vector<1x1x8xf32> to vector<1x16x8xf32>
      %72 = arith.mulf %70, %71 : vector<1x16x8xf32>
      %73 = vector.broadcast %3 : vector<1x1x8xf32> to vector<1x16x8xf32>
      %74 = arith.addf %72, %73 : vector<1x16x8xf32>
      %75 = arith.truncf %74 : vector<1x16x8xf32> to vector<1x16x8xbf16>
      %c0_41 = arith.constant 0 : index
      %c1_42 = arith.constant 1 : index
      %c0_43 = arith.constant 0 : index
      %76 = vector.load %arg8[%c0_41, %c1_42, %c0_43] : memref<18x18x8xbf16, #tpu.memory_space<vmem>>, vector<1x16x8xbf16>
      tpu.vector_store %arg8[%c0_41, %c1_42, %c0_43], %75 {strides = array<i32>} : memref<18x18x8xbf16, #tpu.memory_space<vmem>>, vector<1x16x8xbf16>,
    } else {
    }
    %c0_i32_17 = arith.constant 0 : i32
    %25 = arith.cmpi eq, %arg1, %c0_i32_17 : i32
    %26 = arith.extui %25 : i1 to i32
    %c0_i32_18 = arith.constant 0 : i32
    %27 = arith.cmpi ne, %26, %c0_i32_18 : i32
    scf.if %27 {
      %c17_37 = arith.constant 17 : index
      %c1_38 = arith.constant 1 : index
      %c0_39 = arith.constant 0 : index
      %65 = vector.load %arg8[%c17_37, %c1_38, %c0_39] : memref<18x18x8xbf16, #tpu.memory_space<vmem>>, vector<1x16x8xbf16>
      tpu.vector_store %arg8[%c17_37, %c1_38, %c0_39], %5 {strides = array<i32>} : memref<18x18x8xbf16, #tpu.memory_space<vmem>>, vector<1x16x8xbf16>,
    } else {
    }
    %c0_i32_19 = arith.constant 0 : i32
    %28 = arith.cmpi slt, %arg1, %c0_i32_19 : i32
    %29 = arith.extui %28 : i1 to i32
    %c0_i32_20 = arith.constant 0 : i32
    %30 = arith.cmpi ne, %29, %c0_i32_20 : i32
    scf.if %30 {
      %c16_i32_37 = arith.constant 16 : i32
      %65 = arith.muli %arg1, %c16_i32_37 : i32
      %c16_i32_38 = arith.constant 16 : i32
      %66 = arith.addi %65, %c16_i32_38 : i32
      %c0_39 = arith.constant 0 : index
      %67 = arith.index_cast %66 : i32 to index
      %c0_40 = arith.constant 0 : index
      %c0_41 = arith.constant 0 : index
      %68 = vector.load %arg2[%c0_39, %67, %c0_40, %c0_41] : memref<1x16x16x8xbf16, #tpu.memory_space<vmem>>, vector<1x1x16x8xbf16>
      %69 = vector.shape_cast %68 : vector<1x1x16x8xbf16> to vector<1x16x8xbf16>
      %70 = arith.extf %69 : vector<1x16x8xbf16> to vector<1x16x8xf32>
      %71 = vector.broadcast %1 : vector<1x1x8xf32> to vector<1x16x8xf32>
      %72 = arith.mulf %70, %71 : vector<1x16x8xf32>
      %73 = vector.broadcast %3 : vector<1x1x8xf32> to vector<1x16x8xf32>
      %74 = arith.addf %72, %73 : vector<1x16x8xf32>
      %75 = arith.truncf %74 : vector<1x16x8xf32> to vector<1x16x8xbf16>
      %c17_42 = arith.constant 17 : index
      %c1_43 = arith.constant 1 : index
      %c0_44 = arith.constant 0 : index
      %76 = vector.load %arg8[%c17_42, %c1_43, %c0_44] : memref<18x18x8xbf16, #tpu.memory_space<vmem>>, vector<1x16x8xbf16>
      tpu.vector_store %arg8[%c17_42, %c1_43, %c0_44], %75 {strides = array<i32>} : memref<18x18x8xbf16, #tpu.memory_space<vmem>>, vector<1x16x8xbf16>,
    } else {
    }
    %c0_21 = arith.constant 0 : index
    %c0_22 = arith.constant 0 : index
    %c0_23 = arith.constant 0 : index
    %31 = vector.load %arg8[%c0_21, %c0_22, %c0_23] : memref<18x18x8xbf16, #tpu.memory_space<vmem>>, vector<18x18x8xbf16>
    %32 = vector.extract_strided_slice %31 {offsets = [0, 0, 0], sizes = [16, 16, 8], strides = [1, 1, 1]} : vector<18x18x8xbf16> to vector<16x16x8xbf16>
    %33 = vector.shape_cast %32 : vector<16x16x8xbf16> to vector<256x8xbf16>
    %34 = vector.extract_strided_slice %31 {offsets = [0, 1, 0], sizes = [16, 16, 8], strides = [1, 1, 1]} : vector<18x18x8xbf16> to vector<16x16x8xbf16>
    %35 = vector.shape_cast %34 : vector<16x16x8xbf16> to vector<256x8xbf16>
    %36 = vector.extract_strided_slice %31 {offsets = [0, 2, 0], sizes = [16, 16, 8], strides = [1, 1, 1]} : vector<18x18x8xbf16> to vector<16x16x8xbf16>
    %37 = vector.shape_cast %36 : vector<16x16x8xbf16> to vector<256x8xbf16>
    %38 = vector.extract_strided_slice %31 {offsets = [1, 0, 0], sizes = [16, 16, 8], strides = [1, 1, 1]} : vector<18x18x8xbf16> to vector<16x16x8xbf16>
    %39 = vector.shape_cast %38 : vector<16x16x8xbf16> to vector<256x8xbf16>
    %40 = vector.extract_strided_slice %31 {offsets = [1, 1, 0], sizes = [16, 16, 8], strides = [1, 1, 1]} : vector<18x18x8xbf16> to vector<16x16x8xbf16>
    %41 = vector.shape_cast %40 : vector<16x16x8xbf16> to vector<256x8xbf16>
    %42 = vector.extract_strided_slice %31 {offsets = [1, 2, 0], sizes = [16, 16, 8], strides = [1, 1, 1]} : vector<18x18x8xbf16> to vector<16x16x8xbf16>
    %43 = vector.shape_cast %42 : vector<16x16x8xbf16> to vector<256x8xbf16>
    %44 = vector.extract_strided_slice %31 {offsets = [2, 0, 0], sizes = [16, 16, 8], strides = [1, 1, 1]} : vector<18x18x8xbf16> to vector<16x16x8xbf16>
    %45 = vector.shape_cast %44 : vector<16x16x8xbf16> to vector<256x8xbf16>
    %46 = vector.extract_strided_slice %31 {offsets = [2, 1, 0], sizes = [16, 16, 8], strides = [1, 1, 1]} : vector<18x18x8xbf16> to vector<16x16x8xbf16>
    %47 = vector.shape_cast %46 : vector<16x16x8xbf16> to vector<256x8xbf16>
    %48 = vector.extract_strided_slice %31 {offsets = [2, 2, 0], sizes = [16, 16, 8], strides = [1, 1, 1]} : vector<18x18x8xbf16> to vector<16x16x8xbf16>
    %49 = vector.shape_cast %48 : vector<16x16x8xbf16> to vector<256x8xbf16>
    %50 = tpu.concatenate %33, %35, %37, %39, %41, %43, %45, %47, %49 in 1 : vector<256x8xbf16>, vector<256x8xbf16>, vector<256x8xbf16>, vector<256x8xbf16>, vector<256x8xbf16>, vector<256x8xbf16>, vector<256x8xbf16>, vector<256x8xbf16>, vector<256x8xbf16> -> vector<256x72xbf16>
    %c0_24 = arith.constant 0 : index
    %c0_25 = arith.constant 0 : index
    %51 = vector.load %arg3[%c0_24, %c0_25] : memref<72x64xbf16, #tpu.memory_space<vmem>>, vector<72x64xbf16>
    %cst_26 = arith.constant dense<0.000000e+00> : vector<256x64xf32>
    %52 = tpu.matmul %50, %51, %cst_26 {dimension_numbers = #tpu.dot_dimension_numbers<[1], [0], [0], [1], [0, 0, 1, 1], [], []>} : vector<256x72xbf16>, vector<72x64xbf16>, vector<256x64xf32> -> vector<256x64xf32>
    %53 = vector.shape_cast %52 : vector<256x64xf32> to vector<1x16x16x64xf32>
    %54 = arith.truncf %53 : vector<1x16x16x64xf32> to vector<1x16x16x64xbf16>
    %c0_27 = arith.constant 0 : index
    %c0_28 = arith.constant 0 : index
    %c0_29 = arith.constant 0 : index
    %c0_30 = arith.constant 0 : index
    %55 = vector.load %arg6[%c0_27, %c0_28, %c0_29, %c0_30] : memref<1x16x16x64xbf16, #tpu.memory_space<vmem>>, vector<1x16x16x64xbf16>
    tpu.vector_store %arg6[%c0_27, %c0_28, %c0_29, %c0_30], %54 {strides = array<i32>} : memref<1x16x16x64xbf16, #tpu.memory_space<vmem>>, vector<1x16x16x64xbf16>,
    %cst_31 = arith.constant dense<0.000000e+00> : vector<64xf32>
    %56 = vector.multi_reduction <add>, %52, %cst_31 [0] : vector<256x64xf32> to vector<64xf32>
    %57 = vector.shape_cast %56 : vector<64xf32> to vector<1x64xf32>
    %58 = arith.mulf %52, %52 : vector<256x64xf32>
    %cst_32 = arith.constant dense<0.000000e+00> : vector<64xf32>
    %59 = vector.multi_reduction <add>, %58, %cst_32 [0] : vector<256x64xf32> to vector<64xf32>
    %60 = vector.shape_cast %59 : vector<64xf32> to vector<1x64xf32>
    %61 = tpu.concatenate %57, %60 in 0 : vector<1x64xf32>, vector<1x64xf32> -> vector<2x64xf32>
    %c0_33 = arith.constant 0 : index
    %c0_34 = arith.constant 0 : index
    %c0_35 = arith.constant 0 : index
    %c0_36 = arith.constant 0 : index
    %62 = vector.load %arg7[%c0_33, %c0_34, %c0_35, %c0_36] : memref<1x1x2x64xf32, #tpu.memory_space<vmem>>, vector<1x1x2x64xf32>
    %63 = vector.shape_cast %62 : vector<1x1x2x64xf32> to vector<2x64xf32>
    %64 = vector.shape_cast %61 : vector<2x64xf32> to vector<1x1x2x64xf32>
    tpu.vector_store %arg7[%c0_33, %c0_34, %c0_35, %c0_36], %64 {strides = array<i32>} : memref<1x1x2x64xf32, #tpu.memory_space<vmem>>, vector<1x1x2x64xf32>,
    return
  }
  func.func @transform_0(%arg0: i32, %arg1: i32) -> (i32, i32, i32, i32) {
    %c0_i32 = arith.constant 0 : i32
    %c0_i32_0 = arith.constant 0 : i32
    %c0_i32_1 = arith.constant 0 : i32
    %c0_i32_2 = arith.constant 0 : i32
    return %arg0, %c0_i32, %c0_i32_0, %c0_i32_1 : i32, i32, i32, i32
  }
  func.func @transform_1(%arg0: i32, %arg1: i32) -> (i32, i32) {
    %c0_i32 = arith.constant 0 : i32
    %c0_i32_0 = arith.constant 0 : i32
    %c0_i32_1 = arith.constant 0 : i32
    return %c0_i32, %c0_i32_0 : i32, i32
  }
  func.func @transform_2(%arg0: i32, %arg1: i32) -> (i32, i32) {
    %c0_i32 = arith.constant 0 : i32
    %c0_i32_0 = arith.constant 0 : i32
    %c0_i32_1 = arith.constant 0 : i32
    return %c0_i32, %c0_i32_0 : i32, i32
  }
  func.func @transform_3(%arg0: i32, %arg1: i32) -> (i32, i32) {
    %c0_i32 = arith.constant 0 : i32
    %c0_i32_0 = arith.constant 0 : i32
    %c0_i32_1 = arith.constant 0 : i32
    return %c0_i32, %c0_i32_0 : i32, i32
  }
  func.func @transform_4(%arg0: i32, %arg1: i32) -> (i32, i32, i32, i32) {
    %c0_i32 = arith.constant 0 : i32
    %c0_i32_0 = arith.constant 0 : i32
    %c0_i32_1 = arith.constant 0 : i32
    return %arg0, %arg1, %c0_i32, %c0_i32_0 : i32, i32, i32, i32
  }
  func.func @transform_5(%arg0: i32, %arg1: i32) -> (i32, i32, i32, i32) {
    %c0_i32 = arith.constant 0 : i32
    %c0_i32_0 = arith.constant 0 : i32
    %c0_i32_1 = arith.constant 0 : i32
    return %arg0, %arg1, %c0_i32, %c0_i32_0 : i32, i32, i32, i32
  }
}

module attributes {stable_mosaic.version = 11 : i64} {
  func.func @_conv3x3_kernel(%arg0: i32, %arg1: i32, %arg2: memref<1x16x16x64xbf16, #tpu.memory_space<vmem>>, %arg3: memref<576x64xbf16, #tpu.memory_space<vmem>>, %arg4: memref<1x64xf32, #tpu.memory_space<vmem>>, %arg5: memref<1x64xf32, #tpu.memory_space<vmem>>, %arg6: memref<1x16x16x64xbf16, #tpu.memory_space<vmem>>, %arg7: memref<1x1x2x64xf32, #tpu.memory_space<vmem>>, %arg8: memref<18x18x64xbf16, #tpu.memory_space<vmem>>) attributes {dimension_semantics = [#tpu.dimension_semantics<parallel>, #tpu.dimension_semantics<parallel>], iteration_bounds = array<i64: 2, 1>, scalar_prefetch = 0 : i64, scratch_operands = 1 : i64, tpu.core_type = #tpu.core_type<tc>, window_params = [{transform_indices = @transform_0, window_bounds = array<i64: 1, 16, 16, 64>}, {pipeline_mode = #tpu.pipeline_mode<synchronous>, transform_indices = @transform_1, window_bounds = array<i64: 576, 64>}, {pipeline_mode = #tpu.pipeline_mode<synchronous>, transform_indices = @transform_2, window_bounds = array<i64: 1, 64>}, {pipeline_mode = #tpu.pipeline_mode<synchronous>, transform_indices = @transform_3, window_bounds = array<i64: 1, 64>}, {transform_indices = @transform_4, window_bounds = array<i64: 1, 16, 16, 64>}, {transform_indices = @transform_5, window_bounds = array<i64: 1, 1, 2, 64>}]} {
    %c0 = arith.constant 0 : index
    %c0_0 = arith.constant 0 : index
    %0 = vector.load %arg4[%c0, %c0_0] : memref<1x64xf32, #tpu.memory_space<vmem>>, vector<1x64xf32>
    %1 = vector.shape_cast %0 : vector<1x64xf32> to vector<1x1x64xf32>
    %c0_1 = arith.constant 0 : index
    %c0_2 = arith.constant 0 : index
    %2 = vector.load %arg5[%c0_1, %c0_2] : memref<1x64xf32, #tpu.memory_space<vmem>>, vector<1x64xf32>
    %3 = vector.shape_cast %2 : vector<1x64xf32> to vector<1x1x64xf32>
    %cst = arith.constant 0.000000e+00 : bf16
    %4 = vector.broadcast %cst : bf16 to vector<18x1x64xbf16>
    %cst_3 = arith.constant 0.000000e+00 : bf16
    %5 = vector.broadcast %cst_3 : bf16 to vector<1x16x64xbf16>
    %c0_4 = arith.constant 0 : index
    %c0_5 = arith.constant 0 : index
    %c0_6 = arith.constant 0 : index
    %6 = vector.load %arg8[%c0_4, %c0_5, %c0_6] : memref<18x18x64xbf16, #tpu.memory_space<vmem>>, vector<18x1x64xbf16>
    tpu.vector_store %arg8[%c0_4, %c0_5, %c0_6], %4 {strides = array<i32>} : memref<18x18x64xbf16, #tpu.memory_space<vmem>>, vector<18x1x64xbf16>,
    %c0_7 = arith.constant 0 : index
    %c17 = arith.constant 17 : index
    %c0_8 = arith.constant 0 : index
    %7 = vector.load %arg8[%c0_7, %c17, %c0_8] : memref<18x18x64xbf16, #tpu.memory_space<vmem>>, vector<18x1x64xbf16>
    tpu.vector_store %arg8[%c0_7, %c17, %c0_8], %4 {strides = array<i32>} : memref<18x18x64xbf16, #tpu.memory_space<vmem>>, vector<18x1x64xbf16>,
    %c16_i32 = arith.constant 16 : i32
    %8 = arith.muli %arg1, %c16_i32 : i32
    %c0_9 = arith.constant 0 : index
    %9 = arith.index_cast %8 : i32 to index
    %c0_10 = arith.constant 0 : index
    %c0_11 = arith.constant 0 : index
    %10 = vector.load %arg2[%c0_9, %9, %c0_10, %c0_11] : memref<1x16x16x64xbf16, #tpu.memory_space<vmem>>, vector<1x16x16x64xbf16>
    %11 = vector.shape_cast %10 : vector<1x16x16x64xbf16> to vector<16x16x64xbf16>
    %12 = arith.extf %11 : vector<16x16x64xbf16> to vector<16x16x64xf32>
    %13 = vector.broadcast %1 : vector<1x1x64xf32> to vector<16x16x64xf32>
    %14 = arith.mulf %12, %13 : vector<16x16x64xf32>
    %15 = vector.broadcast %3 : vector<1x1x64xf32> to vector<16x16x64xf32>
    %16 = arith.addf %14, %15 : vector<16x16x64xf32>
    %cst_12 = arith.constant 0.000000e+00 : f32
    %17 = vector.broadcast %cst_12 : f32 to vector<16x16x64xf32>
    %18 = arith.maximumf %16, %17 : vector<16x16x64xf32>
    %19 = arith.truncf %18 : vector<16x16x64xf32> to vector<16x16x64xbf16>
    %c1 = arith.constant 1 : index
    %c1_13 = arith.constant 1 : index
    %c0_14 = arith.constant 0 : index
    %20 = vector.load %arg8[%c1, %c1_13, %c0_14] : memref<18x18x64xbf16, #tpu.memory_space<vmem>>, vector<16x16x64xbf16>
    tpu.vector_store %arg8[%c1, %c1_13, %c0_14], %19 {strides = array<i32>} : memref<18x18x64xbf16, #tpu.memory_space<vmem>>, vector<16x16x64xbf16>,
    %c0_i32 = arith.constant 0 : i32
    %21 = arith.cmpi eq, %arg1, %c0_i32 : i32
    %22 = arith.extui %21 : i1 to i32
    %c0_i32_15 = arith.constant 0 : i32
    %23 = arith.cmpi ne, %22, %c0_i32_15 : i32
    scf.if %23 {
      %c0_38 = arith.constant 0 : index
      %c1_39 = arith.constant 1 : index
      %c0_40 = arith.constant 0 : index
      %67 = vector.load %arg8[%c0_38, %c1_39, %c0_40] : memref<18x18x64xbf16, #tpu.memory_space<vmem>>, vector<1x16x64xbf16>
      tpu.vector_store %arg8[%c0_38, %c1_39, %c0_40], %5 {strides = array<i32>} : memref<18x18x64xbf16, #tpu.memory_space<vmem>>, vector<1x16x64xbf16>,
    } else {
    }
    %c0_i32_16 = arith.constant 0 : i32
    %24 = arith.cmpi sgt, %arg1, %c0_i32_16 : i32
    %25 = arith.extui %24 : i1 to i32
    %c0_i32_17 = arith.constant 0 : i32
    %26 = arith.cmpi ne, %25, %c0_i32_17 : i32
    scf.if %26 {
      %c16_i32_38 = arith.constant 16 : i32
      %67 = arith.muli %arg1, %c16_i32_38 : i32
      %c1_i32 = arith.constant 1 : i32
      %68 = arith.subi %67, %c1_i32 : i32
      %c0_39 = arith.constant 0 : index
      %69 = arith.index_cast %68 : i32 to index
      %c0_40 = arith.constant 0 : index
      %c0_41 = arith.constant 0 : index
      %70 = vector.load %arg2[%c0_39, %69, %c0_40, %c0_41] : memref<1x16x16x64xbf16, #tpu.memory_space<vmem>>, vector<1x1x16x64xbf16>
      %71 = vector.shape_cast %70 : vector<1x1x16x64xbf16> to vector<1x16x64xbf16>
      %72 = arith.extf %71 : vector<1x16x64xbf16> to vector<1x16x64xf32>
      %73 = vector.broadcast %1 : vector<1x1x64xf32> to vector<1x16x64xf32>
      %74 = arith.mulf %72, %73 : vector<1x16x64xf32>
      %75 = vector.broadcast %3 : vector<1x1x64xf32> to vector<1x16x64xf32>
      %76 = arith.addf %74, %75 : vector<1x16x64xf32>
      %cst_42 = arith.constant 0.000000e+00 : f32
      %77 = vector.broadcast %cst_42 : f32 to vector<1x16x64xf32>
      %78 = arith.maximumf %76, %77 : vector<1x16x64xf32>
      %79 = arith.truncf %78 : vector<1x16x64xf32> to vector<1x16x64xbf16>
      %c0_43 = arith.constant 0 : index
      %c1_44 = arith.constant 1 : index
      %c0_45 = arith.constant 0 : index
      %80 = vector.load %arg8[%c0_43, %c1_44, %c0_45] : memref<18x18x64xbf16, #tpu.memory_space<vmem>>, vector<1x16x64xbf16>
      tpu.vector_store %arg8[%c0_43, %c1_44, %c0_45], %79 {strides = array<i32>} : memref<18x18x64xbf16, #tpu.memory_space<vmem>>, vector<1x16x64xbf16>,
    } else {
    }
    %c0_i32_18 = arith.constant 0 : i32
    %27 = arith.cmpi eq, %arg1, %c0_i32_18 : i32
    %28 = arith.extui %27 : i1 to i32
    %c0_i32_19 = arith.constant 0 : i32
    %29 = arith.cmpi ne, %28, %c0_i32_19 : i32
    scf.if %29 {
      %c17_38 = arith.constant 17 : index
      %c1_39 = arith.constant 1 : index
      %c0_40 = arith.constant 0 : index
      %67 = vector.load %arg8[%c17_38, %c1_39, %c0_40] : memref<18x18x64xbf16, #tpu.memory_space<vmem>>, vector<1x16x64xbf16>
      tpu.vector_store %arg8[%c17_38, %c1_39, %c0_40], %5 {strides = array<i32>} : memref<18x18x64xbf16, #tpu.memory_space<vmem>>, vector<1x16x64xbf16>,
    } else {
    }
    %c0_i32_20 = arith.constant 0 : i32
    %30 = arith.cmpi slt, %arg1, %c0_i32_20 : i32
    %31 = arith.extui %30 : i1 to i32
    %c0_i32_21 = arith.constant 0 : i32
    %32 = arith.cmpi ne, %31, %c0_i32_21 : i32
    scf.if %32 {
      %c16_i32_38 = arith.constant 16 : i32
      %67 = arith.muli %arg1, %c16_i32_38 : i32
      %c16_i32_39 = arith.constant 16 : i32
      %68 = arith.addi %67, %c16_i32_39 : i32
      %c0_40 = arith.constant 0 : index
      %69 = arith.index_cast %68 : i32 to index
      %c0_41 = arith.constant 0 : index
      %c0_42 = arith.constant 0 : index
      %70 = vector.load %arg2[%c0_40, %69, %c0_41, %c0_42] : memref<1x16x16x64xbf16, #tpu.memory_space<vmem>>, vector<1x1x16x64xbf16>
      %71 = vector.shape_cast %70 : vector<1x1x16x64xbf16> to vector<1x16x64xbf16>
      %72 = arith.extf %71 : vector<1x16x64xbf16> to vector<1x16x64xf32>
      %73 = vector.broadcast %1 : vector<1x1x64xf32> to vector<1x16x64xf32>
      %74 = arith.mulf %72, %73 : vector<1x16x64xf32>
      %75 = vector.broadcast %3 : vector<1x1x64xf32> to vector<1x16x64xf32>
      %76 = arith.addf %74, %75 : vector<1x16x64xf32>
      %cst_43 = arith.constant 0.000000e+00 : f32
      %77 = vector.broadcast %cst_43 : f32 to vector<1x16x64xf32>
      %78 = arith.maximumf %76, %77 : vector<1x16x64xf32>
      %79 = arith.truncf %78 : vector<1x16x64xf32> to vector<1x16x64xbf16>
      %c17_44 = arith.constant 17 : index
      %c1_45 = arith.constant 1 : index
      %c0_46 = arith.constant 0 : index
      %80 = vector.load %arg8[%c17_44, %c1_45, %c0_46] : memref<18x18x64xbf16, #tpu.memory_space<vmem>>, vector<1x16x64xbf16>
      tpu.vector_store %arg8[%c17_44, %c1_45, %c0_46], %79 {strides = array<i32>} : memref<18x18x64xbf16, #tpu.memory_space<vmem>>, vector<1x16x64xbf16>,
    } else {
    }
    %c0_22 = arith.constant 0 : index
    %c0_23 = arith.constant 0 : index
    %c0_24 = arith.constant 0 : index
    %33 = vector.load %arg8[%c0_22, %c0_23, %c0_24] : memref<18x18x64xbf16, #tpu.memory_space<vmem>>, vector<18x18x64xbf16>
    %34 = vector.extract_strided_slice %33 {offsets = [0, 0, 0], sizes = [16, 16, 64], strides = [1, 1, 1]} : vector<18x18x64xbf16> to vector<16x16x64xbf16>
    %35 = vector.shape_cast %34 : vector<16x16x64xbf16> to vector<256x64xbf16>
    %36 = vector.extract_strided_slice %33 {offsets = [0, 1, 0], sizes = [16, 16, 64], strides = [1, 1, 1]} : vector<18x18x64xbf16> to vector<16x16x64xbf16>
    %37 = vector.shape_cast %36 : vector<16x16x64xbf16> to vector<256x64xbf16>
    %38 = vector.extract_strided_slice %33 {offsets = [0, 2, 0], sizes = [16, 16, 64], strides = [1, 1, 1]} : vector<18x18x64xbf16> to vector<16x16x64xbf16>
    %39 = vector.shape_cast %38 : vector<16x16x64xbf16> to vector<256x64xbf16>
    %40 = vector.extract_strided_slice %33 {offsets = [1, 0, 0], sizes = [16, 16, 64], strides = [1, 1, 1]} : vector<18x18x64xbf16> to vector<16x16x64xbf16>
    %41 = vector.shape_cast %40 : vector<16x16x64xbf16> to vector<256x64xbf16>
    %42 = vector.extract_strided_slice %33 {offsets = [1, 1, 0], sizes = [16, 16, 64], strides = [1, 1, 1]} : vector<18x18x64xbf16> to vector<16x16x64xbf16>
    %43 = vector.shape_cast %42 : vector<16x16x64xbf16> to vector<256x64xbf16>
    %44 = vector.extract_strided_slice %33 {offsets = [1, 2, 0], sizes = [16, 16, 64], strides = [1, 1, 1]} : vector<18x18x64xbf16> to vector<16x16x64xbf16>
    %45 = vector.shape_cast %44 : vector<16x16x64xbf16> to vector<256x64xbf16>
    %46 = vector.extract_strided_slice %33 {offsets = [2, 0, 0], sizes = [16, 16, 64], strides = [1, 1, 1]} : vector<18x18x64xbf16> to vector<16x16x64xbf16>
    %47 = vector.shape_cast %46 : vector<16x16x64xbf16> to vector<256x64xbf16>
    %48 = vector.extract_strided_slice %33 {offsets = [2, 1, 0], sizes = [16, 16, 64], strides = [1, 1, 1]} : vector<18x18x64xbf16> to vector<16x16x64xbf16>
    %49 = vector.shape_cast %48 : vector<16x16x64xbf16> to vector<256x64xbf16>
    %50 = vector.extract_strided_slice %33 {offsets = [2, 2, 0], sizes = [16, 16, 64], strides = [1, 1, 1]} : vector<18x18x64xbf16> to vector<16x16x64xbf16>
    %51 = vector.shape_cast %50 : vector<16x16x64xbf16> to vector<256x64xbf16>
    %52 = tpu.concatenate %35, %37, %39, %41, %43, %45, %47, %49, %51 in 1 : vector<256x64xbf16>, vector<256x64xbf16>, vector<256x64xbf16>, vector<256x64xbf16>, vector<256x64xbf16>, vector<256x64xbf16>, vector<256x64xbf16>, vector<256x64xbf16>, vector<256x64xbf16> -> vector<256x576xbf16>
    %c0_25 = arith.constant 0 : index
    %c0_26 = arith.constant 0 : index
    %53 = vector.load %arg3[%c0_25, %c0_26] : memref<576x64xbf16, #tpu.memory_space<vmem>>, vector<576x64xbf16>
    %cst_27 = arith.constant dense<0.000000e+00> : vector<256x64xf32>
    %54 = tpu.matmul %52, %53, %cst_27 {dimension_numbers = #tpu.dot_dimension_numbers<[1], [0], [0], [1], [0, 0, 1, 1], [], []>} : vector<256x576xbf16>, vector<576x64xbf16>, vector<256x64xf32> -> vector<256x64xf32>
    %55 = vector.shape_cast %54 : vector<256x64xf32> to vector<1x16x16x64xf32>
    %56 = arith.truncf %55 : vector<1x16x16x64xf32> to vector<1x16x16x64xbf16>
    %c0_28 = arith.constant 0 : index
    %c0_29 = arith.constant 0 : index
    %c0_30 = arith.constant 0 : index
    %c0_31 = arith.constant 0 : index
    %57 = vector.load %arg6[%c0_28, %c0_29, %c0_30, %c0_31] : memref<1x16x16x64xbf16, #tpu.memory_space<vmem>>, vector<1x16x16x64xbf16>
    tpu.vector_store %arg6[%c0_28, %c0_29, %c0_30, %c0_31], %56 {strides = array<i32>} : memref<1x16x16x64xbf16, #tpu.memory_space<vmem>>, vector<1x16x16x64xbf16>,
    %cst_32 = arith.constant dense<0.000000e+00> : vector<64xf32>
    %58 = vector.multi_reduction <add>, %54, %cst_32 [0] : vector<256x64xf32> to vector<64xf32>
    %59 = vector.shape_cast %58 : vector<64xf32> to vector<1x64xf32>
    %60 = arith.mulf %54, %54 : vector<256x64xf32>
    %cst_33 = arith.constant dense<0.000000e+00> : vector<64xf32>
    %61 = vector.multi_reduction <add>, %60, %cst_33 [0] : vector<256x64xf32> to vector<64xf32>
    %62 = vector.shape_cast %61 : vector<64xf32> to vector<1x64xf32>
    %63 = tpu.concatenate %59, %62 in 0 : vector<1x64xf32>, vector<1x64xf32> -> vector<2x64xf32>
    %c0_34 = arith.constant 0 : index
    %c0_35 = arith.constant 0 : index
    %c0_36 = arith.constant 0 : index
    %c0_37 = arith.constant 0 : index
    %64 = vector.load %arg7[%c0_34, %c0_35, %c0_36, %c0_37] : memref<1x1x2x64xf32, #tpu.memory_space<vmem>>, vector<1x1x2x64xf32>
    %65 = vector.shape_cast %64 : vector<1x1x2x64xf32> to vector<2x64xf32>
    %66 = vector.shape_cast %63 : vector<2x64xf32> to vector<1x1x2x64xf32>
    tpu.vector_store %arg7[%c0_34, %c0_35, %c0_36, %c0_37], %66 {strides = array<i32>} : memref<1x1x2x64xf32, #tpu.memory_space<vmem>>, vector<1x1x2x64xf32>,
    return
  }
  func.func @transform_0(%arg0: i32, %arg1: i32) -> (i32, i32, i32, i32) {
    %c0_i32 = arith.constant 0 : i32
    %c0_i32_0 = arith.constant 0 : i32
    %c0_i32_1 = arith.constant 0 : i32
    %c0_i32_2 = arith.constant 0 : i32
    return %arg0, %c0_i32, %c0_i32_0, %c0_i32_1 : i32, i32, i32, i32
  }
  func.func @transform_1(%arg0: i32, %arg1: i32) -> (i32, i32) {
    %c0_i32 = arith.constant 0 : i32
    %c0_i32_0 = arith.constant 0 : i32
    %c0_i32_1 = arith.constant 0 : i32
    return %c0_i32, %c0_i32_0 : i32, i32
  }
  func.func @transform_2(%arg0: i32, %arg1: i32) -> (i32, i32) {
    %c0_i32 = arith.constant 0 : i32
    %c0_i32_0 = arith.constant 0 : i32
    %c0_i32_1 = arith.constant 0 : i32
    return %c0_i32, %c0_i32_0 : i32, i32
  }
  func.func @transform_3(%arg0: i32, %arg1: i32) -> (i32, i32) {
    %c0_i32 = arith.constant 0 : i32
    %c0_i32_0 = arith.constant 0 : i32
    %c0_i32_1 = arith.constant 0 : i32
    return %c0_i32, %c0_i32_0 : i32, i32
  }
  func.func @transform_4(%arg0: i32, %arg1: i32) -> (i32, i32, i32, i32) {
    %c0_i32 = arith.constant 0 : i32
    %c0_i32_0 = arith.constant 0 : i32
    %c0_i32_1 = arith.constant 0 : i32
    return %arg0, %arg1, %c0_i32, %c0_i32_0 : i32, i32, i32, i32
  }
  func.func @transform_5(%arg0: i32, %arg1: i32) -> (i32, i32, i32, i32) {
    %c0_i32 = arith.constant 0 : i32
    %c0_i32_0 = arith.constant 0 : i32
    %c0_i32_1 = arith.constant 0 : i32
    return %arg0, %arg1, %c0_i32, %c0_i32_0 : i32, i32, i32, i32
  }
}

module attributes {stable_mosaic.version = 11 : i64} {
  func.func @_conv3x3_kernel(%arg0: i32, %arg1: i32, %arg2: memref<1x16x16x64xbf16, #tpu.memory_space<vmem>>, %arg3: memref<576x4xbf16, #tpu.memory_space<vmem>>, %arg4: memref<1x64xf32, #tpu.memory_space<vmem>>, %arg5: memref<1x64xf32, #tpu.memory_space<vmem>>, %arg6: memref<1x16x16x4xf32, #tpu.memory_space<vmem>>, %arg7: memref<1x1x2x4xf32, #tpu.memory_space<vmem>>, %arg8: memref<18x18x64xbf16, #tpu.memory_space<vmem>>) attributes {dimension_semantics = [#tpu.dimension_semantics<parallel>, #tpu.dimension_semantics<parallel>], iteration_bounds = array<i64: 2, 1>, scalar_prefetch = 0 : i64, scratch_operands = 1 : i64, tpu.core_type = #tpu.core_type<tc>, window_params = [{transform_indices = @transform_0, window_bounds = array<i64: 1, 16, 16, 64>}, {pipeline_mode = #tpu.pipeline_mode<synchronous>, transform_indices = @transform_1, window_bounds = array<i64: 576, 4>}, {pipeline_mode = #tpu.pipeline_mode<synchronous>, transform_indices = @transform_2, window_bounds = array<i64: 1, 64>}, {pipeline_mode = #tpu.pipeline_mode<synchronous>, transform_indices = @transform_3, window_bounds = array<i64: 1, 64>}, {transform_indices = @transform_4, window_bounds = array<i64: 1, 16, 16, 4>}, {transform_indices = @transform_5, window_bounds = array<i64: 1, 1, 2, 4>}]} {
    %c0 = arith.constant 0 : index
    %c0_0 = arith.constant 0 : index
    %0 = vector.load %arg4[%c0, %c0_0] : memref<1x64xf32, #tpu.memory_space<vmem>>, vector<1x64xf32>
    %1 = vector.shape_cast %0 : vector<1x64xf32> to vector<1x1x64xf32>
    %c0_1 = arith.constant 0 : index
    %c0_2 = arith.constant 0 : index
    %2 = vector.load %arg5[%c0_1, %c0_2] : memref<1x64xf32, #tpu.memory_space<vmem>>, vector<1x64xf32>
    %3 = vector.shape_cast %2 : vector<1x64xf32> to vector<1x1x64xf32>
    %cst = arith.constant 0.000000e+00 : bf16
    %4 = vector.broadcast %cst : bf16 to vector<18x1x64xbf16>
    %cst_3 = arith.constant 0.000000e+00 : bf16
    %5 = vector.broadcast %cst_3 : bf16 to vector<1x16x64xbf16>
    %c0_4 = arith.constant 0 : index
    %c0_5 = arith.constant 0 : index
    %c0_6 = arith.constant 0 : index
    %6 = vector.load %arg8[%c0_4, %c0_5, %c0_6] : memref<18x18x64xbf16, #tpu.memory_space<vmem>>, vector<18x1x64xbf16>
    tpu.vector_store %arg8[%c0_4, %c0_5, %c0_6], %4 {strides = array<i32>} : memref<18x18x64xbf16, #tpu.memory_space<vmem>>, vector<18x1x64xbf16>,
    %c0_7 = arith.constant 0 : index
    %c17 = arith.constant 17 : index
    %c0_8 = arith.constant 0 : index
    %7 = vector.load %arg8[%c0_7, %c17, %c0_8] : memref<18x18x64xbf16, #tpu.memory_space<vmem>>, vector<18x1x64xbf16>
    tpu.vector_store %arg8[%c0_7, %c17, %c0_8], %4 {strides = array<i32>} : memref<18x18x64xbf16, #tpu.memory_space<vmem>>, vector<18x1x64xbf16>,
    %c16_i32 = arith.constant 16 : i32
    %8 = arith.muli %arg1, %c16_i32 : i32
    %c0_9 = arith.constant 0 : index
    %9 = arith.index_cast %8 : i32 to index
    %c0_10 = arith.constant 0 : index
    %c0_11 = arith.constant 0 : index
    %10 = vector.load %arg2[%c0_9, %9, %c0_10, %c0_11] : memref<1x16x16x64xbf16, #tpu.memory_space<vmem>>, vector<1x16x16x64xbf16>
    %11 = vector.shape_cast %10 : vector<1x16x16x64xbf16> to vector<16x16x64xbf16>
    %12 = arith.extf %11 : vector<16x16x64xbf16> to vector<16x16x64xf32>
    %13 = vector.broadcast %1 : vector<1x1x64xf32> to vector<16x16x64xf32>
    %14 = arith.mulf %12, %13 : vector<16x16x64xf32>
    %15 = vector.broadcast %3 : vector<1x1x64xf32> to vector<16x16x64xf32>
    %16 = arith.addf %14, %15 : vector<16x16x64xf32>
    %cst_12 = arith.constant 0.000000e+00 : f32
    %17 = vector.broadcast %cst_12 : f32 to vector<16x16x64xf32>
    %18 = arith.maximumf %16, %17 : vector<16x16x64xf32>
    %19 = arith.truncf %18 : vector<16x16x64xf32> to vector<16x16x64xbf16>
    %c1 = arith.constant 1 : index
    %c1_13 = arith.constant 1 : index
    %c0_14 = arith.constant 0 : index
    %20 = vector.load %arg8[%c1, %c1_13, %c0_14] : memref<18x18x64xbf16, #tpu.memory_space<vmem>>, vector<16x16x64xbf16>
    tpu.vector_store %arg8[%c1, %c1_13, %c0_14], %19 {strides = array<i32>} : memref<18x18x64xbf16, #tpu.memory_space<vmem>>, vector<16x16x64xbf16>,
    %c0_i32 = arith.constant 0 : i32
    %21 = arith.cmpi eq, %arg1, %c0_i32 : i32
    %22 = arith.extui %21 : i1 to i32
    %c0_i32_15 = arith.constant 0 : i32
    %23 = arith.cmpi ne, %22, %c0_i32_15 : i32
    scf.if %23 {
      %c0_38 = arith.constant 0 : index
      %c1_39 = arith.constant 1 : index
      %c0_40 = arith.constant 0 : index
      %66 = vector.load %arg8[%c0_38, %c1_39, %c0_40] : memref<18x18x64xbf16, #tpu.memory_space<vmem>>, vector<1x16x64xbf16>
      tpu.vector_store %arg8[%c0_38, %c1_39, %c0_40], %5 {strides = array<i32>} : memref<18x18x64xbf16, #tpu.memory_space<vmem>>, vector<1x16x64xbf16>,
    } else {
    }
    %c0_i32_16 = arith.constant 0 : i32
    %24 = arith.cmpi sgt, %arg1, %c0_i32_16 : i32
    %25 = arith.extui %24 : i1 to i32
    %c0_i32_17 = arith.constant 0 : i32
    %26 = arith.cmpi ne, %25, %c0_i32_17 : i32
    scf.if %26 {
      %c16_i32_38 = arith.constant 16 : i32
      %66 = arith.muli %arg1, %c16_i32_38 : i32
      %c1_i32 = arith.constant 1 : i32
      %67 = arith.subi %66, %c1_i32 : i32
      %c0_39 = arith.constant 0 : index
      %68 = arith.index_cast %67 : i32 to index
      %c0_40 = arith.constant 0 : index
      %c0_41 = arith.constant 0 : index
      %69 = vector.load %arg2[%c0_39, %68, %c0_40, %c0_41] : memref<1x16x16x64xbf16, #tpu.memory_space<vmem>>, vector<1x1x16x64xbf16>
      %70 = vector.shape_cast %69 : vector<1x1x16x64xbf16> to vector<1x16x64xbf16>
      %71 = arith.extf %70 : vector<1x16x64xbf16> to vector<1x16x64xf32>
      %72 = vector.broadcast %1 : vector<1x1x64xf32> to vector<1x16x64xf32>
      %73 = arith.mulf %71, %72 : vector<1x16x64xf32>
      %74 = vector.broadcast %3 : vector<1x1x64xf32> to vector<1x16x64xf32>
      %75 = arith.addf %73, %74 : vector<1x16x64xf32>
      %cst_42 = arith.constant 0.000000e+00 : f32
      %76 = vector.broadcast %cst_42 : f32 to vector<1x16x64xf32>
      %77 = arith.maximumf %75, %76 : vector<1x16x64xf32>
      %78 = arith.truncf %77 : vector<1x16x64xf32> to vector<1x16x64xbf16>
      %c0_43 = arith.constant 0 : index
      %c1_44 = arith.constant 1 : index
      %c0_45 = arith.constant 0 : index
      %79 = vector.load %arg8[%c0_43, %c1_44, %c0_45] : memref<18x18x64xbf16, #tpu.memory_space<vmem>>, vector<1x16x64xbf16>
      tpu.vector_store %arg8[%c0_43, %c1_44, %c0_45], %78 {strides = array<i32>} : memref<18x18x64xbf16, #tpu.memory_space<vmem>>, vector<1x16x64xbf16>,
    } else {
    }
    %c0_i32_18 = arith.constant 0 : i32
    %27 = arith.cmpi eq, %arg1, %c0_i32_18 : i32
    %28 = arith.extui %27 : i1 to i32
    %c0_i32_19 = arith.constant 0 : i32
    %29 = arith.cmpi ne, %28, %c0_i32_19 : i32
    scf.if %29 {
      %c17_38 = arith.constant 17 : index
      %c1_39 = arith.constant 1 : index
      %c0_40 = arith.constant 0 : index
      %66 = vector.load %arg8[%c17_38, %c1_39, %c0_40] : memref<18x18x64xbf16, #tpu.memory_space<vmem>>, vector<1x16x64xbf16>
      tpu.vector_store %arg8[%c17_38, %c1_39, %c0_40], %5 {strides = array<i32>} : memref<18x18x64xbf16, #tpu.memory_space<vmem>>, vector<1x16x64xbf16>,
    } else {
    }
    %c0_i32_20 = arith.constant 0 : i32
    %30 = arith.cmpi slt, %arg1, %c0_i32_20 : i32
    %31 = arith.extui %30 : i1 to i32
    %c0_i32_21 = arith.constant 0 : i32
    %32 = arith.cmpi ne, %31, %c0_i32_21 : i32
    scf.if %32 {
      %c16_i32_38 = arith.constant 16 : i32
      %66 = arith.muli %arg1, %c16_i32_38 : i32
      %c16_i32_39 = arith.constant 16 : i32
      %67 = arith.addi %66, %c16_i32_39 : i32
      %c0_40 = arith.constant 0 : index
      %68 = arith.index_cast %67 : i32 to index
      %c0_41 = arith.constant 0 : index
      %c0_42 = arith.constant 0 : index
      %69 = vector.load %arg2[%c0_40, %68, %c0_41, %c0_42] : memref<1x16x16x64xbf16, #tpu.memory_space<vmem>>, vector<1x1x16x64xbf16>
      %70 = vector.shape_cast %69 : vector<1x1x16x64xbf16> to vector<1x16x64xbf16>
      %71 = arith.extf %70 : vector<1x16x64xbf16> to vector<1x16x64xf32>
      %72 = vector.broadcast %1 : vector<1x1x64xf32> to vector<1x16x64xf32>
      %73 = arith.mulf %71, %72 : vector<1x16x64xf32>
      %74 = vector.broadcast %3 : vector<1x1x64xf32> to vector<1x16x64xf32>
      %75 = arith.addf %73, %74 : vector<1x16x64xf32>
      %cst_43 = arith.constant 0.000000e+00 : f32
      %76 = vector.broadcast %cst_43 : f32 to vector<1x16x64xf32>
      %77 = arith.maximumf %75, %76 : vector<1x16x64xf32>
      %78 = arith.truncf %77 : vector<1x16x64xf32> to vector<1x16x64xbf16>
      %c17_44 = arith.constant 17 : index
      %c1_45 = arith.constant 1 : index
      %c0_46 = arith.constant 0 : index
      %79 = vector.load %arg8[%c17_44, %c1_45, %c0_46] : memref<18x18x64xbf16, #tpu.memory_space<vmem>>, vector<1x16x64xbf16>
      tpu.vector_store %arg8[%c17_44, %c1_45, %c0_46], %78 {strides = array<i32>} : memref<18x18x64xbf16, #tpu.memory_space<vmem>>, vector<1x16x64xbf16>,
    } else {
    }
    %c0_22 = arith.constant 0 : index
    %c0_23 = arith.constant 0 : index
    %c0_24 = arith.constant 0 : index
    %33 = vector.load %arg8[%c0_22, %c0_23, %c0_24] : memref<18x18x64xbf16, #tpu.memory_space<vmem>>, vector<18x18x64xbf16>
    %34 = vector.extract_strided_slice %33 {offsets = [0, 0, 0], sizes = [16, 16, 64], strides = [1, 1, 1]} : vector<18x18x64xbf16> to vector<16x16x64xbf16>
    %35 = vector.shape_cast %34 : vector<16x16x64xbf16> to vector<256x64xbf16>
    %36 = vector.extract_strided_slice %33 {offsets = [0, 1, 0], sizes = [16, 16, 64], strides = [1, 1, 1]} : vector<18x18x64xbf16> to vector<16x16x64xbf16>
    %37 = vector.shape_cast %36 : vector<16x16x64xbf16> to vector<256x64xbf16>
    %38 = vector.extract_strided_slice %33 {offsets = [0, 2, 0], sizes = [16, 16, 64], strides = [1, 1, 1]} : vector<18x18x64xbf16> to vector<16x16x64xbf16>
    %39 = vector.shape_cast %38 : vector<16x16x64xbf16> to vector<256x64xbf16>
    %40 = vector.extract_strided_slice %33 {offsets = [1, 0, 0], sizes = [16, 16, 64], strides = [1, 1, 1]} : vector<18x18x64xbf16> to vector<16x16x64xbf16>
    %41 = vector.shape_cast %40 : vector<16x16x64xbf16> to vector<256x64xbf16>
    %42 = vector.extract_strided_slice %33 {offsets = [1, 1, 0], sizes = [16, 16, 64], strides = [1, 1, 1]} : vector<18x18x64xbf16> to vector<16x16x64xbf16>
    %43 = vector.shape_cast %42 : vector<16x16x64xbf16> to vector<256x64xbf16>
    %44 = vector.extract_strided_slice %33 {offsets = [1, 2, 0], sizes = [16, 16, 64], strides = [1, 1, 1]} : vector<18x18x64xbf16> to vector<16x16x64xbf16>
    %45 = vector.shape_cast %44 : vector<16x16x64xbf16> to vector<256x64xbf16>
    %46 = vector.extract_strided_slice %33 {offsets = [2, 0, 0], sizes = [16, 16, 64], strides = [1, 1, 1]} : vector<18x18x64xbf16> to vector<16x16x64xbf16>
    %47 = vector.shape_cast %46 : vector<16x16x64xbf16> to vector<256x64xbf16>
    %48 = vector.extract_strided_slice %33 {offsets = [2, 1, 0], sizes = [16, 16, 64], strides = [1, 1, 1]} : vector<18x18x64xbf16> to vector<16x16x64xbf16>
    %49 = vector.shape_cast %48 : vector<16x16x64xbf16> to vector<256x64xbf16>
    %50 = vector.extract_strided_slice %33 {offsets = [2, 2, 0], sizes = [16, 16, 64], strides = [1, 1, 1]} : vector<18x18x64xbf16> to vector<16x16x64xbf16>
    %51 = vector.shape_cast %50 : vector<16x16x64xbf16> to vector<256x64xbf16>
    %52 = tpu.concatenate %35, %37, %39, %41, %43, %45, %47, %49, %51 in 1 : vector<256x64xbf16>, vector<256x64xbf16>, vector<256x64xbf16>, vector<256x64xbf16>, vector<256x64xbf16>, vector<256x64xbf16>, vector<256x64xbf16>, vector<256x64xbf16>, vector<256x64xbf16> -> vector<256x576xbf16>
    %c0_25 = arith.constant 0 : index
    %c0_26 = arith.constant 0 : index
    %53 = vector.load %arg3[%c0_25, %c0_26] : memref<576x4xbf16, #tpu.memory_space<vmem>>, vector<576x4xbf16>
    %cst_27 = arith.constant dense<0.000000e+00> : vector<256x4xf32>
    %54 = tpu.matmul %52, %53, %cst_27 {dimension_numbers = #tpu.dot_dimension_numbers<[1], [0], [0], [1], [0, 0, 1, 1], [], []>} : vector<256x576xbf16>, vector<576x4xbf16>, vector<256x4xf32> -> vector<256x4xf32>
    %55 = vector.shape_cast %54 : vector<256x4xf32> to vector<1x16x16x4xf32>
    %c0_28 = arith.constant 0 : index
    %c0_29 = arith.constant 0 : index
    %c0_30 = arith.constant 0 : index
    %c0_31 = arith.constant 0 : index
    %56 = vector.load %arg6[%c0_28, %c0_29, %c0_30, %c0_31] : memref<1x16x16x4xf32, #tpu.memory_space<vmem>>, vector<1x16x16x4xf32>
    tpu.vector_store %arg6[%c0_28, %c0_29, %c0_30, %c0_31], %55 {strides = array<i32>} : memref<1x16x16x4xf32, #tpu.memory_space<vmem>>, vector<1x16x16x4xf32>,
    %cst_32 = arith.constant dense<0.000000e+00> : vector<4xf32>
    %57 = vector.multi_reduction <add>, %54, %cst_32 [0] : vector<256x4xf32> to vector<4xf32>
    %58 = vector.shape_cast %57 : vector<4xf32> to vector<1x4xf32>
    %59 = arith.mulf %54, %54 : vector<256x4xf32>
    %cst_33 = arith.constant dense<0.000000e+00> : vector<4xf32>
    %60 = vector.multi_reduction <add>, %59, %cst_33 [0] : vector<256x4xf32> to vector<4xf32>
    %61 = vector.shape_cast %60 : vector<4xf32> to vector<1x4xf32>
    %62 = tpu.concatenate %58, %61 in 0 : vector<1x4xf32>, vector<1x4xf32> -> vector<2x4xf32>
    %c0_34 = arith.constant 0 : index
    %c0_35 = arith.constant 0 : index
    %c0_36 = arith.constant 0 : index
    %c0_37 = arith.constant 0 : index
    %63 = vector.load %arg7[%c0_34, %c0_35, %c0_36, %c0_37] : memref<1x1x2x4xf32, #tpu.memory_space<vmem>>, vector<1x1x2x4xf32>
    %64 = vector.shape_cast %63 : vector<1x1x2x4xf32> to vector<2x4xf32>
    %65 = vector.shape_cast %62 : vector<2x4xf32> to vector<1x1x2x4xf32>
    tpu.vector_store %arg7[%c0_34, %c0_35, %c0_36, %c0_37], %65 {strides = array<i32>} : memref<1x1x2x4xf32, #tpu.memory_space<vmem>>, vector<1x1x2x4xf32>,
    return
  }
  func.func @transform_0(%arg0: i32, %arg1: i32) -> (i32, i32, i32, i32) {
    %c0_i32 = arith.constant 0 : i32
    %c0_i32_0 = arith.constant 0 : i32
    %c0_i32_1 = arith.constant 0 : i32
    %c0_i32_2 = arith.constant 0 : i32
    return %arg0, %c0_i32, %c0_i32_0, %c0_i32_1 : i32, i32, i32, i32
  }
  func.func @transform_1(%arg0: i32, %arg1: i32) -> (i32, i32) {
    %c0_i32 = arith.constant 0 : i32
    %c0_i32_0 = arith.constant 0 : i32
    %c0_i32_1 = arith.constant 0 : i32
    return %c0_i32, %c0_i32_0 : i32, i32
  }
  func.func @transform_2(%arg0: i32, %arg1: i32) -> (i32, i32) {
    %c0_i32 = arith.constant 0 : i32
    %c0_i32_0 = arith.constant 0 : i32
    %c0_i32_1 = arith.constant 0 : i32
    return %c0_i32, %c0_i32_0 : i32, i32
  }
  func.func @transform_3(%arg0: i32, %arg1: i32) -> (i32, i32) {
    %c0_i32 = arith.constant 0 : i32
    %c0_i32_0 = arith.constant 0 : i32
    %c0_i32_1 = arith.constant 0 : i32
    return %c0_i32, %c0_i32_0 : i32, i32
  }
  func.func @transform_4(%arg0: i32, %arg1: i32) -> (i32, i32, i32, i32) {
    %c0_i32 = arith.constant 0 : i32
    %c0_i32_0 = arith.constant 0 : i32
    %c0_i32_1 = arith.constant 0 : i32
    return %arg0, %arg1, %c0_i32, %c0_i32_0 : i32, i32, i32, i32
  }
  func.func @transform_5(%arg0: i32, %arg1: i32) -> (i32, i32, i32, i32) {
    %c0_i32 = arith.constant 0 : i32
    %c0_i32_0 = arith.constant 0 : i32
    %c0_i32_1 = arith.constant 0 : i32
    return %arg0, %arg1, %c0_i32, %c0_i32_0 : i32, i32, i32, i32
  }
}

</mosaic_0001>

<bundles_post_ra>
// kernel: _lambda_.5
= control target key start
LH: loop header
LB: loop body
LE: loop exit
PB: predicated region body
PF: predicated region fallthrough
CT: control target
= control target key end

     0   :  { %11 = vsyncpa [#allocation4], 0  ;;  %s6149_s0 = inlined_call_operand.hbm [shape: bf16[2,16,16,8], index: 0, kind: input, shape index: {}]   ;;  %s6150_s1 = inlined_call_operand.hbm [shape: bf16[72,64], index: 1, kind: input, shape index: {}]   ;;  %s6151_s2 = inlined_call_operand.hbm [shape: f32[1,8], index: 2, kind: input, shape index: {}]   ;;  %s6152_s3 = inlined_call_operand.hbm [shape: f32[1,8], index: 3, kind: input, shape index: {}]   ;;  %s6153_s4 = inlined_call_operand.hbm [shape: bf16[2,16,16,64], index: 4, kind: output, shape index: {0}]   ;;  %s6154_s5 = inlined_call_operand.hbm [shape: f32[2,1,2,64], index: 5, kind: output, shape index: {1}]  }
   0x1   :  { %13 = vsyncpa [#allocation4 + $0x1], 0 }
   0x2   :  { %14 = vsyncpa [#allocation7], 0 }
   0x3   :  { %15 = vsyncpa [#allocation10], 0 }
   0x4   :  { %16 = vsyncpa [#allocation5], 0 }
   0x5   :  { %18 = vsyncpa [#allocation5 + $0x1], 0 }
   0x6   :  { %19 = vsyncpa [#allocation13], 0 }
   0x7   :  { %21 = vsyncpa [#allocation13 + $0x1], 0  ;;  %s4192_s18 = smov 0   ;;  %s4194_s19 = smov 0  }
   0x8   :  { %s4196_s20 = smov 0   ;;  %s4198_s21 = smov 0  }
   0x9   :  { %s4200_s22 = smov 0   ;;  %s4202_s23 = smov 0  }
   0xa LB: > { %6162 = sst [smem:[#allocation19_spill]] %s4122_s18  ;;  %s3355_s24 = sadd.s32 4294967295, %s4142_s23   ;;  %s4142_s23 = sphi %s4202_s23, %s27_s23   ;;  %s4138_s22 = sphi %s4200_s22, %s6200_s22   ;;  %s4134_s21 = sphi %s4198_s21, %s6199_s21   ;;  %s4130_s20 = sphi %s4196_s20, %s6198_s20   ;;  %s4126_s19 = sphi %s4194_s19, %s6197_s19   ;;  %s4122_s18 = sphi %s4192_s18, %s6196_s18  }
   0xb   : > { %s3356_s25 = sadd.s32 4294967294, %s4142_s23   ;;  %p59_p0 = scmp.ne.s32.totalorder %s4126_s19, %s4122_s18 }
   0xc   : > { %p4226_p1 = scmp.eq.s32.totalorder %s3355_s24, 0  ;;  %p4230_p2 = scmp.eq.s32.totalorder %s3355_s24, 1 }
   0xd   : > { %p154_p3 = scmp.eq.s32.totalorder %s3356_s25, 1  ;;  %p3357_p5 = scmp.ge.s32.totalorder %s4142_s23, 1 }
   0xe   : > { %s6163_s26 = scalar_select %p4226_p1, 1, 0 }
   0xf   : > { %s6164_s27 = scalar_select %p4230_p2, 1, 0 }
  0x10   : > { %p4236_p4 = por %p4226_p1, %p59_p0  ;;  %p4241_p6 = por %p154_p3, %p59_p0 }
  0x11   : > { %p189_p7 = scmp.lt.s32.totalorder %s4142_s23, 3  ;;  %s4144_s6 = smov [#allocation6]  }
  0x12   : > { %s6165_s28 = scalar_select %p4236_p4, 1, 0 }
  0x13   : > { %s6166_s29 = scalar_select %p4241_p6, 1, 0 }
  0x14   : > { %p4246_p8 = pnand %p3357_p5, %p189_p7  ;;  %s201_s7 = sshll.u32 %s4144_s6, 4  ;;  %s4250_s7 = int_to_ptr.vmem [resolvable:$true] %s201_s7 }
  0x15   : > { %6167 = sst [smem:[#allocation20_spill]] %s6166_s29  ;;  %s4145_s9 = smov [#allocation8]  }
  0x16   : > { %s6168_s30 = scalar_select %p4246_p8, 1, 0 }
  0x17   : > { %p3788_p9 = pneg %p4246_p8  ;;  %s215_s10 = sshll.u32 %s4145_s9, 4  ;;  %s4261_s10 = int_to_ptr.vmem [resolvable:$true] %s215_s10 }
  0x18   : > { %s4146_s11 = smov [#allocation9]   ;;  %s3906_s15 = scalar_lea.hbm %s6150_s1, 576 }
  0x19   : > { %p4257_p11 = pnand %p3788_p9, %p4226_p1  ;;  %s4263_s12 = sshll.u32 %s4146_s11, 4  ;;  %s227_s12 = int_to_ptr.vmem [resolvable:$true] %s4263_s12 }
  0x1a   : > { %p3907_p12 = scmp.ne.s32.totalorder %s6150_s1, %s3906_s15  ;;  %p3913_p5 = scmp.lt.u32.totalorder %s3906_s15, %s6150_s1 }
  0x1b   : > { %p4273_p13 = pneg %p4257_p11 }
  0x1d   : > { %p3909_p0 = pnand %p4273_p13, %p3907_p12 }
  0x1f   : > { %p3910_p3 = pneg %p3909_p0 }
  0x21   : > { %p3915_p7 = pnand %p3913_p5, %p3910_p3 }
  0x23   : > { %3918 = shalt.err (!%p3915_p7)
}
  0x24   : > { %s3919_s9 = scalar_lea.vmem %s4250_s7, 576  ;;  %p3927_p1 = scmp.lt.s32.totalorder %s4250_s7, %s4250_s7 }
  0x25   : > { %p3920_p9 = scmp.ne.s32.totalorder %s4250_s7, %s3919_s9  ;;  %p3928_p4 = scmp.lt.s32.totalorder %s3919_s9, %s3919_s9 }
  0x27   : > { %p3922_p10 = pnand %p3920_p9, %p4273_p13  ;;  %p3929_p12 = por %p3928_p4, %p3927_p1 }
  0x29   : > { %p3923_p6 = pneg %p3922_p10 }
  0x2b   : > { %p3930_p0 = pnand %p3929_p12, %p3923_p6 }
  0x2d   : > { %3933 = shalt.err (!%p3930_p0)
}
  0x2e   : > { %s4147_s11 = smov 64   ;;  %s4148_s13 = smov 4  }
  0x2f   : > { %3791 = dma.hbm_to_vmem [thread:$0]  (!%p4257_p11), %s6150_s1, 576, %s4250_s7, [#allocation7], %s4147_s11, %s4147_s11, %s4148_s13  }
  0x30   : > { %s3934_s25 = scalar_lea.hbm %s6151_s2, 16 }
  0x31   : > { %p3935_p1 = scmp.ne.s32.totalorder %s6151_s2, %s3934_s25  ;;  %p3941_p10 = scmp.lt.u32.totalorder %s3934_s25, %s6151_s2 }
  0x33   : > { %p3937_p4 = pnand %p3935_p1, %p4273_p13 }
  0x35   : > { %p3938_p6 = pneg %p3937_p4 }
  0x37   : > { %p3943_p3 = pnand %p3941_p10, %p3938_p6 }
  0x39   : > { %3946 = shalt.err (!%p3943_p3)
}
  0x3a   : > { %s3947_s7 = scalar_lea.vmem %s4261_s10, 16  ;;  %s3954_s14 = scalar_lea.vmem %s4261_s10, 32 }
  0x3b   : > { %p3948_p5 = scmp.ne.s32.totalorder %s4261_s10, %s3947_s7  ;;  %p3955_p12 = scmp.lt.s32.totalorder %s4261_s10, %s4261_s10 }
  0x3c   : > { %p3956_p0 = scmp.lt.s32.totalorder %s3954_s14, %s3947_s7 }
  0x3d   : > { %p3950_p7 = pnand %p3948_p5, %p4273_p13 }
  0x3e   : > { %p3957_p1 = por %p3956_p0, %p3955_p12 }
  0x3f   : > { %p3951_p9 = pneg %p3950_p7 }
  0x41   : > { %p3958_p4 = pnand %p3957_p1, %p3951_p9 }
  0x43   : > { %3961 = shalt.err (!%p3958_p4)
}
  0x44   : > { %3794 = dma.hbm_to_vmem [thread:$0]  (!%p4257_p11), %s6151_s2, 16, %s4261_s10, [#allocation7]  }
  0x45   : > { %s3962_s17 = scalar_lea.hbm %s6152_s3, 16 }
  0x46   : > { %p3963_p6 = scmp.ne.s32.totalorder %s6152_s3, %s3962_s17  ;;  %p3969_p5 = scmp.lt.u32.totalorder %s3962_s17, %s6152_s3 }
  0x48   : > { %p3965_p10 = pnand %p3963_p6, %p4273_p13 }
  0x4a   : > { %p3966_p3 = pneg %p3965_p10 }
  0x4c   : > { %p3971_p7 = pnand %p3969_p5, %p3966_p3 }
  0x4e   : > { %3974 = shalt.err (!%p3971_p7)
}
  0x4f   : > { %s3975_s14 = scalar_lea.vmem %s227_s12, 16  ;;  %s3982_s10 = scalar_lea.vmem %s227_s12, 32 }
  0x50   : > { %p3976_p9 = scmp.ne.s32.totalorder %s227_s12, %s3975_s14  ;;  %p3983_p1 = scmp.lt.s32.totalorder %s227_s12, %s227_s12 }
  0x51   : > { %p3984_p4 = scmp.lt.s32.totalorder %s3982_s10, %s3975_s14 }
  0x52   : > { %p3978_p12 = pnand %p3976_p9, %p4273_p13 }
  0x53   : > { %p3985_p8 = por %p3984_p4, %p3983_p1 }
  0x54   : > { %p3979_p0 = pneg %p3978_p12 }
  0x56   : > { %p3986_p2 = pnand %p3985_p8, %p3979_p0 }
  0x58   : > { %3989 = shalt.err (!%p3986_p2)
}
  0x59   : > { %3797 = dma.hbm_to_vmem [thread:$0]  (!%p4257_p11), %s6152_s3, 16, %s227_s12, [#allocation10]  }
  0x5a   : > { %s46_s24 = sadd.s32 1, %s4130_s20  ;;  %s39_s15 = sadd.s32 1, %s4138_s22 }
  0x5b   : > { %p53_p2 = scmp.ne.s32.totalorder %s4130_s20, %s4126_s19  ;;  %p41_p8 = scmp.ge.s32.totalorder %s39_s15, 2 }
  0x5c   : > { %p54_p13 = scmp.eq.s32.totalorder %s4142_s23, 0  ;;  %p6171_p6 = scmp.ne.s32.totalorder %s6164_s27, 0 }
  0x5d   : > { %p3812_p3 = scmp.lt.s32.totalorder %s4142_s23, 2  ;;  %s6202_s15 = smov (%p41_p8, %s39_s15), 0 }
  0x5e   : > { %p4347_p10 = por %p6171_p6, %p53_p2  ;;  %p55_p5 = por %p54_p13, %p53_p2 }
  0x5f   : > { %s237_s16 = sand.u32 1, %s4130_s20   ;;  %s43_s17 = ssub.s32 %s4138_s22, %s6202_s15 }
  0x60   : > { %p44_p7 = scmp.eq.s32.totalorder %s43_s17, 0  ;;  %s3362_s12 = sshll.u32 %s237_s16, 7 }
  0x61   : > { %s3546_s25 = sshll.u32 %s4138_s22, 11  ;;  %s241_s14 = scalar_lea.vmem [#allocation3], %s3362_s12 }
  0x62   : > { %s4359_s6 = scalar_select %p44_p7, %s4130_s20, %s46_s24  }
  0x63   : > { %s4364_s27 = scalar_lea.hbm %s6149_s0, %s3546_s25  ;;  %s248_s10 = sshll.u32 %s241_s14, 4  ;;  %s4366_s10 = int_to_ptr.vmem [resolvable:$true] %s248_s10 }
  0x64   : > { %p4370_p11 = pnand %p3812_p3, %p55_p5  ;;  %s4374_s29 = scalar_lea.sflag [#allocation4], %s237_s16 }
  0x65   : > { %s3990_s24 = scalar_lea.hbm %s4364_s27, 2048  ;;  %s3995_s25 = scalar_lea.hbm %s6149_s0, 4096 }
  0x66   : > { %p3991_p9 = scmp.ne.s32.totalorder %s4364_s27, %s3990_s24  ;;  %p3992_p12 = pneg %p4370_p11 }
  0x67   : > { %p3996_p4 = scmp.lt.u32.totalorder %s4364_s27, %s6149_s0  ;;  %p3997_p2 = scmp.lt.u32.totalorder %s3995_s25, %s3990_s24 }
  0x68   : > { %p3993_p0 = pnand %p3992_p12, %p3991_p9  ;;  %p3999_p13 = scmp.lt.u32.totalorder %s3990_s24, %s4364_s27 }
  0x69   : > { %p3998_p8 = por %p3997_p2, %p3996_p4 }
  0x6a   : > { %p3994_p1 = pneg %p3993_p0 }
  0x6b   : > { %p4000_p6 = por %p3999_p13, %p3998_p8 }
  0x6d   : > { %p4001_p3 = pnand %p4000_p6, %p3994_p1 }
  0x6f   : > { %4004 = shalt.err (!%p4001_p3)
}
  0x70   : > { %s4005_s16 = scalar_lea.vmem %s4366_s10, 2048  ;;  %s4149_s14 = smov [#allocation3]  }
  0x71   : > { %p4006_p5 = scmp.ne.s32.totalorder %s4366_s10, %s4005_s16  ;;  %s4010_s17 = sshll.u32 %s4149_s14, 4  ;;  %s4011_s17 = int_to_ptr.vmem [resolvable:$false] %s4010_s17 }
  0x72   : > { %s4012_s12 = scalar_lea.vmem %s4011_s17, 4096  ;;  %p4013_p0 = scmp.lt.s32.totalorder %s4366_s10, %s4011_s17 }
  0x73   : > { %p4008_p7 = pnand %p4006_p5, %p3992_p12  ;;  %p4014_p4 = scmp.lt.s32.totalorder %s4012_s12, %s4005_s16 }
  0x75   : > { %p4009_p9 = pneg %p4008_p7  ;;  %p4015_p2 = por %p4014_p4, %p4013_p0 }
  0x77   : > { %p4016_p8 = pnand %p4015_p2, %p4009_p9 }
  0x79   : > { %4019 = shalt.err (!%p4016_p8)
}
  0x7a   : > { %3801 = dma.hbm_to_vmem [thread:$0]  (!%p4370_p11), %s4364_s27, 2048, %s4366_s10, %s4374_s29, %s4147_s11, %s4147_s11, %s4148_s13  }
  0x7b   : > { %p6174_p12 = scmp.ne.s32.totalorder %s6168_s30, 0 }
  0x7d   : > { %260 = sbr.rel (%p6174_p12) target bundleno = 813 (0x32d), region = 36 }
  0x84   : > { %s4408_s24 = sand.u32 1, %s4126_s19   ;;  %p6175_p1 = scmp.ne.s32.totalorder %s6165_s28, 0 }
  0x85   : > { %s3366_s25 = sshll.u32 %s4408_s24, 7  ;;  %s263_s9 = scalar_lea.sflag [#allocation4], %s4408_s24 }
  0x86   : > { %s4414_s18 = scalar_lea.vmem [#allocation3], %s3366_s25 }
  0x87   : > { %4101 = dma.done.wait (%p6175_p1), %s263_s9, 2048  }
  0x88   : > { %4103 = vsyncadd (%p6175_p1), %s263_s9, 4294965248  ;;  %p6176_p11 = scmp.ne.s32.totalorder %s6163_s26, 0 }
  0x8a   : > { %4105 = dma.done.wait (%p6176_p11), [#allocation7], 592  }
  0x8b   : > { %4107 = vsyncadd (%p6176_p11), [#allocation7], 4294966704 }
  0x8c   : > { %4109 = dma.done.wait (%p6176_p11), [#allocation10], 16  }
  0x8d   : > { %4111 = vsyncadd (%p6176_p11), [#allocation10], 4294967280  ;;  %vm990_vm0 = vcmask 60416   ;;  %vm314_vm1 = vcmask 57344   ;;  %vm315_vm2 = vsmask.f32 256 }
  0x8e   : > { %vm371_vm3 = vsmask.f32 7938  ;;  %v4150_v0 = vmov 0   ;;  %vm4431_vm4 = vmand %vm314_vm1, %vm315_vm2  ;;  %v317_v3 = vld [vmem:[#allocation2] sm:$0x1]  ;;  %v3617_v11 = vld [vmem:[%s4414_s18] sm:$0xff]  }
  0x8f   : > { %1112 = vst.msk [vmem:[#allocation2 + $0x4] sm:$0xf] %vm990_vm0, %v4150_v0  ;;  %1172 = vst.msk [vmem:[#allocation2 + $0xd0] sm:$0xf] %vm990_vm0, %v4150_v0  ;;  %v373_v4 = vld [vmem:[#allocation2 + $0x8] sm:$0x1]  ;;  %v3618_v13 = vunpack.c.l.bf16 %v3617_v11  ;;  %v3619_v14 = vunpack.c.h.bf16 %v3617_v11 }
  0x90   : > { %vm4436_vm5 = vmand %vm314_vm1, %vm371_vm3  ;;  %v318_v5 = vsel %vm4431_vm4, 0, %v317_v3  ;;  %v4444_v7 = vld [vmem:[#allocation8] ss:$0 sm:$0xff]  ;;  %v320_v8 = vld [vmem:[#allocation2 + $0xc] sm:$0x1]  ;;  %vm1715_vm8 = vcmask 1042432  }
  0x91   : > { %v374_v6 = vsel %vm4436_vm5, 0, %v373_v4  ;;  %319 = vst [vmem:[#allocation2] sm:$0x1] %v318_v5  ;;  %v321_v10 = vsel %vm4431_vm4, 0, %v320_v8  ;;  %v323_v12 = vld [vmem:[#allocation2 + $0x18] sm:$0x1]  ;;  %v501_v27 = vmul.f32 %v3618_v13, %v4444_v7  ;;  %v502_v28 = vmul.f32 %v3619_v14, %v4444_v7  ;;  %vm4470_vm7 = vmand %vm990_vm0, %vm371_vm3 }
  0x92   : > { %375 = vst [vmem:[#allocation2 + $0x8] sm:$0x1] %v374_v6  ;;  %322 = vst [vmem:[#allocation2 + $0xc] sm:$0x1] %v321_v10  ;;  %vm667_vm6 = vsmask.f32 4368 }
  0x93   : > { %v324_v15 = vsel %vm4431_vm4, 0, %v323_v12  ;;  %v3680_v16 = vld [vmem:[%s4414_s18 + $0x8] sm:$0xff]   ;;  %v3681_v18 = vld [vmem:[%s4414_s18 + $0x10] sm:$0xff]   ;;  %v4455_v19 = vld [vmem:[#allocation9] ss:$0 sm:$0xff]  ;;  %vm1716_vm9 = vcmask 1046532  }
  0x94   : > { %v326_v17 = vld [vmem:[#allocation2 + $0x24] sm:$0x1]  ;;  %325 = vst [vmem:[#allocation2 + $0x18] sm:$0x1] %v324_v15  ;;  %v3622_v20 = vunpack.c.l.bf16 %v3680_v16  ;;  %v3623_v21 = vunpack.c.h.bf16 %v3680_v16  ;;  %v3626_v23 = vunpack.c.l.bf16 %v3681_v18  ;;  %v329_v24 = vld [vmem:[#allocation2 + $0x30] sm:$0x1]  ;;  %v3627_v29 = vunpack.c.h.bf16 %v3681_v18  ;;  %vm4492_vm10 = vmor %vm315_vm2, %vm667_vm6 }
  0x95   : > { %v327_v22 = vsel %vm4431_vm4, 0, %v326_v17  ;;  %v3682_v25 = vld [vmem:[%s4414_s18 + $0x18] sm:$0xff]   ;;  %v330_v33 = vsel %vm4431_vm4, 0, %v329_v24  ;;  %v539_v35 = vadd.f32 %v4455_v19, %v501_v27  ;;  %v540_v36 = vadd.f32 %v4455_v19, %v502_v28  ;;  %vm4512_vm11 = vmor %vm1715_vm8, %vm1716_vm9  ;;  %s4151_s26 = smov 16   ;;  %s4152_s28 = smov 24  }
  0x96   : > { %v4446_v9 = vld [vmem:[#allocation2 + $0x4] sm:$0xf]  ;;  %328 = vst [vmem:[#allocation2 + $0x24] sm:$0x1] %v327_v22  ;;  %v503_v30 = vmul.f32 %v3622_v20, %v4444_v7  ;;  %v504_v31 = vmul.f32 %v3623_v21, %v4444_v7  ;;  %v505_v32 = vmul.f32 %v3626_v23, %v4444_v7  ;;  %v506_v37 = vmul.f32 %v3627_v29, %v4444_v7  ;;  %s4153_s30 = smov 48   ;;  %s4154_s11 = smov 8  }
  0x97   : > { %v1720_v26 = vrot.slane %v4446_v9, 5  ;;  %331 = vst [vmem:[#allocation2 + $0x30] sm:$0x1] %v330_v33  ;;  %v3630_v38 = vunpack.c.l.bf16 %v3682_v25  ;;  %v3631_v42 = vunpack.c.h.bf16 %v3682_v25  ;;  %v3547_v45 = vpack.c.bf16 %v539_v35, %v539_v35  ;;  %s4155_s13 = smov 40   ;;  %s4156_s27 = smov 64  }
  0x98   : > { %v541_v39 = vadd.f32 %v4455_v19, %v503_v30  ;;  %v542_v40 = vadd.f32 %v4455_v19, %v504_v31  ;;  %v543_v41 = vadd.f32 %v4455_v19, %v505_v32  ;;  %v1109_v43 = vld [vmem:[#allocation2] sm:$0xf]  ;;  %v3548_v46 = vpack.c.bf16 %v540_v36, %v540_v36  ;;  %s4157_s10 = smov 32   ;;  %s4158_s29 = smov 56  }
  0x99   : > { %v1113_v44 = vld [vmem:[#allocation2 + $0x8] sm:$0x1]  ;;  %v544_v47 = vadd.f32 %v4455_v19, %v506_v37  ;;  %v507_v48 = vmul.f32 %v3630_v38, %v4444_v7  ;;  %v1110_v49 = vsel %vm4470_vm7, 0, %v1109_v43  ;;  %v670_v53 = vshrl.u32 %v3547_v45, 16  ;;  %v992_v4 = vld [vmem:[#allocation2 + $0xc] sm:$0xf] }
  0x9a   : > { %v1114_v50 = vsel %vm4431_vm4, 0, %v1113_v44  ;;  %v3549_v51 = vpack.c.bf16 %v541_v39, %v541_v39  ;;  %v3550_v52 = vpack.c.bf16 %v542_v40, %v542_v40  ;;  %1111 = vst [vmem:[#allocation2] sm:$0xf] %v1110_v49  ;;  %v673_v54 = vshll.u32 %v3547_v45, 16  ;;  %s5930_s7 = scalar_lea.vmem [#allocation11], %s3366_s25  ;;  %s3615_s16 = sshll.u32 %s4134_s21, 11 }
  0x9b   : > { %1115 = vst [vmem:[#allocation2 + $0x8] sm:$0x1] %v1114_v50  ;;  %v678_v55 = vshrl.u32 %v3548_v46, 16  ;;  %v681_v56 = vshll.u32 %v3548_v46, 16  ;;  %v672_v61 = vrot.slane %v670_v53, 7  ;;  %v3551_v63 = vpack.c.bf16 %v543_v41, %v543_v41  ;;  %s3187_s14 = sshll.u32 %s5930_s7, 4  ;;  %s6052_s25 = scalar_lea.hbm %s6153_s4, %s3615_s16  ;;  %s6058_s14 = int_to_ptr.vmem [resolvable:$true] %s3187_s14 }
  0x9c   : > { %v687_v57 = vshrl.u32 %v3549_v51, 16  ;;  %v690_v58 = vshll.u32 %v3549_v51, 16  ;;  %v695_v59 = vshrl.u32 %v3550_v52, 16  ;;  %v698_v60 = vshll.u32 %v3550_v52, 16  ;;  %v1000_v13 = vld [vmem:[#allocation2 + $0x18] sm:$0xf] }
  0x9d   : > { %v4486_v62 = vrot.slane %v678_v55, 7  ;;  %v1722_v0 = vrot.slane %v1720_v26, 4  ;;  %v3552_v8 = vpack.c.bf16 %v544_v47, %v544_v47  ;;  %v675_v10 = vor.u32 %v673_v54, %v672_v61  ;;  %v1007_v37 = vld [vmem:[#allocation2 + $0x24] sm:$0xf]  ;;  %v4541_v52 = vld [vmem:[%s4414_s18 + $0x20] sm:$0xff]   ;;  %s3166_s9 = scalar_lea.sflag [#allocation5], %s4408_s24 }
  0x9e   : > { %v689_v5 = vrot.slane %v687_v57, 7  ;;  %v4496_v6 = vrot.slane %v695_v59, 7  ;;  %v676_v11 = vrot.slane %v672_v61, 4  ;;  %v508_v14 = vmul.f32 %v3631_v42, %v4444_v7  ;;  %v1014_v50 = vld [vmem:[#allocation2 + $0x30] sm:$0xf] }
  0x9f   : > { %v683_v12 = vor.u32 %v681_v56, %v4486_v62  ;;  %v545_v18 = vadd.f32 %v4455_v19, %v507_v48  ;;  %v993_v21 = vsel %vm4470_vm7, %v675_v10, %v992_v4  ;;  %v704_v22 = vshrl.u32 %v3551_v63, 16 }
  0xa0   : > { %v692_v15 = vor.u32 %v690_v58, %v689_v5  ;;  %v693_v16 = vrot.slane %v689_v5, 4  ;;  %v700_v17 = vor.u32 %v698_v60, %v4496_v6  ;;  %v707_v23 = vshll.u32 %v3551_v63, 16  ;;  %994 = vst [vmem:[#allocation2 + $0xc] sm:$0xf] %v993_v21 }
  0xa1   : > { %v684_v20 = vsel %vm4492_vm10, %v676_v11, %v683_v12  ;;  %v4506_v24 = vld [vmem:[#allocation2] sm:$0xf]  ;;  %v712_v30 = vshrl.u32 %v3552_v8, 16  ;;  %v715_v31 = vshll.u32 %v3552_v8, 16  ;;  %v706_v35 = vrot.slane %v704_v22, 7 }
  0xa2   : > { %v4508_v25 = vld [vmem:[#allocation2 + $0x8] sm:$0x1]  ;;  %996 = vst.msk [vmem:[#allocation2 + $0x10] sm:$0xf] %vm990_vm0, %v684_v20  ;;  %v701_v28 = vsel %vm4492_vm10, %v693_v16, %v700_v17  ;;  %v1001_v29 = vsel %vm4470_vm7, %v692_v15, %v1000_v13  ;;  %v3414_v32 = vrot.slane %v4506_v24, 9  ;;  %v546_v38 = vadd.f32 %v4455_v19, %v508_v14 }
  0xa3   : > { %v1723_v33 = vrot.slane %v4508_v25, 5  ;;  %1002 = vst [vmem:[#allocation2 + $0x18] sm:$0xf] %v1001_v29  ;;  %1003 = vst.msk [vmem:[#allocation2 + $0x1c] sm:$0xf] %vm990_vm0, %v701_v28  ;;  %v4524_v36 = vrot.slane %v712_v30, 7  ;;  %v3553_v39 = vpack.c.bf16 %v545_v18, %v545_v18  ;;  %v709_v42 = vor.u32 %v707_v23, %v706_v35 }
  0xa4   : > { %v1721_v40 = vsel %vm4512_vm11, %v3414_v32, %v1720_v26  ;;  %v710_v43 = vrot.slane %v706_v35, 4  ;;  %v3554_v46 = vpack.c.bf16 %v546_v38, %v546_v38  ;;  %vm1280_vm12 = vsmask.f32 3328  ;;  %v376_v13 = vld [vmem:[#allocation2 + $0x14] sm:$0x1] }
  0xa5   : > { %v1724_v41 = vsel %vm4512_vm11, %v1722_v0, %v1723_v33  ;;  %v717_v45 = vor.u32 %v715_v31, %v4524_v36  ;;  %v1008_v47 = vsel %vm4470_vm7, %v709_v42, %v1007_v37  ;;  %v721_v48 = vshrl.u32 %v3553_v39, 16  ;;  %v379_v20 = vld [vmem:[#allocation2 + $0x20] sm:$0x1] }
  0xa6   : > { %v3464_v44 = vcombine.low %v1721_v40, %v1724_v41  ;;  %v724_v49 = vshll.u32 %v3553_v39, 16  ;;  %1009 = vst [vmem:[#allocation2 + $0x24] sm:$0xf] %v1008_v47  ;;  %vm1281_vm13 = vsmask.f32 7440  ;;  %v1284_v51 = vshrl.u32 %v4506_v24, 16 }
  0xa7   : > { %v718_v26 = vsel %vm4492_vm10, %v710_v43, %v717_v45  ;;  %v4543_v53 = vld [vmem:[#allocation2 + $0xc] sm:$0xf]  ;;  %v723_v55 = vrot.slane %v721_v48, 7  ;;  %v729_v56 = vshrl.u32 %v3554_v46, 16  ;;  %v685_v57 = vrot.slane %v4486_v62, 4  ;;  %vm4602_vm14 = vmor %vm1280_vm12, %vm1281_vm13 }
  0xa8   : > { %2074 = vrot.lane.b32.xlu1 %v3464_v44, %s4151_s26  ;;  %1010 = vst.msk [vmem:[#allocation2 + $0x28] sm:$0xf] %vm990_vm0, %v718_v26  ;;  %v1287_v60 = vshll.u32 %v4506_v24, 16  ;;  %v1293_v61 = vshll.u32 %v4446_v9, 16  ;;  %v1303_v63 = vshll.u32 %v4508_v25, 16  ;;  %v702_v0 = vrot.slane %v4496_v6, 4 }
  0xa9   : > { %v4545_v54 = vld [vmem:[#allocation2 + $0x10] sm:$0xf]  ;;  %v726_v5 = vor.u32 %v724_v49, %v723_v55  ;;  %v732_v8 = vshll.u32 %v3554_v46, 16  ;;  %v719_v11 = vrot.slane %v4524_v36, 4  ;;  %v1286_v12 = vrot.slane %v1284_v51, 4 }
  0xaa   : > { %v4551_v58 = vcombine.low %v4543_v53, %v4545_v54  ;;  %v4553_v59 = vld [vmem:[#allocation2 + $0x18] sm:$0xf]  ;;  %v4559_v4 = vld [vmem:[#allocation2 + $0x1c] sm:$0xf]  ;;  %v3634_v14 = vunpack.c.l.bf16 %v4541_v52  ;;  %v1321_v15 = vshrl.u32 %v4545_v54, 16  ;;  %v727_v16 = vrot.slane %v723_v55, 4 }
  0xab   : > { %v4565_v10 = vcombine.low %v4553_v59, %v4559_v4  ;;  %v4570_v17 = vrot.slane %v729_v56, 7  ;;  %v1015_v18 = vsel %vm4470_vm7, %v726_v5, %v1014_v50  ;;  %v1289_v21 = vrot.slane %v1287_v60, 5  ;;  %v382_v24 = vld [vmem:[#allocation2 + $0x2c] sm:$0x1] }
  0xac   : > { %2109 = vrot.lane.b32.xlu0 %v4551_v58, %s4152_s28  ;;  %1016 = vst [vmem:[#allocation2 + $0x30] sm:$0xf] %v1015_v18  ;;  %v1295_v22 = vrot.slane %v1293_v61, 5  ;;  %v1297_v23 = vshrl.u32 %v4446_v9, 16  ;;  %v3635_v25 = vunpack.c.h.bf16 %v4541_v52  ;;  %v1317_v28 = vshll.u32 %v4545_v54, 16 }
  0xad   : > { %2111 = vrot.lane.b32.xlu1 %v4565_v10, %s4152_s28  ;;  %v1308_v29 = vshrl.u32 %v4543_v53, 16  ;;  %v4580_v30 = vld [vmem:[#allocation2 + $0x24] sm:$0xf]  ;;  %v734_v31 = vor.u32 %v732_v8, %v4570_v17  ;;  %v377_v32 = vsel %vm4436_vm5, 0, %v376_v13  ;;  %v1311_v33 = vshll.u32 %v4543_v53, 16 }
  0xae   : > { %v1332_v35 = vshrl.u32 %v4553_v59, 16  ;;  %v1290_v37 = vor.u32 %v1289_v21, %v1286_v12  ;;  %v1299_v38 = vrot.slane %v1297_v23, 4  ;;  %378 = vst [vmem:[#allocation2 + $0x14] sm:$0x1] %v377_v32  ;;  %v4591_v39 = vrot.slane %v1321_v15, 4 }
  0xaf   : > { %v4589_v9 = vld [vmem:[#allocation2 + $0x28] sm:$0xf]  ;;  %v1335_v40 = vshll.u32 %v4553_v59, 16  ;;  %v735_v42 = vsel %vm4492_vm10, %v727_v16, %v734_v31  ;;  %v1305_v46 = vrot.slane %v1303_v63, 5  ;;  %v380_v47 = vsel %vm4436_vm5, 0, %v379_v20 }
  0xb0   : > { %2214 = vrot.lane.b32.xlu0 %v4565_v10, %s4153_s30  ;;  %v4596_v41 = vcombine.low %v4580_v30, %v4589_v9  ;;  %1017 = vst.msk [vmem:[#allocation2 + $0x34] sm:$0xf] %vm990_vm0, %v735_v42  ;;  %v1291_v44 = vrot.slane %v1290_v37, 4  ;;  %v1300_v45 = vor.u32 %v1299_v38, %v1295_v22  ;;  %v4609_v48 = vrot.slane %v1308_v29, 4  ;;  %381 = vst [vmem:[#allocation2 + $0x20] sm:$0x1] %v380_v47 }
  0xb1   : > { %v1345_v49 = vshrl.u32 %v4559_v4, 16  ;;  %v3415_v26 = vrot.slane %v4543_v53, 9  ;;  %v383_v50 = vsel %vm4436_vm5, 0, %v382_v24  ;;  %v1356_v51 = vshrl.u32 %v4580_v30, 16 }
  0xb2   : > { %2216 = vrot.lane.b32.xlu1 %v4596_v41, %s4153_s30  ;;  %v1359_v55 = vshll.u32 %v4580_v30, 16  ;;  %v1296_v56 = vsel %vm4602_vm14, %v1291_v44, %v1295_v22  ;;  %v1301_v60 = vrot.slane %v1300_v45, 4  ;;  %384 = vst [vmem:[#allocation2 + $0x2c] sm:$0x1] %v383_v50  ;;  %v1313_v61 = vrot.slane %v1311_v33, 5 }
  0xb3   : > { %v1727_v63 = vrot.slane %v4545_v54, 5  ;;  %v1334_v53 = vrot.slane %v1332_v35, 4  ;;  %v1337_v5 = vrot.slane %v1335_v40, 5  ;;  %v1369_v8 = vshrl.u32 %v4589_v9, 16  ;;  %v4629_v16 = vld [vmem:[#allocation2 + $0x30] sm:$0xf] }
  0xb4   : > { %2113 = vrot.lane.b32.xlu0 %v4596_v41, %s4152_s28  ;;  %v736_v12 = vrot.slane %v4570_v17, 4  ;;  %v1306_v13 = vsel %vm4602_vm14, %v1301_v60, %v1305_v46  ;;  %v3416_v15 = vrot.slane %v4553_v59, 9  ;;  %v1341_v23 = vshll.u32 %v4559_v4, 16  ;;  %v385_v45 = vld [vmem:[#allocation2 + $0x38] sm:$0x1] }
  0xb5   : > { %v3448_v18 = vcombine.low %v1296_v56, %v1306_v13  ;;  %v997_v20 = vld [vmem:[#allocation2 + $0x14] sm:$0x1]  ;;  %v4633_v21 = vsel %vm4512_vm11, %v3415_v26, %v1727_v63  ;;  %v1338_v22 = vor.u32 %v1337_v5, %v1334_v53  ;;  %v1347_v29 = vrot.slane %v1345_v49, 4 }
  0xb6   : > { %v998_v24 = vsel %vm4431_vm4, %v685_v57, %v997_v20  ;;  %v1358_v31 = vrot.slane %v1356_v51, 4  ;;  %v1361_v32 = vrot.slane %v1359_v55, 5  ;;  %v1729_v33 = vrot.slane %v1727_v63, 4  ;;  %v3890_v20 = vld [vmem:[#allocation6] sm:$0xff]  }
  0xb7   : > { %v4640_v59 = vld [vmem:[#allocation2 + $0x34] sm:$0xf]  ;;  %999 = vst [vmem:[#allocation2 + $0x14] sm:$0x1] %v998_v24  ;;  %v1734_v35 = vrot.slane %v4559_v4, 5  ;;  %v3417_v37 = vrot.slane %v4580_v30, 9  ;;  %v1314_v49 = vor.u32 %v1313_v61, %v4609_v48  ;;  %3716 = vmatprep.subr.bf16.mxu0 %v3890_v20  ;;  %3758 = vmatprep.subr.bf16.mxu1 %v3890_v20 }
  0xb8   : > { %1994 = vrot.lane.b32.xlu0 %v3448_v18, %s4154_s11  ;;  %v4645_v38 = vrot.slane %v1341_v23, 5  ;;  %v4649_v62 = vcombine.low %v4629_v16, %v4640_v59  ;;  %v1004_v57 = vld [vmem:[#allocation2 + $0x20] sm:$0x1]  ;;  %v1741_v40 = vrot.slane %v4589_v9, 5  ;;  %v1362_v42 = vor.u32 %v1361_v32, %v1358_v31  ;;  %3717 = vmatpush3.bf16.msra.mxu0 %v3890_v20 }
  0xb9   : > { %v1365_v44 = vshll.u32 %v4589_v9, 16  ;;  %v1380_v46 = vshrl.u32 %v4629_v16, 16  ;;  %v1005_v4 = vsel %vm4431_vm4, %v702_v0, %v1004_v57  ;;  %v4660_v30 = vsel %vm4512_vm11, %v3416_v15, %v1734_v35  ;;  %v1011_v47 = vld [vmem:[#allocation2 + $0x2c] sm:$0x1]  ;;  %3763 = vmatpush3.bf16.msra.mxu1 %v3890_v20  ;;  %v391_v20 = vld [vmem:[#allocation2 + $0x50] sm:$0x1] }
  0xba   : > { %2115 = vrot.lane.b32.xlu1 %v4649_v62, %s4152_s28  ;;  %1006 = vst [vmem:[#allocation2 + $0x20] sm:$0x1] %v1005_v4  ;;  %v1012_v9 = vsel %vm4431_vm4, %v719_v11, %v1011_v47  ;;  %v4669_v6 = vrot.slane %v1338_v22, 4  ;;  %v1348_v0 = vor.u32 %v1347_v29, %v4645_v38  ;;  %v4674_v26 = vrot.slane %v1317_v28, 5  ;;  %v332_v11 = vld [vmem:[#allocation2 + $0x3c] sm:$0x1] }
  0xbb   : > { %v1383_v50 = vshll.u32 %v4629_v16, 16  ;;  %v1736_v48 = vrot.slane %v1734_v35, 4  ;;  %1013 = vst [vmem:[#allocation2 + $0x2c] sm:$0x1] %v1012_v9  ;;  %v4679_v51 = vsel %vm4512_vm11, %v3417_v37, %v1741_v40  ;;  %v386_v36 = vsel %vm4436_vm5, 0, %v385_v45 }
  0xbc   : > { %v1393_v55 = vshrl.u32 %v4640_v59, 16  ;;  %v4684_v56 = vrot.slane %v1362_v42, 4  ;;  %v4686_v60 = vrot.slane %v1365_v44, 5  ;;  %v1371_v54 = vrot.slane %v1369_v8, 4  ;;  %387 = vst [vmem:[#allocation2 + $0x38] sm:$0x1] %v386_v36 }
  0xbd   : > { %v1743_v28 = vrot.slane %v1741_v40, 4  ;;  %v4688_v61 = vrot.slane %v1314_v49, 4  ;;  %v1324_v63 = vor.u32 %v4591_v39, %v4674_v26  ;;  %v1389_v53 = vshll.u32 %v4640_v59, 16  ;;  %v3891_v49 = vld [vmem:[#allocation6 + $0x8] sm:$0xff]  }
  0xbe   : > { %v1231_v5 = vld [vmem:[#allocation2 + $0x14] sm:$0x1]  ;;  %v1344_v13 = vsel %vm4602_vm14, %v4669_v6, %v4645_v38  ;;  %v4697_v15 = vrot.slane %v1348_v0, 4  ;;  %v4699_v18 = vrot.slane %v1380_v46, 4  ;;  %v333_v8 = vsel %vm4431_vm4, 0, %v332_v11  ;;  %3718 = vmatprep.subr.bf16.mxu0 %v3891_v49  ;;  %3759 = vmatprep.subr.bf16.mxu1 %v3891_v49 }
  0xbf   : > { %v1730_v22 = vrot.slane %v1231_v5, 5  ;;  %v1327_v23 = vshll.u32 %v1231_v5, 16  ;;  %v4703_v24 = vrot.slane %v1383_v50, 5  ;;  %334 = vst [vmem:[#allocation2 + $0x3c] sm:$0x1] %v333_v8  ;;  %v509_v39 = vmul.f32 %v3634_v14, %v4444_v7  ;;  %v3684_v8 = vld [vmem:[%s4414_s18 + $0x28] sm:$0xff]   ;;  %3719 = vmatpush3.bf16.msra.mxu0 %v3891_v49  ;;  %3764 = vmatpush3.bf16.msra.mxu1 %v3891_v49 }
  0xc0   : > { %v1368_v29 = vsel %vm4602_vm14, %v4684_v56, %v4686_v60  ;;  %v1372_v31 = vor.u32 %v1371_v54, %v4686_v60  ;;  %v4713_v32 = vrot.slane %v1389_v53, 5  ;;  %v4715_v35 = vrot.slane %v1393_v55, 4  ;;  %v335_v54 = vld [vmem:[#allocation2 + $0x48] sm:$0x1] }
  0xc1   : > { %v1731_v37 = vsel %vm4512_vm11, %v1729_v33, %v1730_v22  ;;  %v1234_v57 = vld [vmem:[#allocation2 + $0x20] sm:$0x1]  ;;  %v4719_v40 = vrot.slane %v1324_v63, 4  ;;  %v4721_v14 = vrot.slane %v1327_v23, 5  ;;  %v510_v42 = vmul.f32 %v3635_v25, %v4444_v7  ;;  %v388_v25 = vld [vmem:[#allocation2 + $0x44] sm:$0x1] }
  0xc2   : > { %v3465_v44 = vcombine.low %v4633_v21, %v1731_v37  ;;  %v1737_v45 = vrot.slane %v1234_v57, 5  ;;  %v1237_v46 = vld [vmem:[#allocation2 + $0x2c] sm:$0x1]  ;;  %v1351_v4 = vshll.u32 %v1234_v57, 16  ;;  %v547_v47 = vadd.f32 %v4455_v19, %v509_v39  ;;  %v338_v37 = vld [vmem:[#allocation2 + $0x54] sm:$0x1] }
  0xc3   : > { %v1744_v33 = vrot.slane %v1237_v46, 5  ;;  %v1375_v9 = vshll.u32 %v1237_v46, 16  ;;  %v1320_v0 = vsel %vm4602_vm14, %v4688_v61, %v4674_v26  ;;  %v1018_v50 = vld [vmem:[#allocation2 + $0x38] sm:$0x1]  ;;  %v1386_v52 = vor.u32 %v4703_v24, %v4699_v18  ;;  %v3892_v22 = vld [vmem:[#allocation6 + $0x10] sm:$0xff]  }
  0xc4   : > { %2076 = vrot.lane.b32.xlu1 %v3465_v44, %s4151_s26  ;;  %2179 = vrot.lane.b32.xlu0 %v3465_v44, %s4155_s13  ;;  %v1738_v21 = vsel %vm4512_vm11, %v1736_v48, %v1737_v45  ;;  %v1353_v36 = vrot.slane %v1351_v4, 5  ;;  %v1019_v11 = vsel %vm4431_vm4, %v736_v12, %v1018_v50  ;;  %v1396_v55 = vor.u32 %v4715_v35, %v4713_v32  ;;  %v3685_v57 = vld [vmem:[%s4414_s18 + $0x30] sm:$0xff]   ;;  %v394_v46 = vld [vmem:[#allocation2 + $0x5c] sm:$0x1] }
  0xc5   : > { %v4745_v63 = vcombine.low %v4660_v30, %v1738_v21  ;;  %v1745_v53 = vsel %vm4512_vm11, %v1743_v28, %v1744_v33  ;;  %v4749_v5 = vrot.slane %v1372_v31, 4  ;;  %1020 = vst [vmem:[#allocation2 + $0x38] sm:$0x1] %v1019_v11  ;;  %v548_v48 = vadd.f32 %v4455_v19, %v510_v42  ;;  %3720 = vmatprep.subr.bf16.mxu0 %v3892_v22  ;;  %v397_v60 = vld [vmem:[#allocation2 + $0x68] sm:$0x1] }
  0xc6   : > { %v1354_v17 = vsel %vm4602_vm14, %v4697_v15, %v1353_v36  ;;  %v1330_v12 = vsel %vm4602_vm14, %v4719_v40, %v4721_v14  ;;  %v3555_v30 = vpack.c.bf16 %v547_v47, %v547_v47  ;;  %v389_v28 = vsel %vm4436_vm5, 0, %v388_v25  ;;  %3760 = vmatprep.subr.bf16.mxu1 %v3892_v22  ;;  %3721 = vmatpush3.bf16.msra.mxu0 %v3892_v22  ;;  %v1021_v21 = vld [vmem:[#allocation2 + $0x3c] sm:$0xf] }
  0xc7   : > { %v4763_v23 = vcombine.low %v4679_v51, %v1745_v53  ;;  %v4765_v39 = vrot.slane %v1375_v9, 5  ;;  %v3556_v31 = vpack.c.bf16 %v548_v48, %v548_v48  ;;  %390 = vst [vmem:[#allocation2 + $0x44] sm:$0x1] %v389_v28  ;;  %v336_v15 = vsel %vm4431_vm4, 0, %v335_v54  ;;  %3765 = vmatpush3.bf16.msra.mxu1 %v3892_v22 }
  0xc8   : > { %2181 = vrot.lane.b32.xlu1 %v4745_v63, %s4155_s13  ;;  %2284 = vrot.lane.b32.xlu0 %v4745_v63, %s4156_s27  ;;  %v4779_v51 = vcombine.low %v1344_v13, %v1354_v17  ;;  %v738_v42 = vshrl.u32 %v3555_v30, 16  ;;  %v741_v44 = vshll.u32 %v3555_v30, 16  ;;  %337 = vst [vmem:[#allocation2 + $0x48] sm:$0x1] %v336_v15  ;;  %v3638_v45 = vunpack.c.l.bf16 %v3684_v8  ;;  %v3894_v13 = vld [vmem:[#allocation6 + $0x18] sm:$0xff]  }
  0xc9   : > { %v746_v4 = vshrl.u32 %v3556_v31, 16  ;;  %v749_v47 = vshll.u32 %v3556_v31, 16  ;;  %v3639_v49 = vunpack.c.h.bf16 %v3684_v8  ;;  %v392_v33 = vsel %vm4436_vm5, 0, %v391_v20  ;;  %3722 = vmatprep.subr.bf16.mxu0 %v3894_v13  ;;  %3761 = vmatprep.subr.bf16.mxu1 %v3894_v13 }
  0xca   : > { %v740_v9 = vrot.slane %v738_v42, 7  ;;  %v511_v50 = vmul.f32 %v3638_v45, %v4444_v7  ;;  %393 = vst [vmem:[#allocation2 + $0x50] sm:$0x1] %v392_v33  ;;  %v339_v38 = vsel %vm4431_vm4, 0, %v338_v37  ;;  %v3642_v6 = vunpack.c.l.bf16 %v3685_v57  ;;  %v341_v42 = vld [vmem:[#allocation2 + $0x60] sm:$0x1]  ;;  %3723 = vmatpush3.bf16.msra.mxu0 %v3894_v13 }
  0xcb   : > { %v748_v25 = vrot.slane %v746_v4, 7  ;;  %v512_v36 = vmul.f32 %v3639_v49, %v4444_v7  ;;  %340 = vst [vmem:[#allocation2 + $0x54] sm:$0x1] %v339_v38  ;;  %v3643_v11 = vunpack.c.h.bf16 %v3685_v57  ;;  %v395_v54 = vsel %vm4436_vm5, 0, %v394_v46  ;;  %3766 = vmatpush3.bf16.msra.mxu1 %v3894_v13 }
  0xcc   : > { %2080 = vrot.lane.b32.xlu1 %v4763_v23, %s4151_s26  ;;  %2286 = vrot.lane.b32.xlu0 %v4763_v23, %s4156_s27  ;;  %v1378_v53 = vsel %vm4602_vm14, %v4749_v5, %v4765_v39  ;;  %v4797_v48 = vld [vmem:[#allocation2 + $0x38] sm:$0x1]  ;;  %v743_v8 = vor.u32 %v741_v44, %v740_v9  ;;  %v744_v17 = vrot.slane %v740_v9, 4  ;;  %v549_v30 = vadd.f32 %v4455_v19, %v511_v50  ;;  %v3686_v9 = vld [vmem:[%s4414_s18 + $0x38] sm:$0xff]  }
  0xcd   : > { %396 = vst [vmem:[#allocation2 + $0x5c] sm:$0x1] %v395_v54  ;;  %v1399_v28 = vshll.u32 %v4797_v48, 16  ;;  %v751_v20 = vor.u32 %v749_v47, %v748_v25  ;;  %v753_v22 = vrot.slane %v748_v25, 4  ;;  %v513_v31 = vmul.f32 %v3642_v6, %v4444_v7 }
  0xce   : > { %v1022_v15 = vsel %vm4470_vm7, %v743_v8, %v1021_v21  ;;  %v1025_v37 = vld [vmem:[#allocation2 + $0x44] sm:$0x1]  ;;  %v550_v5 = vadd.f32 %v4455_v19, %v512_v36  ;;  %v3557_v39 = vpack.c.bf16 %v549_v30, %v549_v30  ;;  %v514_v57 = vmul.f32 %v3643_v11, %v4444_v7 }
  0xcf   : > { %v3449_v44 = vcombine.low %v1320_v0, %v1330_v12  ;;  %v1748_v45 = vrot.slane %v4640_v59, 5  ;;  %v752_v46 = vsel %vm4492_vm10, %v744_v17, %v751_v20  ;;  %1023 = vst [vmem:[#allocation2 + $0x3c] sm:$0xf] %v1022_v15  ;;  %v1026_v4 = vsel %vm4431_vm4, %v753_v22, %v1025_v37 }
  0xd0   : > { %2146 = vrot.lane.b32.xlu1 %v4779_v51, %s4157_s10  ;;  %2078 = vrot.lane.b32.xlu0 %v4745_v63, %s4151_s26  ;;  %v4830_v26 = vcombine.low %v1368_v29, %v1378_v53  ;;  %1024 = vst.msk [vmem:[#allocation2 + $0x40] sm:$0xf] %vm990_vm0, %v752_v46  ;;  %1027 = vst [vmem:[#allocation2 + $0x44] sm:$0x1] %v1026_v4  ;;  %v3558_v61 = vpack.c.bf16 %v550_v5, %v550_v5  ;;  %v755_v40 = vshrl.u32 %v3557_v39, 16  ;;  %vm2665_vm15 = vcmask 1043456  }
  0xd1   : > { %v758_v14 = vshll.u32 %v3557_v39, 16  ;;  %v1387_v0 = vrot.slane %v1386_v52, 4  ;;  %v551_v63 = vadd.f32 %v4455_v19, %v513_v31  ;;  %v552_v12 = vadd.f32 %v4455_v19, %v514_v57  ;;  %v1028_v52 = vld [vmem:[#allocation2 + $0x48] sm:$0xf]  ;;  %v1032_v39 = vld [vmem:[#allocation2 + $0x50] sm:$0x1] }
  0xd2   : > { %v342_v56 = vsel %vm4431_vm4, 0, %v341_v42  ;;  %v1397_v29 = vrot.slane %v1396_v55, 4  ;;  %v1401_v47 = vrot.slane %v1399_v28, 5  ;;  %v757_v49 = vrot.slane %v755_v40, 7 }
  0xd3   : > { %v763_v33 = vshrl.u32 %v3558_v61, 16  ;;  %343 = vst [vmem:[#allocation2 + $0x60] sm:$0x1] %v342_v56  ;;  %v3418_v18 = vrot.slane %v4629_v16, 9  ;;  %v766_v24 = vshll.u32 %v3558_v61, 16  ;;  %v3559_v50 = vpack.c.bf16 %v551_v63, %v551_v63 }
  0xd4   : > { %2251 = vrot.lane.b32.xlu1 %v4830_v26, %s4158_s29  ;;  %1996 = vrot.lane.b32.xlu0 %v3449_v44, %s4154_s11  ;;  %v760_v38 = vor.u32 %v758_v14, %v757_v49  ;;  %v3560_v35 = vpack.c.bf16 %v552_v12, %v552_v12  ;;  %v398_v55 = vsel %vm4436_vm5, 0, %v397_v60  ;;  %v1392_v13 = vsel %vm4602_vm14, %v1387_v0, %v4713_v32 }
  0xd5   : > { %v765_v6 = vrot.slane %v763_v33, 7  ;;  %v1750_v16 = vrot.slane %v1748_v45, 4  ;;  %v1751_v25 = vrot.slane %v4797_v48, 5  ;;  %v3646_v21 = vunpack.c.l.bf16 %v3686_v9  ;;  %399 = vst [vmem:[#allocation2 + $0x68] sm:$0x1] %v398_v55 }
  0xd6   : > { %v1402_v36 = vsel %vm4602_vm14, %v1397_v29, %v1401_v47  ;;  %v4858_v11 = vld [vmem:[#allocation2 + $0x3c] sm:$0xf]  ;;  %v761_v54 = vrot.slane %v757_v49, 4  ;;  %v1029_v53 = vsel %vm4470_vm7, %v760_v38, %v1028_v52  ;;  %v3647_v8 = vunpack.c.h.bf16 %v3686_v9 }
  0xd7   : > { %v4862_v17 = vld [vmem:[#allocation2 + $0x40] sm:$0xf]  ;;  %v1404_v32 = vshrl.u32 %v4858_v11, 16  ;;  %v1407_v30 = vshll.u32 %v4858_v11, 16  ;;  %v768_v28 = vor.u32 %v766_v24, %v765_v6  ;;  %1030 = vst [vmem:[#allocation2 + $0x48] sm:$0xf] %v1029_v53  ;;  %v515_v57 = vmul.f32 %v3646_v21, %v4444_v7 }
  0xd8   : > { %v772_v48 = vshrl.u32 %v3559_v50, 16  ;;  %1998 = vrot.lane.b32.xlu1 %v4779_v51, %s4154_s11  ;;  %2144 = vrot.lane.b32.xlu0 %v3449_v44, %s4157_s10  ;;  %v1417_v20 = vshrl.u32 %v4862_v17, 16  ;;  %v1413_v22 = vshll.u32 %v4862_v17, 16  ;;  %v770_v31 = vrot.slane %v765_v6, 4  ;;  %v4876_v46 = vld [vmem:[#allocation2 + $0x44] sm:$0x1] }
  0xd9   : > { %v780_v15 = vshrl.u32 %v3560_v35, 16  ;;  %v1406_v37 = vrot.slane %v1404_v32, 4  ;;  %v1409_v5 = vrot.slane %v1407_v30, 5  ;;  %v1749_v42 = vsel %vm4512_vm11, %v3418_v18, %v1748_v45  ;;  %v344_v24 = vld [vmem:[#allocation2 + $0x6c] sm:$0x1] }
  0xda   : > { %v4878_v4 = vrot.slane %v1413_v22, 5  ;;  %v1419_v44 = vrot.slane %v1417_v20, 4  ;;  %v775_v61 = vshll.u32 %v3559_v50, 16  ;;  %v4880_v40 = vcombine.low %v1392_v13, %v1402_v36  ;;  %v3687_v22 = vld [vmem:[%s4414_s18 + $0x40] sm:$0xff]  }
  0xdb   : > { %v1752_v14 = vsel %vm4512_vm11, %v1750_v16, %v1751_v25  ;;  %v769_v0 = vsel %vm4492_vm10, %v761_v54, %v768_v28  ;;  %v516_v63 = vmul.f32 %v3647_v8, %v4444_v7  ;;  %v1033_v59 = vsel %vm4431_vm4, %v770_v31, %v1032_v39  ;;  %v1035_v7 = vld [vmem:[#allocation2 + $0x54] sm:$0xf] }
  0xdc   : > { %2000 = vrot.lane.b32.xlu1 %v4830_v26, %s4154_s11  ;;  %2249 = vrot.lane.b32.xlu0 %v4779_v51, %s4158_s29  ;;  %1031 = vst.msk [vmem:[#allocation2 + $0x4c] sm:$0xf] %vm990_vm0, %v769_v0  ;;  %v774_v45 = vrot.slane %v772_v48, 7  ;;  %v782_v12 = vrot.slane %v780_v15, 7  ;;  %v783_v56 = vshll.u32 %v3560_v35, 16  ;;  %v1410_v60 = vor.u32 %v1409_v5, %v1406_v37 }
  0xdd   : > { %v1420_v29 = vor.u32 %v1419_v44, %v4878_v4  ;;  %v1423_v47 = vshll.u32 %v4876_v46, 16  ;;  %1034 = vst [vmem:[#allocation2 + $0x50] sm:$0x1] %v1033_v59  ;;  %v553_v49 = vadd.f32 %v4455_v19, %v515_v57  ;;  %v1039_v51 = vld [vmem:[#allocation2 + $0x5c] sm:$0x1]  ;;  %v554_v18 = vadd.f32 %v4455_v19, %v516_v63 }
  0xde   : > { %v777_v33 = vor.u32 %v775_v61, %v774_v45  ;;  %v778_v9 = vrot.slane %v774_v45, 4  ;;  %v4902_v52 = vcombine.low %v1749_v42, %v1752_v14  ;;  %v785_v50 = vor.u32 %v783_v56, %v782_v12  ;;  %v4913_v36 = vld [vmem:[#allocation2 + $0x48] sm:$0xf]  ;;  %v1042_v57 = vld [vmem:[#allocation2 + $0x60] sm:$0xf] }
  0xdf   : > { %v787_v38 = vrot.slane %v782_v12, 4  ;;  %v1411_v35 = vrot.slane %v1410_v60, 4  ;;  %v1421_v55 = vrot.slane %v1420_v29, 4  ;;  %v1425_v13 = vrot.slane %v1423_v47, 5  ;;  %v4958_v47 = vld [vmem:[#allocation8] ss:$0 sm:$0xff] }
  0xe0   : > { %2150 = vrot.lane.b32.xlu1 %v4880_v40, %s4157_s10  ;;  %2148 = vrot.lane.b32.xlu0 %v4830_v26, %s4157_s10  ;;  %v1036_v6 = vsel %vm4470_vm7, %v777_v33, %v1035_v7  ;;  %v3561_v16 = vpack.c.bf16 %v553_v49, %v553_v49  ;;  %v786_v19 = vsel %vm4492_vm10, %v778_v9, %v785_v50  ;;  %v345_v26 = vsel %vm4431_vm4, 0, %v344_v24  ;;  %v400_v9 = vld [vmem:[#allocation2 + $0x74] sm:$0x1] }
  0xe1   : > { %1037 = vst [vmem:[#allocation2 + $0x54] sm:$0xf] %v1036_v6  ;;  %v1040_v25 = vsel %vm4431_vm4, %v787_v38, %v1039_v51  ;;  %v1755_v21 = vrot.slane %v4862_v17, 5  ;;  %1038 = vst.msk [vmem:[#allocation2 + $0x58] sm:$0xf] %vm990_vm0, %v786_v19  ;;  %v3562_v54 = vpack.c.bf16 %v554_v18, %v554_v18  ;;  %v4922_v32 = vcombine.low %v4858_v11, %v4862_v17 }
  0xe2   : > { %1041 = vst [vmem:[#allocation2 + $0x5c] sm:$0x1] %v1040_v25  ;;  %v789_v53 = vshrl.u32 %v3561_v16, 16  ;;  %v792_v8 = vshll.u32 %v3561_v16, 16  ;;  %346 = vst [vmem:[#allocation2 + $0x6c] sm:$0x1] %v345_v26  ;;  %v1416_v30 = vsel %vm4602_vm14, %v1411_v35, %v4878_v4  ;;  %v1426_v28 = vsel %vm4602_vm14, %v1421_v55, %v1425_v13 }
  0xe3   : > { %v4929_v48 = vld [vmem:[#allocation2 + $0x4c] sm:$0xf]  ;;  %v3419_v31 = vrot.slane %v4858_v11, 9  ;;  %v1428_v15 = vshrl.u32 %v4913_v36, 16  ;;  %v1757_v37 = vrot.slane %v1755_v21, 4  ;;  %v1758_v17 = vrot.slane %v4876_v46, 5 }
  0xe4   : > { %2185 = vrot.lane.b32.xlu1 %v4902_v52, %s4155_s13  ;;  %2183 = vrot.lane.b32.xlu0 %v4763_v23, %s4155_s13  ;;  %v791_v20 = vrot.slane %v789_v53, 7  ;;  %v1431_v23 = vshll.u32 %v4913_v36, 16  ;;  %v797_v39 = vshrl.u32 %v3562_v54, 16  ;;  %v4940_v42 = vcombine.low %v1416_v30, %v1426_v28  ;;  %v4954_v56 = vld [vmem:[#allocation2 + $0x50] sm:$0x1] }
  0xe5   : > { %v1441_v11 = vshrl.u32 %v4929_v48, 16  ;;  %v1437_v4 = vshll.u32 %v4929_v48, 16  ;;  %v3650_v44 = vunpack.c.l.bf16 %v3687_v22  ;;  %v1756_v61 = vsel %vm4512_vm11, %v3419_v31, %v1755_v21  ;;  %v1046_v38 = vld [vmem:[#allocation2 + $0x68] sm:$0x1]  ;;  %v4976_v25 = vld [vmem:[#allocation9] ss:$0 sm:$0xff] }
  0xe6   : > { %v794_v5 = vor.u32 %v792_v8, %v791_v20  ;;  %v1430_v46 = vrot.slane %v1428_v15, 4  ;;  %v1433_v14 = vrot.slane %v1431_v23, 5  ;;  %v1759_v63 = vsel %vm4512_vm11, %v1757_v37, %v1758_v17  ;;  %v347_v17 = vld [vmem:[#allocation2 + $0x78] sm:$0x1] }
  0xe7   : > { %v799_v59 = vrot.slane %v797_v39, 7  ;;  %v800_v45 = vshll.u32 %v3562_v54, 16  ;;  %v3651_v12 = vunpack.c.h.bf16 %v3687_v22  ;;  %v4956_v60 = vrot.slane %v1437_v4, 5  ;;  %v3688_v4 = vld [vmem:[%s4414_s18 + $0x48] sm:$0xff]  }
  0xe8   : > { %2220 = vrot.lane.b32.xlu1 %v4922_v32, %s4153_s30  ;;  %2218 = vrot.lane.b32.xlu0 %v4649_v62, %s4153_s30  ;;  %v1043_v0 = vsel %vm4470_vm7, %v794_v5, %v1042_v57  ;;  %v1443_v29 = vrot.slane %v1441_v11, 4  ;;  %v517_v7 = vmul.f32 %v4958_v47, %v3650_v44  ;;  %v4961_v49 = vld [vmem:[#allocation2 + $0x54] sm:$0xf]  ;;  %v795_v33 = vrot.slane %v791_v20, 4  ;;  %v4966_v50 = vld [vmem:[#allocation2 + $0x58] sm:$0xf] }
  0xe9   : > { %1044 = vst [vmem:[#allocation2 + $0x60] sm:$0xf] %v1043_v0  ;;  %v4963_v51 = vcombine.low %v1756_v61, %v1759_v63  ;;  %v1434_v18 = vor.u32 %v1433_v14, %v1430_v46  ;;  %v1762_v24 = vrot.slane %v4929_v48, 5  ;;  %v1447_v6 = vshll.u32 %v4954_v56, 16  ;;  %v403_v44 = vld [vmem:[#allocation2 + $0x80] sm:$0x1] }
  0xea   : > { %v802_v35 = vor.u32 %v800_v45, %v799_v59  ;;  %v804_v55 = vrot.slane %v799_v59, 4  ;;  %v518_v13 = vmul.f32 %v4958_v47, %v3651_v12  ;;  %v1444_v16 = vor.u32 %v1443_v29, %v4956_v60  ;;  %v350_v14 = vld [vmem:[#allocation2 + $0x84] sm:$0x1]  ;;  %v5005_v12 = vld [vmem:[#allocation2 + $0x5c] sm:$0x1] }
  0xeb   : > { %v1452_v19 = vshrl.u32 %v4961_v49, 16  ;;  %v555_v26 = vadd.f32 %v4976_v25, %v517_v7  ;;  %v401_v21 = vsel %vm4436_vm5, 0, %v400_v9  ;;  %v1455_v54 = vshll.u32 %v4961_v49, 16 }
  0xec   : > { %2255 = vrot.lane.b32.xlu1 %v4940_v42, %s4158_s29  ;;  %2253 = vrot.lane.b32.xlu0 %v4880_v40, %s4158_s29  ;;  %v1465_v53 = vshrl.u32 %v4966_v50, 16  ;;  %v1047_v8 = vsel %vm4431_vm4, %v804_v55, %v1046_v38  ;;  %402 = vst [vmem:[#allocation2 + $0x74] sm:$0x1] %v401_v21  ;;  %v3420_v30 = vrot.slane %v4913_v36, 9  ;;  %v1461_v28 = vshll.u32 %v4966_v50, 16 }
  0xed   : > { %1048 = vst [vmem:[#allocation2 + $0x68] sm:$0x1] %v1047_v8  ;;  %v556_v20 = vadd.f32 %v4976_v25, %v518_v13  ;;  %v3563_v22 = vpack.c.bf16 %v555_v26, %v555_v26  ;;  %v4993_v31 = vcombine.low %v4913_v36, %v4929_v48  ;;  %v1435_v15 = vrot.slane %v1434_v18, 4 }
  0xee   : > { %v1764_v23 = vrot.slane %v1762_v24, 4  ;;  %v1765_v37 = vrot.slane %v4954_v56, 5  ;;  %v1449_v5 = vrot.slane %v1447_v6, 5  ;;  %v1445_v61 = vrot.slane %v1444_v16, 4 }
  0xef   : > { %v3564_v39 = vpack.c.bf16 %v556_v20, %v556_v20  ;;  %v806_v57 = vshrl.u32 %v3563_v22, 16  ;;  %v809_v11 = vshll.u32 %v3563_v22, 16  ;;  %v1454_v36 = vrot.slane %v1452_v19, 4  ;;  %v1049_v19 = vld [vmem:[#allocation2 + $0x6c] sm:$0xf] }
  0xf0   : > { %2002 = vrot.lane.b32.xlu1 %v4880_v40, %s4154_s11  ;;  %2288 = vrot.lane.b32.xlu0 %v4902_v52, %s4156_s27  ;;  %v803_v40 = vsel %vm4492_vm10, %v795_v33, %v802_v35  ;;  %v1457_v48 = vrot.slane %v1455_v54, 5  ;;  %v1467_v46 = vrot.slane %v1465_v53, 4  ;;  %v5001_v0 = vrot.slane %v1461_v28, 5  ;;  %v3689_v35 = vld [vmem:[%s4414_s18 + $0x50] sm:$0xff]  }
  0xf1   : > { %1045 = vst.msk [vmem:[#allocation2 + $0x64] sm:$0xf] %vm990_vm0, %v803_v40  ;;  %v808_v63 = vrot.slane %v806_v57, 7  ;;  %v814_v59 = vshrl.u32 %v3564_v39, 16  ;;  %v348_v45 = vsel %vm4431_vm4, 0, %v347_v17  ;;  %v817_v56 = vshll.u32 %v3564_v39, 16 }
  0xf2   : > { %349 = vst [vmem:[#allocation2 + $0x78] sm:$0x1] %v348_v45  ;;  %v3654_v29 = vunpack.c.l.bf16 %v3688_v4  ;;  %v3655_v7 = vunpack.c.h.bf16 %v3688_v4  ;;  %v404_v33 = vsel %vm4436_vm5, 0, %v403_v44  ;;  %v1763_v9 = vsel %vm4512_vm11, %v3420_v30, %v1762_v24 }
  0xf3   : > { %v811_v18 = vor.u32 %v809_v11, %v808_v63  ;;  %v816_v38 = vrot.slane %v814_v59, 7  ;;  %405 = vst [vmem:[#allocation2 + $0x80] sm:$0x1] %v404_v33  ;;  %v351_v6 = vsel %vm4431_vm4, 0, %v350_v14  ;;  %v1440_v55 = vsel %vm4602_vm14, %v1435_v15, %v4956_v60  ;;  %v1053_v21 = vld [vmem:[#allocation2 + $0x74] sm:$0x1] }
  0xf4   : > { %2004 = vrot.lane.b32.xlu1 %v4940_v42, %s4154_s11  ;;  %2290 = vrot.lane.b32.xlu0 %v4963_v51, %s4156_s27  ;;  %v1450_v13 = vsel %vm4602_vm14, %v1445_v61, %v1449_v5  ;;  %v812_v16 = vrot.slane %v808_v63, 4  ;;  %352 = vst [vmem:[#allocation2 + $0x84] sm:$0x1] %v351_v6  ;;  %v1458_v24 = vor.u32 %v1457_v48, %v1454_v36  ;;  %v1471_v26 = vshll.u32 %v5005_v12, 16  ;;  %v5039_v15 = vld [vmem:[#allocation2 + $0x60] sm:$0xf] }
  0xf5   : > { %v519_v54 = vmul.f32 %v4958_v47, %v3654_v29  ;;  %v520_v53 = vmul.f32 %v4958_v47, %v3655_v7  ;;  %v1468_v40 = vor.u32 %v1467_v46, %v5001_v0  ;;  %v819_v60 = vor.u32 %v817_v56, %v816_v38  ;;  %v406_v11 = vld [vmem:[#allocation2 + $0x8c] sm:$0x1]  ;;  %v5059_v56 = vld [vmem:[#allocation6 + $0x20] ss:$0 sps:$4 sm:$0xff]  }
  0xf6   : > { %v821_v8 = vrot.slane %v816_v38, 4  ;;  %v3658_v30 = vunpack.c.l.bf16 %v3689_v35  ;;  %v5033_v28 = vcombine.low %v1440_v55, %v1450_v13  ;;  %v1050_v20 = vsel %vm4470_vm7, %v811_v18, %v1049_v19  ;;  %3768 = vmatprep.subr.msk.bf16.mxu0 %vm2665_vm15, %v5059_v56  ;;  %3769 = vmatprep.subr.msk.bf16.mxu1 %vm2665_vm15, %v5059_v56 }
  0xf7   : > { %1051 = vst [vmem:[#allocation2 + $0x6c] sm:$0xf] %v1050_v20  ;;  %v1473_v17 = vrot.slane %v1471_v26, 5  ;;  %v1769_v5 = vrot.slane %v4966_v50, 5  ;;  %v557_v39 = vadd.f32 %v4976_v25, %v519_v54  ;;  %v558_v57 = vadd.f32 %v4976_v25, %v520_v53 }
  0xf8   : > { %2084 = vrot.lane.b32.xlu1 %v4963_v51, %s4151_s26  ;;  %2082 = vrot.lane.b32.xlu0 %v4902_v52, %s4151_s26  ;;  %v1766_v52 = vsel %vm4512_vm11, %v1764_v23, %v1765_v37  ;;  %v820_v23 = vsel %vm4492_vm10, %v812_v16, %v819_v60  ;;  %v1054_v37 = vsel %vm4431_vm4, %v821_v8, %v1053_v21  ;;  %v1459_v4 = vrot.slane %v1458_v24, 4  ;;  %v5096_v60 = vld [vmem:[#allocation2 + $0x68] sm:$0x1] }
  0xf9   : > { %v5037_v22 = vcombine.low %v1763_v9, %v1766_v52  ;;  %1052 = vst.msk [vmem:[#allocation2 + $0x70] sm:$0xf] %vm990_vm0, %v820_v23  ;;  %1055 = vst [vmem:[#allocation2 + $0x74] sm:$0x1] %v1054_v37  ;;  %v1469_v44 = vrot.slane %v1468_v40, 4  ;;  %v3659_v61 = vunpack.c.h.bf16 %v3689_v35  ;;  %v521_v36 = vmul.f32 %v4958_v47, %v3658_v30 }
  0xfa   : > { %v1476_v48 = vshrl.u32 %v5039_v15, 16  ;;  %v1479_v46 = vshll.u32 %v5039_v15, 16  ;;  %v3565_v14 = vpack.c.bf16 %v557_v39, %v557_v39  ;;  %v3566_v63 = vpack.c.bf16 %v558_v57, %v558_v57  ;;  %v1056_v40 = vld [vmem:[#allocation2 + $0x78] sm:$0xf]  ;;  %v1060_v20 = vld [vmem:[#allocation2 + $0x80] sm:$0x1] }
  0xfb   : > { %v522_v59 = vmul.f32 %v4958_v47, %v3659_v61  ;;  %v407_v45 = vsel %vm4436_vm5, 0, %v406_v11  ;;  %v5063_v29 = vcombine.low %v4961_v49, %v4966_v50  ;;  %v3421_v7 = vrot.slane %v4961_v49, 9 }
  0xfc   : > { %2119 = vrot.lane.b32.xlu1 %v4993_v31, %s4152_s28  ;;  %2117 = vrot.lane.b32.xlu0 %v4922_v32, %s4152_s28  ;;  %v823_v33 = vshrl.u32 %v3565_v14, 16  ;;  %v831_v9 = vshrl.u32 %v3566_v63, 16  ;;  %408 = vst [vmem:[#allocation2 + $0x8c] sm:$0x1] %v407_v45  ;;  %v1464_v18 = vsel %vm4602_vm14, %v1459_v4, %v5001_v0  ;;  %v1771_v38 = vrot.slane %v1769_v5, 4 }
  0xfd   : > { %v1772_v6 = vrot.slane %v5005_v12, 5  ;;  %v559_v35 = vadd.f32 %v4976_v25, %v521_v36  ;;  %v1474_v49 = vsel %vm4602_vm14, %v1469_v44, %v1473_v17  ;;  %v1478_v50 = vrot.slane %v1476_v48, 4 }
  0xfe   : > { %v1481_v55 = vrot.slane %v1479_v46, 5  ;;  %v825_v0 = vrot.slane %v823_v33, 7  ;;  %v826_v52 = vshll.u32 %v3565_v14, 16  ;;  %v560_v12 = vadd.f32 %v4976_v25, %v522_v59  ;;  %v5102_v11 = vld [vmem:[#allocation2 + $0x6c] sm:$0xf] }
  0xff   : > { %v833_v16 = vrot.slane %v831_v9, 7  ;;  %v834_v19 = vshll.u32 %v3566_v63, 16  ;;  %v1770_v24 = vsel %vm4512_vm11, %v3421_v7, %v1769_v5  ;;  %v3567_v26 = vpack.c.bf16 %v559_v35, %v559_v35  ;;  %v353_v14 = vld [vmem:[#allocation2 + $0x90] sm:$0x1] }
 0x100   : > { %2154 = vrot.lane.b32.xlu1 %v5033_v28, %s4157_s10  ;;  %2152 = vrot.lane.b32.xlu0 %v4940_v42, %s4157_s10  ;;  %v5066_v42 = vld [vmem:[#allocation2 + $0x64] sm:$0xf]  ;;  %v5092_v21 = vcombine.low %v1464_v18, %v1474_v49  ;;  %v1773_v54 = vsel %vm4512_vm11, %v1771_v38, %v1772_v6  ;;  %v1482_v53 = vor.u32 %v1481_v55, %v1478_v50  ;;  %v829_v17 = vrot.slane %v825_v0, 4  ;;  %v3690_v63 = vld [vmem:[%s4414_s18 + $0x58] sm:$0xff]  }
 0x101   : > { %v1485_v13 = vshll.u32 %v5066_v42, 16  ;;  %v828_v30 = vor.u32 %v826_v52, %v825_v0  ;;  %v3568_v23 = vpack.c.bf16 %v560_v12, %v560_v12  ;;  %v836_v5 = vor.u32 %v834_v19, %v833_v16  ;;  %v5119_v45 = vld [vmem:[#allocation2 + $0x70] sm:$0xf]  ;;  %v1063_v49 = vld [vmem:[#allocation2 + $0x84] sm:$0xf] }
 0x102   : > { %v838_v39 = vrot.slane %v833_v16, 4  ;;  %v5100_v57 = vcombine.low %v1770_v24, %v1773_v54  ;;  %v840_v44 = vshrl.u32 %v3567_v26, 16  ;;  %v5110_v61 = vrot.slane %v1482_v53, 4  ;;  %v409_v52 = vld [vmem:[#allocation2 + $0x98] sm:$0x1] }
 0x103   : > { %v5098_v8 = vrot.slane %v1485_v13, 5  ;;  %v1057_v4 = vsel %vm4470_vm7, %v828_v30, %v1056_v40  ;;  %v1495_v36 = vshll.u32 %v5096_v60, 16  ;;  %v837_v48 = vsel %vm4492_vm10, %v829_v17, %v836_v5  ;;  %v356_v12 = vld [vmem:[#allocation2 + $0x9c] sm:$0x1]  ;;  %v1067_v19 = vld [vmem:[#allocation2 + $0x8c] sm:$0x1] }
 0x104   : > { %2189 = vrot.lane.b32.xlu1 %v5037_v22, %s4155_s13  ;;  %2187 = vrot.lane.b32.xlu0 %v4963_v51, %s4155_s13  ;;  %v1489_v51 = vshrl.u32 %v5066_v42, 16  ;;  %1058 = vst [vmem:[#allocation2 + $0x78] sm:$0xf] %v1057_v4  ;;  %v1061_v46 = vsel %vm4431_vm4, %v838_v39, %v1060_v20  ;;  %v1776_v59 = vrot.slane %v5066_v42, 5  ;;  %1059 = vst.msk [vmem:[#allocation2 + $0x7c] sm:$0xf] %vm990_vm0, %v837_v48  ;;  %v3662_v0 = vunpack.c.l.bf16 %v3690_v63 }
 0x105   : > { %1062 = vst [vmem:[#allocation2 + $0x80] sm:$0x1] %v1061_v46  ;;  %v842_v7 = vrot.slane %v840_v44, 7  ;;  %v843_v33 = vshll.u32 %v3567_v26, 16  ;;  %v848_v9 = vshrl.u32 %v3568_v23, 16  ;;  %v1500_v38 = vshrl.u32 %v5102_v11, 16 }
 0x106   : > { %v1491_v37 = vrot.slane %v1489_v51, 4  ;;  %v1503_v6 = vshll.u32 %v5102_v11, 16  ;;  %v851_v35 = vshll.u32 %v3568_v23, 16  ;;  %v1513_v51 = vshrl.u32 %v5119_v45, 16  ;;  %v3691_v4 = vld [vmem:[%s4414_s18 + $0x60] sm:$0xff]  }
 0x107   : > { %v845_v50 = vor.u32 %v843_v33, %v842_v7  ;;  %v846_v55 = vrot.slane %v842_v7, 4  ;;  %v850_v13 = vrot.slane %v848_v9, 7  ;;  %v1509_v16 = vshll.u32 %v5119_v45, 16 }
 0x108   : > { %2224 = vrot.lane.b32.xlu1 %v5063_v29, %s4153_s30  ;;  %2222 = vrot.lane.b32.xlu0 %v4993_v31, %s4153_s30  ;;  %v1492_v18 = vor.u32 %v1491_v37, %v5098_v8  ;;  %v2667_v24 = vsel %vm2665_vm15, %v5059_v56, 0  ;;  %v354_v26 = vsel %vm4431_vm4, 0, %v353_v14  ;;  %v1497_v20 = vrot.slane %v1495_v36, 5  ;;  %v5153_v14 = vld [vmem:[#allocation2 + $0x74] sm:$0x1] }
 0x109   : > { %v853_v54 = vor.u32 %v851_v35, %v850_v13  ;;  %v855_v53 = vrot.slane %v850_v13, 4  ;;  %v1064_v40 = vsel %vm4470_vm7, %v845_v50, %v1063_v49  ;;  %3725 = vmatpush3.bf16.msra.mxu0 %v2667_v24  ;;  %355 = vst [vmem:[#allocation2 + $0x90] sm:$0x1] %v354_v26  ;;  %3767 = vmatpush3.bf16.msra.mxu1 %v2667_v24  ;;  %v410_v23 = vsel %vm4436_vm5, 0, %v409_v52 }
 0x10a   : > { %v1493_v30 = vrot.slane %v1492_v18, 4  ;;  %1065 = vst [vmem:[#allocation2 + $0x84] sm:$0xf] %v1064_v40  ;;  %v357_v56 = vsel %vm4431_vm4, 0, %v356_v12  ;;  %v1502_v37 = vrot.slane %v1500_v38, 4  ;;  %v523_v39 = vmul.f32 %v4958_v47, %v3662_v0 }
 0x10b   : > { %v854_v17 = vsel %vm4492_vm10, %v846_v55, %v853_v54  ;;  %v1068_v5 = vsel %vm4431_vm4, %v855_v53, %v1067_v19  ;;  %411 = vst [vmem:[#allocation2 + $0x98] sm:$0x1] %v410_v23  ;;  %358 = vst [vmem:[#allocation2 + $0x9c] sm:$0x1] %v357_v56  ;;  %v1505_v44 = vrot.slane %v1503_v6, 5  ;;  %v1511_v36 = vrot.slane %v1509_v16, 5 }
 0x10c   : > { %2259 = vrot.lane.b32.xlu1 %v5092_v21, %s4158_s29  ;;  %2257 = vrot.lane.b32.xlu0 %v5033_v28, %s4158_s29  ;;  %v1515_v48 = vrot.slane %v1513_v51, 4  ;;  %1066 = vst.msk [vmem:[#allocation2 + $0x88] sm:$0xf] %vm990_vm0, %v854_v17  ;;  %1069 = vst [vmem:[#allocation2 + $0x8c] sm:$0x1] %v1068_v5  ;;  %v3422_v7 = vrot.slane %v5039_v15, 9  ;;  %v3666_v9 = vunpack.c.l.bf16 %v3691_v4  ;;  %v1488_v18 = vsel %vm4602_vm14, %v5110_v61, %v5098_v8 }
 0x10d   : > { %v1779_v33 = vrot.slane %v5096_v60, 5  ;;  %v1498_v38 = vsel %vm4602_vm14, %v1493_v30, %v1497_v20  ;;  %v1778_v6 = vrot.slane %v1776_v59, 4  ;;  %v561_v35 = vadd.f32 %v4976_v25, %v523_v39  ;;  %v5206_v30 = vld [vmem:[#allocation2 + $0x78] sm:$0xf] }
 0x10e   : > { %v1516_v60 = vor.u32 %v1515_v48, %v1511_v36  ;;  %v1519_v49 = vshll.u32 %v5153_v14, 16  ;;  %v3667_v61 = vunpack.c.h.bf16 %v3691_v4  ;;  %v525_v50 = vmul.f32 %v4958_v47, %v3666_v9 }
 0x10f   : > { %v5177_v55 = vcombine.low %v1488_v18, %v1498_v38  ;;  %v1777_v13 = vsel %vm4512_vm11, %v3422_v7, %v1776_v59  ;;  %v1780_v0 = vsel %vm4512_vm11, %v1778_v6, %v1779_v33  ;;  %v1783_v54 = vrot.slane %v5119_v45, 5  ;;  %v5219_v7 = vld [vmem:[#allocation2 + $0x7c] sm:$0xf] }
 0x110   : > { %2006 = vrot.lane.b32.xlu1 %v5033_v28, %s4154_s11  ;;  %2292 = vrot.lane.b32.xlu0 %v5037_v22, %s4156_s27  ;;  %v3663_v28 = vunpack.c.h.bf16 %v3690_v63  ;;  %v5157_v63 = vcombine.low %v5039_v15, %v5066_v42  ;;  %v1506_v15 = vor.u32 %v1505_v44, %v1502_v37  ;;  %v1517_v12 = vrot.slane %v1516_v60, 4  ;;  %v1070_v4 = vld [vmem:[#allocation2 + $0x90] sm:$0xf] }
 0x111   : > { %v1521_v51 = vrot.slane %v1519_v49, 5  ;;  %v526_v59 = vmul.f32 %v4958_v47, %v3667_v61  ;;  %v563_v24 = vadd.f32 %v4976_v25, %v525_v50  ;;  %v5195_v26 = vcombine.low %v1777_v13, %v1780_v0  ;;  %v412_v49 = vld [vmem:[#allocation2 + $0xa4] sm:$0x1] }
 0x112   : > { %v524_v46 = vmul.f32 %v4958_v47, %v3663_v28  ;;  %6189 = vst [vmem:[#allocation21_spill] sm:$0xff] %v5157_v63  ;;  %v1507_v52 = vrot.slane %v1506_v15, 4  ;;  %v5210_v56 = vcombine.low %v5102_v11, %v5119_v45  ;;  %v3423_v37 = vrot.slane %v5102_v11, 9  ;;  %v1074_v18 = vld [vmem:[#allocation2 + $0x98] sm:$0x1] }
 0x113   : > { %v1522_v28 = vsel %vm4602_vm14, %v1517_v12, %v1521_v51  ;;  %v564_v44 = vadd.f32 %v4976_v25, %v526_v59  ;;  %v1524_v33 = vshrl.u32 %v5206_v30, 16  ;;  %v1527_v61 = vshll.u32 %v5206_v30, 16  ;;  %v362_v59 = vld [vmem:[#allocation2 + $0xb4] sm:$0x1] }
 0x114   : > { %2008 = vrot.lane.b32.xlu1 %v5092_v21, %s4154_s11  ;;  %2294 = vrot.lane.b32.xlu0 %v5100_v57, %s4156_s27  ;;  %v562_v8 = vadd.f32 %v4976_v25, %v524_v46  ;;  %v1512_v40 = vsel %vm4602_vm14, %v1507_v52, %v1511_v36  ;;  %v3571_v36 = vpack.c.bf16 %v563_v24, %v563_v24  ;;  %v1785_v46 = vrot.slane %v1783_v54, 4  ;;  %v415_v52 = vld [vmem:[#allocation2 + $0xb0] sm:$0x1] }
 0x115   : > { %v5215_v48 = vcombine.low %v1512_v40, %v1522_v28  ;;  %v3572_v60 = vpack.c.bf16 %v564_v44, %v564_v44  ;;  %v413_v40 = vsel %vm4436_vm5, 0, %v412_v49  ;;  %v365_v49 = vld [vmem:[#allocation2 + $0xc0] sm:$0x1]  ;;  %vm2316_vm1 = vcmask 64512  }
 0x116   : > { %v3570_v16 = vpack.c.bf16 %v562_v8, %v562_v8  ;;  %v359_v8 = vld [vmem:[#allocation2 + $0xa8] sm:$0x1]  ;;  %v874_v13 = vshrl.u32 %v3571_v36, 16  ;;  %v877_v0 = vshll.u32 %v3571_v36, 16  ;;  %414 = vst [vmem:[#allocation2 + $0xa4] sm:$0x1] %v413_v40 }
 0x117   : > { %v360_v28 = vsel %vm4431_vm4, 0, %v359_v8  ;;  %v1784_v8 = vsel %vm4512_vm11, %v3423_v37, %v1783_v54  ;;  %v3693_v40 = vld [vmem:[%s4414_s18 + $0x70] sm:$0xff]   ;;  %vm2365_vm2 = vcmask 130048   ;;  %vm2398_vm3 = vcmask 195584  }
 0x118   : > { %2088 = vrot.lane.b32.xlu1 %v5100_v57, %s4151_s26  ;;  %2086 = vrot.lane.b32.xlu0 %v5037_v22, %s4151_s26  ;;  %v3569_v22 = vpack.c.bf16 %v561_v35, %v561_v35  ;;  %v865_v23 = vshrl.u32 %v3570_v16, 16  ;;  %v868_v5 = vshll.u32 %v3570_v16, 16  ;;  %v882_v16 = vshrl.u32 %v3572_v60, 16  ;;  %361 = vst [vmem:[#allocation2 + $0xa8] sm:$0x1] %v360_v28 }
 0x119   : > { %v876_v24 = vrot.slane %v874_v13, 7  ;;  %v1526_v13 = vrot.slane %v1524_v33, 4  ;;  %v366_v33 = vsel %vm4431_vm4, 0, %v365_v49  ;;  %vm2431_vm6 = vcmask 261120  }
 0x11a   : > { %v5189_v19 = vpop.permute.xlu1 %2074  ;;  %v857_v53 = vshrl.u32 %v3569_v22, 16  ;;  %v860_v20 = vshll.u32 %v3569_v22, 16  ;;  %v867_v39 = vrot.slane %v865_v23, 7  ;;  %v3692_v22 = vld [vmem:[%s4414_s18 + $0x68] sm:$0xff]   ;;  %v884_v23 = vrot.slane %v882_v16, 7 }
 0x11b   : > { %v880_v44 = vrot.slane %v876_v24, 4  ;;  %v3671_v36 = vunpack.c.h.bf16 %v3692_v22  ;;  %367 = vst [vmem:[#allocation2 + $0xc0] sm:$0x1] %v366_v33  ;;  %vm2464_vm8 = vcmask 326656   ;;  %vm2497_vm9 = vcmask 392192  }
 0x11c   : > { %2123 = vrot.lane.b32.xlu1 %v5157_v63, %s4152_s28  ;;  %2121 = vrot.lane.b32.xlu0 %v5063_v29, %s4152_s28  ;;  %v859_v17 = vrot.slane %v857_v53, 7  ;;  %v870_v35 = vor.u32 %v868_v5, %v867_v39  ;;  %v872_v15 = vrot.slane %v867_v39, 4  ;;  %v885_v53 = vshll.u32 %v3572_v60, 16 }
 0x11d   : > { %v3670_v5 = vunpack.c.l.bf16 %v3692_v22  ;;  %v416_v39 = vsel %vm4436_vm5, 0, %v415_v52  ;;  %v1529_v22 = vrot.slane %v1527_v61, 5  ;;  %v5283_v61 = vld [vmem:[#allocation2 + $0x80] sm:$0x1]  ;;  %v889_v52 = vrot.slane %v884_v23, 4 }
 0x11e   : > { %v5191_v42 = vpop.permute.xlu0 %2109  ;;  %v862_v9 = vor.u32 %v860_v20, %v859_v17  ;;  %v863_v6 = vrot.slane %v859_v17, 4  ;;  %v1075_v51 = vsel %vm4431_vm4, %v872_v15, %v1074_v18  ;;  %v1533_v20 = vshll.u32 %v5219_v7, 16  ;;  %v1077_v17 = vld [vmem:[#allocation2 + $0x9c] sm:$0xf]  ;;  %417 = vst [vmem:[#allocation2 + $0xb0] sm:$0x1] %v416_v39 }
 0x11f   : > { %1076 = vst [vmem:[#allocation2 + $0x98] sm:$0x1] %v1075_v51  ;;  %v418_v18 = vld [vmem:[#allocation2 + $0xbc] sm:$0x1]  ;;  %v887_v15 = vor.u32 %v885_v53, %v884_v23  ;;  %v527_v60 = vmul.f32 %v4958_v47, %v3670_v5  ;;  %v1081_v51 = vld [vmem:[#allocation2 + $0xa4] sm:$0x1]  ;;  %v1530_v28 = vor.u32 %v1529_v22, %v1526_v13 }
 0x120   : > { %2158 = vrot.lane.b32.xlu1 %v5177_v55, %s4157_s10  ;;  %2156 = vrot.lane.b32.xlu0 %v5092_v21, %s4157_s10  ;;  %v1786_v21 = vrot.slane %v5153_v14, 5  ;;  %v5226_v14 = vpop.permute.xlu1 %2111  ;;  %v1071_v50 = vsel %vm4470_vm7, %v862_v9, %v1070_v4  ;;  %v871_v12 = vsel %vm4492_vm10, %v863_v6, %v870_v35  ;;  %v879_v4 = vor.u32 %v877_v0, %v876_v24  ;;  %v5297_v24 = vld [vmem:[#allocation2 + $0x88] sm:$0xf] }
 0x121   : > { %1072 = vst [vmem:[#allocation2 + $0x90] sm:$0xf] %v1071_v50  ;;  %1073 = vst.msk [vmem:[#allocation2 + $0x94] sm:$0xf] %vm990_vm0, %v871_v12  ;;  %v363_v9 = vsel %vm4431_vm4, 0, %v362_v59  ;;  %v888_v11 = vsel %vm4492_vm10, %v880_v44, %v887_v15  ;;  %v565_v45 = vadd.f32 %v4976_v25, %v527_v60  ;;  %v419_v54 = vsel %vm4436_vm5, 0, %v418_v18 }
 0x122   : > { %v5228_v38 = vpop.permute.xlu0 %2214  ;;  %364 = vst [vmem:[#allocation2 + $0xb4] sm:$0x1] %v363_v9  ;;  %v1787_v50 = vsel %vm4512_vm11, %v1785_v46, %v1786_v21  ;;  %v1078_v0 = vsel %vm4470_vm7, %v879_v4, %v1077_v17  ;;  %v5277_v37 = vrot.slane %v1533_v20, 5  ;;  %1080 = vst.msk [vmem:[#allocation2 + $0xa0] sm:$0xf] %vm990_vm0, %v888_v11  ;;  %v528_v46 = vmul.f32 %v4958_v47, %v3671_v36 }
 0x123   : > { %1079 = vst [vmem:[#allocation2 + $0x9c] sm:$0xf] %v1078_v0  ;;  %420 = vst [vmem:[#allocation2 + $0xbc] sm:$0x1] %v419_v54  ;;  %v5285_v12 = vld [vmem:[#allocation2 + $0x84] sm:$0xf]  ;;  %v5295_v59 = vcombine.low %v1784_v8, %v1787_v50  ;;  %v3573_v53 = vpack.c.bf16 %v565_v45, %v565_v45  ;;  %v1082_v39 = vsel %vm4431_vm4, %v889_v52, %v1081_v51  ;;  %v3674_v36 = vunpack.c.l.bf16 %v3693_v40 }
 0x124   : > { %2193 = vrot.lane.b32.xlu1 %v5195_v26, %s4155_s13  ;;  %2191 = vrot.lane.b32.xlu0 %v5100_v57, %s4155_s13  ;;  %v1537_v57 = vshrl.u32 %v5219_v7, 16  ;;  %v5253_v6 = vpop.permute.xlu1 %2216  ;;  %v1543_v23 = vshll.u32 %v5283_v61, 16  ;;  %v1548_v17 = vshrl.u32 %v5285_v12, 16  ;;  %v1551_v5 = vshll.u32 %v5285_v12, 16  ;;  %1083 = vst [vmem:[#allocation2 + $0xa4] sm:$0x1] %v1082_v39 }
 0x125   : > { %v1561_v4 = vshrl.u32 %v5297_v24, 16  ;;  %v1557_v44 = vshll.u32 %v5297_v24, 16  ;;  %v5309_v9 = vld [vmem:[#allocation2 + $0x4] sm:$0xf]  ;;  %v5311_v18 = vld [vmem:[#allocation2] sm:$0xf]  ;;  %v3675_v8 = vunpack.c.h.bf16 %v3693_v40  ;;  %v5326_v54 = vcombine.low %v5206_v30, %v5219_v7 }
 0x126   : > { %v5255_v35 = vpop.permute.xlu0 %2113  ;;  %v1539_v21 = vrot.slane %v1537_v57, 4  ;;  %v1790_v60 = vrot.slane %v5219_v7, 5  ;;  %v891_v49 = vshrl.u32 %v3573_v53, 16  ;;  %v1531_v50 = vrot.slane %v1530_v28, 4  ;;  %v5329_v51 = vld [vmem:[#allocation2 + $0x8c] sm:$0x1] }
 0x127   : > { %v1545_v0 = vrot.slane %v1543_v23, 5  ;;  %v894_v33 = vshll.u32 %v3573_v53, 16  ;;  %v3424_v52 = vrot.slane %v5206_v30, 9  ;;  %v5331_v40 = vrot.slane %v1557_v44, 5 }
 0x128   : > { %2228 = vrot.lane.b32.xlu1 %v5210_v56, %s4153_s30  ;;  %2226 = vrot.lane.b32.xlu0 %v5157_v63, %s4153_s30  ;;  %v1540_v20 = vor.u32 %v1539_v21, %v5277_v37  ;;  %v1550_v21 = vrot.slane %v1548_v17, 4  ;;  %v1563_v28 = vrot.slane %v1561_v4, 4  ;;  %v1792_v7 = vrot.slane %v1790_v60, 4  ;;  %v1084_v4 = vld [vmem:[#allocation2 + $0xa8] sm:$0xf] }
 0x129   : > { %v1793_v23 = vrot.slane %v5283_v61, 5  ;;  %v530_v53 = vmul.f32 %v4958_v47, %v3675_v8  ;;  %v1536_v30 = vsel %vm4602_vm14, %v1531_v50, %v5277_v37  ;;  %v1567_v61 = vshll.u32 %v5329_v51, 16 }
 0x12a   : > { %v5293_v16 = vpop.permute.xlu0 %1994  ;;  %v1541_v13 = vrot.slane %v1540_v20, 4  ;;  %v529_v20 = vmul.f32 %v4958_v47, %v3674_v36  ;;  %v1564_v8 = vor.u32 %v1563_v28, %v5331_v40  ;;  %vm2563_vm12 = vcmask 523264  }
 0x12b   : > { %vm2632_vm13 = vcmask 588800  }
 0x12c   : > { %2263 = vrot.lane.b32.xlu1 %v5215_v48, %s4158_s29  ;;  %2261 = vrot.lane.b32.xlu0 %v5177_v55, %s4158_s29  ;;  %v5289_v57 = vpop.permute.xlu1 %2115  ;;  %v1546_v17 = vsel %vm4602_vm14, %v1541_v13, %v1545_v0  ;;  %v567_v37 = vadd.f32 %v4976_v25, %v529_v20  ;;  %v1088_v0 = vld [vmem:[#allocation2 + $0xb0] sm:$0x1] }
 0x12d   : > { %v5356_v50 = vcombine.low %v1536_v30, %v1546_v17  ;;  %v5369_v30 = vrot.slane %v1567_v61, 5 }
 0x12e   : > { %v3575_v17 = vpack.c.bf16 %v567_v37, %v567_v37 }
 0x130   : > { %2010 = vrot.lane.b32.xlu1 %v5177_v55, %s4154_s11  ;;  %2296 = vrot.lane.b32.xlu0 %v5195_v26, %s4156_s27  ;;  %v566_v55 = vadd.f32 %v4976_v25, %v528_v46  ;;  %v1553_v46 = vrot.slane %v1551_v5, 5  ;;  %v911_v61 = vshll.u32 %v3575_v17, 16 }
 0x132   : > { %v3574_v22 = vpack.c.bf16 %v566_v55, %v566_v55  ;;  %v893_v55 = vrot.slane %v891_v49, 7  ;;  %v1554_v36 = vor.u32 %v1553_v46, %v1550_v21  ;;  %v1791_v21 = vsel %vm4512_vm11, %v3424_v52, %v1790_v60 }
 0x133   : > { %v1794_v46 = vsel %vm4512_vm11, %v1792_v7, %v1793_v23  ;;  %v5376_v52 = vrot.slane %v1564_v8, 4  ;;  %v368_v23 = vld [vmem:[#allocation2 + $0xcc] sm:$0x1]  ;;  %v5391_v8 = vcombine.low %v5285_v12, %v5297_v24 }
 0x134   : > { %2012 = vrot.lane.b32.xlu1 %v5215_v48, %s4154_s11  ;;  %2298 = vrot.lane.b32.xlu0 %v5295_v59, %s4156_s27  ;;  %v899_v5 = vshrl.u32 %v3574_v22, 16  ;;  %v902_v39 = vshll.u32 %v3574_v22, 16  ;;  %v896_v49 = vor.u32 %v894_v33, %v893_v55  ;;  %v897_v15 = vrot.slane %v893_v55, 4 }
 0x135   : > { %v568_v22 = vadd.f32 %v4976_v25, %v530_v53  ;;  %v421_v53 = vld [vmem:[#allocation2 + $0xc8] sm:$0x1]  ;;  %v5374_v60 = vrot.slane %v1554_v36, 4  ;;  %v908_v36 = vshrl.u32 %v3575_v17, 16 }
 0x136   : > { %v5320_v11 = vpop.permute.xlu1 %2076  ;;  %v5322_v45 = vpop.permute.xlu0 %2179  ;;  %v901_v63 = vrot.slane %v899_v5, 7  ;;  %v1085_v13 = vsel %vm4470_vm7, %v896_v49, %v1084_v4  ;;  %v5372_v4 = vld [vmem:[%s4414_s18 + $0x78] sm:$0xff]   ;;  %s4020_s18 = scalar_lea.vmem %s6058_s14, 2048 }
 0x137   : > { %1086 = vst [vmem:[#allocation2 + $0xa8] sm:$0xf] %v1085_v13  ;;  %v3576_v5 = vpack.c.bf16 %v568_v22, %v568_v22  ;;  %v3678_v13 = vunpack.c.l.bf16 %v5372_v4  ;;  %p4021_p13 = scmp.ne.s32.totalorder %s6058_s14, %s4020_s18 }
 0x138   : > { %2092 = vrot.lane.b32.xlu1 %v5295_v59, %s4151_s26  ;;  %2090 = vrot.lane.b32.xlu0 %v5195_v26, %s4151_s26  ;;  %v904_v33 = vor.u32 %v902_v39, %v901_v63  ;;  %v906_v28 = vrot.slane %v901_v63, 4  ;;  %v5386_v39 = vcombine.low %v1791_v21, %v1794_v46 }
 0x139   : > { %v916_v49 = vshrl.u32 %v3576_v5, 16  ;;  %v919_v37 = vshll.u32 %v3576_v5, 16  ;;  %v369_v5 = vsel %vm4431_vm4, 0, %v368_v23  ;;  %p4022_p6 = pnand %p4021_p13, %p4347_p10 }
 0x13a   : > { %v5345_v44 = vpop.permute.xlu1 %2181  ;;  %v5347_v26 = vpop.permute.xlu0 %2284  ;;  %v905_v63 = vsel %vm4492_vm10, %v897_v15, %v904_v33  ;;  %v1089_v7 = vsel %vm4431_vm4, %v906_v28, %v1088_v0  ;;  %v424_v15 = vld [vmem:[#allocation2 + $0xd4] sm:$0x1]  ;;  %v6190_v0 = vcombine.low %v5311_v18, %v5309_v9  ;;  %v5403_v33 = vld [vmem:[#allocation2 + $0x90] sm:$0xf]  ;;  %v910_v28 = vrot.slane %v908_v36, 7 }
 0x13b   : > { %1087 = vst.msk [vmem:[#allocation2 + $0xac] sm:$0xf] %vm990_vm0, %v905_v63  ;;  %1090 = vst [vmem:[#allocation2 + $0xb0] sm:$0x1] %v1089_v7  ;;  %v918_v17 = vrot.slane %v916_v49, 7  ;;  %v1797_v9 = vrot.slane %v5297_v24, 5  ;;  %v531_v49 = vmul.f32 %v4958_v47, %v3678_v13  ;;  %p4023_p3 = pneg %p4022_p6 }
 0x13c   : > { %2127 = vrot.lane.b32.xlu1 %v5326_v54, %s4152_s28  ;;  %2125 = vrot.lane.b32.xlu0 %v5210_v56, %s4152_s28  ;;  %v2319_v22 = vsel %vm2316_vm1, %v6190_v0, %v5293_v16  ;;  %v1570_v16 = vsel %vm4602_vm14, %v5376_v52, %v5369_v30  ;;  %v1091_v18 = vld [vmem:[#allocation2 + $0xb4] sm:$0xf]  ;;  %v1095_v63 = vld [vmem:[#allocation2 + $0xbc] sm:$0x1]  ;;  %370 = vst [vmem:[#allocation2 + $0xcc] sm:$0x1] %v369_v5  ;;  %v3679_v0 = vunpack.c.h.bf16 %v5372_v4 }
 0x13d   : > { %v425_v7 = vsel %vm4436_vm5, 0, %v424_v15  ;;  %v914_v23 = vrot.slane %v910_v28, 4  ;;  %v921_v36 = vor.u32 %v919_v37, %v918_v17  ;;  %v923_v30 = vrot.slane %v918_v17, 4 }
 0x13e   : > { %v5365_v20 = vpop.permute.xlu1 %2080  ;;  %v5367_v55 = vpop.permute.xlu0 %2286  ;;  %426 = vst [vmem:[#allocation2 + $0xd4] sm:$0x1] %v425_v7  ;;  %v2367_v24 = vsel %vm2365_vm2, %v2319_v22, %v5189_v19  ;;  %v1572_v52 = vshrl.u32 %v5403_v33, 16  ;;  %v1575_v2 = vshll.u32 %v5403_v33, 16  ;;  %v1800_v17 = vrot.slane %v5329_v51, 5 }
 0x13f   : > { %v1096_v37 = vsel %vm4431_vm4, %v923_v30, %v1095_v63  ;;  %v1799_v63 = vrot.slane %v1797_v9, 4  ;;  %v569_v7 = vadd.f32 %v4976_v25, %v531_v49 }
 0x140   : > { %2162 = vrot.lane.b32.xlu1 %v5356_v50, %s4157_s10  ;;  %2160 = vrot.lane.b32.xlu0 %v5215_v48, %s4157_s10  ;;  %v422_v48 = vsel %vm4436_vm5, 0, %v421_v53  ;;  %v1560_v53 = vsel %vm4602_vm14, %v5374_v60, %v5331_v40  ;;  %v5422_v40 = vld [vmem:[#allocation2 + $0x94] sm:$0xf]  ;;  %v913_v60 = vor.u32 %v911_v61, %v910_v28  ;;  %vm2530_vm5 = vcmask 457728   ;;  %1097 = vst [vmem:[#allocation2 + $0xbc] sm:$0x1] %v1096_v37 }
 0x141   : > { %423 = vst [vmem:[#allocation2 + $0xc8] sm:$0x1] %v422_v48  ;;  %v1585_v22 = vshrl.u32 %v5422_v40, 16  ;;  %v1581_v13 = vshll.u32 %v5422_v40, 16  ;;  %v5447_v4 = vcombine.low %v1560_v53, %v1570_v16  ;;  %v1574_v53 = vrot.slane %v1572_v52, 4 }
 0x142   : > { %v2147_v21 = vpop.permute.xlu1 %2146  ;;  %v5401_v46 = vpop.permute.xlu0 %2078  ;;  %v1092_v61 = vsel %vm4470_vm7, %v913_v60, %v1091_v18  ;;  %v2400_v18 = vsel %vm2398_vm3, %v2367_v24, %v5191_v42  ;;  %v1577_v16 = vrot.slane %v1575_v2, 5  ;;  %v1801_v52 = vsel %vm4512_vm11, %v1799_v63, %v1800_v17 }
 0x143   : > { %1093 = vst [vmem:[#allocation2 + $0xb4] sm:$0xf] %v1092_v61  ;;  %v5465_v42 = vrot.slane %v1581_v13, 5  ;;  %v1587_v30 = vrot.slane %v1585_v22, 4  ;;  %v3577_v2 = vpack.c.bf16 %v569_v7, %v569_v7 }
 0x144   : > { %2197 = vrot.lane.b32.xlu1 %v5386_v39, %s4155_s13  ;;  %2195 = vrot.lane.b32.xlu0 %v5295_v59, %s4155_s13  ;;  %v922_v59 = vsel %vm4492_vm10, %v914_v23, %v921_v36  ;;  %v5463_v36 = vld [vmem:[#allocation2 + $0x98] sm:$0x1]  ;;  %v1578_v37 = vor.u32 %v1577_v16, %v1574_v53 }
 0x145   : > { %1094 = vst.msk [vmem:[#allocation2 + $0xb8] sm:$0xf] %vm990_vm0, %v922_v59  ;;  %v1591_v59 = vshll.u32 %v5463_v36, 16  ;;  %v925_v22 = vshrl.u32 %v3577_v2, 16  ;;  %v928_v53 = vshll.u32 %v3577_v2, 16 }
 0x146   : > { %v2252_v15 = vpop.permute.xlu1 %2251  ;;  %v1997_v48 = vpop.permute.xlu0 %1996  ;;  %v1579_v17 = vrot.slane %v1578_v37, 4  ;;  %v1098_v2 = vld [vmem:[#allocation2 + $0xc0] sm:$0xf] }
 0x147   : > { %v2322_v19 = vsel %vm2316_vm1, %v4551_v58, %v1997_v48  ;;  %v3425_v58 = vrot.slane %v5285_v12, 9  ;;  %v532_v12 = vmul.f32 %v4958_v47, %v3679_v0 }
 0x148   : > { %2232 = vrot.lane.b32.xlu1 %v5391_v8, %s4153_s30  ;;  %v2369_v28 = vsel %vm2365_vm2, %v2322_v19, %v5320_v11  ;;  %2230 = vrot.lane.b32.xlu0 %v5326_v54, %s4153_s30  ;;  %v5499_v19 = vld [vmem:[#allocation2 + $0xa0] sm:$0xf] }
 0x149   : > { %v2402_v5 = vsel %vm2398_vm3, %v2369_v28, %v5226_v14  ;;  %v1798_v24 = vsel %vm4512_vm11, %v3425_v58, %v1797_v9  ;;  %v570_v61 = vadd.f32 %v4976_v25, %v532_v12  ;;  %v1593_v28 = vrot.slane %v1591_v59, 5 }
 0x14a   : > { %v2435_v11 = vsel %vm2431_vm6, %v2402_v5, %v2147_v21  ;;  %v5457_v60 = vpop.permute.xlu1 %1998  ;;  %v2145_v23 = vpop.permute.xlu0 %2144  ;;  %v5492_v0 = vcombine.low %v1798_v24, %v1801_v52  ;;  %v1605_v7 = vshll.u32 %v5499_v19, 16 }
 0x14b   : > { %v2433_v51 = vsel %vm2431_vm6, %v2400_v18, %v2145_v23  ;;  %v2468_v14 = vsel %vm2464_vm8, %v2435_v11, %v5345_v44  ;;  %v3578_v58 = vpack.c.bf16 %v570_v61, %v570_v61  ;;  %v5517_v11 = vcombine.low %v5403_v33, %v5422_v40 }
 0x14c   : > { %2267 = vrot.lane.b32.xlu1 %v5447_v4, %s4158_s29  ;;  %v2466_v21 = vsel %vm2464_vm8, %v2433_v51, %v5322_v45  ;;  %2265 = vrot.lane.b32.xlu0 %v5356_v50, %s4158_s29  ;;  %v2501_v47 = vsel %vm2497_vm9, %v2468_v14, %v5253_v6  ;;  %v927_v23 = vrot.slane %v925_v22, 7  ;;  %v3426_v51 = vrot.slane %v5403_v33, 9 }
 0x14d   : > { %v2499_v44 = vsel %vm2497_vm9, %v2466_v21, %v5228_v38  ;;  %v2534_v45 = vsel %vm2530_vm5, %v2501_v47, %v2252_v15  ;;  %v1588_v38 = vor.u32 %v1587_v30, %v5465_v42  ;;  %v5494_v15 = vld [vmem:[#allocation2 + $0x9c] sm:$0xf]  ;;  %v1807_v30 = vrot.slane %v5463_v36, 5  ;;  %v1169_v47 = vld [vmem:[#allocation2 + $0xcc] sm:$0xf] }
 0x14e   : > { %v2001_v49 = vpop.permute.xlu1 %2000  ;;  %v2250_v48 = vpop.permute.xlu0 %2249  ;;  %v2567_v25 = vsel %vm2563_vm12, %v2534_v45, %v5367_v55  ;;  %v1596_v18 = vshrl.u32 %v5494_v15, 16  ;;  %v1599_v63 = vshll.u32 %v5494_v15, 16  ;;  %v1609_v55 = vshrl.u32 %v5499_v19, 16 }
 0x14f   : > { %v2532_v6 = vsel %vm2530_vm5, %v2499_v44, %v2250_v48  ;;  %v1589_v5 = vrot.slane %v1588_v38, 4  ;;  %v933_v21 = vshrl.u32 %v3578_v58, 16  ;;  %v1584_v44 = vsel %vm4602_vm14, %v1579_v17, %v5465_v42  ;;  %v1173_v48 = vld [vmem:[#allocation2 + $0xd4] sm:$0x1] }
 0x150   : > { %2014 = vrot.lane.b32.xlu1 %v5356_v50, %s4154_s11  ;;  %2300 = vrot.lane.b32.xlu0 %v5386_v39, %s4156_s27  ;;  %v2565_v9 = vsel %vm2563_vm12, %v2532_v6, %v5347_v26  ;;  %v1804_v26 = vrot.slane %v5422_v40, 5  ;;  %v1598_v24 = vrot.slane %v1596_v18, 4  ;;  %v1601_v52 = vrot.slane %v1599_v63, 5 }
 0x151   : > { %3726 = vmatprep.mubr.msk.bf16.mxu0 %vm2632_vm13, %v2565_v9  ;;  %v1594_v40 = vsel %vm4602_vm14, %v1589_v5, %v1593_v28  ;;  %v2325_v33 = vsel %vm2316_vm1, %v4565_v10, %v5457_v60  ;;  %v5535_v36 = vrot.slane %v1605_v7, 5  ;;  %v1611_v42 = vrot.slane %v1609_v55, 4  ;;  %v5541_v9 = vld [vmem:[#allocation2 + $0xa4] sm:$0x1] }
 0x152   : > { %v5501_v13 = vpop.permute.xlu1 %2150  ;;  %3727 = vmatmul.mubr.msk.bf16.vlgmr.msra.gmra.mrb[0].mxu0 %vm2632_vm13, %v2567_v25  ;;  %v5504_v50 = vpop.permute.xlu0 %2148  ;;  %v1806_v14 = vrot.slane %v1804_v26, 4  ;;  %v930_v45 = vor.u32 %v928_v53, %v927_v23  ;;  %v931_v59 = vrot.slane %v927_v23, 4  ;;  %v935_v61 = vrot.slane %v933_v21, 7 }
 0x153   : > { %v936_v6 = vshll.u32 %v3578_v58, 16  ;;  %v1170_v37 = vsel %vm4470_vm7, 0, %v1169_v47  ;;  %v2328_v38 = vsel %vm2316_vm1, %v4596_v41, %v2001_v49  ;;  %v1174_v25 = vsel %vm4431_vm4, 0, %v1173_v48  ;;  %v1102_v41 = vld [vmem:[#allocation2 + $0xc8] sm:$0x1] }
 0x154   : > { %2016 = vrot.lane.b32.xlu1 %v5447_v4, %s4154_s11  ;;  %2302 = vrot.lane.b32.xlu0 %v5492_v0, %s4156_s27  ;;  %1171 = vst [vmem:[#allocation2 + $0xcc] sm:$0xf] %v1170_v37  ;;  %v2371_v22 = vsel %vm2365_vm2, %v2325_v33, %v5401_v46  ;;  %v1805_v28 = vsel %vm4512_vm11, %v3426_v51, %v1804_v26  ;;  %1175 = vst [vmem:[#allocation2 + $0xd4] sm:$0x1] %v1174_v25  ;;  %v940_v46 = vrot.slane %v935_v61, 4 }
 0x155   : > { %v938_v58 = vor.u32 %v936_v6, %v935_v61  ;;  %v5555_v34 = vcombine.low %v1584_v44, %v1594_v40  ;;  %v1808_v49 = vsel %vm4512_vm11, %v1806_v14, %v1807_v30  ;;  %v1602_v17 = vor.u32 %v1601_v52, %v1598_v24 }
 0x156   : > { %v5519_v16 = vpop.permute.xlu1 %2185  ;;  %v2184_v12 = vpop.permute.xlu0 %2183  ;;  %v2373_v26 = vsel %vm2365_vm2, %v2328_v38, %v5365_v20  ;;  %v1612_v5 = vor.u32 %v1611_v42, %v5535_v36  ;;  %v1615_v18 = vshll.u32 %v5541_v9, 16  ;;  %v2404_v55 = vsel %vm2398_vm3, %v2371_v22, %v5255_v35  ;;  %v5611_v42 = vld [vmem:[#allocation2 + $0xac] sm:$0xf] }
 0x157   : > { %v939_v63 = vsel %vm4492_vm10, %v931_v59, %v938_v58  ;;  %v1103_v53 = vsel %vm4431_vm4, %v940_v46, %v1102_v41  ;;  %v2437_v20 = vsel %vm2431_vm6, %v2404_v55, %v5504_v50  ;;  %v2406_v51 = vsel %vm2398_vm3, %v2373_v26, %v5289_v57 }
 0x158   : > { %2096 = vrot.lane.b32.xlu1 %v5492_v0, %s4151_s26  ;;  %2094 = vrot.lane.b32.xlu0 %v5386_v39, %s4151_s26  ;;  %v1099_v39 = vsel %vm4470_vm7, %v930_v45, %v1098_v2  ;;  %1101 = vst.msk [vmem:[#allocation2 + $0xc4] sm:$0xf] %vm990_vm0, %v939_v63  ;;  %1104 = vst [vmem:[#allocation2 + $0xc8] sm:$0x1] %v1103_v53  ;;  %v2470_v3 = vsel %vm2464_vm8, %v2437_v20, %v2184_v12  ;;  %v1603_v14 = vrot.slane %v1602_v17, 4  ;;  %vm2958_vm0 = vcmask 519168  }
 0x159   : > { %1100 = vst [vmem:[#allocation2 + $0xc0] sm:$0xf] %v1099_v39  ;;  %v5579_v35 = vcombine.low %v1805_v28, %v1808_v49  ;;  %v1613_v30 = vrot.slane %v1612_v5, 4  ;;  %v1617_v21 = vrot.slane %v1615_v18, 5  ;;  %v2439_v12 = vsel %vm2431_vm6, %v2406_v51, %v5501_v13  ;;  %v5606_v2 = vld [vmem:[#allocation2 + $0xa8] sm:$0xf] }
 0x15a   : > { %v2221_v10 = vpop.permute.xlu1 %2220  ;;  %v2219_v60 = vpop.permute.xlu0 %2218  ;;  %v5596_v40 = vcombine.low %v5494_v15, %v5499_v19  ;;  %v1608_v13 = vsel %vm4602_vm14, %v1603_v14, %v5535_v36  ;;  %v1811_v52 = vrot.slane %v5499_v19, 5  ;;  %v3427_v19 = vrot.slane %v5494_v15, 9  ;;  %v1270_v17 = vld [vmem:[#allocation2 + $0xb0] sm:$0x1]  ;;  %v5645_v63 = vld [vmem:[#allocation2 + $0xb4] sm:$0xf] }
 0x15b   : > { %v2503_v1 = vsel %vm2497_vm9, %v2470_v3, %v2219_v60  ;;  %v1620_v59 = vshrl.u32 %v5606_v2, 16  ;;  %v1623_v61 = vshll.u32 %v5606_v2, 16  ;;  %v1814_v37 = vrot.slane %v5541_v9, 5 }
 0x15c   : > { %2131 = vrot.lane.b32.xlu1 %v5517_v11, %s4152_s28  ;;  %2129 = vrot.lane.b32.xlu0 %v5391_v8, %s4152_s28  ;;  %v1813_v6 = vrot.slane %v1811_v52, 4  ;;  %v1633_v38 = vshrl.u32 %v5611_v42, 16  ;;  %v1812_v22 = vsel %vm4512_vm11, %v3427_v19, %v1811_v52  ;;  %v1639_v18 = vshll.u32 %v1270_v17, 16 }
 0x15d   : > { %v1622_v15 = vrot.slane %v1620_v59, 4  ;;  %v1625_v25 = vrot.slane %v1623_v61, 5  ;;  %v1818_v53 = vrot.slane %v5611_v42, 5  ;;  %v1644_v20 = vshrl.u32 %v5645_v63, 16 }
 0x15e   : > { %v2256_v7 = vpop.permute.xlu1 %2255  ;;  %v2254_v23 = vpop.permute.xlu0 %2253  ;;  %v1815_v9 = vsel %vm4512_vm11, %v1813_v6, %v1814_v37  ;;  %v1635_v58 = vrot.slane %v1633_v38, 4  ;;  %v1647_v51 = vshll.u32 %v5645_v63, 16 }
 0x15f   : > { %v2536_v50 = vsel %vm2530_vm5, %v2503_v1, %v2254_v23  ;;  %v5643_v46 = vcombine.low %v1812_v22, %v1815_v9  ;;  %v1626_v26 = vor.u32 %v1625_v25, %v1622_v15  ;;  %v5647_v23 = vld [vmem:[#allocation2 + $0xb8] sm:$0xf]  ;;  %v1641_v1 = vrot.slane %v1639_v18, 5 }
 0x160   : > { %2166 = vrot.lane.b32.xlu1 %v5555_v34, %s4157_s10  ;;  %2164 = vrot.lane.b32.xlu0 %v5447_v4, %s4157_s10  ;;  %v2472_v4 = vsel %vm2464_vm8, %v2439_v12, %v5519_v16  ;;  %v1618_v16 = vsel %vm4602_vm14, %v1613_v30, %v1617_v21  ;;  %v1657_v14 = vshrl.u32 %v5647_v23, 16  ;;  %v1653_v30 = vshll.u32 %v5647_v23, 16 }
 0x161   : > { %v2505_v24 = vsel %vm2497_vm9, %v2472_v4, %v2221_v10  ;;  %v5618_v36 = vcombine.low %v1608_v13, %v1618_v16  ;;  %v1629_v10 = vshll.u32 %v5611_v42, 16  ;;  %v3428_v12 = vrot.slane %v5606_v2, 9 }
 0x162   : > { %v5583_v47 = vpop.permute.xlu1 %2002  ;;  %v2289_v57 = vpop.permute.xlu0 %2288  ;;  %v1821_v4 = vrot.slane %v1270_v17, 5  ;;  %v1649_v13 = vrot.slane %v1647_v51, 5  ;;  %v1820_v52 = vrot.slane %v1818_v53, 4 }
 0x163   : > { %v2569_v44 = vsel %vm2563_vm12, %v2536_v50, %v2289_v57  ;;  %v1631_v28 = vrot.slane %v1629_v10, 5  ;;  %v5660_v57 = vcombine.low %v5606_v2, %v5611_v42  ;;  %v1819_v19 = vsel %vm4512_vm11, %v3428_v12, %v1818_v53 }
 0x164   : > { %2201 = vrot.lane.b32.xlu1 %v5579_v35, %s4155_s13  ;;  %2199 = vrot.lane.b32.xlu0 %v5492_v0, %s4155_s13  ;;  %v2538_v0 = vsel %vm2530_vm5, %v2505_v24, %v2256_v7  ;;  %v1646_v24 = vrot.slane %v1644_v20, 4  ;;  %v1822_v37 = vsel %vm4512_vm11, %v1820_v52, %v1821_v4 }
 0x165   : > { %3730 = vmatprep.mubr.msk.bf16.mxu0 %vm2632_vm13, %v2569_v44  ;;  %v1636_v5 = vor.u32 %v1635_v58, %v1631_v28 }
 0x166   : > { %v5609_v48 = vpop.permute.xlu1 %2004  ;;  %v2291_v33 = vpop.permute.xlu0 %2290  ;;  %v1650_v61 = vor.u32 %v1649_v13, %v1646_v24 }
 0x167   : > { %v2571_v45 = vsel %vm2563_vm12, %v2538_v0, %v2291_v33  ;;  %v1637_v3 = vrot.slane %v1636_v5, 4  ;;  %v1655_v0 = vrot.slane %v1653_v30, 5  ;;  %v1659_v33 = vrot.slane %v1657_v14, 4  ;;  %v5731_v14 = vld [vmem:[#allocation2 + $0xc4] sm:$0xf] }
 0x168   : > { %2236 = vrot.lane.b32.xlu1 %v5596_v40, %s4153_s30  ;;  %2234 = vrot.lane.b32.xlu0 %v5517_v11, %s4153_s30  ;;  %v1844_v24 = vshrl.u32 %v5731_v14, 16  ;;  %v1840_v13 = vshll.u32 %v5731_v14, 16 }
 0x169   : > { %3731 = vmatmul.mubr.msk.bf16.gmra.mrb[4].mxu0 %vm2632_vm13, %v2571_v45  ;;  %v1642_v16 = vsel %vm4602_vm14, %v1637_v3, %v1641_v1  ;;  %v5671_v45 = vld [vmem:[#allocation2 + $0xbc] sm:$0x1]  ;;  %v1660_v38 = vor.u32 %v1659_v33, %v1655_v0  ;;  %v5729_v1 = vld [vmem:[#allocation2 + $0xc0] sm:$0xf] }
 0x16a   : > { %v5627_v60 = vpop.permute.xlu1 %2084  ;;  %v2083_v39 = vpop.permute.xlu0 %2082  ;;  %v1663_v10 = vshll.u32 %v5671_v45, 16  ;;  %v1828_v12 = vrot.slane %v5671_v45, 5  ;;  %v1834_v4 = vshll.u32 %v5729_v1, 16  ;;  %v1846_v45 = vrot.slane %v1844_v24, 4 }
 0x16b   : > { %v1661_v58 = vrot.slane %v1660_v38, 4 }
 0x16c   : > { %2271 = vrot.lane.b32.xlu1 %v5618_v36, %s4158_s29  ;;  %2269 = vrot.lane.b32.xlu0 %v5555_v34, %s4158_s29 }
 0x16e   : > { %v5637_v41 = vpop.permute.xlu1 %2119  ;;  %v2118_v49 = vpop.permute.xlu0 %2117 }
 0x170   : > { %2018 = vrot.lane.b32.xlu1 %v5555_v34, %s4154_s11  ;;  %2304 = vrot.lane.b32.xlu0 %v5579_v35, %s4156_s27  ;;  %v1627_v34 = vrot.slane %v1626_v26, 4 }
 0x172   : > { %v2155_v55 = vpop.permute.xlu1 %2154  ;;  %v2153_v7 = vpop.permute.xlu0 %2152  ;;  %v1632_v44 = vsel %vm4602_vm14, %v1627_v34, %v1631_v28  ;;  %v1651_v28 = vrot.slane %v1650_v61, 4  ;;  %v1276_v61 = vld [vmem:[#allocation2 + $0xc8] sm:$0x1] }
 0x173   : > { %v5682_v59 = vcombine.low %v1632_v44, %v1642_v16  ;;  %v1831_v44 = vshrl.u32 %v5729_v1, 16 }
 0x174   : > { %2020 = vrot.lane.b32.xlu1 %v5618_v36, %s4154_s11  ;;  %2306 = vrot.lane.b32.xlu0 %v5643_v46, %s4156_s27 }
 0x175   : > { %v1833_v33 = vrot.slane %v1831_v44, 4 }
 0x176   : > { %v2190_v21 = vpop.permute.xlu1 %2189  ;;  %v2188_v50 = vpop.permute.xlu0 %2187 }
 0x178   : > { %2100 = vrot.lane.b32.xlu1 %v5643_v46, %s4151_s26  ;;  %2098 = vrot.lane.b32.xlu0 %v5579_v35, %s4151_s26  ;;  %v2331_v35 = vsel %vm2316_vm1, %v4649_v62, %v5583_v47  ;;  %v2334_v62 = vsel %vm2316_vm1, %v4922_v32, %v5609_v48 }
 0x179   : > { %v2375_v6 = vsel %vm2365_vm2, %v2331_v35, %v2083_v39  ;;  %v5698_v39 = vcombine.low %v1819_v19, %v1822_v37  ;;  %v2377_v32 = vsel %vm2365_vm2, %v2334_v62, %v5627_v60  ;;  %v5717_v60 = vcombine.low %v5645_v63, %v5647_v23  ;;  %v5765_v37 = vld [vmem:[#allocation2 + $0xd0] sm:$0xf] }
 0x17a   : > { %v2225_v42 = vpop.permute.xlu1 %2224  ;;  %v2223_v2 = vpop.permute.xlu0 %2222  ;;  %v2408_v47 = vsel %vm2398_vm3, %v2375_v6, %v2118_v49  ;;  %v1665_v49 = vrot.slane %v1663_v10, 5  ;;  %v2410_v17 = vsel %vm2398_vm3, %v2377_v32, %v5637_v41  ;;  %v1825_v41 = vrot.slane %v5647_v23, 5 }
 0x17b   : > { %v2441_v22 = vsel %vm2431_vm6, %v2408_v47, %v2153_v7  ;;  %v1850_v62 = vshll.u32 %v1276_v61, 16  ;;  %v5767_v47 = vld [vmem:[#allocation2 + $0xcc] sm:$0xf] }
 0x17c   : > { %2135 = vrot.lane.b32.xlu1 %v5660_v57, %s4152_s28  ;;  %2133 = vrot.lane.b32.xlu0 %v5596_v40, %s4152_s28  ;;  %v2474_v9 = vsel %vm2464_vm8, %v2441_v22, %v2188_v50  ;;  %v1666_v20 = vsel %vm4602_vm14, %v1661_v58, %v1665_v49  ;;  %v1827_v50 = vrot.slane %v1825_v41, 4  ;;  %v1878_v22 = vshrl.u32 %v5765_v37, 16 }
 0x17d   : > { %v2507_v48 = vsel %vm2497_vm9, %v2474_v9, %v2223_v2  ;;  %v1842_v2 = vrot.slane %v1840_v13, 5  ;;  %v1874_v9 = vshll.u32 %v5765_v37, 16  ;;  %v1852_v58 = vrot.slane %v1850_v62, 5 }
 0x17e   : > { %v2260_v15 = vpop.permute.xlu1 %2259  ;;  %v2258_v25 = vpop.permute.xlu0 %2257  ;;  %v1859_v49 = vrot.slane %v5731_v14, 5 }
 0x17f   : > { %v2540_v26 = vsel %vm2530_vm5, %v2507_v48, %v2258_v25  ;;  %v1847_v10 = vor.u32 %v1846_v45, %v1842_v2  ;;  %v1893_v45 = vrot.slane %v5765_v37, 5 }
 0x180   : > { %2170 = vrot.lane.b32.xlu1 %v5682_v59, %s4157_s10  ;;  %2168 = vrot.lane.b32.xlu0 %v5618_v36, %s4157_s10  ;;  %v2443_v36 = vsel %vm2431_vm6, %v2410_v17, %v2155_v55  ;;  %v1656_v55 = vsel %vm4602_vm14, %v1651_v28, %v1655_v0  ;;  %v1829_v0 = vsel %vm4512_vm11, %v1827_v50, %v1828_v12  ;;  %v1868_v28 = vshll.u32 %v5767_v47, 16 }
 0x181   : > { %v2476_v34 = vsel %vm2464_vm8, %v2443_v36, %v2190_v21  ;;  %v5738_v30 = vcombine.low %v1656_v55, %v1666_v20  ;;  %v3429_v21 = vrot.slane %v5645_v63, 9  ;;  %v1848_v48 = vrot.slane %v1847_v10, 4 }
 0x182   : > { %v5706_v5 = vpop.permute.xlu1 %2006  ;;  %v2293_v18 = vpop.permute.xlu0 %2292  ;;  %v2509_v53 = vsel %vm2497_vm9, %v2476_v34, %v2225_v42  ;;  %v1836_v42 = vrot.slane %v1834_v4, 5  ;;  %v1880_v36 = vrot.slane %v1878_v22, 4  ;;  %v3430_v34 = vrot.slane %v5729_v1, 9 }
 0x183   : > { %v2573_v7 = vsel %vm2563_vm12, %v2540_v26, %v2293_v18  ;;  %v2542_v51 = vsel %vm2530_vm5, %v2509_v53, %v2260_v15  ;;  %v1826_v63 = vsel %vm4512_vm11, %v3429_v21, %v1825_v41  ;;  %v5778_v18 = vrot.slane %v1874_v9, 5 }
 0x184   : > { %2205 = vrot.lane.b32.xlu1 %v5698_v39, %s4155_s13  ;;  %2203 = vrot.lane.b32.xlu0 %v5643_v46, %s4155_s13  ;;  %v5763_v6 = vcombine.low %v1826_v63, %v1829_v0  ;;  %v1837_v38 = vor.u32 %v1836_v42, %v1833_v33  ;;  %v1870_v53 = vrot.slane %v1868_v28, 5  ;;  %v1853_v20 = vsel %vm4602_vm14, %v1848_v48, %v1852_v58 }
 0x185   : > { %3734 = vmatprep.mubr.msk.bf16.mxu0 %vm2632_vm13, %v2573_v7  ;;  %v3480_v7 = vcombine.low %v5729_v1, %v5731_v14  ;;  %v1881_v14 = vor.u32 %v1880_v36, %v5778_v18  ;;  %v1860_v4 = vsel %vm4512_vm11, %v3430_v34, %v1859_v49 }
 0x186   : > { %v5727_v3 = vpop.permute.xlu1 %2008  ;;  %v2295_v46 = vpop.permute.xlu0 %2294  ;;  %v1838_v32 = vrot.slane %v1837_v38, 4 }
 0x187   : > { %v2575_v23 = vsel %vm2563_vm12, %v2542_v51, %v2295_v46  ;;  %v1861_v51 = vrot.slane %v1859_v49, 4  ;;  %v1862_v46 = vrot.slane %v1276_v61, 5 }
 0x188   : > { %2240 = vrot.lane.b32.xlu1 %v5717_v60, %s4153_s30  ;;  %2238 = vrot.lane.b32.xlu0 %v5660_v57, %s4153_s30  ;;  %v1843_v55 = vsel %vm4602_vm14, %v1838_v32, %v1842_v2  ;;  %v1882_v2 = vrot.slane %v1881_v14, 4 }
 0x189   : > { %3735 = vmatmul.mubr.msk.bf16.gmra.mrb[8].mxu0 %vm2632_vm13, %v2575_v23  ;;  %v1279_v23 = vld [vmem:[#allocation2 + $0xd4] sm:$0x1]  ;;  %v3481_v1 = vcombine.low %v1843_v55, %v1853_v20  ;;  %v1863_v24 = vsel %vm4512_vm11, %v1861_v51, %v1862_v46  ;;  %v6191_v46 = vld [vmem:[#allocation21_spill] sm:$0xff] }
 0x18a   : > { %v5747_v16 = vpop.permute.xlu1 %2088  ;;  %v2087_v52 = vpop.permute.xlu0 %2086  ;;  %v1884_v12 = vshll.u32 %v1279_v23, 16  ;;  %v1896_v48 = vrot.slane %v1279_v23, 5 }
 0x18c   : > { %2275 = vrot.lane.b32.xlu1 %v5738_v30, %s4158_s29  ;;  %2273 = vrot.lane.b32.xlu0 %v5682_v59, %s4158_s29  ;;  %v1886_v61 = vrot.slane %v1884_v12, 5 }
 0x18e   : > { %v5757_v19 = vpop.permute.xlu1 %2123  ;;  %v2122_v35 = vpop.permute.xlu0 %2121  ;;  %v1887_v32 = vsel %vm4602_vm14, %v1882_v2, %v1886_v61 }
 0x190   : > { %2022 = vrot.lane.b32.xlu1 %v5682_v59, %s4154_s11  ;;  %2308 = vrot.lane.b32.xlu0 %v5698_v39, %s4156_s27  ;;  %v1865_v59 = vshrl.u32 %v5767_v47, 16 }
 0x192   : > { %v2159_v15 = vpop.permute.xlu1 %2158  ;;  %v2157_v25 = vpop.permute.xlu0 %2156  ;;  %v1867_v41 = vrot.slane %v1865_v59, 4  ;;  %v1895_v59 = vrot.slane %v1893_v45, 4 }
 0x194   : > { %2024 = vrot.lane.b32.xlu1 %v5738_v30, %s4154_s11  ;;  %2310 = vrot.lane.b32.xlu0 %v5763_v6, %s4156_s27  ;;  %v1871_v13 = vor.u32 %v1870_v53, %v1867_v41  ;;  %v1897_v43 = vsel %vm4512_vm11, %v1895_v59, %v1896_v48 }
 0x196   : > { %v2194_v17 = vpop.permute.xlu1 %2193  ;;  %v2192_v26 = vpop.permute.xlu0 %2191 }
 0x198   : > { %2104 = vrot.lane.b32.xlu1 %v5763_v6, %s4151_s26  ;;  %2102 = vrot.lane.b32.xlu0 %v5698_v39, %s4151_s26  ;;  %v2337_v39 = vsel %vm2316_vm1, %v4993_v31, %v5706_v5  ;;  %v2340_v31 = vsel %vm2316_vm1, %v5063_v29, %v5727_v3  ;;  %s4159_s26 = smov [#allocation11]  }
 0x199   : > { %v2379_v44 = vsel %vm2365_vm2, %v2337_v39, %v2087_v52  ;;  %v3482_v52 = vcombine.low %v1860_v4, %v1863_v24  ;;  %v2381_v29 = vsel %vm2365_vm2, %v2340_v31, %v5747_v16  ;;  %v3483_v16 = vcombine.low %v5767_v47, %v5765_v37 }
 0x19a   : > { %v2229_v21 = vpop.permute.xlu1 %2228  ;;  %v2227_v50 = vpop.permute.xlu0 %2226  ;;  %v2412_v5 = vsel %vm2398_vm3, %v2379_v44, %v2122_v35  ;;  %v1872_v35 = vrot.slane %v1871_v13, 4  ;;  %v2414_v38 = vsel %vm2398_vm3, %v2381_v29, %v5757_v19  ;;  %v3431_v19 = vrot.slane %v5767_v47, 9 }
 0x19b   : > { %v2445_v33 = vsel %vm2431_vm6, %v2412_v5, %v2157_v25 }
 0x19c   : > { %2139 = vrot.lane.b32.xlu1 %v3480_v7, %s4152_s28  ;;  %2137 = vrot.lane.b32.xlu0 %v5717_v60, %s4152_s28  ;;  %v2478_v42 = vsel %vm2464_vm8, %v2445_v33, %v2192_v26  ;;  %s4024_s28 = sshll.u32 %s4159_s26, 4  ;;  %s4025_s28 = int_to_ptr.vmem [resolvable:$false] %s4024_s28 }
 0x19d   : > { %v2511_v3 = vsel %vm2497_vm9, %v2478_v42, %v2227_v50  ;;  %p4027_p5 = scmp.lt.s32.totalorder %s6058_s14, %s4025_s28 }
 0x19e   : > { %v2264_v63 = vpop.permute.xlu1 %2263  ;;  %v2262_v0 = vpop.permute.xlu0 %2261 }
 0x19f   : > { %v2544_v10 = vsel %vm2530_vm5, %v2511_v3, %v2262_v0 }
 0x1a0   : > { %2174 = vrot.lane.b32.xlu1 %v3481_v1, %s4157_s10  ;;  %2172 = vrot.lane.b32.xlu0 %v5738_v30, %s4157_s10  ;;  %v2447_v30 = vsel %vm2431_vm6, %v2414_v38, %v2159_v15  ;;  %v1877_v15 = vsel %vm4602_vm14, %v1872_v35, %v5778_v18 }
 0x1a1   : > { %v2480_v9 = vsel %vm2464_vm8, %v2447_v30, %v2194_v17  ;;  %v3484_v47 = vcombine.low %v1877_v15, %v1887_v32  ;;  %v1894_v17 = vsel %vm4512_vm11, %v3431_v19, %v1893_v45 }
 0x1a2   : > { %v2011_v62 = vpop.permute.xlu1 %2010  ;;  %v2297_v25 = vpop.permute.xlu0 %2296  ;;  %v2513_v28 = vsel %vm2497_vm9, %v2480_v9, %v2229_v21  ;;  %v3485_v36 = vcombine.low %v1894_v17, %v1897_v43 }
 0x1a3   : > { %v2577_v22 = vsel %vm2563_vm12, %v2544_v10, %v2297_v25  ;;  %v2343_v23 = vsel %vm2316_vm1, %v6191_v46, %v2011_v62 }
 0x1a4   : > { %2209 = vrot.lane.b32.xlu1 %v3482_v52, %s4155_s13  ;;  %2207 = vrot.lane.b32.xlu0 %v5763_v6, %s4155_s13  ;;  %v2546_v6 = vsel %vm2530_vm5, %v2513_v28, %v2264_v63 }
 0x1a5   : > { %3738 = vmatprep.mubr.msk.bf16.mxu0 %vm2632_vm13, %v2577_v22 }
 0x1a6   : > { %v2013_v58 = vpop.permute.xlu1 %2012  ;;  %v2299_v49 = vpop.permute.xlu0 %2298 }
 0x1a7   : > { %v2579_v37 = vsel %vm2563_vm12, %v2546_v6, %v2299_v49  ;;  %v2346_v50 = vsel %vm2316_vm1, %v5210_v56, %v2013_v58 }
 0x1a8   : > { %2244 = vrot.lane.b32.xlu1 %v3483_v16, %s4153_s30  ;;  %2242 = vrot.lane.b32.xlu0 %v3480_v7, %s4153_s30  ;;  %s4026_s30 = scalar_lea.vmem %s4025_s28, 4096 }
 0x1a9   : > { %3739 = vmatmul.mubr.msk.bf16.gmra.mrb[12].mxu0 %vm2632_vm13, %v2579_v37  ;;  %p4028_p7 = scmp.lt.s32.totalorder %s4026_s30, %s4020_s18 }
 0x1aa   : > { %v2093_v26 = vpop.permute.xlu1 %2092  ;;  %v2091_v18 = vpop.permute.xlu0 %2090 }
 0x1ab   : > { %v2383_v21 = vsel %vm2365_vm2, %v2343_v23, %v2091_v18  ;;  %v2385_v4 = vsel %vm2365_vm2, %v2346_v50, %v2093_v26  ;;  %p4029_p9 = por %p4028_p7, %p4027_p5 }
 0x1ac   : > { %2279 = vrot.lane.b32.xlu1 %v3484_v47, %s4158_s29  ;;  %2277 = vrot.lane.b32.xlu0 %v3481_v1, %s4158_s29 }
 0x1ad   : > { %p4030_p0 = pnand %p4029_p9, %p4023_p3 }
 0x1ae   : > { %v2128_v34 = vpop.permute.xlu1 %2127  ;;  %v2126_v41 = vpop.permute.xlu0 %2125 }
 0x1af   : > { %v2416_v39 = vsel %vm2398_vm3, %v2383_v21, %v2126_v41  ;;  %v2418_v13 = vsel %vm2398_vm3, %v2385_v4, %v2128_v34 }
 0x1b0   : > { %2314 = vrot.lane.b32.xlu1 %v3485_v36, %s4156_s27  ;;  %2312 = vrot.lane.b32.xlu0 %v3482_v52, %s4156_s27 }
 0x1b2   : > { %v2163_v7 = vpop.permute.xlu1 %2162  ;;  %v2161_v53 = vpop.permute.xlu0 %2160 }
 0x1b3   : > { %v2449_v12 = vsel %vm2431_vm6, %v2416_v39, %v2161_v53  ;;  %v2451_v56 = vsel %vm2431_vm6, %v2418_v13, %v2163_v7 }
 0x1b6   : > { %v2198_v55 = vpop.permute.xlu1 %2197  ;;  %v2196_v20 = vpop.permute.xlu0 %2195 }
 0x1b7   : > { %v2482_v44 = vsel %vm2464_vm8, %v2449_v12, %v2196_v20  ;;  %v2484_v33 = vsel %vm2464_vm8, %v2451_v56, %v2198_v55 }
 0x1ba   : > { %v2233_v51 = vpop.permute.xlu1 %2232  ;;  %v2231_v27 = vpop.permute.xlu0 %2230 }
 0x1bb   : > { %v2515_v24 = vsel %vm2497_vm9, %v2482_v44, %v2231_v27  ;;  %v2517_v42 = vsel %vm2497_vm9, %v2484_v33, %v2233_v51 }
 0x1be   : > { %v2268_v1 = vpop.permute.xlu1 %2267  ;;  %v2266_v14 = vpop.permute.xlu0 %2265 }
 0x1bf   : > { %v2548_v31 = vsel %vm2530_vm5, %v2515_v24, %v2266_v14  ;;  %v2550_v52 = vsel %vm2530_vm5, %v2517_v42, %v2268_v1 }
 0x1c2   : > { %v2015_v5 = vpop.permute.xlu1 %2014  ;;  %v2301_v63 = vpop.permute.xlu0 %2300 }
 0x1c3   : > { %v2581_v0 = vsel %vm2563_vm12, %v2548_v31, %v2301_v63  ;;  %v2349_v16 = vsel %vm2316_vm1, %v5326_v54, %v2015_v5 }
 0x1c4   : > { %3742 = vmatprep.mubr.msk.bf16.mxu1 %vm2632_vm13, %v2581_v0 }
 0x1c6   : > { %v2017_v2 = vpop.permute.xlu1 %2016  ;;  %v2303_v45 = vpop.permute.xlu0 %2302 }
 0x1c7   : > { %v2583_v29 = vsel %vm2563_vm12, %v2550_v52, %v2303_v45  ;;  %v2352_v59 = vsel %vm2316_vm1, %v5391_v8, %v2017_v2 }
 0x1c8   : > { %3743 = vmatmul.mubr.msk.bf16.vlgmr.msra.gmra.mrb[0].mxu1 %vm2632_vm13, %v2583_v29 }
 0x1ca   : > { %v2097_v3 = vpop.permute.xlu1 %2096  ;;  %v2095_v35 = vpop.permute.xlu0 %2094 }
 0x1cb   : > { %v2387_v19 = vsel %vm2365_vm2, %v2349_v16, %v2095_v35  ;;  %v2389_v58 = vsel %vm2365_vm2, %v2352_v59, %v2097_v3 }
 0x1ce   : > { %v2132_v61 = vpop.permute.xlu1 %2131  ;;  %v2130_v38 = vpop.permute.xlu0 %2129 }
 0x1cf   : > { %v2420_v28 = vsel %vm2398_vm3, %v2387_v19, %v2130_v38  ;;  %v2422_v37 = vsel %vm2398_vm3, %v2389_v58, %v2132_v61 }
 0x1d2   : > { %v2167_v10 = vpop.permute.xlu1 %2166  ;;  %v2165_v62 = vpop.permute.xlu0 %2164 }
 0x1d3   : > { %v2453_v48 = vsel %vm2431_vm6, %v2420_v28, %v2165_v62  ;;  %v2455_v8 = vsel %vm2431_vm6, %v2422_v37, %v2167_v10 }
 0x1d6   : > { %v2202_v25 = vpop.permute.xlu1 %2201  ;;  %v2200_v30 = vpop.permute.xlu0 %2199 }
 0x1d7   : > { %v2486_v6 = vsel %vm2464_vm8, %v2453_v48, %v2200_v30  ;;  %v2488_v26 = vsel %vm2464_vm8, %v2455_v8, %v2202_v25 }
 0x1da   : > { %v2237_v22 = vpop.permute.xlu1 %2236  ;;  %v2235_v9 = vpop.permute.xlu0 %2234 }
 0x1db   : > { %v2519_v49 = vsel %vm2497_vm9, %v2486_v6, %v2235_v9  ;;  %v2521_v18 = vsel %vm2497_vm9, %v2488_v26, %v2237_v22 }
 0x1de   : > { %v2272_v15 = vpop.permute.xlu1 %2271  ;;  %v2270_v32 = vpop.permute.xlu0 %2269 }
 0x1df   : > { %v2552_v54 = vsel %vm2530_vm5, %v2519_v49, %v2270_v32  ;;  %v2554_v36 = vsel %vm2530_vm5, %v2521_v18, %v2272_v15 }
 0x1e2   : > { %v2019_v47 = vpop.permute.xlu1 %2018  ;;  %v2305_v17 = vpop.permute.xlu0 %2304 }
 0x1e3   : > { %v2585_v43 = vsel %vm2563_vm12, %v2552_v54, %v2305_v17  ;;  %v2355_v1 = vsel %vm2316_vm1, %v5517_v11, %v2019_v47 }
 0x1e4   : > { %3746 = vmatprep.mubr.msk.bf16.mxu1 %vm2632_vm13, %v2585_v43 }
 0x1e6   : > { %v2021_v34 = vpop.permute.xlu1 %2020  ;;  %v2307_v41 = vpop.permute.xlu0 %2306 }
 0x1e7   : > { %v2587_v7 = vsel %vm2563_vm12, %v2554_v36, %v2307_v41  ;;  %v2358_v12 = vsel %vm2316_vm1, %v5596_v40, %v2021_v34 }
 0x1e8   : > { %3747 = vmatmul.mubr.msk.bf16.gmra.mrb[4].mxu1 %vm2632_vm13, %v2587_v7 }
 0x1ea   : > { %v2101_v53 = vpop.permute.xlu1 %2100  ;;  %v2099_v55 = vpop.permute.xlu0 %2098 }
 0x1eb   : > { %v2391_v14 = vsel %vm2365_vm2, %v2355_v1, %v2099_v55  ;;  %v2393_v5 = vsel %vm2365_vm2, %v2358_v12, %v2101_v53 }
 0x1ee   : > { %v2136_v20 = vpop.permute.xlu1 %2135  ;;  %v2134_v51 = vpop.permute.xlu0 %2133 }
 0x1ef   : > { %v2424_v44 = vsel %vm2398_vm3, %v2391_v14, %v2134_v51  ;;  %v2426_v56 = vsel %vm2398_vm3, %v2393_v5, %v2136_v20 }
 0x1f2   : > { %v2171_v27 = vpop.permute.xlu1 %2170  ;;  %v2169_v46 = vpop.permute.xlu0 %2168 }
 0x1f3   : > { %v2457_v13 = vsel %vm2431_vm6, %v2424_v44, %v2169_v46  ;;  %v2459_v40 = vsel %vm2431_vm6, %v2426_v56, %v2171_v27 }
 0x1f6   : > { %v2206_v23 = vpop.permute.xlu1 %2205  ;;  %v2204_v21 = vpop.permute.xlu0 %2203 }
 0x1f7   : > { %v2490_v31 = vsel %vm2464_vm8, %v2457_v13, %v2204_v21  ;;  %v2492_v52 = vsel %vm2464_vm8, %v2459_v40, %v2206_v23 }
 0x1fa   : > { %v2241_v50 = vpop.permute.xlu1 %2240  ;;  %v2239_v39 = vpop.permute.xlu0 %2238 }
 0x1fb   : > { %v2523_v63 = vsel %vm2497_vm9, %v2490_v31, %v2239_v39  ;;  %v2525_v2 = vsel %vm2497_vm9, %v2492_v52, %v2241_v50 }
 0x1fe   : > { %v2276_v4 = vpop.permute.xlu1 %2275  ;;  %v2274_v24 = vpop.permute.xlu0 %2273 }
 0x1ff   : > { %v2556_v11 = vsel %vm2530_vm5, %v2523_v63, %v2274_v24  ;;  %v2558_v45 = vsel %vm2530_vm5, %v2525_v2, %v2276_v4 }
 0x202   : > { %v2023_v0 = vpop.permute.xlu1 %2022  ;;  %v2309_v33 = vpop.permute.xlu0 %2308 }
 0x203   : > { %v2589_v42 = vsel %vm2563_vm12, %v2556_v11, %v2309_v33  ;;  %v2361_v28 = vsel %vm2316_vm1, %v5660_v57, %v2023_v0 }
 0x204   : > { %3750 = vmatprep.mubr.msk.bf16.mxu1 %vm2632_vm13, %v2589_v42 }
 0x206   : > { %v2025_v29 = vpop.permute.xlu1 %2024  ;;  %v2311_v3 = vpop.permute.xlu0 %2310 }
 0x207   : > { %v2591_v35 = vsel %vm2563_vm12, %v2558_v45, %v2311_v3  ;;  %v2364_v59 = vsel %vm2316_vm1, %v5717_v60, %v2025_v29 }
 0x208   : > { %3751 = vmatmul.mubr.msk.bf16.gmra.mrb[8].mxu1 %vm2632_vm13, %v2591_v35 }
 0x20a   : > { %v2105_v61 = vpop.permute.xlu1 %2104  ;;  %v2103_v38 = vpop.permute.xlu0 %2102 }
 0x20b   : > { %v2395_v15 = vsel %vm2365_vm2, %v2361_v28, %v2103_v38  ;;  %v2397_v32 = vsel %vm2365_vm2, %v2364_v59, %v2105_v61 }
 0x20e   : > { %v2140_v10 = vpop.permute.xlu1 %2139  ;;  %v2138_v62 = vpop.permute.xlu0 %2137 }
 0x20f   : > { %v2428_v48 = vsel %vm2398_vm3, %v2395_v15, %v2138_v62  ;;  %v2430_v49 = vsel %vm2398_vm3, %v2397_v32, %v2140_v10 }
 0x212   : > { %v2175_v25 = vpop.permute.xlu1 %2174  ;;  %v2173_v30 = vpop.permute.xlu0 %2172 }
 0x213   : > { %v2461_v37 = vsel %vm2431_vm6, %v2428_v48, %v2173_v30  ;;  %v2463_v54 = vsel %vm2431_vm6, %v2430_v49, %v2175_v25 }
 0x216   : > { %v2210_v22 = vpop.permute.xlu1 %2209  ;;  %v2208_v9 = vpop.permute.xlu0 %2207 }
 0x217   : > { %v2494_v47 = vsel %vm2464_vm8, %v2461_v37, %v2208_v9  ;;  %v2496_v60 = vsel %vm2464_vm8, %v2463_v54, %v2210_v22 }
 0x21a   : > { %v2245_v16 = vpop.permute.xlu1 %2244  ;;  %v2243_v19 = vpop.permute.xlu0 %2242 }
 0x21b   : > { %v2527_v57 = vsel %vm2497_vm9, %v2494_v47, %v2243_v19  ;;  %v2529_v17 = vsel %vm2497_vm9, %v2496_v60, %v2245_v16 }
 0x21e   : > { %v2280_v6 = vpop.permute.xlu1 %2279  ;;  %v2278_v58 = vpop.permute.xlu0 %2277 }
 0x21f   : > { %v2560_v8 = vsel %vm2530_vm5, %v2527_v57, %v2278_v58  ;;  %v2562_v18 = vsel %vm2530_vm5, %v2529_v17, %v2280_v6 }
 0x222   : > { %v2315_v43 = vpop.permute.xlu1 %2314  ;;  %v2313_v26 = vpop.permute.xlu0 %2312 }
 0x223   : > { %v2593_v36 = vsel %vm2563_vm12, %v2560_v8, %v2313_v26  ;;  %v2595_v34 = vsel %vm2563_vm12, %v2562_v18, %v2315_v43 }
 0x224   : > { %3754 = vmatprep.mubr.msk.bf16.mxu1 %vm2632_vm13, %v2593_v36 }
 0x225   : > { %v3728_v41 = vpop.f32.mrb[0].mxu0  ;;  %3755 = vmatmul.mubr.msk.bf16.gmra.mrb[12].mxu1 %vm2632_vm13, %v2595_v34 }
 0x226   : > { %v3585_v7 = vpack.c.bf16 %v3728_v41, %v3728_v41  ;;  %v2703_v53 = vpop.f32.mrb[1].mxu0  ;;  %v3062_v27 = vmul.f32 %v3728_v41, %v3728_v41  ;;  %v2994_v12 = vsel %vm2563_vm12, %v3728_v41, 0.0 }
 0x227   : > { %v3583_v55 = vpack.c.bf16 %v2703_v53, %v2703_v53  ;;  %v3060_v20 = vmul.f32 %v2703_v53, %v2703_v53  ;;  %v3729_v51 = vpop.f32.mrb[2].mxu0  ;;  %v2991_v21 = vsel %vm2563_vm12, %v2703_v53, 0.0 }
 0x228   : > { %2961 = vst.msk [vmem:[%s5930_s7 + $0x8] sm:$0xf] %vm2958_vm0, %v3585_v7  ;;  %v3586_v46 = vpack.c.bf16 %v3729_v51, %v3729_v51  ;;  %v2706_v23 = vpop.f32.mrb[3].mxu0  ;;  %v3063_v4 = vmul.f32 %v3729_v51, %v3729_v51  ;;  %v3095_v5 = vsel %vm2563_vm12, %v3062_v27, 0.0  ;;  %v2996_v63 = vsel %vm2563_vm12, %v3729_v51, 0.0 }
 0x229   : > { %2959 = vst.msk [vmem:[%s5930_s7] sm:$0xf] %vm2958_vm0, %v3583_v55  ;;  %v3584_v50 = vpack.c.bf16 %v2706_v23, %v2706_v23  ;;  %v2992_v39 = vsel %vm2563_vm12, %v2706_v23, 0.0  ;;  %v3061_v1 = vmul.f32 %v2706_v23, %v2706_v23  ;;  %v3092_v44 = vsel %vm2563_vm12, %v3060_v20, 0.0 }
 0x22a   : > { %2962 = vst.msk [vmem:[%s5930_s7 + $0xc] sm:$0xf] %vm2958_vm0, %v3586_v46  ;;  %v2993_v14 = vadd.f32 %v2992_v39, %v2991_v21  ;;  %v3097_v0 = vsel %vm2563_vm12, %v3063_v4, 0.0 }
 0x22b   : > { %2960 = vst.msk [vmem:[%s5930_s7 + $0x4] sm:$0xf] %vm2958_vm0, %v3584_v50  ;;  %v3093_v24 = vsel %vm2563_vm12, %v3061_v1, 0.0 }
 0x22c   : > { %v2995_v13 = vadd.f32 %v2994_v12, %v2993_v14  ;;  %v3094_v31 = vadd.f32 %v3093_v24, %v3092_v44 }
 0x22e   : > { %v3096_v56 = vadd.f32 %v3095_v5, %v3094_v31  ;;  %v2997_v11 = vadd.f32 %v2996_v63, %v2995_v13 }
 0x230   : > { %v3098_v33 = vadd.f32 %v3097_v0, %v3096_v56 }
 0x23c   : > { %v3732_v40 = vpop.f32.mrb[4].mxu0 }
 0x23d   : > { %v3589_v42 = vpack.c.bf16 %v3732_v40, %v3732_v40  ;;  %v2719_v52 = vpop.f32.mrb[5].mxu0  ;;  %v3066_v30 = vmul.f32 %v3732_v40, %v3732_v40  ;;  %v3002_v19 = vsel %vm2563_vm12, %v3732_v40, 0.0 }
 0x23e   : > { %v3587_v2 = vpack.c.bf16 %v2719_v52, %v2719_v52  ;;  %v2998_v45 = vsel %vm2563_vm12, %v2719_v52, 0.0  ;;  %v3064_v29 = vmul.f32 %v2719_v52, %v2719_v52  ;;  %v3733_v3 = vpop.f32.mrb[6].mxu0 }
 0x23f   : > { %2965 = vst.msk [vmem:[%s5930_s7 + $0x18] sm:$0xf] %vm2958_vm0, %v3589_v42  ;;  %v2999_v35 = vadd.f32 %v2998_v45, %v2997_v11  ;;  %v3590_v61 = vpack.c.bf16 %v3733_v3, %v3733_v3  ;;  %v2722_v38 = vpop.f32.mrb[7].mxu0  ;;  %v3067_v59 = vmul.f32 %v3733_v3, %v3733_v3  ;;  %v3004_v32 = vsel %vm2563_vm12, %v3733_v3, 0.0 }
 0x240   : > { %2963 = vst.msk [vmem:[%s5930_s7 + $0x10] sm:$0xf] %vm2958_vm0, %v3587_v2  ;;  %v3099_v10 = vsel %vm2563_vm12, %v3064_v29, 0.0  ;;  %v3588_v62 = vpack.c.bf16 %v2722_v38, %v2722_v38  ;;  %v3000_v25 = vsel %vm2563_vm12, %v2722_v38, 0.0  ;;  %v3065_v16 = vmul.f32 %v2722_v38, %v2722_v38 }
 0x241   : > { %v3100_v22 = vadd.f32 %v3099_v10, %v3098_v33  ;;  %2966 = vst.msk [vmem:[%s5930_s7 + $0x1c] sm:$0xf] %vm2958_vm0, %v3590_v61  ;;  %v3001_v9 = vadd.f32 %v3000_v25, %v2999_v35  ;;  %v3103_v6 = vsel %vm2563_vm12, %v3066_v30, 0.0  ;;  %v3105_v37 = vsel %vm2563_vm12, %v3067_v59, 0.0 }
 0x242   : > { %2964 = vst.msk [vmem:[%s5930_s7 + $0x14] sm:$0xf] %vm2958_vm0, %v3588_v62  ;;  %v3101_v15 = vsel %vm2563_vm12, %v3065_v16, 0.0 }
 0x243   : > { %v3003_v28 = vadd.f32 %v3002_v19, %v3001_v9  ;;  %v3102_v48 = vadd.f32 %v3101_v15, %v3100_v22 }
 0x245   : > { %v3005_v58 = vadd.f32 %v3004_v32, %v3003_v28  ;;  %v3104_v49 = vadd.f32 %v3103_v6, %v3102_v48 }
 0x247   : > { %v3106_v54 = vadd.f32 %v3105_v37, %v3104_v49 }
 0x25c   : > { %v3736_v47 = vpop.f32.mrb[8].mxu0 }
 0x25d   : > { %v3593_v60 = vpack.c.bf16 %v3736_v47, %v3736_v47  ;;  %v2735_v57 = vpop.f32.mrb[9].mxu0  ;;  %v3070_v55 = vmul.f32 %v3736_v47, %v3736_v47  ;;  %v3010_v46 = vsel %vm2563_vm12, %v3736_v47, 0.0 }
 0x25e   : > { %v3591_v17 = vpack.c.bf16 %v2735_v57, %v2735_v57  ;;  %v3006_v8 = vsel %vm2563_vm12, %v2735_v57, 0.0  ;;  %v3068_v43 = vmul.f32 %v2735_v57, %v2735_v57  ;;  %v3737_v26 = vpop.f32.mrb[10].mxu0 }
 0x25f   : > { %2969 = vst.msk [vmem:[%s5930_s7 + $0x28] sm:$0xf] %vm2958_vm0, %v3593_v60  ;;  %v3007_v18 = vadd.f32 %v3006_v8, %v3005_v58  ;;  %v3594_v36 = vpack.c.bf16 %v3737_v26, %v3737_v26  ;;  %v2738_v34 = vpop.f32.mrb[11].mxu0  ;;  %v3071_v23 = vmul.f32 %v3737_v26, %v3737_v26  ;;  %v3012_v39 = vsel %vm2563_vm12, %v3737_v26, 0.0 }
 0x260   : > { %2967 = vst.msk [vmem:[%s5930_s7 + $0x20] sm:$0xf] %vm2958_vm0, %v3591_v17  ;;  %v3107_v41 = vsel %vm2563_vm12, %v3068_v43, 0.0  ;;  %v3592_v7 = vpack.c.bf16 %v2738_v34, %v2738_v34  ;;  %v3008_v53 = vsel %vm2563_vm12, %v2738_v34, 0.0  ;;  %v3069_v27 = vmul.f32 %v2738_v34, %v2738_v34 }
 0x261   : > { %v3108_v20 = vadd.f32 %v3107_v41, %v3106_v54  ;;  %2970 = vst.msk [vmem:[%s5930_s7 + $0x2c] sm:$0xf] %vm2958_vm0, %v3594_v36  ;;  %v3009_v51 = vadd.f32 %v3008_v53, %v3007_v18  ;;  %v3111_v14 = vsel %vm2563_vm12, %v3070_v55, 0.0  ;;  %v3113_v4 = vsel %vm2563_vm12, %v3071_v23, 0.0 }
 0x262   : > { %2968 = vst.msk [vmem:[%s5930_s7 + $0x24] sm:$0xf] %vm2958_vm0, %v3592_v7  ;;  %v3109_v50 = vsel %vm2563_vm12, %v3069_v27, 0.0 }
 0x263   : > { %v3011_v21 = vadd.f32 %v3010_v46, %v3009_v51  ;;  %v3110_v1 = vadd.f32 %v3109_v50, %v3108_v20 }
 0x265   : > { %v3013_v12 = vadd.f32 %v3012_v39, %v3011_v21  ;;  %v3112_v44 = vadd.f32 %v3111_v14, %v3110_v1 }
 0x267   : > { %v3114_v24 = vadd.f32 %v3113_v4, %v3112_v44 }
 0x27c   : > { %v3740_v13 = vpop.f32.mrb[12].mxu0 }
 0x27d   : > { %v3597_v31 = vpack.c.bf16 %v3740_v13, %v3740_v13  ;;  %v2751_v5 = vpop.f32.mrb[13].mxu0  ;;  %v3074_v29 = vmul.f32 %v3740_v13, %v3740_v13  ;;  %v3018_v38 = vsel %vm2563_vm12, %v3740_v13, 0.0 }
 0x27e   : > { %v3595_v63 = vpack.c.bf16 %v2751_v5, %v2751_v5  ;;  %v3014_v56 = vsel %vm2563_vm12, %v2751_v5, 0.0  ;;  %v3072_v11 = vmul.f32 %v2751_v5, %v2751_v5  ;;  %v3741_v0 = vpop.f32.mrb[14].mxu0 }
 0x27f   : > { %2973 = vst.msk [vmem:[%s5930_s7 + $0x38] sm:$0xf] %vm2958_vm0, %v3597_v31  ;;  %v3015_v33 = vadd.f32 %v3014_v56, %v3013_v12  ;;  %v3598_v40 = vpack.c.bf16 %v3741_v0, %v3741_v0  ;;  %v2754_v42 = vpop.f32.mrb[15].mxu0  ;;  %v3075_v10 = vmul.f32 %v3741_v0, %v3741_v0  ;;  %v3020_v30 = vsel %vm2563_vm12, %v3741_v0, 0.0 }
 0x280   : > { %2971 = vst.msk [vmem:[%s5930_s7 + $0x30] sm:$0xf] %vm2958_vm0, %v3595_v63  ;;  %v3115_v52 = vsel %vm2563_vm12, %v3072_v11, 0.0  ;;  %v3596_v2 = vpack.c.bf16 %v2754_v42, %v2754_v42  ;;  %v3016_v45 = vsel %vm2563_vm12, %v2754_v42, 0.0  ;;  %v3073_v61 = vmul.f32 %v2754_v42, %v2754_v42 }
 0x281   : > { %v3116_v3 = vadd.f32 %v3115_v52, %v3114_v24  ;;  %2974 = vst.msk [vmem:[%s5930_s7 + $0x3c] sm:$0xf] %vm2958_vm0, %v3598_v40  ;;  %v3017_v35 = vadd.f32 %v3016_v45, %v3015_v33  ;;  %v3119_v9 = vsel %vm2563_vm12, %v3074_v29, 0.0  ;;  %v3121_v59 = vsel %vm2563_vm12, %v3075_v10, 0.0 }
 0x282   : > { %2972 = vst.msk [vmem:[%s5930_s7 + $0x34] sm:$0xf] %vm2958_vm0, %v3596_v2  ;;  %v3117_v25 = vsel %vm2563_vm12, %v3073_v61, 0.0 }
 0x283   : > { %v3019_v62 = vadd.f32 %v3018_v38, %v3017_v35  ;;  %v3118_v22 = vadd.f32 %v3117_v25, %v3116_v3 }
 0x285   : > { %v3021_v16 = vadd.f32 %v3020_v30, %v3019_v62  ;;  %v3120_v19 = vadd.f32 %v3119_v9, %v3118_v22 }
 0x287   : > { %v3122_v28 = vadd.f32 %v3121_v59, %v3120_v19 }
 0x29b   : > { %v3744_v15 = vpop.f32.mrb[0].mxu1 }
 0x29c   : > { %v3601_v32 = vpack.c.bf16 %v3744_v15, %v3744_v15  ;;  %v2767_v48 = vpop.f32.mrb[1].mxu1  ;;  %v3078_v43 = vmul.f32 %v3744_v15, %v3744_v15  ;;  %v3026_v34 = vsel %vm2563_vm12, %v3744_v15, 0.0 }
 0x29d   : > { %v3599_v6 = vpack.c.bf16 %v2767_v48, %v2767_v48  ;;  %v3022_v58 = vsel %vm2563_vm12, %v2767_v48, 0.0  ;;  %v3076_v49 = vmul.f32 %v2767_v48, %v2767_v48  ;;  %v3745_v37 = vpop.f32.mrb[2].mxu1 }
 0x29e   : > { %2977 = vst.msk [vmem:[%s5930_s7 + $0x48] sm:$0xf] %vm2958_vm0, %v3601_v32  ;;  %v3023_v54 = vadd.f32 %v3022_v58, %v3021_v16  ;;  %v3602_v47 = vpack.c.bf16 %v3745_v37, %v3745_v37  ;;  %v2770_v60 = vpop.f32.mrb[3].mxu1  ;;  %v3079_v41 = vmul.f32 %v3745_v37, %v3745_v37  ;;  %v3028_v55 = vsel %vm2563_vm12, %v3745_v37, 0.0 }
 0x29f   : > { %2975 = vst.msk [vmem:[%s5930_s7 + $0x40] sm:$0xf] %vm2958_vm0, %v3599_v6  ;;  %v3123_v57 = vsel %vm2563_vm12, %v3076_v49, 0.0  ;;  %v3600_v17 = vpack.c.bf16 %v2770_v60, %v2770_v60  ;;  %v3024_v8 = vsel %vm2563_vm12, %v2770_v60, 0.0  ;;  %v3077_v36 = vmul.f32 %v2770_v60, %v2770_v60 }
 0x2a0   : > { %v3124_v26 = vadd.f32 %v3123_v57, %v3122_v28  ;;  %2978 = vst.msk [vmem:[%s5930_s7 + $0x4c] sm:$0xf] %vm2958_vm0, %v3602_v47  ;;  %v3025_v18 = vadd.f32 %v3024_v8, %v3023_v54  ;;  %v3127_v51 = vsel %vm2563_vm12, %v3078_v43, 0.0  ;;  %v3129_v23 = vsel %vm2563_vm12, %v3079_v41, 0.0 }
 0x2a1   : > { %2976 = vst.msk [vmem:[%s5930_s7 + $0x44] sm:$0xf] %vm2958_vm0, %v3600_v17  ;;  %v3125_v53 = vsel %vm2563_vm12, %v3077_v36, 0.0 }
 0x2a2   : > { %v3027_v7 = vadd.f32 %v3026_v34, %v3025_v18  ;;  %v3126_v20 = vadd.f32 %v3125_v53, %v3124_v26 }
 0x2a4   : > { %v3029_v27 = vadd.f32 %v3028_v55, %v3027_v7  ;;  %v3128_v46 = vadd.f32 %v3127_v51, %v3126_v20 }
 0x2a6   : > { %v3130_v21 = vadd.f32 %v3129_v23, %v3128_v46 }
 0x2bb   : > { %v3748_v50 = vpop.f32.mrb[4].mxu1 }
 0x2bc   : > { %v3605_v39 = vpack.c.bf16 %v3748_v50, %v3748_v50  ;;  %v2783_v1 = vpop.f32.mrb[5].mxu1  ;;  %v3082_v11 = vmul.f32 %v3748_v50, %v3748_v50  ;;  %v3034_v42 = vsel %vm2563_vm12, %v3748_v50, 0.0 }
 0x2bd   : > { %v3603_v14 = vpack.c.bf16 %v2783_v1, %v2783_v1  ;;  %v3030_v12 = vsel %vm2563_vm12, %v2783_v1, 0.0  ;;  %v3080_v44 = vmul.f32 %v2783_v1, %v2783_v1  ;;  %v3749_v4 = vpop.f32.mrb[6].mxu1 }
 0x2be   : > { %2981 = vst.msk [vmem:[%s5930_s7 + $0x58] sm:$0xf] %vm2958_vm0, %v3605_v39  ;;  %v3031_v24 = vadd.f32 %v3030_v12, %v3029_v27  ;;  %v3606_v13 = vpack.c.bf16 %v3749_v4, %v3749_v4  ;;  %v2786_v31 = vpop.f32.mrb[7].mxu1  ;;  %v3083_v52 = vmul.f32 %v3749_v4, %v3749_v4  ;;  %v3036_v29 = vsel %vm2563_vm12, %v3749_v4, 0.0 }
 0x2bf   : > { %2979 = vst.msk [vmem:[%s5930_s7 + $0x50] sm:$0xf] %vm2958_vm0, %v3603_v14  ;;  %v3131_v5 = vsel %vm2563_vm12, %v3080_v44, 0.0  ;;  %v3604_v63 = vpack.c.bf16 %v2786_v31, %v2786_v31  ;;  %v3032_v56 = vsel %vm2563_vm12, %v2786_v31, 0.0  ;;  %v3081_v40 = vmul.f32 %v2786_v31, %v2786_v31 }
 0x2c0   : > { %v3132_v0 = vadd.f32 %v3131_v5, %v3130_v21  ;;  %2982 = vst.msk [vmem:[%s5930_s7 + $0x5c] sm:$0xf] %vm2958_vm0, %v3606_v13  ;;  %v3033_v33 = vadd.f32 %v3032_v56, %v3031_v24  ;;  %v3135_v35 = vsel %vm2563_vm12, %v3082_v11, 0.0  ;;  %v3137_v10 = vsel %vm2563_vm12, %v3083_v52, 0.0 }
 0x2c1   : > { %2980 = vst.msk [vmem:[%s5930_s7 + $0x54] sm:$0xf] %vm2958_vm0, %v3604_v63  ;;  %v3133_v45 = vsel %vm2563_vm12, %v3081_v40, 0.0 }
 0x2c2   : > { %v3035_v2 = vadd.f32 %v3034_v42, %v3033_v33  ;;  %v3134_v3 = vadd.f32 %v3133_v45, %v3132_v0 }
 0x2c4   : > { %v3037_v61 = vadd.f32 %v3036_v29, %v3035_v2  ;;  %v3136_v38 = vadd.f32 %v3135_v35, %v3134_v3 }
 0x2c6   : > { %v3138_v62 = vadd.f32 %v3137_v10, %v3136_v38 }
 0x2db   : > { %v3752_v25 = vpop.f32.mrb[8].mxu1 }
 0x2dc   : > { %v3609_v30 = vpack.c.bf16 %v3752_v25, %v3752_v25  ;;  %v2799_v22 = vpop.f32.mrb[9].mxu1  ;;  %v3086_v49 = vmul.f32 %v3752_v25, %v3752_v25  ;;  %v3042_v60 = vsel %vm2563_vm12, %v3752_v25, 0.0 }
 0x2dd   : > { %v3607_v9 = vpack.c.bf16 %v2799_v22, %v2799_v22  ;;  %v3038_v16 = vsel %vm2563_vm12, %v2799_v22, 0.0  ;;  %v3084_v19 = vmul.f32 %v2799_v22, %v2799_v22  ;;  %v3753_v59 = vpop.f32.mrb[10].mxu1 }
 0x2de   : > { %2985 = vst.msk [vmem:[%s5930_s7 + $0x68] sm:$0xf] %vm2958_vm0, %v3609_v30  ;;  %v3039_v28 = vadd.f32 %v3038_v16, %v3037_v61  ;;  %v3610_v15 = vpack.c.bf16 %v3753_v59, %v3753_v59  ;;  %v2802_v32 = vpop.f32.mrb[11].mxu1  ;;  %v3087_v57 = vmul.f32 %v3753_v59, %v3753_v59  ;;  %v3044_v43 = vsel %vm2563_vm12, %v3753_v59, 0.0 }
 0x2df   : > { %2983 = vst.msk [vmem:[%s5930_s7 + $0x60] sm:$0xf] %vm2958_vm0, %v3607_v9  ;;  %v3139_v48 = vsel %vm2563_vm12, %v3084_v19, 0.0  ;;  %v3608_v6 = vpack.c.bf16 %v2802_v32, %v2802_v32  ;;  %v3040_v58 = vsel %vm2563_vm12, %v2802_v32, 0.0  ;;  %v3085_v47 = vmul.f32 %v2802_v32, %v2802_v32 }
 0x2e0   : > { %v3140_v37 = vadd.f32 %v3139_v48, %v3138_v62  ;;  %2986 = vst.msk [vmem:[%s5930_s7 + $0x6c] sm:$0xf] %vm2958_vm0, %v3610_v15  ;;  %v3041_v54 = vadd.f32 %v3040_v58, %v3039_v28  ;;  %v3143_v18 = vsel %vm2563_vm12, %v3086_v49, 0.0  ;;  %v3145_v41 = vsel %vm2563_vm12, %v3087_v57, 0.0 }
 0x2e1   : > { %2984 = vst.msk [vmem:[%s5930_s7 + $0x64] sm:$0xf] %vm2958_vm0, %v3608_v6  ;;  %v3141_v8 = vsel %vm2563_vm12, %v3085_v47, 0.0 }
 0x2e2   : > { %v3043_v17 = vadd.f32 %v3042_v60, %v3041_v54  ;;  %v3142_v26 = vadd.f32 %v3141_v8, %v3140_v37 }
 0x2e4   : > { %v3045_v36 = vadd.f32 %v3044_v43, %v3043_v17  ;;  %v3144_v34 = vadd.f32 %v3143_v18, %v3142_v26 }
 0x2e6   : > { %v3146_v7 = vadd.f32 %v3145_v41, %v3144_v34 }
 0x2f8   : > { %v3756_v53 = vpop.f32.mrb[12].mxu1 }
 0x2f9   : > { %v3613_v55 = vpack.c.bf16 %v3756_v53, %v3756_v53  ;;  %v2815_v20 = vpop.f32.mrb[13].mxu1  ;;  %v3090_v44 = vmul.f32 %v3756_v53, %v3756_v53  ;;  %v3050_v31 = vsel %vm2563_vm12, %v3756_v53, 0.0 }
 0x2fa   : > { %v3611_v51 = vpack.c.bf16 %v2815_v20, %v2815_v20  ;;  %v3046_v27 = vsel %vm2563_vm12, %v2815_v20, 0.0  ;;  %v3088_v46 = vmul.f32 %v2815_v20, %v2815_v20  ;;  %v3757_v23 = vpop.f32.mrb[14].mxu1 }
 0x2fb   : > { %2989 = vst.msk [vmem:[%s5930_s7 + $0x78] sm:$0xf] %vm2958_vm0, %v3613_v55  ;;  %v3047_v21 = vadd.f32 %v3046_v27, %v3045_v36  ;;  %v3614_v50 = vpack.c.bf16 %v3757_v23, %v3757_v23  ;;  %v2818_v39 = vpop.f32.mrb[15].mxu1  ;;  %v3091_v5 = vmul.f32 %v3757_v23, %v3757_v23 }
 0x2fc   : > { %2987 = vst.msk [vmem:[%s5930_s7 + $0x70] sm:$0xf] %vm2958_vm0, %v3611_v51  ;;  %v3147_v1 = vsel %vm2563_vm12, %v3088_v46, 0.0  ;;  %v3612_v14 = vpack.c.bf16 %v2818_v39, %v2818_v39  ;;  %v3048_v12 = vsel %vm2563_vm12, %v2818_v39, 0.0  ;;  %v3089_v13 = vmul.f32 %v2818_v39, %v2818_v39 }
 0x2fd   : > { %v3148_v4 = vadd.f32 %v3147_v1, %v3146_v7  ;;  %2990 = vst.msk [vmem:[%s5930_s7 + $0x7c] sm:$0xf] %vm2958_vm0, %v3614_v50  ;;  %v3049_v24 = vadd.f32 %v3048_v12, %v3047_v21 }
 0x2fe   : > { %2988 = vst.msk [vmem:[%s5930_s7 + $0x74] sm:$0xf] %vm2958_vm0, %v3612_v14  ;;  %v3149_v56 = vsel %vm2563_vm12, %v3089_v13, 0.0 }
 0x2ff   : > { %v3051_v63 = vadd.f32 %v3050_v31, %v3049_v24 }
 0x300   : > { %4033 = shalt.err (!%p4030_p0)
}
 0x301   : > { %s4034_s11 = scalar_lea.hbm %s6052_s25, 2048  ;;  %s4038_s29 = scalar_lea.hbm %s6153_s4, 4096 }
 0x302   : > { %p4035_p4 = scmp.ne.s32.totalorder %s6052_s25, %s4034_s11  ;;  %p4039_p12 = scmp.lt.u32.totalorder %s6052_s25, %s6153_s4 }
 0x303   : > { %p4040_p1 = scmp.lt.u32.totalorder %s4038_s29, %s4034_s11  ;;  %p4042_p13 = scmp.lt.u32.totalorder %s4034_s11, %s6052_s25 }
 0x304   : > { %p4036_p2 = pnand %p4035_p4, %p4347_p10 }
 0x305   : > { %p4041_p11 = por %p4040_p1, %p4039_p12 }
 0x306   : > { %p4037_p8 = pneg %p4036_p2 }
 0x307   : > { %p4043_p6 = por %p4042_p13, %p4041_p11 }
 0x309   : > { %p4044_p3 = pnand %p4043_p6, %p4037_p8 }
 0x30b   : > { %4047 = shalt.err (!%p4044_p3)
}
 0x30c   : > { %s4160_s17 = smov 4   ;;  %v3052_v11 = vsel %vm2563_vm12, %v3757_v23, 0.0  ;;  %v3150_v0 = vadd.f32 %v3149_v56, %v3148_v4  ;;  %v3151_v33 = vsel %vm2563_vm12, %v3090_v44, 0.0  ;;  %v3153_v52 = vsel %vm2563_vm12, %v3091_v5, 0.0  ;;  %s3371_s12 = sshll.u32 %s4408_s24, 1 }
 0x30d   : > { %3784 = dma.vmem_to_hbm [thread:$0]  (%p4347_p10), %s6058_s14, 2048, %s6052_s25, %s3166_s9, %s4156_s27, %s4156_s27, %s4160_s17   ;;  %v3053_v40 = vadd.f32 %v3052_v11, %v3051_v63  ;;  %vm3161_vm4 = vcmask 1040384   ;;  %vm3163_vm7 = vcmask 517120  }
 0x30e   : > { %v3152_v42 = vadd.f32 %v3151_v33, %v3150_v0  ;;  %s3543_s27 = sshll.u32 %s4134_s21, 5  ;;  %s309_s14 = scalar_lea.vmem [#allocation12], %s3371_s12 }
 0x30f   : > { %v3054_v2 = vrot.slane %v3053_v40, 4  ;;  %s3204_s25 = sshll.u32 %s309_s14, 4  ;;  %s6100_s26 = scalar_lea.hbm %s6154_s5, %s3543_s27  ;;  %s6102_s25 = int_to_ptr.vmem [resolvable:$true] %s3204_s25 }
 0x310   : > { %v3154_v45 = vadd.f32 %v3153_v52, %v3152_v42  ;;  %s3171_s28 = scalar_lea.sflag [#allocation13], %s4408_s24  ;;  %s4048_s21 = scalar_lea.vmem %s6102_s25, 32 }
 0x311   : > { %v3055_v29 = vadd.f32 %v3054_v2, %v3053_v40  ;;  %p4049_p5 = scmp.ne.s32.totalorder %s6102_s25, %s4048_s21  ;;  %s4161_s30 = smov [#allocation12]  }
 0x312   : > { %v3155_v3 = vrot.slane %v3154_v45, 4  ;;  %s4052_s11 = sshll.u32 %s4161_s30, 4  ;;  %s4053_s11 = int_to_ptr.vmem [resolvable:$false] %s4052_s11 }
 0x313   : > { %v3056_v35 = vrot.slane %v3055_v29, 2  ;;  %p4050_p7 = pnand %p4049_p5, %p4347_p10  ;;  %s4054_s13 = scalar_lea.vmem %s4053_s11, 64 }
 0x314   : > { %v3156_v61 = vadd.f32 %v3155_v3, %v3154_v45  ;;  %p4055_p0 = scmp.lt.s32.totalorder %s6102_s25, %s4053_s11  ;;  %p4056_p4 = scmp.lt.s32.totalorder %s4054_s13, %s4048_s21 }
 0x315   : > { %v3057_v38 = vadd.f32 %v3056_v35, %v3055_v29  ;;  %p4051_p9 = pneg %p4050_p7 }
 0x316   : > { %v3157_v10 = vrot.slane %v3156_v61, 2  ;;  %p4057_p2 = por %p4056_p4, %p4055_p0 }
 0x317   : > { %v3058_v62 = vrot.slane %v3057_v38, 1 }
 0x318   : > { %v3158_v25 = vadd.f32 %v3157_v10, %v3156_v61  ;;  %p4058_p8 = pnand %p4057_p2, %p4051_p9 }
 0x319   : > { %v3059_v22 = vadd.f32 %v3058_v62, %v3057_v38 }
 0x31a   : > { %v3159_v30 = vrot.slane %v3158_v25, 1 }
 0x31c   : > { %v3160_v9 = vadd.f32 %v3159_v30, %v3158_v25 }
 0x31e   : > { %v3162_v16 = vsel %vm3161_vm4, %v3059_v22, %v3160_v9 }
 0x31f   : > { %3164 = vst.msk [vmem:[%s309_s14] sm:$0x3] %vm3163_vm7, %v3162_v16 }
 0x320   : > { %4061 = shalt.err (!%p4058_p8)
}
 0x321   : > { %s4062_s24 = scalar_lea.hbm %s6100_s26, 32  ;;  %s4066_s7 = scalar_lea.hbm %s6154_s5, 64 }
 0x322   : > { %p4063_p12 = scmp.ne.s32.totalorder %s6100_s26, %s4062_s24  ;;  %p4067_p13 = scmp.lt.u32.totalorder %s6100_s26, %s6154_s5 }
 0x323   : > { %p4068_p6 = scmp.lt.u32.totalorder %s4066_s7, %s4062_s24  ;;  %p4070_p5 = scmp.lt.u32.totalorder %s4062_s24, %s6100_s26 }
 0x324   : > { %p4064_p1 = pnand %p4063_p12, %p4347_p10 }
 0x325   : > { %p4069_p3 = por %p4068_p6, %p4067_p13 }
 0x326   : > { %p4065_p11 = pneg %p4064_p1 }
 0x327   : > { %p4071_p7 = por %p4070_p5, %p4069_p3 }
 0x329   : > { %p4072_p9 = pnand %p4071_p7, %p4065_p11 }
 0x32b   : > { %4075 = shalt.err (!%p4072_p9)
}
 0x32c   : > { %3785 = dma.vmem_to_hbm [thread:$0]  (%p4347_p10), %s6102_s25, 32, %s6100_s26, %s3171_s28  }
 0x32d PF: > { %s6192_s12 = sld [smem:[#allocation19_spill]]  ;;  %s6193_s27 = sld [smem:[#allocation20_spill]] }
 0x32e   : > { %p6195_p4 = scmp.ge.s32.totalorder %s4142_s23, 2 }
 0x333   : > { %s3216_s14 = sand.u32 1, %s6192_s12   ;;  %p6194_p0 = scmp.ne.s32.totalorder %s6193_s27, 0 }
 0x334   : > { %s3217_s9 = scalar_lea.sflag [#allocation5], %s3216_s14 }
 0x335   : > { %p3803_p2 = pnand %p6195_p4, %p6194_p0 }
 0x337   : > { %4113 = dma.done.wait (!%p3803_p2), %s3217_s9, 2048  }
 0x338   : > { %4115 = vsyncadd (!%p3803_p2), %s3217_s9, 4294965248  ;;  %s3226_s18 = scalar_lea.sflag [#allocation13], %s3216_s14 }
 0x339   : > { %4117 = dma.done.wait (!%p3803_p2), %s3226_s18, 32  }
 0x33a   : > { %4119 = vsyncadd (!%p3803_p2), %s3226_s18, 4294967264  ;;  %s27_s23 = sadd.s32 1, %s4142_s23   ;;  %s6196_s18 = smov %s4126_s19 }
 0x33b   : > { %p24_p8 = scmp.ge.s32.totalorder %s27_s23, 4   ;;  %s6197_s19 = smov %s4130_s20 }
 0x33c   : > { %s6198_s20 = smov %s4359_s6  ;;  %s6199_s21 = smov %s4138_s22 }
 0x33d   : > { %s6200_s22 = smov %s6202_s15  ;;  %26 = sbr.rel (!%p24_p8) target bundleno = 10 (0xa), region = 132 }
 0x344   :  { %3231 = vsyncpa [#allocation4], 1 }
 0x345   :  { %3233 = vsyncpa [#allocation4 + $0x1], 1 }
 0x346   :  { %3234 = vsyncpa [#allocation7], 1 }
 0x347   :  { %3235 = vsyncpa [#allocation10], 1 }
 0x348   :  { %3236 = vsyncpa [#allocation5], 1 }
 0x349   :  { %3238 = vsyncpa [#allocation5 + $0x1], 1 }
 0x34a   :  { %3239 = vsyncpa [#allocation13], 1 }
 0x34b   :  { %3241 = vsyncpa [#allocation13 + $0x1], 1 }

// kernel: _lambda_.6
= control target key start
LH: loop header
LB: loop body
LE: loop exit
PB: predicated region body
PF: predicated region fallthrough
CT: control target
= control target key end

     0   :  { %11 = vsyncpa [#allocation4], 0  ;;  %s6679_s0 = inlined_call_operand.hbm [shape: bf16[2,16,16,64], index: 0, kind: input, shape index: {}]   ;;  %s6680_s1 = inlined_call_operand.hbm [shape: bf16[576,64], index: 1, kind: input, shape index: {}]   ;;  %s6681_s2 = inlined_call_operand.hbm [shape: f32[1,64], index: 2, kind: input, shape index: {}]   ;;  %s6682_s3 = inlined_call_operand.hbm [shape: f32[1,64], index: 3, kind: input, shape index: {}]   ;;  %s6683_s4 = inlined_call_operand.hbm [shape: bf16[2,16,16,64], index: 4, kind: output, shape index: {0}]   ;;  %s6684_s5 = inlined_call_operand.hbm [shape: f32[2,1,2,64], index: 5, kind: output, shape index: {1}]  }
   0x1   :  { %13 = vsyncpa [#allocation4 + $0x1], 0 }
   0x2   :  { %14 = vsyncpa [#allocation7], 0 }
   0x3   :  { %15 = vsyncpa [#allocation10], 0 }
   0x4   :  { %16 = vsyncpa [#allocation5], 0 }
   0x5   :  { %18 = vsyncpa [#allocation5 + $0x1], 0 }
   0x6   :  { %19 = vsyncpa [#allocation13], 0 }
   0x7   :  { %21 = vsyncpa [#allocation13 + $0x1], 0  ;;  %s4851_s18 = smov 0   ;;  %s4853_s19 = smov 0  }
   0x8   :  { %s4855_s20 = smov 0   ;;  %s4857_s21 = smov 0  }
   0x9   :  { %s4859_s22 = smov 0   ;;  %s4861_s23 = smov 0  }
   0xa LB: > { %6708 = sst [smem:[#allocation19_spill]] %s4788_s18  ;;  %s3726_s24 = sadd.s32 4294967295, %s4808_s23   ;;  %s4808_s23 = sphi %s4861_s23, %s27_s23   ;;  %s4804_s22 = sphi %s4859_s22, %s6778_s22   ;;  %s4800_s21 = sphi %s4857_s21, %s6777_s21   ;;  %s4796_s20 = sphi %s4855_s20, %s6776_s20   ;;  %s4792_s19 = sphi %s4853_s19, %s6775_s19   ;;  %s4788_s18 = sphi %s4851_s18, %s6774_s18  }
   0xb   : > { %s3727_s25 = sadd.s32 4294967294, %s4808_s23   ;;  %p59_p0 = scmp.ne.s32.totalorder %s4792_s19, %s4788_s18 }
   0xc   : > { %p4885_p1 = scmp.eq.s32.totalorder %s3726_s24, 0  ;;  %p4889_p2 = scmp.eq.s32.totalorder %s3726_s24, 1 }
   0xd   : > { %p154_p3 = scmp.eq.s32.totalorder %s3727_s25, 1  ;;  %p3728_p5 = scmp.ge.s32.totalorder %s4808_s23, 1 }
   0xe   : > { %s6709_s26 = scalar_select %p4885_p1, 1, 0 }
   0xf   : > { %s6710_s27 = scalar_select %p4889_p2, 1, 0 }
  0x10   : > { %p4895_p4 = por %p4885_p1, %p59_p0  ;;  %p4900_p6 = por %p154_p3, %p59_p0 }
  0x11   : > { %p189_p7 = scmp.lt.s32.totalorder %s4808_s23, 3  ;;  %s4810_s6 = smov [#allocation6]  }
  0x12   : > { %s6711_s28 = scalar_select %p4895_p4, 1, 0 }
  0x13   : > { %s6712_s29 = scalar_select %p4900_p6, 1, 0 }
  0x14   : > { %p4905_p8 = pnand %p3728_p5, %p189_p7  ;;  %s201_s7 = sshll.u32 %s4810_s6, 4  ;;  %s4909_s7 = int_to_ptr.vmem [resolvable:$true] %s201_s7 }
  0x15   : > { %6713 = sst [smem:[#allocation20_spill]] %s6712_s29  ;;  %s4811_s9 = smov [#allocation8]  }
  0x16   : > { %s6714_s30 = scalar_select %p4905_p8, 1, 0 }
  0x17   : > { %p4415_p9 = pneg %p4905_p8  ;;  %s215_s10 = sshll.u32 %s4811_s9, 4  ;;  %s4920_s10 = int_to_ptr.vmem [resolvable:$true] %s215_s10 }
  0x18   : > { %s4812_s11 = smov [#allocation9]   ;;  %s4572_s15 = scalar_lea.hbm %s6680_s1, 4608 }
  0x19   : > { %p4916_p11 = pnand %p4415_p9, %p4885_p1  ;;  %s4922_s12 = sshll.u32 %s4812_s11, 4  ;;  %s227_s12 = int_to_ptr.vmem [resolvable:$true] %s4922_s12 }
  0x1a   : > { %p4573_p12 = scmp.ne.s32.totalorder %s6680_s1, %s4572_s15  ;;  %p4579_p5 = scmp.lt.u32.totalorder %s4572_s15, %s6680_s1 }
  0x1b   : > { %p4932_p13 = pneg %p4916_p11 }
  0x1d   : > { %p4575_p0 = pnand %p4932_p13, %p4573_p12 }
  0x1f   : > { %p4576_p3 = pneg %p4575_p0 }
  0x21   : > { %p4581_p7 = pnand %p4579_p5, %p4576_p3 }
  0x23   : > { %4584 = shalt.err (!%p4581_p7)
}
  0x24   : > { %s4585_s9 = scalar_lea.vmem %s4909_s7, 4608  ;;  %p4593_p1 = scmp.lt.s32.totalorder %s4909_s7, %s4909_s7 }
  0x25   : > { %p4586_p9 = scmp.ne.s32.totalorder %s4909_s7, %s4585_s9  ;;  %p4594_p4 = scmp.lt.s32.totalorder %s4585_s9, %s4585_s9 }
  0x27   : > { %p4588_p10 = pnand %p4586_p9, %p4932_p13  ;;  %p4595_p12 = por %p4594_p4, %p4593_p1 }
  0x29   : > { %p4589_p6 = pneg %p4588_p10 }
  0x2b   : > { %p4596_p0 = pnand %p4595_p12, %p4589_p6 }
  0x2d   : > { %4599 = shalt.err (!%p4596_p0)
}
  0x2e   : > { %s4813_s11 = smov 64   ;;  %s4814_s13 = smov 4  }
  0x2f   : > { %4418 = dma.hbm_to_vmem [thread:$0]  (!%p4916_p11), %s6680_s1, 4608, %s4909_s7, [#allocation7], %s4813_s11, %s4813_s11, %s4814_s13  }
  0x30   : > { %s4600_s25 = scalar_lea.hbm %s6681_s2, 16 }
  0x31   : > { %p4601_p1 = scmp.ne.s32.totalorder %s6681_s2, %s4600_s25  ;;  %p4607_p10 = scmp.lt.u32.totalorder %s4600_s25, %s6681_s2 }
  0x33   : > { %p4603_p4 = pnand %p4601_p1, %p4932_p13 }
  0x35   : > { %p4604_p6 = pneg %p4603_p4 }
  0x37   : > { %p4609_p3 = pnand %p4607_p10, %p4604_p6 }
  0x39   : > { %4612 = shalt.err (!%p4609_p3)
}
  0x3a   : > { %s4613_s7 = scalar_lea.vmem %s4920_s10, 16  ;;  %s4620_s14 = scalar_lea.vmem %s4920_s10, 32 }
  0x3b   : > { %p4614_p5 = scmp.ne.s32.totalorder %s4920_s10, %s4613_s7  ;;  %p4621_p12 = scmp.lt.s32.totalorder %s4920_s10, %s4920_s10 }
  0x3c   : > { %p4622_p0 = scmp.lt.s32.totalorder %s4620_s14, %s4613_s7 }
  0x3d   : > { %p4616_p7 = pnand %p4614_p5, %p4932_p13 }
  0x3e   : > { %p4623_p1 = por %p4622_p0, %p4621_p12 }
  0x3f   : > { %p4617_p9 = pneg %p4616_p7 }
  0x41   : > { %p4624_p4 = pnand %p4623_p1, %p4617_p9 }
  0x43   : > { %4627 = shalt.err (!%p4624_p4)
}
  0x44   : > { %4421 = dma.hbm_to_vmem [thread:$0]  (!%p4916_p11), %s6681_s2, 16, %s4920_s10, [#allocation7]  }
  0x45   : > { %s4628_s17 = scalar_lea.hbm %s6682_s3, 16 }
  0x46   : > { %p4629_p6 = scmp.ne.s32.totalorder %s6682_s3, %s4628_s17  ;;  %p4635_p5 = scmp.lt.u32.totalorder %s4628_s17, %s6682_s3 }
  0x48   : > { %p4631_p10 = pnand %p4629_p6, %p4932_p13 }
  0x4a   : > { %p4632_p3 = pneg %p4631_p10 }
  0x4c   : > { %p4637_p7 = pnand %p4635_p5, %p4632_p3 }
  0x4e   : > { %4640 = shalt.err (!%p4637_p7)
}
  0x4f   : > { %s4641_s14 = scalar_lea.vmem %s227_s12, 16  ;;  %s4648_s10 = scalar_lea.vmem %s227_s12, 32 }
  0x50   : > { %p4642_p9 = scmp.ne.s32.totalorder %s227_s12, %s4641_s14  ;;  %p4649_p1 = scmp.lt.s32.totalorder %s227_s12, %s227_s12 }
  0x51   : > { %p4650_p4 = scmp.lt.s32.totalorder %s4648_s10, %s4641_s14 }
  0x52   : > { %p4644_p12 = pnand %p4642_p9, %p4932_p13 }
  0x53   : > { %p4651_p8 = por %p4650_p4, %p4649_p1 }
  0x54   : > { %p4645_p0 = pneg %p4644_p12 }
  0x56   : > { %p4652_p2 = pnand %p4651_p8, %p4645_p0 }
  0x58   : > { %4655 = shalt.err (!%p4652_p2)
}
  0x59   : > { %4424 = dma.hbm_to_vmem [thread:$0]  (!%p4916_p11), %s6682_s3, 16, %s227_s12, [#allocation10]  }
  0x5a   : > { %s46_s24 = sadd.s32 1, %s4796_s20  ;;  %s39_s15 = sadd.s32 1, %s4804_s22 }
  0x5b   : > { %p53_p2 = scmp.ne.s32.totalorder %s4796_s20, %s4792_s19  ;;  %p41_p8 = scmp.ge.s32.totalorder %s39_s15, 2 }
  0x5c   : > { %p54_p13 = scmp.eq.s32.totalorder %s4808_s23, 0  ;;  %p6717_p6 = scmp.ne.s32.totalorder %s6710_s27, 0 }
  0x5d   : > { %p4439_p3 = scmp.lt.s32.totalorder %s4808_s23, 2  ;;  %s6780_s15 = smov (%p41_p8, %s39_s15), 0 }
  0x5e   : > { %p5006_p10 = por %p6717_p6, %p53_p2  ;;  %p55_p5 = por %p54_p13, %p53_p2 }
  0x5f   : > { %s237_s16 = sand.u32 1, %s4796_s20   ;;  %s43_s17 = ssub.s32 %s4804_s22, %s6780_s15 }
  0x60   : > { %p44_p7 = scmp.eq.s32.totalorder %s43_s17, 0  ;;  %s3733_s12 = sshll.u32 %s237_s16, 7 }
  0x61   : > { %s3948_s25 = sshll.u32 %s4804_s22, 11  ;;  %s241_s14 = scalar_lea.vmem [#allocation3], %s3733_s12 }
  0x62   : > { %s5018_s6 = scalar_select %p44_p7, %s4796_s20, %s46_s24  }
  0x63   : > { %s5023_s27 = scalar_lea.hbm %s6679_s0, %s3948_s25  ;;  %s248_s10 = sshll.u32 %s241_s14, 4  ;;  %s5025_s10 = int_to_ptr.vmem [resolvable:$true] %s248_s10 }
  0x64   : > { %p5029_p11 = pnand %p4439_p3, %p55_p5  ;;  %s5033_s29 = scalar_lea.sflag [#allocation4], %s237_s16 }
  0x65   : > { %s4656_s24 = scalar_lea.hbm %s5023_s27, 2048  ;;  %s4661_s25 = scalar_lea.hbm %s6679_s0, 4096 }
  0x66   : > { %p4657_p9 = scmp.ne.s32.totalorder %s5023_s27, %s4656_s24  ;;  %p4658_p12 = pneg %p5029_p11 }
  0x67   : > { %p4662_p4 = scmp.lt.u32.totalorder %s5023_s27, %s6679_s0  ;;  %p4663_p2 = scmp.lt.u32.totalorder %s4661_s25, %s4656_s24 }
  0x68   : > { %p4659_p0 = pnand %p4658_p12, %p4657_p9  ;;  %p4665_p13 = scmp.lt.u32.totalorder %s4656_s24, %s5023_s27 }
  0x69   : > { %p4664_p8 = por %p4663_p2, %p4662_p4 }
  0x6a   : > { %p4660_p1 = pneg %p4659_p0 }
  0x6b   : > { %p4666_p6 = por %p4665_p13, %p4664_p8 }
  0x6d   : > { %p4667_p3 = pnand %p4666_p6, %p4660_p1 }
  0x6f   : > { %4670 = shalt.err (!%p4667_p3)
}
  0x70   : > { %s4671_s16 = scalar_lea.vmem %s5025_s10, 2048  ;;  %s4815_s14 = smov [#allocation3]  }
  0x71   : > { %p4672_p5 = scmp.ne.s32.totalorder %s5025_s10, %s4671_s16  ;;  %s4676_s17 = sshll.u32 %s4815_s14, 4  ;;  %s4677_s17 = int_to_ptr.vmem [resolvable:$false] %s4676_s17 }
  0x72   : > { %s4678_s12 = scalar_lea.vmem %s4677_s17, 4096  ;;  %p4679_p0 = scmp.lt.s32.totalorder %s5025_s10, %s4677_s17 }
  0x73   : > { %p4674_p7 = pnand %p4672_p5, %p4658_p12  ;;  %p4680_p4 = scmp.lt.s32.totalorder %s4678_s12, %s4671_s16 }
  0x75   : > { %p4675_p9 = pneg %p4674_p7  ;;  %p4681_p2 = por %p4680_p4, %p4679_p0 }
  0x77   : > { %p4682_p8 = pnand %p4681_p2, %p4675_p9 }
  0x79   : > { %4685 = shalt.err (!%p4682_p8)
}
  0x7a   : > { %4428 = dma.hbm_to_vmem [thread:$0]  (!%p5029_p11), %s5023_s27, 2048, %s5025_s10, %s5033_s29, %s4813_s11, %s4813_s11, %s4814_s13  }
  0x7b   : > { %p6720_p12 = scmp.ne.s32.totalorder %s6714_s30, 0 }
  0x7d   : > { %260 = sbr.rel (%p6720_p12) target bundleno = 791 (0x317), region = 36 }
  0x84   : > { %s5067_s24 = sand.u32 1, %s4792_s19   ;;  %p6721_p1 = scmp.ne.s32.totalorder %s6711_s28, 0 }
  0x85   : > { %s3737_s25 = sshll.u32 %s5067_s24, 7  ;;  %s263_s9 = scalar_lea.sflag [#allocation4], %s5067_s24 }
  0x86   : > { %s5073_s18 = scalar_lea.vmem [#allocation3], %s3737_s25 }
  0x87   : > { %4767 = dma.done.wait (%p6721_p1), %s263_s9, 2048  }
  0x88   : > { %4769 = vsyncadd (%p6721_p1), %s263_s9, 4294965248  ;;  %p6722_p11 = scmp.ne.s32.totalorder %s6709_s26, 0 }
  0x8a   : > { %4771 = dma.done.wait (%p6722_p11), [#allocation7], 4624  }
  0x8b   : > { %4773 = vsyncadd (%p6722_p11), [#allocation7], 4294962672 }
  0x8c   : > { %4775 = dma.done.wait (%p6722_p11), [#allocation10], 16  }
  0x8d   : > { %4777 = vsyncadd (%p6722_p11), [#allocation10], 4294967280  ;;  %vm1022_vm0 = vcmask 519168   ;;  %vm314_vm1 = vcmask 516096   ;;  %vm315_vm2 = vsmask.f32 256 }
  0x8e   : > { %v4816_v0 = vmov 0   ;;  %vm371_vm3 = vsmask.f32 7938  ;;  %vm5090_vm4 = vmand %vm314_vm1, %vm315_vm2  ;;  %v5099_v3 = vld [vmem:[#allocation8] ss:$0 sm:$0xff]  ;;  %v4092_v26 = vld [vmem:[%s5073_s18 + $0x58] sm:$0xff]  }
  0x8f   : > { %1144 = vst.msk [vmem:[#allocation2 + $0x4] sm:$0xf] %vm1022_vm0, %v4816_v0  ;;  %1206 = vst.msk [vmem:[#allocation2 + $0xd0] sm:$0xf] %vm1022_vm0, %v4816_v0  ;;  %v320_v4 = vld [vmem:[#allocation2 + $0xc] sm:$0x1]  ;;  %v4064_v37 = vunpack.c.l.bf16 %v4092_v26  ;;  %v4065_v38 = vunpack.c.h.bf16 %v4092_v26 }
  0x90   : > { %vm5095_vm5 = vmand %vm314_vm1, %vm371_vm3  ;;  %v5101_v5 = vld [vmem:[#allocation9] ss:$0 sm:$0xff]  ;;  %v321_v6 = vsel %vm5090_vm4, 0, %v320_v4  ;;  %v317_v8 = vld [vmem:[#allocation2] sm:$0x1]  ;;  %s4817_s26 = smov 64  }
  0x91   : > { %v4019_v7 = vld [vmem:[%s5073_s18] sm:$0xff]   ;;  %v373_v9 = vld [vmem:[#allocation2 + $0x8] sm:$0x1]  ;;  %322 = vst [vmem:[#allocation2 + $0xc] sm:$0x1] %v321_v6  ;;  %v318_v12 = vsel %vm5090_vm4, 0, %v317_v8  ;;  %vm5131_vm7 = vmand %vm1022_vm0, %vm371_vm3  ;;  %v523_v46 = vmul.f32 %v4064_v37, %v5099_v3  ;;  %v524_v47 = vmul.f32 %v4065_v38, %v5099_v3 }
  0x92   : > { %v4020_v10 = vunpack.c.l.bf16 %v4019_v7  ;;  %v4021_v11 = vunpack.c.h.bf16 %v4019_v7  ;;  %v374_v13 = vsel %vm5095_vm5, 0, %v373_v9  ;;  %v356_v15 = vld [vmem:[#allocation2 + $0x9c] sm:$0x1]  ;;  %319 = vst [vmem:[#allocation2] sm:$0x1] %v318_v12  ;;  %v4082_v36 = vld [vmem:[%s5073_s18 + $0x8] sm:$0xff]  }
  0x93   : > { %375 = vst [vmem:[#allocation2 + $0x8] sm:$0x1] %v374_v13  ;;  %v357_v18 = vsel %vm5090_vm4, 0, %v356_v15  ;;  %v4093_v19 = vld [vmem:[%s5073_s18 + $0x60] sm:$0xff]   ;;  %v353_v20 = vld [vmem:[#allocation2 + $0x90] sm:$0x1]  ;;  %v4024_v48 = vunpack.c.l.bf16 %v4082_v36  ;;  %v561_v57 = vadd.f32 %v5101_v5, %v523_v46  ;;  %v562_v58 = vadd.f32 %v5101_v5, %v524_v47 }
  0x94   : > { %v501_v21 = vmul.f32 %v4020_v10, %v5099_v3  ;;  %v502_v22 = vmul.f32 %v4021_v11, %v5099_v3  ;;  %358 = vst [vmem:[#allocation2 + $0x9c] sm:$0x1] %v357_v18  ;;  %v4068_v23 = vunpack.c.l.bf16 %v4093_v19  ;;  %v4069_v24 = vunpack.c.h.bf16 %v4093_v19  ;;  %v409_v25 = vld [vmem:[#allocation2 + $0x98] sm:$0x1]  ;;  %v4542_v42 = vld [vmem:[#allocation6 + $0xe8] sm:$0xff]   ;;  %s6414_s28 = scalar_lea.vmem [#allocation11], %s3737_s25 }
  0x95   : > { %v323_v27 = vld [vmem:[#allocation2 + $0x18] sm:$0x1]  ;;  %v354_v30 = vsel %vm5090_vm4, 0, %v353_v20  ;;  %v410_v31 = vsel %vm5095_vm5, 0, %v409_v25  ;;  %vm699_vm6 = vsmask.f32 4368  ;;  %v4025_v9 = vunpack.c.h.bf16 %v4082_v36 }
  0x96   : > { %v1263_v14 = vld [vmem:[#allocation2 + $0x4] sm:$0xf]  ;;  %v539_v32 = vadd.f32 %v5101_v5, %v501_v21  ;;  %v540_v33 = vadd.f32 %v5101_v5, %v502_v22  ;;  %v525_v34 = vmul.f32 %v4068_v23, %v5099_v3  ;;  %v526_v35 = vmul.f32 %v4069_v24, %v5099_v3  ;;  %355 = vst [vmem:[#allocation2 + $0x90] sm:$0x1] %v354_v30  ;;  %vm5151_vm9 = vmor %vm315_vm2, %vm699_vm6  ;;  %s4017_s30 = sshll.u32 %s4800_s21, 11  ;;  %s3558_s11 = sshll.u32 %s6414_s28, 4  ;;  %s6594_s11 = int_to_ptr.vmem [resolvable:$true] %s3558_s11 }
  0x97   : > { %v1329_v16 = vshll.u32 %v1263_v14, 16  ;;  %v1333_v17 = vshrl.u32 %v1263_v14, 16  ;;  %411 = vst [vmem:[#allocation2 + $0x98] sm:$0x1] %v410_v31  ;;  %v324_v39 = vsel %vm5090_vm4, 0, %v323_v27  ;;  %v593_v4 = vmax.f32 %v561_v57, 0.0  ;;  %s6588_s10 = scalar_lea.hbm %s6683_s4, %s4017_s30 }
  0x98   : > { %v571_v40 = vmax.f32 %v539_v32, 0.0  ;;  %v572_v41 = vmax.f32 %v540_v33, 0.0  ;;  %v563_v43 = vadd.f32 %v5101_v5, %v525_v34  ;;  %v564_v44 = vadd.f32 %v5101_v5, %v526_v35  ;;  %325 = vst [vmem:[#allocation2 + $0x18] sm:$0x1] %v324_v39  ;;  %v1024_v12 = vld [vmem:[#allocation2 + $0xc] sm:$0xf] }
  0x99   : > { %v5116_v28 = vrot.slane %v1329_v16, 5  ;;  %v1335_v29 = vrot.slane %v1333_v17, 4  ;;  %v1141_v51 = vld [vmem:[#allocation2] sm:$0xf]  ;;  %vm1316_vm8 = vsmask.f32 3328  ;;  %v503_v10 = vmul.f32 %v4024_v48, %v5099_v3 }
  0x9a   : > { %v3949_v49 = vpack.c.bf16 %v571_v40, %v571_v40  ;;  %v3950_v50 = vpack.c.bf16 %v572_v41, %v572_v41  ;;  %v1145_v52 = vld [vmem:[#allocation2 + $0x8] sm:$0x1]  ;;  %v595_v53 = vmax.f32 %v563_v43, 0.0  ;;  %v596_v54 = vmax.f32 %v564_v44, 0.0  ;;  %s3537_s29 = scalar_lea.sflag [#allocation5], %s5067_s24  ;;  %s4686_s7 = scalar_lea.vmem %s6594_s11, 2048 }
  0x9b   : > { %v1336_v45 = vor.u32 %v1335_v29, %v5116_v28  ;;  %v1142_v55 = vsel %vm5131_vm7, 0, %v1141_v51  ;;  %v1146_v56 = vsel %vm5090_vm4, 0, %v1145_v52  ;;  %v594_v6 = vmax.f32 %v562_v58, 0.0  ;;  %v1109_v26 = vld [vmem:[#allocation2 + $0x9c] sm:$0xf]  ;;  %p4687_p13 = scmp.ne.s32.totalorder %s6594_s11, %s4686_s7  ;;  %s4818_s16 = smov [#allocation11]  }
  0x9c   : > { %v702_v59 = vshrl.u32 %v3949_v49, 16  ;;  %v705_v60 = vshll.u32 %v3949_v49, 16  ;;  %v710_v61 = vshrl.u32 %v3950_v50, 16  ;;  %v713_v62 = vshll.u32 %v3950_v50, 16  ;;  %1143 = vst [vmem:[#allocation2] sm:$0xf] %v1142_v55 }
  0x9d   : > { %1147 = vst [vmem:[#allocation2 + $0x8] sm:$0x1] %v1146_v56  ;;  %v3973_v63 = vpack.c.bf16 %v595_v53, %v595_v53  ;;  %v3974_v0 = vpack.c.bf16 %v596_v54, %v596_v54  ;;  %vm1317_vm10 = vsmask.f32 7440  ;;  %v5156_v20 = vrot.slane %v1336_v45, 4  ;;  %p4688_p6 = pnand %p4687_p13, %p5006_p10  ;;  %s4690_s14 = sshll.u32 %s4818_s16, 4  ;;  %s4691_s14 = int_to_ptr.vmem [resolvable:$false] %s4690_s14 }
  0x9e   : > { %v704_v7 = vrot.slane %v702_v59, 7  ;;  %v5146_v8 = vrot.slane %v710_v61, 7  ;;  %v3971_v23 = vpack.c.bf16 %v593_v4, %v593_v4  ;;  %v3972_v27 = vpack.c.bf16 %v594_v6, %v594_v6  ;;  %v359_v45 = vld [vmem:[#allocation2 + $0xa8] sm:$0x1]  ;;  %vm5175_vm11 = vmor %vm1316_vm8, %vm1317_vm10  ;;  %v1102_v53 = vld [vmem:[#allocation2 + $0x90] sm:$0xf]  ;;  %p4693_p5 = scmp.lt.s32.totalorder %s6594_s11, %s4691_s14 }
  0x9f   : > { %v906_v13 = vshrl.u32 %v3973_v63, 16  ;;  %v909_v14 = vshll.u32 %v3973_v63, 16  ;;  %v914_v15 = vshrl.u32 %v3974_v0, 16  ;;  %v917_v16 = vshll.u32 %v3974_v0, 16  ;;  %v1106_v59 = vld [vmem:[#allocation2 + $0x98] sm:$0x1]  ;;  %p4689_p3 = pneg %p4688_p6 }
  0xa0   : > { %v707_v17 = vor.u32 %v705_v60, %v704_v7  ;;  %v708_v18 = vrot.slane %v704_v7, 4  ;;  %v715_v19 = vor.u32 %v713_v62, %v5146_v8  ;;  %v504_v29 = vmul.f32 %v4025_v9, %v5099_v3  ;;  %v4094_v61 = vld [vmem:[%s5073_s18 + $0x68] sm:$0xff]   ;;  %s4692_s17 = scalar_lea.vmem %s4691_s14, 4096 }
  0xa1   : > { %v908_v21 = vrot.slane %v906_v13, 7  ;;  %v5158_v22 = vrot.slane %v914_v15, 7  ;;  %v541_v35 = vadd.f32 %v5101_v5, %v503_v10  ;;  %v717_v36 = vrot.slane %v5146_v8, 4  ;;  %v326_v8 = vld [vmem:[#allocation2 + $0x24] sm:$0x1]  ;;  %p4694_p7 = scmp.lt.s32.totalorder %s4692_s17, %s4686_s7 }
  0xa2   : > { %v716_v24 = vsel %vm5151_vm9, %v708_v18, %v715_v19  ;;  %v1025_v25 = vsel %vm5131_vm7, %v707_v17, %v1024_v12  ;;  %v889_v43 = vshrl.u32 %v3971_v23, 16  ;;  %v892_v44 = vshll.u32 %v3971_v23, 16  ;;  %v376_v18 = vld [vmem:[#allocation2 + $0x14] sm:$0x1] }
  0xa3   : > { %1026 = vst [vmem:[#allocation2 + $0xc] sm:$0xf] %v1025_v25  ;;  %1028 = vst.msk [vmem:[#allocation2 + $0x10] sm:$0xf] %vm1022_vm0, %v716_v24  ;;  %v1262_v30 = vld [vmem:[#allocation2] sm:$0xf]  ;;  %v911_v32 = vor.u32 %v909_v14, %v908_v21  ;;  %v919_v34 = vor.u32 %v917_v16, %v5158_v22  ;;  %v542_v54 = vadd.f32 %v5101_v5, %v504_v29  ;;  %v4072_v17 = vunpack.c.l.bf16 %v4094_v61  ;;  %p4695_p9 = por %p4694_p7, %p4693_p5 }
  0xa4   : > { %v1264_v31 = vld [vmem:[#allocation2 + $0x8] sm:$0x1]  ;;  %v912_v33 = vrot.slane %v908_v21, 4  ;;  %v1320_v37 = vshrl.u32 %v1262_v30, 16  ;;  %v1323_v38 = vshll.u32 %v1262_v30, 16  ;;  %v897_v50 = vshrl.u32 %v3972_v27, 16 }
  0xa5   : > { %v1339_v39 = vshll.u32 %v1264_v31, 16  ;;  %v1110_v41 = vsel %vm5131_vm7, %v911_v32, %v1109_v26  ;;  %v891_v51 = vrot.slane %v889_v43, 7  ;;  %v900_v52 = vshll.u32 %v3972_v27, 16  ;;  %p4696_p0 = pnand %p4695_p9, %p4689_p3 }
  0xa6   : > { %v920_v40 = vsel %vm5151_vm9, %v912_v33, %v919_v34  ;;  %v1322_v47 = vrot.slane %v1320_v37, 4  ;;  %v1325_v48 = vrot.slane %v1323_v38, 5  ;;  %1111 = vst [vmem:[#allocation2 + $0x9c] sm:$0xf] %v1110_v41  ;;  %v573_v55 = vmax.f32 %v541_v35, 0.0 }
  0xa7   : > { %v1341_v49 = vrot.slane %v1339_v39, 5  ;;  %1112 = vst.msk [vmem:[#allocation2 + $0xa0] sm:$0xf] %vm1022_vm0, %v920_v40  ;;  %v921_v57 = vrot.slane %v5158_v22, 4  ;;  %v899_v58 = vrot.slane %v897_v50, 7  ;;  %v360_v60 = vsel %vm5090_vm4, 0, %v359_v45 }
  0xa8   : > { %v1326_v56 = vor.u32 %v1325_v48, %v1322_v47  ;;  %v894_v63 = vor.u32 %v892_v44, %v891_v51  ;;  %v895_v0 = vrot.slane %v891_v51, 4  ;;  %v574_v4 = vmax.f32 %v542_v54, 0.0  ;;  %361 = vst [vmem:[#allocation2 + $0xa8] sm:$0x1] %v360_v60  ;;  %v412_v39 = vld [vmem:[#allocation2 + $0xa4] sm:$0x1] }
  0xa9   : > { %v1342_v62 = vsel %vm5175_vm11, %v5156_v20, %v1341_v49  ;;  %v902_v10 = vor.u32 %v900_v52, %v899_v58  ;;  %v904_v12 = vrot.slane %v899_v58, 4  ;;  %v3951_v13 = vpack.c.bf16 %v573_v55, %v573_v55  ;;  %v1032_v49 = vld [vmem:[#allocation2 + $0x18] sm:$0xf] }
  0xaa   : > { %v5188_v6 = vld [vmem:[#allocation2 + $0xc] sm:$0xf]  ;;  %v5190_v7 = vld [vmem:[#allocation2 + $0x10] sm:$0xf]  ;;  %v1327_v9 = vrot.slane %v1326_v56, 4  ;;  %v1103_v23 = vsel %vm5131_vm7, %v894_v63, %v1102_v53  ;;  %v3952_v35 = vpack.c.bf16 %v574_v4, %v574_v4  ;;  %v4073_v40 = vunpack.c.h.bf16 %v4094_v61 }
  0xab   : > { %v1357_v14 = vshrl.u32 %v5190_v7, 16  ;;  %v5195_v15 = vcombine.low %v5188_v6, %v5190_v7  ;;  %v1344_v16 = vshrl.u32 %v5188_v6, 16  ;;  %v1347_v19 = vshll.u32 %v5188_v6, 16  ;;  %1104 = vst [vmem:[#allocation2 + $0x90] sm:$0xf] %v1103_v23 }
  0xac   : > { %v1332_v20 = vsel %vm5175_vm11, %v1327_v9, %v5116_v28  ;;  %v903_v21 = vsel %vm5151_vm9, %v895_v0, %v902_v10  ;;  %v1353_v24 = vshll.u32 %v5190_v7, 16  ;;  %v1107_v28 = vsel %vm5090_vm4, %v904_v12, %v1106_v59 }
  0xad   : > { %2113 = vrot.lane.b32.xlu0 %v5195_v15, %s4817_s26  ;;  %v1346_v25 = vrot.slane %v1344_v16, 4  ;;  %v3819_v26 = vcombine.low %v1332_v20, %v1342_v62  ;;  %v5209_v27 = vld [vmem:[#allocation2 + $0x9c] sm:$0xf]  ;;  %1105 = vst.msk [vmem:[#allocation2 + $0x94] sm:$0xf] %vm1022_vm0, %v903_v21  ;;  %v5216_v30 = vrot.slane %v1357_v14, 4  ;;  %v527_v41 = vmul.f32 %v4072_v17, %v5099_v3 }
  0xae   : > { %v5211_v29 = vld [vmem:[#allocation2 + $0xa0] sm:$0xf]  ;;  %v1349_v31 = vrot.slane %v1347_v19, 5  ;;  %v1632_v32 = vshrl.u32 %v5209_v27, 16  ;;  %v1635_v33 = vshll.u32 %v5209_v27, 16  ;;  %v719_v37 = vshrl.u32 %v3951_v13, 16 }
  0xaf   : > { %1108 = vst [vmem:[#allocation2 + $0x98] sm:$0x1] %v1107_v28  ;;  %2030 = vrot.lane.b32.xlu1 %v3819_v26, %s4817_s26  ;;  %v5223_v34 = vcombine.low %v5209_v27, %v5211_v29  ;;  %v722_v38 = vshll.u32 %v3951_v13, 16  ;;  %v377_v43 = vsel %vm5095_vm5, 0, %v376_v18  ;;  %v1645_v45 = vshrl.u32 %v5211_v29, 16 }
  0xb0   : > { %v1350_v44 = vor.u32 %v1349_v31, %v1346_v25  ;;  %v721_v47 = vrot.slane %v719_v37, 7  ;;  %v727_v48 = vshrl.u32 %v3952_v35, 16  ;;  %378 = vst [vmem:[#allocation2 + $0x14] sm:$0x1] %v377_v43  ;;  %v5231_v50 = vrot.slane %v1353_v24, 5 }
  0xb1   : > { %2137 = vrot.lane.b32.xlu0 %v5223_v34, %s4817_s26  ;;  %v730_v51 = vshll.u32 %v3952_v35, 16  ;;  %v528_v52 = vmul.f32 %v4073_v40, %v5099_v3  ;;  %v565_v53 = vadd.f32 %v5101_v5, %v527_v41  ;;  %v413_v54 = vsel %vm5095_vm5, 0, %v412_v39 }
  0xb2   : > { %v724_v55 = vor.u32 %v722_v38, %v721_v47  ;;  %v5237_v56 = vrot.slane %v727_v48, 7  ;;  %v5239_v58 = vrot.slane %v1350_v44, 4  ;;  %414 = vst [vmem:[#allocation2 + $0xa4] sm:$0x1] %v413_v54  ;;  %v1298_v59 = vld [vmem:[#allocation2 + $0x90] sm:$0xf]  ;;  %v1360_v0 = vor.u32 %v5216_v30, %v5231_v50 }
  0xb3   : > { %v725_v61 = vrot.slane %v721_v47, 4  ;;  %v566_v62 = vadd.f32 %v5101_v5, %v528_v52  ;;  %v597_v63 = vmax.f32 %v565_v53, 0.0  ;;  %v1608_v9 = vshrl.u32 %v1298_v59, 16  ;;  %v1116_v54 = vld [vmem:[#allocation2 + $0xa8] sm:$0xf] }
  0xb4   : > { %v1299_v60 = vld [vmem:[#allocation2 + $0x94] sm:$0xf]  ;;  %v1611_v10 = vshll.u32 %v1298_v59, 16  ;;  %v732_v16 = vor.u32 %v730_v51, %v5237_v56  ;;  %v1033_v17 = vsel %vm5131_vm7, %v724_v55, %v1032_v49  ;;  %v1634_v18 = vrot.slane %v1632_v32, 4  ;;  %v4083_v55 = vld [vmem:[%s5073_s18 + $0x10] sm:$0xff]  }
  0xb5   : > { %v1617_v12 = vshll.u32 %v1299_v60, 16  ;;  %v1621_v13 = vshrl.u32 %v1299_v60, 16  ;;  %v1610_v19 = vrot.slane %v1608_v9, 4  ;;  %1034 = vst [vmem:[#allocation2 + $0x18] sm:$0xf] %v1033_v17  ;;  %v734_v25 = vrot.slane %v5237_v56, 4 }
  0xb6   : > { %v1300_v4 = vld [vmem:[#allocation2 + $0x98] sm:$0x1]  ;;  %v1613_v20 = vrot.slane %v1611_v10, 5  ;;  %v733_v24 = vsel %vm5151_vm9, %v725_v61, %v732_v16  ;;  %v598_v26 = vmax.f32 %v566_v62, 0.0  ;;  %v3975_v27 = vpack.c.bf16 %v597_v63, %v597_v63  ;;  %v379_v9 = vld [vmem:[#allocation2 + $0x20] sm:$0x1] }
  0xb7   : > { %v1627_v14 = vshll.u32 %v1300_v4, 16  ;;  %v1619_v21 = vrot.slane %v1617_v12, 5  ;;  %v1623_v23 = vrot.slane %v1621_v13, 4  ;;  %v1029_v28 = vld [vmem:[#allocation2 + $0x14] sm:$0x1]  ;;  %v1637_v41 = vrot.slane %v1635_v33, 5 }
  0xb8   : > { %v1614_v30 = vor.u32 %v1613_v20, %v1610_v19  ;;  %1035 = vst.msk [vmem:[#allocation2 + $0x1c] sm:$0xf] %vm1022_vm0, %v733_v24  ;;  %v1030_v32 = vsel %vm5090_vm4, %v717_v36, %v1029_v28  ;;  %v3976_v37 = vpack.c.bf16 %v598_v26, %v598_v26  ;;  %v923_v38 = vshrl.u32 %v3975_v27, 16  ;;  %v362_v4 = vld [vmem:[#allocation2 + $0xb4] sm:$0x1] }
  0xb9   : > { %v1624_v31 = vor.u32 %v1623_v23, %v1619_v21  ;;  %v1629_v35 = vrot.slane %v1627_v14, 5  ;;  %v926_v39 = vshll.u32 %v3975_v27, 16  ;;  %1031 = vst [vmem:[#allocation2 + $0x14] sm:$0x1] %v1030_v32  ;;  %v1113_v40 = vld [vmem:[#allocation2 + $0xa4] sm:$0x1]  ;;  %v1638_v52 = vor.u32 %v1637_v41, %v1634_v18 }
  0xba   : > { %v1615_v43 = vrot.slane %v1614_v30, 4  ;;  %v1114_v47 = vsel %vm5090_vm4, %v921_v57, %v1113_v40  ;;  %v1641_v48 = vshll.u32 %v5211_v29, 16  ;;  %v925_v49 = vrot.slane %v923_v38, 7  ;;  %v4095_v29 = vld [vmem:[%s5073_s18 + $0x70] sm:$0xff]  }
  0xbb   : > { %v1625_v44 = vrot.slane %v1624_v31, 4  ;;  %v931_v51 = vshrl.u32 %v3976_v37, 16  ;;  %v934_v36 = vshll.u32 %v3976_v37, 16  ;;  %1115 = vst [vmem:[#allocation2 + $0xa4] sm:$0x1] %v1114_v47  ;;  %v1647_v57 = vrot.slane %v1645_v45, 4 }
  0xbc   : > { %v1620_v53 = vsel %vm5175_vm11, %v1615_v43, %v1619_v21  ;;  %v5264_v22 = vrot.slane %v1641_v48, 5  ;;  %v5271_v60 = vld [vmem:[#allocation2 + $0x18] sm:$0xf]  ;;  %v928_v61 = vor.u32 %v926_v39, %v925_v49  ;;  %v929_v62 = vrot.slane %v925_v49, 4 }
  0xbd   : > { %v1630_v33 = vsel %vm5175_vm11, %v1625_v44, %v1629_v35  ;;  %v5273_v63 = vrot.slane %v931_v51, 7  ;;  %v1368_v10 = vshrl.u32 %v5271_v60, 16  ;;  %v1371_v12 = vshll.u32 %v5271_v60, 16 }
  0xbe   : > { %v5269_v59 = vcombine.low %v1620_v53, %v1630_v33  ;;  %v1361_v13 = vrot.slane %v1360_v0, 4  ;;  %v1648_v14 = vor.u32 %v1647_v57, %v5264_v22  ;;  %v1117_v17 = vsel %vm5131_vm7, %v928_v61, %v1116_v54 }
  0xbf   : > { %v5281_v45 = vld [vmem:[#allocation2 + $0x1c] sm:$0xf]  ;;  %v936_v16 = vor.u32 %v934_v36, %v5273_v63  ;;  %v1639_v18 = vrot.slane %v1638_v52, 4  ;;  %v327_v19 = vsel %vm5090_vm4, 0, %v326_v8  ;;  %v938_v20 = vrot.slane %v5273_v63, 4 }
  0xc0   : > { %6733 = vst [vmem:[#allocation21_spill] sm:$0xff] %v5269_v59  ;;  %2054 = vrot.lane.b32.xlu1 %v5269_v59, %s4817_s26  ;;  %v5290_v0 = vcombine.low %v5271_v60, %v5281_v45  ;;  %1118 = vst [vmem:[#allocation2 + $0xa8] sm:$0xf] %v1117_v17  ;;  %v5293_v21 = vld [vmem:[#allocation2 + $0x14] sm:$0x1]  ;;  %v1356_v23 = vsel %vm5175_vm11, %v5239_v58, %v5231_v50  ;;  %v1649_v24 = vrot.slane %v1648_v14, 4  ;;  %v4028_v28 = vunpack.c.l.bf16 %v4083_v55 }
  0xc1   : > { %328 = vst [vmem:[#allocation2 + $0x24] sm:$0x1] %v327_v19  ;;  %v937_v26 = vsel %vm5151_vm9, %v929_v62, %v936_v16  ;;  %v1363_v27 = vshll.u32 %v5293_v21, 16  ;;  %v4029_v30 = vunpack.c.h.bf16 %v4083_v55  ;;  %v363_v35 = vsel %vm5090_vm4, 0, %v362_v4 }
  0xc2   : > { %2115 = vrot.lane.b32.xlu0 %v5290_v0, %s4817_s26  ;;  %1119 = vst.msk [vmem:[#allocation2 + $0xac] sm:$0xf] %vm1022_vm0, %v937_v26  ;;  %v1303_v31 = vld [vmem:[#allocation2 + $0xa4] sm:$0x1]  ;;  %v4076_v32 = vunpack.c.l.bf16 %v4095_v29  ;;  %v4077_v50 = vunpack.c.h.bf16 %v4095_v29  ;;  %v380_v58 = vsel %vm5095_vm5, 0, %v379_v9  ;;  %v505_v39 = vmul.f32 %v4028_v28, %v5099_v3 }
  0xc3   : > { %v1365_v37 = vrot.slane %v1363_v27, 5  ;;  %v1651_v38 = vshll.u32 %v1303_v31, 16  ;;  %v506_v40 = vmul.f32 %v4029_v30, %v5099_v3  ;;  %364 = vst [vmem:[#allocation2 + $0xb4] sm:$0x1] %v363_v35  ;;  %381 = vst [vmem:[#allocation2 + $0x20] sm:$0x1] %v380_v58  ;;  %v1644_v54 = vsel %vm5175_vm11, %v1639_v18, %v5264_v22 }
  0xc4   : > { %v529_v41 = vmul.f32 %v4076_v32, %v5099_v3  ;;  %v530_v43 = vmul.f32 %v4077_v50, %v5099_v3  ;;  %v5313_v44 = vrot.slane %v1368_v10, 4  ;;  %v5315_v47 = vrot.slane %v1371_v12, 5  ;;  %v5349_v31 = vld [vmem:[%s5073_s18 + $0x18] sm:$0xff]  }
  0xc5   : > { %v1366_v48 = vsel %vm5175_vm11, %v1361_v13, %v1365_v37  ;;  %v1653_v8 = vrot.slane %v1651_v38, 5  ;;  %v543_v49 = vadd.f32 %v5101_v5, %v505_v39  ;;  %v544_v51 = vadd.f32 %v5101_v5, %v506_v40 }
  0xc6   : > { %v5321_v36 = vcombine.low %v1356_v23, %v1366_v48  ;;  %v567_v52 = vadd.f32 %v5101_v5, %v529_v41  ;;  %v568_v53 = vadd.f32 %v5101_v5, %v530_v43  ;;  %v1381_v62 = vshrl.u32 %v5281_v45, 16  ;;  %v4515_v48 = vld [vmem:[#allocation6 + $0x40] sm:$0xff]  }
  0xc7   : > { %v5325_v33 = vld [vmem:[#allocation2 + $0xa8] sm:$0xf]  ;;  %v1654_v57 = vsel %vm5175_vm11, %v1649_v24, %v1653_v8  ;;  %v575_v55 = vmax.f32 %v543_v49, 0.0  ;;  %v576_v61 = vmax.f32 %v544_v51, 0.0  ;;  %v1374_v10 = vor.u32 %v5315_v47, %v5313_v44  ;;  %v415_v24 = vld [vmem:[#allocation2 + $0xb0] sm:$0x1]  ;;  %4097 = vmatprep.subr.bf16.mxu0 %v4515_v48  ;;  %4381 = vmatprep.subr.bf16.mxu1 %v4515_v48 }
  0xc8   : > { %v1656_v4 = vshrl.u32 %v5325_v33, 16  ;;  %2032 = vrot.lane.b32.xlu0 %v5321_v36, %s4817_s26  ;;  %v599_v9 = vmax.f32 %v567_v52, 0.0  ;;  %v1659_v22 = vshll.u32 %v5325_v33, 16  ;;  %v600_v29 = vmax.f32 %v568_v53, 0.0  ;;  %v1039_v35 = vld [vmem:[#allocation2 + $0x24] sm:$0xf] }
  0xc9   : > { %v5338_v12 = vld [vmem:[#allocation2 + $0xac] sm:$0xf]  ;;  %v3953_v13 = vpack.c.bf16 %v575_v55, %v575_v55  ;;  %v3954_v14 = vpack.c.bf16 %v576_v61, %v576_v61  ;;  %v5345_v17 = vcombine.low %v1644_v54, %v1654_v57  ;;  %v1377_v23 = vshll.u32 %v5281_v45, 16  ;;  %v4516_v8 = vld [vmem:[#allocation6] sm:$0xff]   ;;  %v329_v53 = vld [vmem:[#allocation2 + $0x30] sm:$0x1] }
  0xca   : > { %v5343_v16 = vcombine.low %v5325_v33, %v5338_v12  ;;  %v3977_v18 = vpack.c.bf16 %v599_v9, %v599_v9  ;;  %v1036_v19 = vld [vmem:[#allocation2 + $0x20] sm:$0x1]  ;;  %v3978_v32 = vpack.c.bf16 %v600_v29, %v600_v29  ;;  %v1123_v40 = vld [vmem:[#allocation2 + $0xb4] sm:$0xf]  ;;  %v1383_v43 = vrot.slane %v1381_v62, 4  ;;  %4098 = vmatpush3.bf16.msra.mxu0 %v4516_v8  ;;  %4389 = vmatpush3.bf16.msra.mxu1 %v4516_v8 }
  0xcb   : > { %6734 = vst [vmem:[#allocation22_spill] sm:$0xff] %v5345_v17  ;;  %v736_v26 = vshrl.u32 %v3953_v13, 16  ;;  %v739_v27 = vshll.u32 %v3953_v13, 16  ;;  %v744_v28 = vshrl.u32 %v3954_v14, 16  ;;  %v747_v30 = vshll.u32 %v3954_v14, 16  ;;  %v4096_v14 = vld [vmem:[%s5073_s18 + $0x78] sm:$0xff]  }
  0xcc   : > { %2139 = vrot.lane.b32.xlu1 %v5343_v16, %s4817_s26  ;;  %v940_v50 = vshrl.u32 %v3977_v18, 16  ;;  %v943_v58 = vshll.u32 %v3977_v18, 16  ;;  %v1037_v37 = vsel %vm5090_vm4, %v734_v25, %v1036_v19  ;;  %v5359_v41 = vrot.slane %v1377_v23, 5  ;;  %v365_v13 = vld [vmem:[#allocation2 + $0xc0] sm:$0x1] }
  0xcd   : > { %v738_v38 = vrot.slane %v736_v26, 7  ;;  %v5357_v39 = vrot.slane %v744_v28, 7  ;;  %1038 = vst [vmem:[#allocation2 + $0x20] sm:$0x1] %v1037_v37  ;;  %v948_v51 = vshrl.u32 %v3978_v32, 16  ;;  %v951_v52 = vshll.u32 %v3978_v32, 16 }
  0xce   : > { %v942_v49 = vrot.slane %v940_v50, 7  ;;  %v416_v56 = vsel %vm5095_vm5, 0, %v415_v24  ;;  %v1669_v25 = vshrl.u32 %v5338_v12, 16  ;;  %v4032_v9 = vunpack.c.l.bf16 %v5349_v31  ;;  %v4517_v24 = vld [vmem:[#allocation6 + $0x48] sm:$0xff]  }
  0xcf   : > { %v741_v33 = vor.u32 %v739_v27, %v738_v38  ;;  %v742_v54 = vrot.slane %v738_v38, 4  ;;  %v749_v57 = vor.u32 %v747_v30, %v5357_v39  ;;  %417 = vst [vmem:[#allocation2 + $0xb0] sm:$0x1] %v416_v56  ;;  %v5367_v62 = vrot.slane %v948_v51, 7  ;;  %v4518_v26 = vld [vmem:[#allocation6 + $0x8] sm:$0xff]   ;;  %4099 = vmatprep.subr.bf16.mxu0 %v4517_v24  ;;  %4382 = vmatprep.subr.bf16.mxu1 %v4517_v24  ;;  %v4519_v56 = vld [vmem:[#allocation6 + $0x50] sm:$0xff]  }
  0xd0   : > { %2056 = vrot.lane.b32.xlu1 %v5345_v17, %s4817_s26  ;;  %v945_v55 = vor.u32 %v943_v58, %v942_v49  ;;  %v946_v61 = vrot.slane %v942_v49, 4  ;;  %v1384_v19 = vor.u32 %v1383_v43, %v5359_v41  ;;  %v1658_v23 = vrot.slane %v1656_v4, 4  ;;  %4100 = vmatpush3.bf16.msra.mxu0 %v4518_v26 }
  0xd1   : > { %v750_v29 = vsel %vm5151_vm9, %v742_v54, %v749_v57  ;;  %v1040_v18 = vsel %vm5131_vm7, %v741_v33, %v1039_v35  ;;  %v953_v27 = vor.u32 %v951_v52, %v5367_v62  ;;  %v5383_v30 = vrot.slane %v1374_v10, 4  ;;  %4390 = vmatpush3.bf16.msra.mxu1 %v4518_v26  ;;  %v4520_v57 = vld [vmem:[#allocation6 + $0x10] sm:$0xff]   ;;  %4101 = vmatprep.subr.bf16.mxu0 %v4519_v56 }
  0xd2   : > { %1041 = vst [vmem:[#allocation2 + $0x24] sm:$0xf] %v1040_v18  ;;  %1042 = vst.msk [vmem:[#allocation2 + $0x28] sm:$0xf] %vm1022_vm0, %v750_v29  ;;  %v1124_v28 = vsel %vm5131_vm7, %v945_v55, %v1123_v40  ;;  %v1661_v35 = vrot.slane %v1659_v22, 5  ;;  %v5385_v32 = vrot.slane %v1384_v19, 4  ;;  %v4033_v47 = vunpack.c.h.bf16 %v5349_v31  ;;  %4383 = vmatprep.subr.bf16.mxu1 %v4519_v56 }
  0xd3   : > { %1125 = vst [vmem:[#allocation2 + $0xb4] sm:$0xf] %v1124_v28  ;;  %v1665_v4 = vshll.u32 %v5338_v12, 16  ;;  %v1671_v50 = vrot.slane %v1669_v25, 4  ;;  %v330_v58 = vsel %vm5090_vm4, 0, %v329_v53  ;;  %v954_v37 = vsel %vm5151_vm9, %v946_v61, %v953_v27  ;;  %v4521_v55 = vld [vmem:[#allocation6 + $0x58] sm:$0xff]  }
  0xd4   : > { %v5392_v38 = vld [vmem:[#allocation2 + $0x20] sm:$0x1]  ;;  %v1662_v44 = vor.u32 %v1661_v35, %v1658_v23  ;;  %331 = vst [vmem:[#allocation2 + $0x30] sm:$0x1] %v330_v58  ;;  %v507_v10 = vmul.f32 %v4032_v9, %v5099_v3  ;;  %v382_v22 = vld [vmem:[#allocation2 + $0x2c] sm:$0x1]  ;;  %v4080_v48 = vunpack.c.l.bf16 %v4096_v14  ;;  %v508_v31 = vmul.f32 %v4033_v47, %v5099_v3  ;;  %4102 = vmatpush3.bf16.msra.mxu0 %v4520_v57 }
  0xd5   : > { %1126 = vst.msk [vmem:[#allocation2 + $0xb8] sm:$0xf] %vm1022_vm0, %v954_v37  ;;  %v1387_v12 = vshll.u32 %v5392_v38, 16  ;;  %v5398_v40 = vrot.slane %v1665_v4, 5  ;;  %v366_v43 = vsel %vm5090_vm4, 0, %v365_v13  ;;  %v4081_v52 = vunpack.c.h.bf16 %v4096_v14  ;;  %v4522_v23 = vld [vmem:[#allocation6 + $0x18] sm:$0xff]   ;;  %4391 = vmatpush3.bf16.msra.mxu1 %v4520_v57  ;;  %4103 = vmatprep.subr.bf16.mxu0 %v4521_v55 }
  0xd6   : > { %v1120_v8 = vld [vmem:[#allocation2 + $0xb0] sm:$0x1]  ;;  %v5402_v49 = vrot.slane %v1662_v44, 4  ;;  %v545_v51 = vadd.f32 %v5101_v5, %v507_v10  ;;  %367 = vst [vmem:[#allocation2 + $0xc0] sm:$0x1] %v366_v43  ;;  %v531_v54 = vmul.f32 %v4080_v48, %v5099_v3  ;;  %v751_v61 = vrot.slane %v5357_v39, 4  ;;  %4384 = vmatprep.subr.bf16.mxu1 %v4521_v55 }
  0xd7   : > { %v1389_v53 = vrot.slane %v1387_v12, 5  ;;  %v1121_v25 = vsel %vm5090_vm4, %v938_v20, %v1120_v8  ;;  %v1672_v33 = vor.u32 %v1671_v50, %v5398_v40  ;;  %v546_v9 = vadd.f32 %v5101_v5, %v508_v31  ;;  %v4524_v8 = vld [vmem:[#allocation6 + $0x20] sm:$0xff]  }
  0xd8   : > { %1122 = vst [vmem:[#allocation2 + $0xb0] sm:$0x1] %v1121_v25  ;;  %v577_v13 = vmax.f32 %v545_v51, 0.0  ;;  %v532_v14 = vmul.f32 %v4081_v52, %v5099_v3  ;;  %v1380_v20 = vsel %vm5175_vm11, %v5383_v30, %v5359_v41  ;;  %v569_v19 = vadd.f32 %v5101_v5, %v531_v54  ;;  %v4523_v30 = vld [vmem:[#allocation6 + $0x60] sm:$0xff]   ;;  %4104 = vmatpush3.bf16.msra.mxu0 %v4522_v23 }
  0xd9   : > { %v5415_v63 = vld [vmem:[#allocation2 + $0x24] sm:$0xf]  ;;  %v5417_v29 = vld [vmem:[#allocation2 + $0x28] sm:$0xf]  ;;  %v1390_v18 = vsel %vm5175_vm11, %v5385_v32, %v1389_v53  ;;  %v383_v3 = vsel %vm5095_vm5, 0, %v382_v22  ;;  %v1668_v28 = vsel %vm5175_vm11, %v5402_v49, %v5398_v40  ;;  %v5443_v4 = vrot.slane %v1672_v33, 4  ;;  %4392 = vmatpush3.bf16.msra.mxu1 %v4522_v23  ;;  %4105 = vmatprep.subr.bf16.mxu0 %v4523_v30 }
  0xda   : > { %v1392_v24 = vshrl.u32 %v5415_v63, 16  ;;  %v1395_v26 = vshll.u32 %v5415_v63, 16  ;;  %v5433_v27 = vcombine.low %v5415_v63, %v5417_v29  ;;  %v5435_v41 = vld [vmem:[#allocation2 + $0xb4] sm:$0xf]  ;;  %384 = vst [vmem:[#allocation2 + $0x2c] sm:$0x1] %v383_v3  ;;  %v5449_v37 = vcombine.low %v1380_v20, %v1390_v18  ;;  %4385 = vmatprep.subr.bf16.mxu1 %v4523_v30 }
  0xdb   : > { %v1405_v35 = vshrl.u32 %v5417_v29, 16  ;;  %v1680_v32 = vshrl.u32 %v5435_v41, 16  ;;  %v578_v50 = vmax.f32 %v546_v9, 0.0  ;;  %v3955_v44 = vpack.c.bf16 %v577_v13, %v577_v13  ;;  %v4525_v53 = vld [vmem:[#allocation6 + $0x68] sm:$0xff]   ;;  %v1046_v13 = vld [vmem:[#allocation2 + $0x30] sm:$0xf] }
  0xdc   : > { %2117 = vrot.lane.b32.xlu0 %v5433_v27, %s4817_s26  ;;  %v5447_v58 = vld [vmem:[#allocation2 + $0xb8] sm:$0xf]  ;;  %v570_v47 = vadd.f32 %v5101_v5, %v532_v14  ;;  %v601_v10 = vmax.f32 %v569_v19, 0.0  ;;  %v5456_v43 = vrot.slane %v1392_v24, 4  ;;  %v5458_v48 = vrot.slane %v1395_v26, 5  ;;  %4106 = vmatpush3.bf16.msra.mxu0 %v4524_v8  ;;  %v4526_v30 = vld [vmem:[#allocation6 + $0x28] sm:$0xff]  }
  0xdd   : > { %v5454_v22 = vcombine.low %v5435_v41, %v5447_v58  ;;  %v3956_v12 = vpack.c.bf16 %v578_v50, %v578_v50  ;;  %v753_v31 = vshrl.u32 %v3955_v44, 16  ;;  %v756_v51 = vshll.u32 %v3955_v44, 16  ;;  %v1130_v23 = vld [vmem:[#allocation2 + $0xc0] sm:$0xf]  ;;  %v418_v26 = vld [vmem:[#allocation2 + $0xbc] sm:$0x1]  ;;  %4393 = vmatpush3.bf16.msra.mxu1 %v4524_v8  ;;  %4107 = vmatprep.subr.bf16.mxu0 %v4525_v53 }
  0xde   : > { %v602_v52 = vmax.f32 %v570_v47, 0.0  ;;  %v3979_v56 = vpack.c.bf16 %v601_v10, %v601_v10  ;;  %v1683_v5 = vshll.u32 %v5435_v41, 16  ;;  %v1401_v57 = vshll.u32 %v5417_v29, 16  ;;  %4386 = vmatprep.subr.bf16.mxu1 %v4525_v53  ;;  %v4531_v41 = vld [vmem:[#allocation6 + $0xc0] sm:$0xff]  }
  0xdf   : > { %2141 = vrot.lane.b32.xlu1 %v5454_v22, %s4817_s26  ;;  %v1306_v25 = vld [vmem:[#allocation2 + $0xb0] sm:$0x1]  ;;  %v761_v33 = vshrl.u32 %v3956_v12, 16  ;;  %v764_v54 = vshll.u32 %v3956_v12, 16  ;;  %v755_v9 = vrot.slane %v753_v31, 7  ;;  %v1693_v18 = vshrl.u32 %v5447_v58, 16 }
  0xe0   : > { %2034 = vrot.lane.b32.xlu0 %v5449_v37, %s4817_s26  ;;  %v1675_v55 = vshll.u32 %v1306_v25, 16  ;;  %v3980_v14 = vpack.c.bf16 %v602_v52, %v602_v52  ;;  %v957_v20 = vshrl.u32 %v3979_v56, 16  ;;  %v960_v3 = vshll.u32 %v3979_v56, 16  ;;  %v4527_v31 = vld [vmem:[#allocation6 + $0x70] sm:$0xff]   ;;  %4108 = vmatpush3.bf16.msra.mxu0 %v4526_v30 }
  0xe1   : > { %v5467_v19 = vrot.slane %v761_v33, 7  ;;  %v1398_v24 = vor.u32 %v5458_v48, %v5456_v43  ;;  %v758_v44 = vor.u32 %v756_v51, %v755_v9  ;;  %v759_v47 = vrot.slane %v755_v9, 4  ;;  %v1043_v12 = vld [vmem:[#allocation2 + $0x2c] sm:$0x1]  ;;  %v332_v43 = vld [vmem:[#allocation2 + $0x3c] sm:$0x1]  ;;  %4394 = vmatpush3.bf16.msra.mxu1 %v4526_v30  ;;  %4109 = vmatprep.subr.bf16.mxu0 %v4527_v31 }
  0xe2   : > { %v1677_v50 = vrot.slane %v1675_v55, 5  ;;  %v959_v10 = vrot.slane %v957_v20, 7  ;;  %v965_v56 = vshrl.u32 %v3980_v14, 16  ;;  %v968_v25 = vshll.u32 %v3980_v14, 16  ;;  %v4085_v9 = vld [vmem:[%s5073_s18 + $0x20] sm:$0xff]   ;;  %v4528_v14 = vld [vmem:[#allocation6 + $0x30] sm:$0xff]   ;;  %4387 = vmatprep.subr.bf16.mxu1 %v4527_v31 }
  0xe3   : > { %v766_v52 = vor.u32 %v764_v54, %v5467_v19  ;;  %v5472_v33 = vrot.slane %v1401_v57, 5  ;;  %v1047_v8 = vsel %vm5131_vm7, %v758_v44, %v1046_v13  ;;  %vm1751_vm12 = vcmask 1042432   ;;  %v385_v13 = vld [vmem:[#allocation2 + $0x38] sm:$0x1]  ;;  %v335_v30 = vld [vmem:[#allocation2 + $0x48] sm:$0x1] }
  0xe4   : > { %v1678_v48 = vsel %vm5175_vm11, %v5443_v4, %v1677_v50  ;;  %v962_v51 = vor.u32 %v960_v3, %v959_v10  ;;  %v963_v55 = vrot.slane %v959_v10, 4  ;;  %vm1752_vm13 = vcmask 1046532   ;;  %1048 = vst [vmem:[#allocation2 + $0x30] sm:$0xf] %v1047_v8  ;;  %v4530_v10 = vld [vmem:[#allocation6 + $0x38] sm:$0xff]   ;;  %4110 = vmatpush3.bf16.msra.mxu0 %v4528_v14  ;;  %v5535_v8 = vld [vmem:[%s5073_s18 + $0x28] sm:$0xff]  }
  0xe5   : > { %v5485_v53 = vcombine.low %v1668_v28, %v1678_v48  ;;  %v767_v54 = vsel %vm5151_vm9, %v759_v47, %v766_v52  ;;  %v5489_v4 = vrot.slane %v965_v56, 7  ;;  %v1044_v57 = vsel %vm5090_vm4, %v751_v61, %v1043_v12  ;;  %v4529_v61 = vld [vmem:[#allocation6 + $0x78] sm:$0xff]   ;;  %4395 = vmatpush3.bf16.msra.mxu1 %v4528_v14  ;;  %v4532_v52 = vld [vmem:[#allocation6 + $0x100] sm:$0xff]   ;;  %vm5570_vm14 = vmor %vm1751_vm12, %vm1752_vm13 }
  0xe6   : > { %v955_v20 = vrot.slane %v5367_v62, 4  ;;  %1049 = vst.msk [vmem:[#allocation2 + $0x34] sm:$0xf] %vm1022_vm0, %v767_v54  ;;  %v1131_v40 = vsel %vm5131_vm7, %v962_v51, %v1130_v23  ;;  %1045 = vst [vmem:[#allocation2 + $0x2c] sm:$0x1] %v1044_v57  ;;  %v1407_v49 = vrot.slane %v1405_v35, 4  ;;  %v4036_v31 = vunpack.c.l.bf16 %v4085_v9  ;;  %4111 = vmatprep.subr.bf16.mxu0 %v4529_v61  ;;  %4388 = vmatprep.subr.bf16.mxu1 %v4529_v61 }
  0xe7   : > { %6735 = vst [vmem:[#allocation23_spill] sm:$0xff] %v5485_v53  ;;  %v419_v39 = vsel %vm5095_vm5, 0, %v418_v26  ;;  %2058 = vrot.lane.b32.xlu1 %v5485_v53, %s4817_s26  ;;  %v970_v28 = vor.u32 %v968_v25, %v5489_v4  ;;  %1132 = vst [vmem:[#allocation2 + $0xc0] sm:$0xf] %v1131_v40  ;;  %v5506_v3 = vrot.slane %v1398_v24, 4  ;;  %v1682_v23 = vrot.slane %v1680_v32, 4 }
  0xe8   : > { %420 = vst [vmem:[#allocation2 + $0xbc] sm:$0x1] %v419_v39  ;;  %v1685_v35 = vrot.slane %v1683_v5, 5  ;;  %v1408_v26 = vor.u32 %v1407_v49, %v5472_v33  ;;  %v1689_v50 = vshll.u32 %v5447_v58, 16  ;;  %v1695_v44 = vrot.slane %v1693_v18, 4  ;;  %4112 = vmatpush3.bf16.msra.mxu0 %v4530_v10 }
  0xe9   : > { %v333_v47 = vsel %vm5090_vm4, 0, %v332_v43  ;;  %v971_v24 = vsel %vm5151_vm9, %v963_v55, %v970_v28  ;;  %v4037_v32 = vunpack.c.h.bf16 %v4085_v9  ;;  %v768_v5 = vrot.slane %v5467_v19, 4  ;;  %v5530_v43 = vld [vmem:[#allocation8] ss:$0 sm:$0xff]  ;;  %v5550_v39 = vld [vmem:[#allocation9] ss:$0 sm:$0xff]  ;;  %4396 = vmatpush3.bf16.msra.mxu1 %v4530_v10  ;;  %4341 = vmatprep.subr.bf16.mxu0 %v4532_v52 }
  0xea   : > { %v1686_v12 = vor.u32 %v1685_v35, %v1682_v23  ;;  %334 = vst [vmem:[#allocation2 + $0x3c] sm:$0x1] %v333_v47  ;;  %1133 = vst.msk [vmem:[#allocation2 + $0xc4] sm:$0xf] %vm1022_vm0, %v971_v24  ;;  %v5520_v58 = vrot.slane %v1689_v50, 5  ;;  %v386_v18 = vsel %vm5095_vm5, 0, %v385_v13  ;;  %v1404_v56 = vsel %vm5175_vm11, %v5506_v3, %v5472_v33  ;;  %4209 = vmatprep.subr.bf16.mxu1 %v4531_v41 }
  0xeb   : > { %v509_v19 = vmul.f32 %v5530_v43, %v4036_v31  ;;  %v510_v48 = vmul.f32 %v5530_v43, %v4037_v32  ;;  %387 = vst [vmem:[#allocation2 + $0x38] sm:$0x1] %v386_v18  ;;  %v5537_v51 = vld [vmem:[#allocation2 + $0x30] sm:$0xf]  ;;  %v1409_v55 = vrot.slane %v1408_v26, 4  ;;  %v3786_v9 = vrot.slane %v5188_v6, 9 }
  0xec   : > { %v5528_v25 = vrot.slane %v1686_v12, 4  ;;  %v1763_v54 = vrot.slane %v5190_v7, 5  ;;  %v336_v33 = vsel %vm5090_vm4, 0, %v335_v30  ;;  %v1416_v13 = vshrl.u32 %v5537_v51, 16 }
  0xed   : > { %v5543_v57 = vld [vmem:[#allocation2 + $0x34] sm:$0xf]  ;;  %v1419_v14 = vshll.u32 %v5537_v51, 16  ;;  %v5547_v40 = vld [vmem:[#allocation2 + $0x2c] sm:$0x1]  ;;  %v1696_v49 = vor.u32 %v1695_v44, %v5520_v58  ;;  %v547_v61 = vadd.f32 %v5550_v39, %v509_v19  ;;  %v548_v23 = vadd.f32 %v5550_v39, %v510_v48 }
  0xee   : > { %337 = vst [vmem:[#allocation2 + $0x48] sm:$0x1] %v336_v33  ;;  %v1429_v6 = vshrl.u32 %v5543_v57, 16  ;;  %v5556_v7 = vcombine.low %v5537_v51, %v5543_v57  ;;  %v1411_v28 = vshll.u32 %v5547_v40, 16  ;;  %v1310_v35 = vld [vmem:[#allocation2 + $0xc0] sm:$0xf]  ;;  %v1692_v26 = vsel %vm5175_vm11, %v5528_v25, %v5520_v58 }
  0xef   : > { %v1127_v3 = vld [vmem:[#allocation2 + $0xbc] sm:$0x1]  ;;  %v1766_v44 = vrot.slane %v5293_v21, 5  ;;  %v4040_v47 = vunpack.c.l.bf16 %v5535_v8  ;;  %v580_v10 = vmax.f32 %v548_v23, 0.0  ;;  %v1418_v24 = vrot.slane %v1416_v13, 4 }
  0xf0   : > { %v1128_v30 = vsel %vm5090_vm4, %v955_v20, %v1127_v3  ;;  %2119 = vrot.lane.b32.xlu0 %v5556_v7, %s4817_s26  ;;  %v1413_v62 = vrot.slane %v1411_v28, 5  ;;  %v579_v20 = vmax.f32 %v547_v61, 0.0  ;;  %v1697_v31 = vrot.slane %v1696_v49, 4  ;;  %v391_v58 = vld [vmem:[#allocation2 + $0x50] sm:$0x1] }
  0xf1   : > { %1129 = vst [vmem:[#allocation2 + $0xbc] sm:$0x1] %v1128_v30  ;;  %v1311_v12 = vld [vmem:[#allocation2 + $0xc4] sm:$0xf]  ;;  %v1421_v32 = vrot.slane %v1419_v14, 5  ;;  %v1425_v41 = vshll.u32 %v5543_v57, 16  ;;  %v1764_v33 = vsel %vm5570_vm14, %v3786_v9, %v1763_v54  ;;  %v3958_v61 = vpack.c.bf16 %v580_v10, %v580_v10 }
  0xf2   : > { %v1431_v18 = vrot.slane %v1429_v6, 4  ;;  %v5579_v52 = vcombine.low %v1310_v35, %v1311_v12  ;;  %v1414_v21 = vsel %vm5175_vm11, %v1409_v55, %v1413_v62  ;;  %v3957_v19 = vpack.c.bf16 %v579_v20, %v579_v20  ;;  %v1050_v48 = vld [vmem:[#allocation2 + $0x38] sm:$0x1]  ;;  %v388_v10 = vld [vmem:[#allocation2 + $0x44] sm:$0x1] }
  0xf3   : > { %v5585_v28 = vcombine.low %v1404_v56, %v1414_v21  ;;  %v1051_v13 = vsel %vm5090_vm4, %v768_v5, %v1050_v48  ;;  %v1422_v14 = vor.u32 %v1421_v32, %v1418_v24  ;;  %v5591_v3 = vrot.slane %v1425_v41, 5 }
  0xf4   : > { %6738 = vst [vmem:[#allocation24_spill] sm:$0xff] %v5579_v52  ;;  %2143 = vrot.lane.b32.xlu1 %v5579_v52, %s4817_s26  ;;  %v770_v49 = vshrl.u32 %v3957_v19, 16  ;;  %v773_v6 = vshll.u32 %v3957_v19, 16  ;;  %1052 = vst [vmem:[#allocation2 + $0x38] sm:$0x1] %v1051_v13  ;;  %v1765_v55 = vrot.slane %v1763_v54, 4  ;;  %v4041_v35 = vunpack.c.h.bf16 %v5535_v8 }
  0xf5   : > { %2036 = vrot.lane.b32.xlu0 %v5585_v28, %s4817_s26  ;;  %v778_v9 = vshrl.u32 %v3958_v61, 16  ;;  %v781_v56 = vshll.u32 %v3958_v61, 16  ;;  %v1423_v23 = vrot.slane %v1422_v14, 4  ;;  %v1432_v5 = vor.u32 %v1431_v18, %v5591_v3  ;;  %v1053_v54 = vld [vmem:[#allocation2 + $0x3c] sm:$0xf] }
  0xf6   : > { %v772_v30 = vrot.slane %v770_v49, 7  ;;  %v1767_v62 = vsel %vm5570_vm14, %v1765_v55, %v1766_v44  ;;  %v511_v20 = vmul.f32 %v5530_v43, %v4040_v47  ;;  %v512_v8 = vmul.f32 %v5530_v43, %v4041_v35  ;;  %v338_v14 = vld [vmem:[#allocation2 + $0x54] sm:$0x1] }
  0xf7   : > { %v5600_v12 = vrot.slane %v778_v9, 7  ;;  %v1428_v32 = vsel %vm5175_vm11, %v1423_v23, %v5591_v3  ;;  %v5605_v41 = vcombine.low %v1764_v33, %v1767_v62  ;;  %v1433_v48 = vrot.slane %v1432_v5, 4 }
  0xf8   : > { %v1309_v24 = vld [vmem:[#allocation2 + $0xbc] sm:$0x1]  ;;  %v775_v18 = vor.u32 %v773_v6, %v772_v30  ;;  %v776_v19 = vrot.slane %v772_v30, 4  ;;  %v549_v61 = vadd.f32 %v5550_v39, %v511_v20  ;;  %v550_v13 = vadd.f32 %v5550_v39, %v512_v8  ;;  %v4087_v30 = vld [vmem:[%s5073_s18 + $0x30] sm:$0xff]  }
  0xf9   : > { %v1699_v21 = vshll.u32 %v1309_v24, 16  ;;  %v783_v44 = vor.u32 %v781_v56, %v5600_v12  ;;  %v785_v47 = vrot.slane %v5600_v12, 4  ;;  %v389_v3 = vsel %vm5095_vm5, 0, %v388_v10 }
  0xfa   : > { %v1054_v33 = vsel %vm5131_vm7, %v775_v18, %v1053_v54  ;;  %v3787_v6 = vrot.slane %v5271_v60, 9  ;;  %v581_v56 = vmax.f32 %v549_v61, 0.0  ;;  %v582_v23 = vmax.f32 %v550_v13, 0.0  ;;  %390 = vst [vmem:[#allocation2 + $0x44] sm:$0x1] %v389_v3 }
  0xfb   : > { %v1701_v49 = vrot.slane %v1699_v21, 5  ;;  %v784_v55 = vsel %vm5151_vm9, %v776_v19, %v783_v44  ;;  %1055 = vst [vmem:[#allocation2 + $0x3c] sm:$0xf] %v1054_v33  ;;  %v5619_v9 = vld [vmem:[#allocation2 + $0x38] sm:$0x1]  ;;  %v1770_v35 = vrot.slane %v5281_v45, 5  ;;  %v4044_v8 = vunpack.c.l.bf16 %v4087_v30 }
  0xfc   : > { %1056 = vst.msk [vmem:[#allocation2 + $0x40] sm:$0xf] %vm1022_vm0, %v784_v55  ;;  %v1435_v62 = vshll.u32 %v5619_v9, 16  ;;  %v1773_v60 = vrot.slane %v5392_v38, 5  ;;  %v339_v20 = vsel %vm5090_vm4, 0, %v338_v14  ;;  %v3959_v45 = vpack.c.bf16 %v581_v56, %v581_v56 }
  0xfd   : > { %v1702_v5 = vsel %vm5175_vm11, %v1697_v31, %v1701_v49  ;;  %v3960_v24 = vpack.c.bf16 %v582_v23, %v582_v23  ;;  %v1771_v31 = vsel %vm5570_vm14, %v3787_v6, %v1770_v35  ;;  %340 = vst [vmem:[#allocation2 + $0x54] sm:$0x1] %v339_v20  ;;  %v1772_v54 = vrot.slane %v1770_v35, 4  ;;  %v1060_v3 = vld [vmem:[#allocation2 + $0x48] sm:$0xf] }
  0xfe   : > { %v5635_v10 = vcombine.low %v1692_v26, %v1702_v5  ;;  %v1437_v12 = vrot.slane %v1435_v62, 5  ;;  %v4045_v38 = vunpack.c.h.bf16 %v4087_v30  ;;  %v787_v21 = vshrl.u32 %v3959_v45, 16 }
  0xff   : > { %v790_v18 = vshll.u32 %v3959_v45, 16  ;;  %v795_v19 = vshrl.u32 %v3960_v24, 16  ;;  %v798_v44 = vshll.u32 %v3960_v24, 16  ;;  %v1774_v26 = vsel %vm5570_vm14, %v1772_v54, %v1773_v60 }
 0x100   : > { %6739 = vst [vmem:[#allocation25_spill] sm:$0xff] %v5635_v10  ;;  %2060 = vrot.lane.b32.xlu1 %v5635_v10, %s4817_s26  ;;  %v1438_v25 = vsel %vm5175_vm11, %v1433_v48, %v1437_v12  ;;  %v513_v61 = vmul.f32 %v5530_v43, %v4044_v8  ;;  %v514_v13 = vmul.f32 %v5530_v43, %v4045_v38  ;;  %v789_v49 = vrot.slane %v787_v21, 7  ;;  %v341_v38 = vld [vmem:[#allocation2 + $0x60] sm:$0x1] }
 0x101   : > { %v5647_v14 = vcombine.low %v1428_v32, %v1438_v25  ;;  %v797_v33 = vrot.slane %v795_v19, 7  ;;  %v5649_v6 = vcombine.low %v1771_v31, %v1774_v26  ;;  %v1057_v56 = vld [vmem:[#allocation2 + $0x44] sm:$0x1]  ;;  %v392_v35 = vsel %vm5095_vm5, 0, %v391_v58  ;;  %v4088_v58 = vld [vmem:[%s5073_s18 + $0x38] sm:$0xff]  }
 0x102   : > { %v5651_v55 = vld [vmem:[#allocation2 + $0x3c] sm:$0xf]  ;;  %v551_v23 = vadd.f32 %v5550_v39, %v513_v61  ;;  %v552_v48 = vadd.f32 %v5550_v39, %v514_v13  ;;  %v792_v62 = vor.u32 %v790_v18, %v789_v49  ;;  %v793_v60 = vrot.slane %v789_v49, 4  ;;  %393 = vst [vmem:[#allocation2 + $0x50] sm:$0x1] %v392_v35 }
 0x103   : > { %6740 = vst [vmem:[#allocation26_spill] sm:$0xff] %v5647_v14  ;;  %v5657_v30 = vld [vmem:[#allocation2 + $0x40] sm:$0xf]  ;;  %v1440_v32 = vshrl.u32 %v5651_v55, 16  ;;  %v1443_v5 = vshll.u32 %v5651_v55, 16  ;;  %v800_v24 = vor.u32 %v798_v44, %v797_v33  ;;  %v1058_v12 = vsel %vm5090_vm4, %v785_v47, %v1057_v56 }
 0x104   : > { %2038 = vrot.lane.b32.xlu1 %v5647_v14, %s4817_s26  ;;  %v1453_v20 = vshrl.u32 %v5657_v30, 16  ;;  %v5666_v45 = vcombine.low %v5651_v55, %v5657_v30  ;;  %v1061_v31 = vsel %vm5131_vm7, %v792_v62, %v1060_v3  ;;  %1059 = vst [vmem:[#allocation2 + $0x44] sm:$0x1] %v1058_v12  ;;  %v1449_v18 = vshll.u32 %v5657_v30, 16 }
 0x105   : > { %v1442_v54 = vrot.slane %v1440_v32, 4  ;;  %v1445_v8 = vrot.slane %v1443_v5, 5  ;;  %v801_v21 = vsel %vm5151_vm9, %v793_v60, %v800_v24  ;;  %1062 = vst [vmem:[#allocation2 + $0x48] sm:$0xf] %v1061_v31  ;;  %v583_v44 = vmax.f32 %v551_v23, 0.0 }
 0x106   : > { %2121 = vrot.lane.b32.xlu0 %v5666_v45, %s4817_s26  ;;  %v1455_v19 = vrot.slane %v1453_v20, 4  ;;  %v802_v25 = vrot.slane %v797_v33, 4  ;;  %1063 = vst.msk [vmem:[#allocation2 + $0x4c] sm:$0xf] %vm1022_vm0, %v801_v21  ;;  %v584_v26 = vmax.f32 %v552_v48, 0.0  ;;  %v3788_v61 = vrot.slane %v5415_v63, 9 }
 0x107   : > { %v1446_v47 = vor.u32 %v1445_v8, %v1442_v54  ;;  %v1451_v13 = vrot.slane %v1449_v18, 5  ;;  %v3961_v49 = vpack.c.bf16 %v583_v44, %v583_v44  ;;  %v1777_v3 = vrot.slane %v5417_v29, 5  ;;  %v394_v20 = vld [vmem:[#allocation2 + $0x5c] sm:$0x1] }
 0x108   : > { %v342_v56 = vsel %vm5090_vm4, 0, %v341_v38  ;;  %v3962_v32 = vpack.c.bf16 %v584_v26, %v584_v26  ;;  %v1780_v5 = vrot.slane %v5547_v40, 5  ;;  %v4048_v23 = vunpack.c.l.bf16 %v4088_v58  ;;  %v1067_v38 = vld [vmem:[#allocation2 + $0x54] sm:$0xf] }
 0x109   : > { %v1447_v35 = vrot.slane %v1446_v47, 4  ;;  %343 = vst [vmem:[#allocation2 + $0x60] sm:$0x1] %v342_v56  ;;  %v1456_v33 = vor.u32 %v1455_v19, %v1451_v13  ;;  %v804_v48 = vshrl.u32 %v3961_v49, 16  ;;  %v807_v62 = vshll.u32 %v3961_v49, 16 }
 0x10a   : > { %2151 = vrot.lane.b32.xlu0 %v5605_v41, %s4817_s26  ;;  %v1064_v63 = vld [vmem:[#allocation2 + $0x50] sm:$0x1]  ;;  %v4049_v60 = vunpack.c.h.bf16 %v4088_v58  ;;  %v812_v24 = vshrl.u32 %v3962_v32, 16  ;;  %v815_v29 = vshll.u32 %v3962_v32, 16  ;;  %v1778_v12 = vsel %vm5570_vm14, %v3788_v61, %v1777_v3 }
 0x10b   : > { %v1065_v31 = vsel %vm5090_vm4, %v802_v25, %v1064_v63  ;;  %v1452_v40 = vsel %vm5175_vm11, %v1447_v35, %v1451_v13  ;;  %v1457_v54 = vrot.slane %v1456_v33, 4  ;;  %v806_v8 = vrot.slane %v804_v48, 7  ;;  %v5694_v19 = vld [vmem:[#allocation2 + $0x44] sm:$0x1] }
 0x10c   : > { %1066 = vst [vmem:[#allocation2 + $0x50] sm:$0x1] %v1065_v31  ;;  %v1779_v21 = vrot.slane %v1777_v3, 4  ;;  %v5692_v18 = vld [vmem:[#allocation2 + $0x48] sm:$0xf]  ;;  %v814_v44 = vrot.slane %v812_v24, 7  ;;  %v515_v58 = vmul.f32 %v5530_v43, %v4048_v23  ;;  %v516_v25 = vmul.f32 %v5530_v43, %v4049_v60 }
 0x10d   : > { %v395_v47 = vsel %vm5095_vm5, 0, %v394_v20  ;;  %v5700_v26 = vld [vmem:[#allocation2 + $0x4c] sm:$0xf]  ;;  %v1464_v61 = vshrl.u32 %v5692_v18, 16  ;;  %v1467_v13 = vshll.u32 %v5692_v18, 16  ;;  %v1459_v49 = vshll.u32 %v5694_v19, 16 }
 0x10e   : > { %v809_v3 = vor.u32 %v807_v62, %v806_v8  ;;  %396 = vst [vmem:[#allocation2 + $0x5c] sm:$0x1] %v395_v47  ;;  %v1477_v56 = vshrl.u32 %v5700_v26, 16  ;;  %v5708_v35 = vcombine.low %v5692_v18, %v5700_v26  ;;  %v810_v32 = vrot.slane %v806_v8, 4 }
 0x10f   : > { %v817_v23 = vor.u32 %v815_v29, %v814_v44  ;;  %v1461_v33 = vrot.slane %v1459_v49, 5  ;;  %v1466_v63 = vrot.slane %v1464_v61, 4  ;;  %v1781_v60 = vsel %vm5570_vm14, %v1779_v21, %v1780_v5 }
 0x110   : > { %v1068_v48 = vsel %vm5131_vm7, %v809_v3, %v1067_v38  ;;  %2123 = vrot.lane.b32.xlu1 %v5708_v35, %s4817_s26  ;;  %v1469_v20 = vrot.slane %v1467_v13, 5  ;;  %v1473_v24 = vshll.u32 %v5700_v26, 16  ;;  %v1479_v31 = vrot.slane %v1477_v56, 4 }
 0x111   : > { %v818_v62 = vsel %vm5151_vm9, %v810_v32, %v817_v23  ;;  %1069 = vst [vmem:[#allocation2 + $0x54] sm:$0xf] %v1068_v48  ;;  %v1462_v29 = vsel %vm5175_vm11, %v1457_v54, %v1461_v33  ;;  %v819_v8 = vrot.slane %v814_v44, 4  ;;  %v553_v38 = vadd.f32 %v5550_v39, %v515_v58  ;;  %v344_v44 = vld [vmem:[#allocation2 + $0x6c] sm:$0x1] }
 0x112   : > { %1070 = vst.msk [vmem:[#allocation2 + $0x58] sm:$0xf] %vm1022_vm0, %v818_v62  ;;  %v554_v5 = vadd.f32 %v5550_v39, %v516_v25  ;;  %v5724_v21 = vcombine.low %v1452_v40, %v1462_v29  ;;  %v1470_v61 = vor.u32 %v1469_v20, %v1466_v63  ;;  %v1475_v49 = vrot.slane %v1473_v24, 5 }
 0x113   : > { %v5726_v47 = vld [vmem:[#allocation2 + $0x50] sm:$0x1]  ;;  %v3789_v13 = vrot.slane %v5537_v51, 9  ;;  %v585_v56 = vmax.f32 %v553_v38, 0.0  ;;  %v1784_v54 = vrot.slane %v5543_v57, 5  ;;  %v5735_v25 = vcombine.low %v1778_v12, %v1781_v60 }
 0x114   : > { %6741 = vst [vmem:[#allocation27_spill] sm:$0xff] %v5724_v21  ;;  %v1483_v3 = vshll.u32 %v5726_v47, 16  ;;  %v586_v32 = vmax.f32 %v554_v5, 0.0  ;;  %2040 = vrot.lane.b32.xlu0 %v5724_v21, %s4817_s26  ;;  %2153 = vrot.lane.b32.xlu1 %v5649_v6, %s4817_s26  ;;  %v1471_v40 = vrot.slane %v1470_v61, 4  ;;  %v1480_v58 = vor.u32 %v1479_v31, %v1475_v49 }
 0x115   : > { %v1071_v23 = vld [vmem:[#allocation2 + $0x5c] sm:$0x1]  ;;  %v1787_v51 = vrot.slane %v5619_v9, 5  ;;  %v3963_v48 = vpack.c.bf16 %v585_v56, %v585_v56  ;;  %v5744_v24 = vsel %vm5570_vm14, %v3789_v13, %v1784_v54  ;;  %v345_v12 = vsel %vm5090_vm4, 0, %v344_v44 }
 0x116   : > { %v1485_v33 = vrot.slane %v1483_v3, 5  ;;  %v3964_v63 = vpack.c.bf16 %v586_v32, %v586_v32  ;;  %v1072_v57 = vsel %vm5090_vm4, %v819_v8, %v1071_v23  ;;  %v1476_v62 = vsel %vm5175_vm11, %v1471_v40, %v1475_v49  ;;  %346 = vst [vmem:[#allocation2 + $0x6c] sm:$0x1] %v345_v12  ;;  %v4089_v3 = vld [vmem:[%s5073_s18 + $0x40] sm:$0xff]   ;;  %v397_v40 = vld [vmem:[#allocation2 + $0x68] sm:$0x1] }
 0x117   : > { %v1481_v20 = vrot.slane %v1480_v58, 4  ;;  %1073 = vst [vmem:[#allocation2 + $0x5c] sm:$0x1] %v1072_v57  ;;  %v821_v60 = vshrl.u32 %v3963_v48, 16  ;;  %v824_v31 = vshll.u32 %v3963_v48, 16  ;;  %v1786_v38 = vrot.slane %v1784_v54, 4 }
 0x118   : > { %v5748_v9 = vld [vmem:[#allocation2 + $0x54] sm:$0xf]  ;;  %v829_v29 = vshrl.u32 %v3964_v63, 16  ;;  %v832_v13 = vshll.u32 %v3964_v63, 16  ;;  %v1074_v23 = vld [vmem:[#allocation2 + $0x60] sm:$0xf]  ;;  %v4053_v52 = vunpack.c.h.bf16 %v4089_v3 }
 0x119   : > { %v5750_v8 = vld [vmem:[#allocation2 + $0x58] sm:$0xf]  ;;  %v1488_v5 = vshrl.u32 %v5748_v9, 16  ;;  %v1491_v61 = vshll.u32 %v5748_v9, 16  ;;  %v1486_v49 = vsel %vm5175_vm11, %v1481_v20, %v1485_v33  ;;  %v823_v54 = vrot.slane %v821_v60, 7 }
 0x11a   : > { %v1501_v56 = vshrl.u32 %v5750_v8, 16  ;;  %v5760_v32 = vcombine.low %v5748_v9, %v5750_v8  ;;  %v5762_v44 = vcombine.low %v1476_v62, %v1486_v49  ;;  %v5764_v58 = vrot.slane %v829_v29, 7 }
 0x11b   : > { %v1490_v48 = vrot.slane %v1488_v5, 4  ;;  %v1493_v57 = vrot.slane %v1491_v61, 5  ;;  %v1497_v12 = vshll.u32 %v5750_v8, 16  ;;  %v826_v33 = vor.u32 %v824_v31, %v823_v54 }
 0x11c   : > { %6742 = vst [vmem:[#allocation28_spill] sm:$0xff] %v5760_v32  ;;  %6743 = vst [vmem:[#allocation29_spill] sm:$0xff] %v5762_v44  ;;  %2125 = vrot.lane.b32.xlu0 %v5760_v32, %s4817_s26  ;;  %2042 = vrot.lane.b32.xlu1 %v5762_v44, %s4817_s26  ;;  %v827_v63 = vrot.slane %v823_v54, 4  ;;  %v1503_v20 = vrot.slane %v1501_v56, 4  ;;  %v4052_v62 = vunpack.c.l.bf16 %v4089_v3  ;;  %v834_v60 = vor.u32 %v832_v13, %v5764_v58 }
 0x11d   : > { %v1494_v49 = vor.u32 %v1493_v57, %v1490_v48  ;;  %v1499_v29 = vrot.slane %v1497_v12, 5  ;;  %v1788_v5 = vsel %vm5570_vm14, %v1786_v38, %v1787_v51  ;;  %v1075_v61 = vsel %vm5131_vm7, %v826_v33, %v1074_v23  ;;  %v347_v48 = vld [vmem:[#allocation2 + $0x78] sm:$0x1]  ;;  %v4090_v57 = vld [vmem:[%s5073_s18 + $0x48] sm:$0xff]  }
 0x11e   : > { %v5776_v10 = vld [vmem:[#allocation2 + $0x5c] sm:$0x1]  ;;  %v517_v53 = vmul.f32 %v5530_v43, %v4052_v62  ;;  %v398_v31 = vsel %vm5095_vm5, 0, %v397_v40  ;;  %v835_v13 = vsel %vm5151_vm9, %v827_v63, %v834_v60  ;;  %1076 = vst [vmem:[#allocation2 + $0x60] sm:$0xf] %v1075_v61  ;;  %v518_v38 = vmul.f32 %v5530_v43, %v4053_v52 }
 0x11f   : > { %v1495_v56 = vrot.slane %v1494_v49, 4  ;;  %v1504_v54 = vor.u32 %v1503_v20, %v1499_v29  ;;  %v1507_v51 = vshll.u32 %v5776_v10, 16  ;;  %399 = vst [vmem:[#allocation2 + $0x68] sm:$0x1] %v398_v31  ;;  %1077 = vst.msk [vmem:[#allocation2 + $0x64] sm:$0xf] %vm1022_vm0, %v835_v13  ;;  %v4056_v61 = vunpack.c.l.bf16 %v4090_v57 }
 0x120   : > { %2155 = vrot.lane.b32.xlu0 %v5735_v25, %s4817_s26  ;;  %v555_v3 = vadd.f32 %v5550_v39, %v517_v53  ;;  %v3790_v40 = vrot.slane %v5651_v55, 9  ;;  %v1791_v23 = vrot.slane %v5657_v30, 5  ;;  %v1794_v20 = vrot.slane %v5694_v19, 5  ;;  %v400_v53 = vld [vmem:[#allocation2 + $0x74] sm:$0x1] }
 0x121   : > { %v1500_v12 = vsel %vm5175_vm11, %v1495_v56, %v1499_v29  ;;  %v1505_v33 = vrot.slane %v1504_v54, 4  ;;  %v1509_v63 = vrot.slane %v1507_v51, 5  ;;  %v836_v62 = vrot.slane %v5764_v58, 4 }
 0x122   : > { %v556_v60 = vadd.f32 %v5550_v39, %v518_v38  ;;  %v587_v52 = vmax.f32 %v555_v3, 0.0  ;;  %v1793_v49 = vrot.slane %v1791_v23, 4  ;;  %v348_v30 = vsel %vm5090_vm4, 0, %v347_v48 }
 0x123   : > { %v1510_v55 = vsel %vm5175_vm11, %v1505_v33, %v1509_v63  ;;  %v4057_v31 = vunpack.c.h.bf16 %v4090_v57  ;;  %v5804_v13 = vcombine.low %v5744_v24, %v1788_v5  ;;  %349 = vst [vmem:[#allocation2 + $0x78] sm:$0x1] %v348_v30  ;;  %v1792_v56 = vsel %vm5570_vm14, %v3790_v40, %v1791_v23  ;;  %v1081_v30 = vld [vmem:[#allocation2 + $0x6c] sm:$0xf] }
 0x124   : > { %v5801_v29 = vcombine.low %v1500_v12, %v1510_v55  ;;  %v588_v19 = vmax.f32 %v556_v60, 0.0  ;;  %v3965_v58 = vpack.c.bf16 %v587_v52, %v587_v52  ;;  %v1795_v54 = vsel %vm5570_vm14, %v1793_v49, %v1794_v20 }
 0x125   : > { %v519_v51 = vmul.f32 %v5530_v43, %v4056_v61  ;;  %v401_v38 = vsel %vm5095_vm5, 0, %v400_v53  ;;  %v5813_v3 = vld [vmem:[#allocation2 + $0x60] sm:$0xf]  ;;  %v520_v12 = vmul.f32 %v5530_v43, %v4057_v31  ;;  %v5837_v44 = vcombine.low %v1792_v56, %v1795_v54 }
 0x126   : > { %6744 = vst [vmem:[#allocation30_spill] sm:$0xff] %v5801_v29  ;;  %2044 = vrot.lane.b32.xlu0 %v5801_v29, %s4817_s26  ;;  %v3966_v24 = vpack.c.bf16 %v588_v19, %v588_v19  ;;  %v838_v5 = vshrl.u32 %v3965_v58, 16  ;;  %v841_v48 = vshll.u32 %v3965_v58, 16  ;;  %v1078_v57 = vld [vmem:[#allocation2 + $0x68] sm:$0x1]  ;;  %v1512_v23 = vshrl.u32 %v5813_v3, 16 }
 0x127   : > { %402 = vst [vmem:[#allocation2 + $0x74] sm:$0x1] %v401_v38  ;;  %v5818_v40 = vld [vmem:[#allocation2 + $0x64] sm:$0xf]  ;;  %v1515_v33 = vshll.u32 %v5813_v3, 16  ;;  %v1079_v63 = vsel %vm5090_vm4, %v836_v62, %v1078_v57  ;;  %v557_v20 = vadd.f32 %v5550_v39, %v519_v51  ;;  %v4091_v29 = vld [vmem:[%s5073_s18 + $0x50] sm:$0xff]  }
 0x128   : > { %v1525_v60 = vshrl.u32 %v5818_v40, 16  ;;  %v5828_v52 = vcombine.low %v5813_v3, %v5818_v40  ;;  %v840_v49 = vrot.slane %v838_v5, 7  ;;  %v846_v53 = vshrl.u32 %v3966_v24, 16  ;;  %1080 = vst [vmem:[#allocation2 + $0x68] sm:$0x1] %v1079_v63 }
 0x129   : > { %v849_v55 = vshll.u32 %v3966_v24, 16  ;;  %v1514_v61 = vrot.slane %v1512_v23, 4  ;;  %v1517_v31 = vrot.slane %v1515_v33, 5  ;;  %v1521_v19 = vshll.u32 %v5818_v40, 16 }
 0x12a   : > { %6745 = vst [vmem:[#allocation31_spill] sm:$0xff] %v5828_v52  ;;  %2127 = vrot.lane.b32.xlu1 %v5828_v52, %s4817_s26  ;;  %v843_v62 = vor.u32 %v841_v48, %v840_v49  ;;  %v844_v58 = vrot.slane %v840_v49, 4  ;;  %v848_v51 = vrot.slane %v846_v53, 7  ;;  %v1527_v38 = vrot.slane %v1525_v60, 4  ;;  %v350_v53 = vld [vmem:[#allocation2 + $0x84] sm:$0x1] }
 0x12b   : > { %v1518_v57 = vor.u32 %v1517_v31, %v1514_v61  ;;  %v1523_v17 = vrot.slane %v1521_v19, 5  ;;  %v558_v5 = vadd.f32 %v5550_v39, %v520_v12  ;;  %v589_v59 = vmax.f32 %v557_v20, 0.0  ;;  %v4558_v52 = vld [vmem:[#allocation2 + $0x4] sm:$0xf] }
 0x12c   : > { %v851_v63 = vor.u32 %v849_v55, %v848_v51  ;;  %v853_v24 = vrot.slane %v848_v51, 4  ;;  %v1082_v23 = vsel %vm5131_vm7, %v843_v62, %v1081_v30  ;;  %v4060_v55 = vunpack.c.l.bf16 %v4091_v29 }
 0x12d   : > { %1083 = vst [vmem:[#allocation2 + $0x6c] sm:$0xf] %v1082_v23  ;;  %v1528_v33 = vor.u32 %v1527_v38, %v1523_v17  ;;  %v590_v21 = vmax.f32 %v558_v5, 0.0  ;;  %v3967_v48 = vpack.c.bf16 %v589_v59, %v589_v59  ;;  %v1519_v20 = vrot.slane %v1518_v57, 4 }
 0x12e   : > { %v1085_v49 = vld [vmem:[#allocation2 + $0x74] sm:$0x1]  ;;  %2157 = vrot.lane.b32.xlu1 %v5804_v13, %s4817_s26  ;;  %v852_v12 = vsel %vm5151_vm9, %v844_v58, %v851_v63  ;;  %v3791_v59 = vrot.slane %v5692_v18, 9  ;;  %v1798_v61 = vrot.slane %v5700_v26, 5  ;;  %v1801_v58 = vrot.slane %v5726_v47, 5 }
 0x12f   : > { %v1086_v60 = vsel %vm5090_vm4, %v853_v24, %v1085_v49  ;;  %1084 = vst.msk [vmem:[#allocation2 + $0x70] sm:$0xf] %vm1022_vm0, %v852_v12  ;;  %v5846_v30 = vld [vmem:[#allocation2 + $0x68] sm:$0x1]  ;;  %v3968_v56 = vpack.c.bf16 %v590_v21, %v590_v21  ;;  %v855_v54 = vshrl.u32 %v3967_v48, 16  ;;  %v1529_v31 = vrot.slane %v1528_v33, 4 }
 0x130   : > { %1087 = vst [vmem:[#allocation2 + $0x74] sm:$0x1] %v1086_v60  ;;  %v1531_v19 = vshll.u32 %v5846_v30, 16  ;;  %v858_v62 = vshll.u32 %v3967_v48, 16  ;;  %v351_v5 = vsel %vm5090_vm4, 0, %v350_v53  ;;  %v1524_v21 = vsel %vm5175_vm11, %v1519_v20, %v1523_v17 }
 0x131   : > { %v857_v51 = vrot.slane %v855_v54, 7  ;;  %v863_v38 = vshrl.u32 %v3968_v56, 16  ;;  %v866_v57 = vshll.u32 %v3968_v56, 16  ;;  %v403_v63 = vld [vmem:[#allocation2 + $0x80] sm:$0x1]  ;;  %v4061_v18 = vunpack.c.h.bf16 %v4091_v29 }
 0x132   : > { %v1533_v24 = vrot.slane %v1531_v19, 5  ;;  %352 = vst [vmem:[#allocation2 + $0x84] sm:$0x1] %v351_v5  ;;  %v521_v26 = vmul.f32 %v5530_v43, %v4060_v55  ;;  %v1088_v49 = vld [vmem:[#allocation2 + $0x78] sm:$0xf]  ;;  %v5859_v47 = vsel %vm5570_vm14, %v3791_v59, %v1798_v61  ;;  %v404_v29 = vsel %vm5095_vm5, 0, %v403_v63 }
 0x133   : > { %v860_v23 = vor.u32 %v858_v62, %v857_v51  ;;  %v861_v33 = vrot.slane %v857_v51, 4  ;;  %v865_v48 = vrot.slane %v863_v38, 7  ;;  %v522_v17 = vmul.f32 %v5530_v43, %v4061_v18  ;;  %405 = vst [vmem:[#allocation2 + $0x80] sm:$0x1] %v404_v29 }
 0x134   : > { %v5861_v12 = vld [vmem:[#allocation2 + $0x6c] sm:$0xf]  ;;  %v1534_v60 = vsel %vm5175_vm11, %v1529_v31, %v1533_v24  ;;  %v559_v20 = vadd.f32 %v5550_v39, %v521_v26  ;;  %v1800_v43 = vrot.slane %v1798_v61, 4  ;;  %v1812_v11 = vrot.slane %v5818_v40, 5  ;;  %v5953_v40 = vpop.permute.xlu1 %2030 }
 0x135   : > { %v1536_v53 = vshrl.u32 %v5861_v12, 16  ;;  %v1539_v55 = vshll.u32 %v5861_v12, 16  ;;  %v5871_v56 = vcombine.low %v1524_v21, %v1534_v60  ;;  %v868_v54 = vor.u32 %v866_v57, %v865_v48 }
 0x136   : > { %v5873_v59 = vld [vmem:[#allocation2 + $0x70] sm:$0xf]  ;;  %v1089_v31 = vsel %vm5131_vm7, %v860_v23, %v1088_v49  ;;  %v560_v62 = vadd.f32 %v5550_v39, %v522_v17  ;;  %v591_v51 = vmax.f32 %v559_v20, 0.0  ;;  %v870_v18 = vrot.slane %v865_v48, 4 }
 0x137   : > { %6746 = vst [vmem:[#allocation32_spill] sm:$0xff] %v5871_v56  ;;  %v5877_v19 = vld [vmem:[#allocation2 + $0x74] sm:$0x1]  ;;  %v1549_v38 = vshrl.u32 %v5873_v59, 16  ;;  %v5883_v5 = vcombine.low %v5861_v12, %v5873_v59  ;;  %2046 = vrot.lane.b32.xlu1 %v5871_v56, %s4817_s26  ;;  %v869_v57 = vsel %vm5151_vm9, %v861_v33, %v868_v54  ;;  %1090 = vst [vmem:[#allocation2 + $0x78] sm:$0xf] %v1089_v31 }
 0x138   : > { %v1538_v63 = vrot.slane %v1536_v53, 4  ;;  %1091 = vst.msk [vmem:[#allocation2 + $0x7c] sm:$0xf] %vm1022_vm0, %v869_v57  ;;  %v1541_v61 = vrot.slane %v1539_v55, 5  ;;  %v1545_v39 = vshll.u32 %v5873_v59, 16  ;;  %v1555_v21 = vshll.u32 %v5877_v19, 16 }
 0x139   : > { %6747 = vst [vmem:[#allocation33_spill] sm:$0xff] %v5883_v5  ;;  %v592_v24 = vmax.f32 %v560_v62, 0.0  ;;  %2129 = vrot.lane.b32.xlu0 %v5883_v5, %s4817_s26  ;;  %v1551_v26 = vrot.slane %v1549_v38, 4  ;;  %v3969_v23 = vpack.c.bf16 %v591_v51, %v591_v51  ;;  %v1805_v49 = vrot.slane %v5750_v8, 5  ;;  %v406_v31 = vld [vmem:[#allocation2 + $0x8c] sm:$0x1] }
 0x13a   : > { %v1542_v60 = vor.u32 %v1541_v61, %v1538_v63  ;;  %v1547_v33 = vrot.slane %v1545_v39, 5  ;;  %v1802_v17 = vsel %vm5570_vm14, %v1800_v43, %v1801_v58  ;;  %v1557_v29 = vrot.slane %v1555_v21, 5  ;;  %v1092_v38 = vld [vmem:[#allocation2 + $0x80] sm:$0x1]  ;;  %v1095_v51 = vld [vmem:[#allocation2 + $0x84] sm:$0xf] }
 0x13b   : > { %v3970_v20 = vpack.c.bf16 %v592_v24, %v592_v24  ;;  %v872_v53 = vshrl.u32 %v3969_v23, 16  ;;  %v875_v55 = vshll.u32 %v3969_v23, 16  ;;  %v3792_v54 = vrot.slane %v5748_v9, 9 }
 0x13c   : > { %v1543_v62 = vrot.slane %v1542_v60, 4  ;;  %v1552_v57 = vor.u32 %v1551_v26, %v1547_v33  ;;  %v1093_v58 = vsel %vm5090_vm4, %v870_v18, %v1092_v38  ;;  %v1807_v43 = vrot.slane %v1805_v49, 4  ;;  %v5909_v26 = vpop.permute.xlu0 %2113 }
 0x13d   : > { %v880_v56 = vshrl.u32 %v3970_v20, 16  ;;  %v883_v48 = vshll.u32 %v3970_v20, 16  ;;  %2159 = vrot.lane.b32.xlu0 %v5837_v44, %s4817_s26  ;;  %v874_v8 = vrot.slane %v872_v53, 7  ;;  %v1808_v63 = vrot.slane %v5776_v10, 5  ;;  %1094 = vst [vmem:[#allocation2 + $0x80] sm:$0x1] %v1093_v58 }
 0x13e   : > { %v5903_v61 = vld [vmem:[#allocation2 + $0x78] sm:$0xf]  ;;  %v1548_v9 = vsel %vm5175_vm11, %v1543_v62, %v1547_v33  ;;  %v1553_v39 = vrot.slane %v1552_v57, 4  ;;  %v407_v24 = vsel %vm5095_vm5, 0, %v406_v31  ;;  %v5925_v57 = vcombine.low %v5859_v47, %v1802_v17 }
 0x13f   : > { %v882_v21 = vrot.slane %v880_v56, 7  ;;  %v5911_v23 = vld [vmem:[#allocation2 + $0x7c] sm:$0xf]  ;;  %v1560_v18 = vshrl.u32 %v5903_v61, 16  ;;  %v1563_v60 = vshll.u32 %v5903_v61, 16  ;;  %v877_v10 = vor.u32 %v875_v55, %v874_v8 }
 0x140   : > { %v878_v20 = vrot.slane %v874_v8, 4  ;;  %408 = vst [vmem:[#allocation2 + $0x8c] sm:$0x1] %v407_v24  ;;  %v1573_v53 = vshrl.u32 %v5911_v23, 16  ;;  %v5918_v56 = vcombine.low %v5903_v61, %v5911_v23  ;;  %v1558_v33 = vsel %vm5175_vm11, %v1553_v39, %v1557_v29 }
 0x141   : > { %v885_v31 = vor.u32 %v883_v48, %v882_v21  ;;  %v5922_v62 = vcombine.low %v1548_v9, %v1558_v33  ;;  %v1096_v55 = vsel %vm5131_vm7, %v877_v10, %v1095_v51  ;;  %v1562_v38 = vrot.slane %v1560_v18, 4  ;;  %v5934_v9 = vld [vmem:[#allocation2 + $0x8] sm:$0x1]  ;;  %v5946_v10 = vpop.permute.xlu0 %2137 }
 0x142   : > { %6748 = vst [vmem:[#allocation34_spill] sm:$0xff] %v5918_v56  ;;  %2131 = vrot.lane.b32.xlu1 %v5918_v56, %s4817_s26  ;;  %1097 = vst [vmem:[#allocation2 + $0x84] sm:$0xf] %v1096_v55  ;;  %v1565_v58 = vrot.slane %v1563_v60, 5  ;;  %v1569_v29 = vshll.u32 %v5911_v23, 16  ;;  %v1575_v48 = vrot.slane %v1573_v53, 4  ;;  %v1806_v18 = vsel %vm5570_vm14, %v3792_v54, %v1805_v49 }
 0x143   : > { %6749 = vst [vmem:[#allocation35_spill] sm:$0xff] %v5922_v62  ;;  %v886_v8 = vsel %vm5151_vm9, %v878_v20, %v885_v31  ;;  %2048 = vrot.lane.b32.xlu0 %v5922_v62, %s4817_s26  ;;  %v887_v17 = vrot.slane %v882_v21, 4  ;;  %v3793_v51 = vrot.slane %v5813_v3, 9  ;;  %v1809_v60 = vsel %vm5570_vm14, %v1807_v43, %v1808_v63  ;;  %v5958_v63 = vld [vmem:[#allocation2 + $0x90] sm:$0xf] }
 0x144   : > { %1098 = vst.msk [vmem:[#allocation2 + $0x88] sm:$0xf] %vm1022_vm0, %v886_v8  ;;  %v1566_v39 = vor.u32 %v1565_v58, %v1562_v38  ;;  %v1571_v24 = vrot.slane %v1569_v29, 5  ;;  %v5948_v20 = vld [vmem:[#allocation2 + $0x80] sm:$0x1]  ;;  %v1814_v53 = vrot.slane %v1812_v11, 4  ;;  %v5966_v55 = vcombine.low %v1806_v18, %v1809_v60 }
 0x145   : > { %v1815_v21 = vrot.slane %v5846_v30, 5  ;;  %v3794_v33 = vrot.slane %v5861_v12, 9  ;;  %v1819_v3 = vrot.slane %v5873_v59, 5  ;;  %v1579_v43 = vshll.u32 %v5948_v20, 16  ;;  %v5960_v31 = vld [vmem:[#allocation2 + $0x94] sm:$0xf] }
 0x146   : > { %2161 = vrot.lane.b32.xlu1 %v5925_v57, %s4817_s26  ;;  %v1567_v49 = vrot.slane %v1566_v39, 4  ;;  %v1576_v54 = vor.u32 %v1575_v48, %v1571_v24  ;;  %v5964_v30 = vcombine.low %v5958_v63, %v5960_v31  ;;  %v1813_v38 = vsel %vm5570_vm14, %v3793_v51, %v1812_v11  ;;  %v5985_v11 = vpop.permute.xlu1 %2054 }
 0x147   : > { %v1099_v12 = vld [vmem:[#allocation2 + $0x8c] sm:$0x1]  ;;  %v1822_v8 = vrot.slane %v5877_v19, 5  ;;  %v1581_v48 = vrot.slane %v1579_v43, 5  ;;  %v3795_v39 = vrot.slane %v5903_v61, 9  ;;  %v1816_v18 = vsel %vm5570_vm14, %v1814_v53, %v1815_v21  ;;  %v2116_v21 = vpop.permute.xlu0 %2115 }
 0x148   : > { %v1100_v59 = vsel %vm5090_vm4, %v887_v17, %v1099_v12  ;;  %v1572_v58 = vsel %vm5175_vm11, %v1567_v49, %v1571_v24  ;;  %v1577_v29 = vrot.slane %v1576_v54, 4  ;;  %v5982_v17 = vsel %vm5570_vm14, %v3794_v33, %v1819_v3  ;;  %v4557_v54 = vld [vmem:[#allocation2] sm:$0xf] }
 0x149   : > { %1101 = vst [vmem:[#allocation2 + $0x8c] sm:$0x1] %v1100_v59  ;;  %v5976_v47 = vld [vmem:[#allocation2 + $0x84] sm:$0xf]  ;;  %v1821_v51 = vrot.slane %v1819_v3, 4  ;;  %v1826_v19 = vrot.slane %v5911_v23, 5  ;;  %v6006_v5 = vcombine.low %v1813_v38, %v1816_v18 }
 0x14a   : > { %v1584_v60 = vshrl.u32 %v5976_v47, 16  ;;  %v1587_v61 = vshll.u32 %v5976_v47, 16  ;;  %v1582_v49 = vsel %vm5175_vm11, %v1577_v29, %v1581_v48  ;;  %v3785_v53 = vrot.slane %v4557_v54, 9 }
 0x14b   : > { %v5987_v24 = vld [vmem:[#allocation2 + $0x88] sm:$0xf]  ;;  %v5998_v23 = vcombine.low %v1572_v58, %v1582_v49  ;;  %v1828_v62 = vrot.slane %v1826_v19, 4  ;;  %v1829_v56 = vrot.slane %v5948_v20, 5  ;;  %v1756_v58 = vrot.slane %v4558_v52, 5 }
 0x14c   : > { %v1597_v33 = vshrl.u32 %v5987_v24, 16  ;;  %v5996_v3 = vcombine.low %v5976_v47, %v5987_v24  ;;  %v1593_v43 = vshll.u32 %v5987_v24, 16  ;;  %v1586_v12 = vrot.slane %v1584_v60, 4 }
 0x14d   : > { %6751 = vst [vmem:[#allocation37_spill] sm:$0xff] %v5998_v23  ;;  %v1589_v59 = vrot.slane %v1587_v61, 5  ;;  %2050 = vrot.lane.b32.xlu1 %v5998_v23, %s4817_s26  ;;  %v1823_v60 = vsel %vm5570_vm14, %v1821_v51, %v1822_v8  ;;  %v1827_v61 = vsel %vm5570_vm14, %v3795_v39, %v1826_v19  ;;  %v3803_v20 = vcombine.low %v4557_v54, %v4558_v52  ;;  %v2033_v51 = vpop.permute.xlu0 %2032 }
 0x14e   : > { %6750 = vst [vmem:[#allocation36_spill] sm:$0xff] %v5996_v3  ;;  %2133 = vrot.lane.b32.xlu0 %v5996_v3, %s4817_s26  ;;  %v1595_v29 = vrot.slane %v1593_v43, 5  ;;  %v1599_v48 = vrot.slane %v1597_v33, 4  ;;  %v1757_v3 = vsel %vm5570_vm14, %v3785_v53, %v1756_v58  ;;  %v1758_v23 = vrot.slane %v1756_v58, 4  ;;  %v6014_v33 = vpop.permute.xlu1 %2139 }
 0x14f   : > { %v1590_v49 = vor.u32 %v1589_v59, %v1586_v12  ;;  %vm2196_vm15 = vcmask 523264   ;;  %v1830_v43 = vsel %vm5570_vm14, %v1828_v62, %v1829_v56  ;;  %v1833_v8 = vrot.slane %v5987_v24, 5 }
 0x150   : > { %v1297_v14 = vld [vmem:[#allocation2 + $0x8c] sm:$0x1]  ;;  %v1600_v32 = vor.u32 %v1599_v48, %v1595_v29  ;;  %v6752_v39 = vrot.slane %v5934_v9, 5  ;;  %v3796_v54 = vrot.slane %v5976_v47, 9  ;;  %v3797_v53 = vrot.slane %v5958_v63, 9 }
 0x151   : > { %v1591_v38 = vrot.slane %v1590_v49, 4  ;;  %v1603_v18 = vshll.u32 %v1297_v14, 16  ;;  %2135 = vrot.lane.b32.xlu1 %v5964_v30, %s4817_s26  ;;  %v2199_v12 = vsel %vm2196_vm15, %v3803_v20, %v5953_v40  ;;  %v1835_v59 = vrot.slane %v1833_v8, 4  ;;  %v4559_v9 = vld [vmem:[#allocation2 + $0x98] sm:$0x1] }
 0x152   : > { %2163 = vrot.lane.b32.xlu0 %v5966_v55, %s4817_s26  ;;  %v1601_v52 = vrot.slane %v1600_v32, 4  ;;  %v1760_v19 = vsel %vm5570_vm14, %v1758_v23, %v6752_v39  ;;  %v1836_v48 = vrot.slane %v1297_v14, 5  ;;  %v1840_v32 = vrot.slane %v5960_v31, 5  ;;  %v2118_v39 = vpop.permute.xlu0 %2117 }
 0x153   : > { %v1596_v56 = vsel %vm5175_vm11, %v1591_v38, %v1595_v29  ;;  %v1605_v62 = vrot.slane %v1603_v18, 5  ;;  %v3835_v24 = vcombine.low %v1757_v3, %v1760_v19  ;;  %v1843_v58 = vrot.slane %v4559_v9, 5  ;;  %v4545_v29 = vld [vmem:[#allocation6 + $0x108] sm:$0xff]   ;;  %v6048_v3 = vpop.permute.xlu1 %2056  ;;  %v6072_v9 = vld [vmem:[#allocation2 + $0xb8] sm:$0xf] }
 0x154   : > { %v6036_v47 = vcombine.low %v1827_v61, %v1830_v43  ;;  %v1841_v14 = vsel %vm5570_vm14, %v3797_v53, %v1840_v32  ;;  %v1842_v40 = vrot.slane %v1840_v32, 4  ;;  %v2267_v31 = vsel %vm2196_vm15, %v5605_v41, %v2116_v21  ;;  %v4561_v38 = vld [vmem:[#allocation2 + $0xa0] sm:$0xf]  ;;  %v4562_v43 = vld [vmem:[#allocation2 + $0xa4] sm:$0x1]  ;;  %v4563_v21 = vld [vmem:[#allocation6 + $0x100] sm:$0xff]  }
 0x155   : > { %v1606_v23 = vsel %vm5175_vm11, %v1601_v52, %v1605_v62  ;;  %v2263_v63 = vsel %vm2196_vm15, %v3835_v24, %v5909_v26  ;;  %2165 = vrot.lane.b32.xlu1 %v6006_v5, %s4817_s26  ;;  %v6051_v61 = vcombine.low %v5982_v17, %v1823_v60  ;;  %v4560_v26 = vld [vmem:[#allocation2 + $0x9c] sm:$0xf]  ;;  %v1847_v18 = vrot.slane %v4561_v38, 5  ;;  %v4564_v60 = vld [vmem:[#allocation2 + $0xa8] sm:$0xf] }
 0x156   : > { %v6040_v49 = vcombine.low %v1596_v56, %v1606_v23  ;;  %2751 = vmatprep.mubr.bf16.mxu0 %v2263_v63  ;;  %v3798_v20 = vrot.slane %v4560_v26, 9  ;;  %v1850_v52 = vrot.slane %v4562_v43, 5  ;;  %v1834_v19 = vsel %vm5570_vm14, %v3796_v54, %v1833_v8  ;;  %v4533_v54 = vld [vmem:[#allocation6 + $0x80] sm:$0xff]   ;;  %v421_v23 = vld [vmem:[#allocation2 + $0xc8] sm:$0x1] }
 0x157   : > { %2752 = vmatmul.mubr.bf16.vlgmr.msra.gmra.mrb[0].mxu0 %v2199_v12  ;;  %v1837_v41 = vsel %vm5570_vm14, %v1835_v59, %v1836_v48  ;;  %v1844_v17 = vsel %vm5570_vm14, %v1842_v40, %v1843_v58  ;;  %v3799_v53 = vrot.slane %v4564_v60, 9  ;;  %v1849_v24 = vrot.slane %v1847_v18, 4  ;;  %v4565_v12 = vld [vmem:[#allocation2 + $0xac] sm:$0xf]  ;;  %v4566_v59 = vld [vmem:[#allocation2 + $0xb0] sm:$0x1] }
 0x158   : > { %2052 = vrot.lane.b32.xlu0 %v6040_v49, %s4817_s26  ;;  %4342 = vmatpush3.bf16.msra.mxu0 %v4563_v21  ;;  %v6061_v56 = vcombine.low %v1841_v14, %v1844_v17  ;;  %v1848_v62 = vsel %vm5570_vm14, %v3798_v20, %v1847_v18  ;;  %v1854_v32 = vrot.slane %v4565_v12, 5  ;;  %v6070_v8 = vsel %vm2196_vm15, %v5964_v30, %v5985_v11  ;;  %v4534_v14 = vld [vmem:[#allocation6 + $0xc8] sm:$0xff]   ;;  %v2142_v20 = vpop.permute.xlu1 %2141  ;;  %v368_v38 = vld [vmem:[#allocation2 + $0xcc] sm:$0x1]  ;;  %v424_v18 = vld [vmem:[#allocation2 + $0xd4] sm:$0x1] }
 0x159   : > { %2759 = vmatprep.mubr.bf16.mxu0 %v2267_v31  ;;  %4343 = vmatprep.subr.bf16.mxu0 %v4545_v29  ;;  %v1857_v48 = vrot.slane %v4566_v59, 5  ;;  %v1861_v58 = vrot.slane %v6072_v9, 5  ;;  %v2203_v40 = vsel %vm2196_vm15, %v5195_v15, %v2033_v51  ;;  %v1851_v30 = vsel %vm5570_vm14, %v1849_v24, %v1850_v52  ;;  %v2035_v15 = vpop.permute.xlu0 %2034  ;;  %v4549_v52 = vld [vmem:[#allocation6 + $0x110] sm:$0xff]   ;;  %v4568_v21 = vld [vmem:[#allocation2 + $0xb4] sm:$0xf] }
 0x15a   : > { %2169 = vrot.lane.b32.xlu1 %v6036_v47, %s4817_s26  ;;  %v2311_v63 = vsel %vm2196_vm15, %v6061_v56, %v5946_v10  ;;  %v1856_v11 = vrot.slane %v1854_v32, 4  ;;  %v6084_v31 = vcombine.low %v1834_v19, %v1837_v41  ;;  %v6086_v26 = vcombine.low %v1848_v62, %v1851_v30  ;;  %v4535_v41 = vld [vmem:[#allocation6 + $0x88] sm:$0xff]   ;;  %v4569_v24 = vld [vmem:[#allocation2 + $0xbc] sm:$0x1]  ;;  %v4538_v30 = vld [vmem:[#allocation6 + $0xd8] sm:$0xff]  }
 0x15b   : > { %2847 = vmatprep.mubr.bf16.mxu1 %v2311_v63  ;;  %v1855_v10 = vsel %vm5570_vm14, %v3799_v53, %v1854_v32  ;;  %v422_v43 = vsel %vm5095_vm5, 0, %v421_v23  ;;  %v2271_v17 = vsel %vm2196_vm15, %v5649_v6, %v2118_v39  ;;  %v3800_v60 = vrot.slane %v4568_v21, 9  ;;  %v6115_v23 = vld [vmem:[#allocation2 + $0xc4] sm:$0xf] }
 0x15c   : > { %2167 = vrot.lane.b32.xlu0 %v6051_v61, %s4817_s26  ;;  %2848 = vmatmul.mubr.bf16.vlgmr.msra.gmra.mrb[0].mxu1 %v6070_v8  ;;  %v1858_v51 = vsel %vm5570_vm14, %v1856_v11, %v1857_v48  ;;  %v2315_v19 = vsel %vm2196_vm15, %v6086_v26, %v6014_v33  ;;  %v1863_v53 = vrot.slane %v1861_v58, 4  ;;  %423 = vst [vmem:[#allocation2 + $0xc8] sm:$0x1] %v422_v43  ;;  %v1864_v12 = vrot.slane %v4569_v24, 5  ;;  %v4550_v48 = vld [vmem:[#allocation6 + $0x118] sm:$0xff]  }
 0x15d   : > { %4344 = vmatpush3.bf16.msra.mxu0 %v4545_v29  ;;  %4210 = vmatpush3.bf16.msra.mxu1 %v4533_v54  ;;  %v4536_v29 = vld [vmem:[#allocation6 + $0xd0] sm:$0xff]   ;;  %v6102_v62 = vcombine.low %v1855_v10, %v1858_v51  ;;  %v369_v32 = vsel %vm5090_vm4, 0, %v368_v38  ;;  %v425_v33 = vsel %vm5095_vm5, 0, %v424_v18  ;;  %v6108_v54 = vld [vmem:[#allocation2 + $0xc0] sm:$0xf]  ;;  %v972_v9 = vrot.slane %v5489_v4, 4 }
 0x15e   : > { %2173 = vrot.lane.b32.xlu1 %v6061_v56, %s4817_s26  ;;  %4211 = vmatprep.subr.bf16.mxu1 %v4534_v14  ;;  %v1867_v39 = vshrl.u32 %v6108_v54, 16  ;;  %v1870_v59 = vshll.u32 %v6108_v54, 16  ;;  %370 = vst [vmem:[#allocation2 + $0xcc] sm:$0x1] %v369_v32  ;;  %426 = vst [vmem:[#allocation2 + $0xd4] sm:$0x1] %v425_v33  ;;  %v6121_v63 = vsel %vm2196_vm15, %v5223_v34, %v6048_v3 }
 0x15f   : > { %2760 = vmatmul.mubr.bf16.gmra.mrb[4].mxu0 %v2203_v40  ;;  %2855 = vmatprep.mubr.bf16.mxu1 %v2315_v19  ;;  %v1880_v2 = vshrl.u32 %v6115_v23, 16  ;;  %v4537_v14 = vld [vmem:[#allocation6 + $0x90] sm:$0xff]   ;;  %v2059_v40 = vpop.permute.xlu1 %2058  ;;  %v2319_v4 = vsel %vm2196_vm15, %v6102_v62, %v2142_v20  ;;  %v1862_v10 = vsel %vm5570_vm14, %v3800_v60, %v1861_v58  ;;  %v1865_v38 = vsel %vm5570_vm14, %v1863_v53, %v1864_v12  ;;  %v6132_v3 = vld [vmem:[#allocation2 + $0xd0] sm:$0xf] }
 0x160   : > { %2171 = vrot.lane.b32.xlu0 %v6084_v31, %s4817_s26  ;;  %2767 = vmatprep.mubr.bf16.mxu0 %v2271_v17  ;;  %v1876_v34 = vshll.u32 %v6115_v23, 16  ;;  %v6138_v18 = vsel %vm2196_vm15, %v5290_v0, %v2035_v15  ;;  %v1869_v20 = vrot.slane %v1867_v39, 4  ;;  %v1872_v51 = vrot.slane %v1870_v59, 5  ;;  %v4539_v19 = vld [vmem:[#allocation6 + $0x98] sm:$0xff]  }
 0x161   : > { %4345 = vmatprep.subr.bf16.mxu0 %v4549_v52  ;;  %4212 = vmatpush3.bf16.msra.mxu1 %v4535_v41  ;;  %v6143_v41 = vcombine.low %v1862_v10, %v1865_v38  ;;  %v1910_v0 = vshll.u32 %v6132_v3, 16  ;;  %v1914_v15 = vshrl.u32 %v6132_v3, 16  ;;  %v1882_v60 = vrot.slane %v1880_v2, 4 }
 0x162   : > { %2177 = vrot.lane.b32.xlu1 %v6102_v62, %s4817_s26  ;;  %4213 = vmatprep.subr.bf16.mxu1 %v4536_v29  ;;  %v2120_v11 = vpop.permute.xlu0 %2119  ;;  %v1878_v21 = vrot.slane %v1876_v34, 5  ;;  %v1873_v12 = vor.u32 %v1872_v51, %v1869_v20  ;;  %v6158_v59 = vsel %vm2196_vm15, %v5343_v16, %v2059_v40  ;;  %v3801_v10 = vrot.slane %v6108_v54, 9  ;;  %v4543_v16 = vld [vmem:[#allocation6 + $0xa8] sm:$0xff]   ;;  %v4544_v34 = vld [vmem:[#allocation6 + $0xf0] sm:$0xff]  }
 0x163   : > { %4346 = vmatpush3.bf16.msra.mxu0 %v4549_v52  ;;  %v2275_v58 = vsel %vm2196_vm15, %v5735_v25, %v2120_v11  ;;  %v1134_v43 = vld [vmem:[#allocation2 + $0xc8] sm:$0x1]  ;;  %v4540_v52 = vld [vmem:[#allocation6 + $0xe0] sm:$0xff]   ;;  %v1912_v2 = vrot.slane %v1910_v0, 5 }
 0x164   : > { %2175 = vrot.lane.b32.xlu0 %v6086_v26, %s4817_s26  ;;  %4347 = vmatprep.subr.bf16.mxu0 %v4550_v48  ;;  %v1135_v17 = vsel %vm5090_vm4, %v972_v9, %v1134_v43  ;;  %v4541_v9 = vld [vmem:[#allocation6 + $0xa0] sm:$0xff]  }
 0x165   : > { %2856 = vmatmul.mubr.bf16.gmra.mrb[4].mxu1 %v6121_v63  ;;  %1136 = vst [vmem:[#allocation2 + $0xc8] sm:$0x1] %v1135_v17  ;;  %v1203_v53 = vld [vmem:[#allocation2 + $0xcc] sm:$0xf]  ;;  %v1207_v29 = vld [vmem:[#allocation2 + $0xd4] sm:$0x1] }
 0x166   : > { %4214 = vmatpush3.bf16.msra.mxu1 %v4537_v14  ;;  %2863 = vmatprep.mubr.bf16.mxu1 %v2319_v4  ;;  %v2144_v24 = vpop.permute.xlu1 %2143  ;;  %v1204_v32 = vsel %vm5131_vm7, 0, %v1203_v53  ;;  %v1208_v33 = vsel %vm5090_vm4, 0, %v1207_v29  ;;  %v1916_v14 = vrot.slane %v1914_v15, 4  ;;  %v1883_v4 = vor.u32 %v1882_v60, %v1878_v21  ;;  %v4546_v53 = vld [vmem:[#allocation6 + $0xb0] sm:$0xff]  }
 0x167   : > { %4215 = vmatprep.subr.bf16.mxu1 %v4538_v30  ;;  %2768 = vmatmul.mubr.bf16.gmra.mrb[8].mxu0 %v6138_v18  ;;  %v2037_v39 = vpop.permute.xlu0 %2036  ;;  %1205 = vst [vmem:[#allocation2 + $0xcc] sm:$0xf] %v1204_v32  ;;  %1209 = vst [vmem:[#allocation2 + $0xd4] sm:$0x1] %v1208_v33  ;;  %v1895_v30 = vrot.slane %v6115_v23, 5  ;;  %v2323_v1 = vsel %vm2196_vm15, %v6143_v41, %v2144_v24 }
 0x168   : > { %2775 = vmatprep.mubr.bf16.mxu0 %v2275_v58  ;;  %2179 = vrot.lane.b32.xlu1 %v6143_v41, %s4817_s26  ;;  %v2211_v11 = vsel %vm2196_vm15, %v5433_v27, %v2037_v39  ;;  %v1917_v38 = vor.u32 %v1916_v14, %v1912_v2  ;;  %v1884_v20 = vrot.slane %v1883_v4, 4 }
 0x169   : > { %4348 = vmatpush3.bf16.msra.mxu0 %v4550_v48  ;;  %v1874_v48 = vrot.slane %v1873_v12, 4  ;;  %v1897_v23 = vrot.slane %v1895_v30, 4  ;;  %v4547_v12 = vld [vmem:[#allocation6 + $0xf8] sm:$0xff]  }
 0x16a   : > { %4216 = vmatpush3.bf16.msra.mxu1 %v4539_v19  ;;  %v1896_v19 = vsel %vm5570_vm14, %v3801_v10, %v1895_v30  ;;  %v1918_v29 = vrot.slane %v1917_v38, 4 }
 0x16b   : > { %4217 = vmatprep.subr.bf16.mxu1 %v4540_v52  ;;  %v1879_v27 = vsel %vm5175_vm11, %v1874_v48, %v1878_v21 }
 0x16c   : > { %v1312_v40 = vld [vmem:[#allocation2 + $0xc8] sm:$0x1] }
 0x16d   : > { %2864 = vmatmul.mubr.bf16.gmra.mrb[8].mxu1 %v6158_v59  ;;  %v1886_v51 = vshll.u32 %v1312_v40, 16  ;;  %v1898_v58 = vrot.slane %v1312_v40, 5 }
 0x16e   : > { %4218 = vmatpush3.bf16.msra.mxu1 %v4541_v9  ;;  %2871 = vmatprep.mubr.bf16.mxu1 %v2323_v1  ;;  %v6169_v43 = vld [vmem:[#allocation2 + $0xcc] sm:$0xf]  ;;  %v1315_v54 = vld [vmem:[#allocation2 + $0xd4] sm:$0x1] }
 0x16f   : > { %4219 = vmatprep.subr.bf16.mxu1 %v4542_v42  ;;  %2776 = vmatmul.mubr.bf16.gmra.mrb[12].mxu0 %v2211_v11  ;;  %v1888_v52 = vrot.slane %v1886_v51, 5  ;;  %v1901_v17 = vshrl.u32 %v6169_v43, 16  ;;  %v1904_v0 = vshll.u32 %v6169_v43, 16  ;;  %v1920_v15 = vshll.u32 %v1315_v54, 16 }
 0x170   : > { %v1899_v24 = vsel %vm5570_vm14, %v1897_v23, %v1898_v58  ;;  %v3802_v51 = vrot.slane %v6169_v43, 9 }
 0x171   : > { %v1889_v32 = vsel %vm5175_vm11, %v1884_v20, %v1888_v52  ;;  %v1903_v33 = vrot.slane %v1901_v17, 4  ;;  %v1906_v39 = vrot.slane %v1904_v0, 5  ;;  %v1922_v14 = vrot.slane %v1920_v15, 5 }
 0x172   : > { %4220 = vmatpush3.bf16.msra.mxu1 %v4543_v16  ;;  %v2061_v60 = vpop.permute.xlu1 %2060  ;;  %v6183_v9 = vcombine.low %v1879_v27, %v1889_v32  ;;  %v6185_v30 = vcombine.low %v1896_v19, %v1899_v24  ;;  %v3854_v0 = vcombine.low %v6169_v43, %v6132_v3 }
 0x173   : > { %4221 = vmatprep.subr.bf16.mxu1 %v4544_v34  ;;  %v6179_v21 = vsel %vm2196_vm15, %v5454_v22, %v2061_v60  ;;  %v1907_v42 = vor.u32 %v1906_v39, %v1903_v33  ;;  %v4548_v22 = vld [vmem:[#allocation6 + $0xb8] sm:$0xff]   ;;  %v1923_v48 = vsel %vm5175_vm11, %v1918_v29, %v1922_v14 }
 0x174   : > { %2189 = vrot.lane.b32.xlu0 %v6183_v9, %s4817_s26  ;;  %2181 = vrot.lane.b32.xlu1 %v6185_v30, %s4817_s26 }
 0x175   : > { %2872 = vmatmul.mubr.bf16.gmra.mrb[12].mxu1 %v6179_v21  ;;  %v1908_v4 = vrot.slane %v1907_v42, 4 }
 0x176   : > { %4222 = vmatpush3.bf16.msra.mxu1 %v4546_v53  ;;  %2912 = vmatprep.mubr.bf16.mxu1 %v6138_v18  ;;  %v2039_v1 = vpop.permute.xlu1 %2038 }
 0x177   : > { %4223 = vmatprep.subr.bf16.mxu1 %v4547_v12  ;;  %v2215_v16 = vsel %vm2196_vm15, %v5556_v7, %v2039_v1  ;;  %v1913_v18 = vsel %vm5175_vm11, %v1908_v4, %v1912_v2  ;;  %v1932_v7 = vrot.slane %v1315_v54, 5  ;;  %v1929_v2 = vrot.slane %v6132_v3, 5  ;;  %v6753_v12 = vld [vmem:[#allocation28_spill] sm:$0xff]  ;;  %v6755_v1 = vld [vmem:[#allocation31_spill] sm:$0xff] }
 0x178   : > { %v2122_v10 = vpop.permute.xlu0 %2121  ;;  %v3855_v38 = vcombine.low %v1913_v18, %v1923_v48 }
 0x179   : > { %v2279_v40 = vsel %vm2196_vm15, %v5804_v13, %v2122_v10  ;;  %v1931_v58 = vrot.slane %v1929_v2, 4  ;;  %v6210_v52 = vsel %vm5570_vm14, %v3802_v51, %v1929_v2  ;;  %v6756_v10 = vld [vmem:[#allocation27_spill] sm:$0xff] }
 0x17a   : > { %4224 = vmatpush3.bf16.msra.mxu1 %v4548_v22  ;;  %2783 = vmatprep.mubr.bf16.mxu0 %v2279_v40 }
 0x17b   : > { %2784 = vmatmul.mubr.bf16.gmra.mrb[16].mxu0 %v2215_v16  ;;  %2191 = vrot.lane.b32.xlu0 %v3855_v38, %s4817_s26  ;;  %v6218_v54 = vsel %vm5570_vm14, %v1931_v58, %v1932_v7  ;;  %v6758_v7 = vld [vmem:[#allocation29_spill] sm:$0xff] }
 0x17c   : > { %v2152_v23 = vpop.permute.xlu0 %2151  ;;  %v3856_v17 = vcombine.low %v6210_v52, %v6218_v54 }
 0x17d   : > { %v2327_v34 = vsel %vm2196_vm15, %v5321_v36, %v2152_v23  ;;  %v6757_v23 = vld [vmem:[#allocation33_spill] sm:$0xff] }
 0x17e   : > { %2913 = vmatmul.mubr.bf16.vlgmr.msra.gmra.mrb[16].mxu1 %v2327_v34 }
 0x17f   : > { %2920 = vmatprep.mubr.bf16.mxu1 %v2211_v11 }
 0x182   : > { %v2124_v20 = vpop.permute.xlu1 %2123 }
 0x183   : > { %v2283_v46 = vsel %vm2196_vm15, %v5837_v44, %v2124_v20 }
 0x184   : > { %2791 = vmatprep.mubr.bf16.mxu0 %v2283_v46 }
 0x186   : > { %v2041_v27 = vpop.permute.xlu0 %2040  ;;  %v2154_v19 = vpop.permute.xlu1 %2153 }
 0x187   : > { %v2219_v36 = vsel %vm2196_vm15, %v5666_v45, %v2041_v27  ;;  %v2331_v11 = vsel %vm2196_vm15, %v5449_v37, %v2154_v19  ;;  %v6759_v27 = vld [vmem:[#allocation34_spill] sm:$0xff] }
 0x188   : > { %2792 = vmatmul.mubr.bf16.gmra.mrb[20].mxu0 %v2219_v36  ;;  %2921 = vmatmul.mubr.bf16.gmra.mrb[20].mxu1 %v2331_v11 }
 0x189   : > { %2928 = vmatprep.mubr.bf16.mxu1 %v2215_v16 }
 0x18e   : > { %v2126_v15 = vpop.permute.xlu0 %2125  ;;  %v2043_v60 = vpop.permute.xlu1 %2042 }
 0x18f   : > { %v2287_v45 = vsel %vm2196_vm15, %v5925_v57, %v2126_v15  ;;  %v2223_v37 = vsel %vm2196_vm15, %v5708_v35, %v2043_v60  ;;  %v6754_v35 = vld [vmem:[#allocation26_spill] sm:$0xff] }
 0x190   : > { %2799 = vmatprep.mubr.bf16.mxu0 %v2287_v45  ;;  %v6760_v15 = vld [vmem:[#allocation30_spill] sm:$0xff] }
 0x191   : > { %2800 = vmatmul.mubr.bf16.gmra.mrb[24].mxu0 %v2223_v37 }
 0x192   : > { %v2156_v50 = vpop.permute.xlu0 %2155 }
 0x193   : > { %v2335_v53 = vsel %vm2196_vm15, %v5585_v28, %v2156_v50 }
 0x194   : > { %2929 = vmatmul.mubr.bf16.gmra.mrb[24].mxu1 %v2335_v53  ;;  %v6761_v53 = vld [vmem:[#allocation36_spill] sm:$0xff] }
 0x195   : > { %2936 = vmatprep.mubr.bf16.mxu1 %v2219_v36 }
 0x198   : > { %v2045_v29 = vpop.permute.xlu0 %2044 }
 0x199   : > { %v2227_v32 = vsel %vm2196_vm15, %v6753_v12, %v2045_v29 }
 0x19c   : > { %v2128_v24 = vpop.permute.xlu1 %2127 }
 0x19d   : > { %v2291_v33 = vsel %vm2196_vm15, %v5966_v55, %v2128_v24  ;;  %v6762_v24 = vld [vmem:[#allocation32_spill] sm:$0xff] }
 0x19e   : > { %2807 = vmatprep.mubr.bf16.mxu0 %v2291_v33  ;;  %v6763_v33 = vld [vmem:[#allocation35_spill] sm:$0xff] }
 0x19f   : > { %2808 = vmatmul.mubr.bf16.gmra.mrb[28].mxu0 %v2227_v32 }
 0x1a0   : > { %v2158_v39 = vpop.permute.xlu1 %2157 }
 0x1a1   : > { %v2339_v14 = vsel %vm2196_vm15, %v6754_v35, %v2158_v39 }
 0x1a2   : > { %2937 = vmatmul.mubr.bf16.gmra.mrb[28].mxu1 %v2339_v14  ;;  %v6764_v14 = vld [vmem:[#allocation37_spill] sm:$0xff] }
 0x1a3   : > { %2944 = vmatprep.mubr.bf16.mxu1 %v2223_v37 }
 0x1a9   : > { %v2047_v42 = vpop.permute.xlu1 %2046 }
 0x1aa   : > { %v2231_v22 = vsel %vm2196_vm15, %v6755_v1, %v2047_v42  ;;  %v6769_v1 = vld [vmem:[#allocation25_spill] sm:$0xff] }
 0x1ab   : > { %v2130_v28 = vpop.permute.xlu0 %2129 }
 0x1ac   : > { %v2295_v4 = vsel %vm2196_vm15, %v6006_v5, %v2130_v28 }
 0x1ad   : > { %2815 = vmatprep.mubr.bf16.mxu0 %v2295_v4 }
 0x1ae   : > { %2816 = vmatmul.mubr.bf16.gmra.mrb[32].mxu0 %v2231_v22 }
 0x1af   : > { %v2160_v48 = vpop.permute.xlu0 %2159 }
 0x1b0   : > { %v2343_v16 = vsel %vm2196_vm15, %v6756_v10, %v2160_v48 }
 0x1b1   : > { %2945 = vmatmul.mubr.bf16.gmra.mrb[32].mxu1 %v2343_v16 }
 0x1b2   : > { %2952 = vmatprep.mubr.bf16.mxu1 %v2227_v32 }
 0x1b4   : > { %v2132_v18 = vpop.permute.xlu1 %2131 }
 0x1b5   : > { %v2049_v40 = vpop.permute.xlu0 %2048  ;;  %v2299_v38 = vsel %vm2196_vm15, %v6051_v61, %v2132_v18 }
 0x1b6   : > { %2823 = vmatprep.mubr.bf16.mxu0 %v2299_v38  ;;  %v2235_v34 = vsel %vm2196_vm15, %v6757_v23, %v2049_v40 }
 0x1b7   : > { %2824 = vmatmul.mubr.bf16.gmra.mrb[36].mxu0 %v2235_v34 }
 0x1b8   : > { %v2162_v20 = vpop.permute.xlu1 %2161 }
 0x1b9   : > { %v2347_v46 = vsel %vm2196_vm15, %v6758_v7, %v2162_v20 }
 0x1ba   : > { %2953 = vmatmul.mubr.bf16.gmra.mrb[36].mxu1 %v2347_v46 }
 0x1bb   : > { %2960 = vmatprep.mubr.bf16.mxu1 %v2231_v22 }
 0x1bf   : > { %v2051_v51 = vpop.permute.xlu1 %2050 }
 0x1c0   : > { %v2134_v2 = vpop.permute.xlu0 %2133  ;;  %v2239_v19 = vsel %vm2196_vm15, %v6759_v27, %v2051_v51 }
 0x1c1   : > { %v2303_v58 = vsel %vm2196_vm15, %v6036_v47, %v2134_v2 }
 0x1c2   : > { %2831 = vmatprep.mubr.bf16.mxu0 %v2303_v58 }
 0x1c3   : > { %2832 = vmatmul.mubr.bf16.gmra.mrb[40].mxu0 %v2239_v19  ;;  %v2136_v11 = vpop.permute.xlu1 %2135 }
 0x1c4   : > { %v2164_v36 = vpop.permute.xlu0 %2163  ;;  %v2307_v45 = vsel %vm2196_vm15, %v6084_v31, %v2136_v11 }
 0x1c5   : > { %v2351_v60 = vsel %vm2196_vm15, %v6760_v15, %v2164_v36  ;;  %2839 = vmatprep.mubr.bf16.mxu0 %v2307_v45 }
 0x1c6   : > { %2961 = vmatmul.mubr.bf16.gmra.mrb[40].mxu1 %v2351_v60 }
 0x1c7   : > { %2968 = vmatprep.mubr.bf16.mxu1 %v2235_v34  ;;  %v2166_v37 = vpop.permute.xlu1 %2165 }
 0x1c8   : > { %v2355_v12 = vsel %vm2196_vm15, %v6762_v24, %v2166_v37 }
 0x1ca   : > { %v2053_v50 = vpop.permute.xlu0 %2052 }
 0x1cb   : > { %v2243_v29 = vsel %vm2196_vm15, %v6761_v53, %v2053_v50 }
 0x1cc   : > { %2840 = vmatmul.mubr.bf16.gmra.mrb[44].mxu0 %v2243_v29  ;;  %v2170_v35 = vpop.permute.xlu1 %2169 }
 0x1cd   : > { %4349 = vmatprep.mubr.msk.bf16.mxu0 %vm2196_vm15, %v5649_v6  ;;  %v2363_v42 = vsel %vm2196_vm15, %v6764_v14, %v2170_v35 }
 0x1ce   : > { %2969 = vmatmul.mubr.bf16.gmra.mrb[44].mxu1 %v2355_v12  ;;  %v2168_v32 = vpop.permute.xlu0 %2167 }
 0x1cf   : > { %2976 = vmatprep.mubr.bf16.mxu1 %v2239_v19  ;;  %v2359_v39 = vsel %vm2196_vm15, %v6763_v33, %v2168_v32 }
 0x1d2   : > { %v2172_v6 = vpop.permute.xlu0 %2171 }
 0x1d4   : > { %4350 = vmatmul.mubr.msk.bf16.vlgmr.msra.gmra.mrb[48].mxu0 %vm2196_vm15, %v5735_v25  ;;  %v2367_v25 = vsel %vm2196_vm15, %v6040_v49, %v2172_v6  ;;  %v6766_v49 = vld [vmem:[#allocation22_spill] sm:$0xff] }
 0x1d5   : > { %4353 = vmatprep.mubr.msk.bf16.mxu0 %vm2196_vm15, %v5804_v13  ;;  %v6765_v13 = vld [vmem:[#allocation21_spill] sm:$0xff] }
 0x1d6   : > { %2977 = vmatmul.mubr.bf16.gmra.mrb[48].mxu1 %v2359_v39 }
 0x1d7   : > { %2984 = vmatprep.mubr.bf16.mxu1 %v2243_v29 }
 0x1dc   : > { %4354 = vmatmul.mubr.msk.bf16.gmra.mrb[52].mxu0 %vm2196_vm15, %v5837_v44  ;;  %v2174_v44 = vpop.permute.xlu1 %2173 }
 0x1dd   : > { %4357 = vmatprep.mubr.msk.bf16.mxu0 %vm2196_vm15, %v5925_v57  ;;  %v2371_v57 = vsel %vm2196_vm15, %v6765_v13, %v2174_v44 }
 0x1de   : > { %2985 = vmatmul.mubr.bf16.gmra.mrb[52].mxu1 %v2363_v42 }
 0x1df   : > { %2992 = vmatprep.mubr.bf16.mxu1 %v6070_v8 }
 0x1e4   : > { %4358 = vmatmul.mubr.msk.bf16.gmra.mrb[56].mxu0 %vm2196_vm15, %v5966_v55  ;;  %v2176_v55 = vpop.permute.xlu0 %2175 }
 0x1e5   : > { %4361 = vmatprep.mubr.msk.bf16.mxu0 %vm2196_vm15, %v6006_v5  ;;  %v2375_v5 = vsel %vm2196_vm15, %v6766_v49, %v2176_v55 }
 0x1e6   : > { %2993 = vmatmul.mubr.bf16.gmra.mrb[56].mxu1 %v2367_v25 }
 0x1e7   : > { %3000 = vmatprep.mubr.bf16.mxu1 %v6121_v63  ;;  %v6767_v63 = vld [vmem:[#allocation23_spill] sm:$0xff] }
 0x1e8   : > { %v2190_v8 = vpop.permute.xlu0 %2189 }
 0x1ec   : > { %4362 = vmatmul.mubr.msk.bf16.gmra.mrb[60].mxu0 %vm2196_vm15, %v6051_v61  ;;  %v2178_v61 = vpop.permute.xlu1 %2177 }
 0x1ed   : > { %4365 = vmatprep.mubr.msk.bf16.mxu0 %vm2196_vm15, %v6036_v47  ;;  %v2379_v47 = vsel %vm2196_vm15, %v6767_v63, %v2178_v61 }
 0x1ee   : > { %3001 = vmatmul.mubr.bf16.gmra.mrb[60].mxu1 %v2371_v57 }
 0x1ef   : > { %3008 = vmatprep.mubr.bf16.mxu1 %v6158_v59  ;;  %v6768_v59 = vld [vmem:[#allocation24_spill] sm:$0xff] }
 0x1f0   : > { %v2391_v28 = vsel %vm2196_vm15, %v6768_v59, %v2190_v8 }
 0x1f4   : > { %4366 = vmatmul.mubr.msk.bf16.gmra.mrb[64].mxu0 %vm2196_vm15, %v6084_v31  ;;  %v2192_v31 = vpop.permute.xlu0 %2191 }
 0x1f5   : > { %4369 = vmatprep.mubr.msk.bf16.mxu0 %vm2196_vm15, %v6061_v56  ;;  %v2180_v56 = vpop.permute.xlu1 %2179 }
 0x1f6   : > { %3009 = vmatmul.mubr.bf16.gmra.mrb[64].mxu1 %v2375_v5 }
 0x1f7   : > { %3016 = vmatprep.mubr.bf16.mxu1 %v6179_v21  ;;  %v2383_v21 = vsel %vm2196_vm15, %v6769_v1, %v2180_v56 }
 0x1fc   : > { %4370 = vmatmul.mubr.msk.bf16.gmra.mrb[68].mxu0 %vm2196_vm15, %v6086_v26  ;;  %v2395_v26 = vsel %vm2196_vm15, %v3854_v0, %v2192_v31 }
 0x1fd   : > { %4373 = vmatprep.mubr.msk.bf16.mxu0 %vm2196_vm15, %v6102_v62  ;;  %v2182_v62 = vpop.permute.xlu1 %2181 }
 0x1fe   : > { %3017 = vmatmul.mubr.bf16.gmra.mrb[68].mxu1 %v2379_v47  ;;  %v2387_v22 = vsel %vm2196_vm15, %v6183_v9, %v2182_v62 }
 0x1ff   : > { %3024 = vmatprep.mubr.bf16.mxu1 %v2391_v28 }
 0x204   : > { %4374 = vmatmul.mubr.msk.bf16.gmra.mrb[72].mxu0 %vm2196_vm15, %v6143_v41 }
 0x205   : > { %4377 = vmatprep.mubr.msk.bf16.mxu0 %vm2196_vm15, %v6185_v30 }
 0x206   : > { %3025 = vmatmul.mubr.bf16.gmra.mrb[72].mxu1 %v2383_v21 }
 0x207   : > { %3032 = vmatprep.mubr.bf16.mxu1 %v2395_v26 }
 0x20c   : > { %4378 = vmatmul.mubr.msk.bf16.gmra.mrb[76].mxu0 %vm2196_vm15, %v3856_v17 }
 0x20e   : > { %3033 = vmatmul.mubr.bf16.gmra.mrb[76].mxu1 %v2387_v22 }
 0x22a   : > { %v4113_v41 = vpop.f32.mrb[0].mxu0 }
 0x22b   : > { %v4114_v4 = vpop.f32.mrb[1].mxu0 }
 0x22c   : > { %v4115_v3 = vadd.f32 %v4114_v4, %v4113_v41  ;;  %v4116_v43 = vpop.f32.mrb[2].mxu0 }
 0x22d   : > { %v4117_v0 = vpop.f32.mrb[3].mxu0 }
 0x22e   : > { %v4118_v48 = vadd.f32 %v4117_v0, %v4116_v43 }
 0x22f   : > { %v4185_v10 = vpop.f32.mrb[0].mxu1 }
 0x230   : > { %v4186_v30 = vpop.f32.mrb[1].mxu1 }
 0x231   : > { %v6320_v16 = vadd.f32 %v4186_v30, %v4185_v10  ;;  %v4188_v18 = vpop.f32.mrb[2].mxu1 }
 0x232   : > { %v4119_v40 = vpop.f32.mrb[4].mxu0  ;;  %v4189_v38 = vpop.f32.mrb[3].mxu1 }
 0x233   : > { %v4120_v9 = vpop.f32.mrb[5].mxu0  ;;  %v6322_v23 = vadd.f32 %v4189_v38, %v4188_v18 }
 0x234   : > { %v4121_v52 = vadd.f32 %v4120_v9, %v4119_v40  ;;  %v4122_v54 = vpop.f32.mrb[6].mxu0 }
 0x235   : > { %v4123_v17 = vpop.f32.mrb[7].mxu0 }
 0x236   : > { %v4124_v34 = vadd.f32 %v4123_v17, %v4122_v54 }
 0x238   : > { %v4191_v20 = vpop.f32.mrb[4].mxu1 }
 0x239   : > { %v4192_v7 = vpop.f32.mrb[5].mxu1 }
 0x23a   : > { %v6324_v46 = vadd.f32 %v4192_v7, %v4191_v20  ;;  %v4194_v2 = vpop.f32.mrb[6].mxu1  ;;  %v4125_v51 = vpop.f32.mrb[8].mxu0 }
 0x23b   : > { %v4195_v58 = vpop.f32.mrb[7].mxu1  ;;  %v4126_v27 = vpop.f32.mrb[9].mxu0 }
 0x23c   : > { %v6326_v19 = vadd.f32 %v4195_v58, %v4194_v2  ;;  %v4127_v36 = vadd.f32 %v4126_v27, %v4125_v51  ;;  %v4128_v11 = vpop.f32.mrb[10].mxu0 }
 0x23d   : > { %v4129_v15 = vpop.f32.mrb[11].mxu0 }
 0x23e   : > { %v4130_v60 = vadd.f32 %v4129_v15, %v4128_v11 }
 0x240   : > { %v4197_v45 = vpop.f32.mrb[8].mxu1 }
 0x241   : > { %v4198_v37 = vpop.f32.mrb[9].mxu1 }
 0x242   : > { %v6328_v50 = vadd.f32 %v4198_v37, %v4197_v45  ;;  %v4200_v53 = vpop.f32.mrb[10].mxu1  ;;  %v4131_v29 = vpop.f32.mrb[12].mxu0 }
 0x243   : > { %v4201_v24 = vpop.f32.mrb[11].mxu1  ;;  %v4132_v12 = vpop.f32.mrb[13].mxu0 }
 0x244   : > { %v6330_v32 = vadd.f32 %v4201_v24, %v4200_v53  ;;  %v6332_v33 = vadd.f32 %v4132_v12, %v4131_v29  ;;  %v4134_v39 = vpop.f32.mrb[14].mxu0 }
 0x245   : > { %v4135_v35 = vpop.f32.mrb[15].mxu0 }
 0x246   : > { %v4136_v14 = vadd.f32 %v4135_v35, %v4134_v39 }
 0x248   : > { %v4203_v42 = vpop.f32.mrb[12].mxu1 }
 0x249   : > { %v4204_v6 = vpop.f32.mrb[13].mxu1 }
 0x24a   : > { %v6334_v25 = vadd.f32 %v4204_v6, %v4203_v42  ;;  %v4206_v44 = vpop.f32.mrb[14].mxu1 }
 0x24b   : > { %v4207_v13 = vpop.f32.mrb[15].mxu1 }
 0x24c   : > { %v6336_v57 = vadd.f32 %v4207_v13, %v4206_v44 }
 0x24e   : > { %v4137_v55 = vpop.f32.mrb[16].mxu0 }
 0x24f   : > { %v4138_v49 = vpop.f32.mrb[17].mxu0 }
 0x250   : > { %v6338_v5 = vadd.f32 %v4138_v49, %v4137_v55  ;;  %v4140_v61 = vpop.f32.mrb[18].mxu0 }
 0x251   : > { %v4141_v8 = vpop.f32.mrb[19].mxu0  ;;  %v4225_v63 = vpop.f32.mrb[16].mxu1 }
 0x252   : > { %v6340_v47 = vadd.f32 %v4141_v8, %v4140_v61  ;;  %v4226_v59 = vpop.f32.mrb[17].mxu1 }
 0x253   : > { %v4227_v28 = vadd.f32 %v4226_v59, %v4225_v63  ;;  %v4228_v56 = vpop.f32.mrb[18].mxu1 }
 0x254   : > { %v4229_v31 = vpop.f32.mrb[19].mxu1 }
 0x255   : > { %v4230_v1 = vadd.f32 %v4229_v31, %v4228_v56  ;;  %v6342_v21 = vadd.f32 %v4227_v28, %v4115_v3 }
 0x257   : > { %v6344_v26 = vadd.f32 %v4230_v1, %v4118_v48 }
 0x25b   : > { %v4143_v62 = vpop.f32.mrb[20].mxu0  ;;  %v4231_v22 = vpop.f32.mrb[20].mxu1 }
 0x25c   : > { %v4144_v41 = vpop.f32.mrb[21].mxu0  ;;  %v4232_v4 = vpop.f32.mrb[21].mxu1 }
 0x25d   : > { %v6346_v43 = vadd.f32 %v4144_v41, %v4143_v62  ;;  %v4146_v0 = vpop.f32.mrb[22].mxu0  ;;  %v4233_v10 = vadd.f32 %v4232_v4, %v4231_v22  ;;  %v4234_v30 = vpop.f32.mrb[22].mxu1 }
 0x25e   : > { %v4147_v18 = vpop.f32.mrb[23].mxu0  ;;  %v4235_v40 = vpop.f32.mrb[23].mxu1 }
 0x25f   : > { %v4148_v38 = vadd.f32 %v4147_v18, %v4146_v0  ;;  %v4236_v9 = vadd.f32 %v4235_v40, %v4234_v30  ;;  %v6348_v54 = vadd.f32 %v4233_v10, %v4121_v52 }
 0x261   : > { %v6350_v17 = vadd.f32 %v4236_v9, %v4124_v34 }
 0x264   : > { %v4149_v3 = vpop.f32.mrb[24].mxu0 }
 0x265   : > { %v4150_v48 = vpop.f32.mrb[25].mxu0 }
 0x266   : > { %v6352_v20 = vadd.f32 %v4150_v48, %v4149_v3  ;;  %v4152_v7 = vpop.f32.mrb[26].mxu0 }
 0x267   : > { %v4153_v2 = vpop.f32.mrb[27].mxu0  ;;  %v4237_v51 = vpop.f32.mrb[24].mxu1 }
 0x268   : > { %v6354_v58 = vadd.f32 %v4153_v2, %v4152_v7  ;;  %v4238_v27 = vpop.f32.mrb[25].mxu1 }
 0x269   : > { %v4239_v11 = vadd.f32 %v4238_v27, %v4237_v51  ;;  %v4240_v15 = vpop.f32.mrb[26].mxu1 }
 0x26a   : > { %v4241_v45 = vpop.f32.mrb[27].mxu1 }
 0x26b   : > { %v4242_v37 = vadd.f32 %v4241_v45, %v4240_v15  ;;  %v6356_v53 = vadd.f32 %v4239_v11, %v4127_v36 }
 0x26d   : > { %v6358_v52 = vadd.f32 %v4242_v37, %v4130_v60 }
 0x272   : > { %v4155_v34 = vpop.f32.mrb[28].mxu0 }
 0x273   : > { %v4156_v29 = vpop.f32.mrb[29].mxu0 }
 0x274   : > { %v6360_v24 = vadd.f32 %v4156_v29, %v4155_v34  ;;  %v4158_v12 = vpop.f32.mrb[30].mxu0 }
 0x275   : > { %v4159_v39 = vpop.f32.mrb[31].mxu0  ;;  %v4243_v35 = vpop.f32.mrb[28].mxu1 }
 0x276   : > { %v6362_v42 = vadd.f32 %v4159_v39, %v4158_v12  ;;  %v4244_v6 = vpop.f32.mrb[29].mxu1 }
 0x277   : > { %v4245_v44 = vadd.f32 %v4244_v6, %v4243_v35  ;;  %v4246_v13 = vpop.f32.mrb[30].mxu1 }
 0x278   : > { %v4247_v55 = vpop.f32.mrb[31].mxu1 }
 0x279   : > { %v4248_v49 = vadd.f32 %v4247_v55, %v4246_v13  ;;  %v6365_v61 = vadd.f32 %v4245_v44, %v6332_v33 }
 0x27b   : > { %v6367_v36 = vadd.f32 %v4248_v49, %v4136_v14 }
 0x281   : > { %v4161_v60 = vpop.f32.mrb[32].mxu0 }
 0x282   : > { %v4162_v8 = vpop.f32.mrb[33].mxu0 }
 0x283   : > { %v6369_v63 = vadd.f32 %v4162_v8, %v4161_v60  ;;  %v4164_v59 = vpop.f32.mrb[34].mxu0 }
 0x284   : > { %v4165_v28 = vpop.f32.mrb[35].mxu0  ;;  %v4249_v56 = vpop.f32.mrb[32].mxu1 }
 0x285   : > { %v6371_v31 = vadd.f32 %v4165_v28, %v4164_v59  ;;  %v4250_v1 = vpop.f32.mrb[33].mxu1 }
 0x286   : > { %v4251_v62 = vadd.f32 %v4250_v1, %v4249_v56  ;;  %v4252_v22 = vpop.f32.mrb[34].mxu1 }
 0x287   : > { %v4253_v41 = vpop.f32.mrb[35].mxu1 }
 0x288   : > { %v4254_v4 = vadd.f32 %v4253_v41, %v4252_v22  ;;  %v6374_v0 = vadd.f32 %v4251_v62, %v6338_v5 }
 0x28a   : > { %v4167_v33 = vpop.f32.mrb[36].mxu0  ;;  %v6377_v14 = vadd.f32 %v4254_v4, %v6340_v47 }
 0x28b   : > { %v4168_v10 = vpop.f32.mrb[37].mxu0 }
 0x28c   : > { %v6379_v30 = vadd.f32 %v4168_v10, %v4167_v33  ;;  %v4170_v18 = vpop.f32.mrb[38].mxu0 }
 0x28d   : > { %v4171_v40 = vpop.f32.mrb[39].mxu0  ;;  %v4255_v9 = vpop.f32.mrb[36].mxu1 }
 0x28e   : > { %v6381_v3 = vadd.f32 %v4171_v40, %v4170_v18  ;;  %v4256_v48 = vpop.f32.mrb[37].mxu1 }
 0x28f   : > { %v4257_v7 = vadd.f32 %v4256_v48, %v4255_v9  ;;  %v4258_v2 = vpop.f32.mrb[38].mxu1 }
 0x290   : > { %v4259_v51 = vpop.f32.mrb[39].mxu1 }
 0x291   : > { %v4260_v27 = vadd.f32 %v4259_v51, %v4258_v2  ;;  %v6384_v5 = vadd.f32 %v4257_v7, %v6346_v43 }
 0x293   : > { %v6386_v11 = vadd.f32 %v4260_v27, %v4148_v38 }
 0x296   : > { %v4173_v47 = vpop.f32.mrb[40].mxu0 }
 0x297   : > { %v4174_v15 = vpop.f32.mrb[41].mxu0 }
 0x298   : > { %v6388_v45 = vadd.f32 %v4174_v15, %v4173_v47  ;;  %v4176_v37 = vpop.f32.mrb[42].mxu0 }
 0x299   : > { %v4177_v34 = vpop.f32.mrb[43].mxu0  ;;  %v4261_v29 = vpop.f32.mrb[40].mxu1 }
 0x29a   : > { %v6390_v12 = vadd.f32 %v4177_v34, %v4176_v37  ;;  %v4262_v39 = vpop.f32.mrb[41].mxu1 }
 0x29b   : > { %v4263_v35 = vadd.f32 %v4262_v39, %v4261_v29  ;;  %v4264_v6 = vpop.f32.mrb[42].mxu1 }
 0x29c   : > { %v4265_v44 = vpop.f32.mrb[43].mxu1 }
 0x29d   : > { %v4266_v13 = vadd.f32 %v4265_v44, %v4264_v6  ;;  %v6393_v55 = vadd.f32 %v4263_v35, %v6352_v20 }
 0x29f   : > { %v4179_v43 = vpop.f32.mrb[44].mxu0  ;;  %v6396_v38 = vadd.f32 %v4266_v13, %v6354_v58 }
 0x2a0   : > { %v4180_v49 = vpop.f32.mrb[45].mxu0 }
 0x2a1   : > { %v6398_v60 = vadd.f32 %v4180_v49, %v4179_v43  ;;  %v4182_v8 = vpop.f32.mrb[46].mxu0  ;;  %v4267_v59 = vpop.f32.mrb[44].mxu1 }
 0x2a2   : > { %v4183_v28 = vpop.f32.mrb[47].mxu0  ;;  %v4268_v56 = vpop.f32.mrb[45].mxu1 }
 0x2a3   : > { %v6400_v1 = vadd.f32 %v4183_v28, %v4182_v8  ;;  %v4269_v62 = vadd.f32 %v4268_v56, %v4267_v59  ;;  %v4270_v22 = vpop.f32.mrb[46].mxu1 }
 0x2a4   : > { %v4271_v41 = vpop.f32.mrb[47].mxu1 }
 0x2a5   : > { %v4272_v4 = vadd.f32 %v4271_v41, %v4270_v22  ;;  %v6403_v20 = vadd.f32 %v4269_v62, %v6360_v24 }
 0x2a7   : > { %v4351_v33 = vpop.f32.mrb[48].mxu0  ;;  %v6406_v58 = vadd.f32 %v4272_v4, %v6362_v42 }
 0x2a8   : > { %v3084_v10 = vadd.f32 %v4351_v33, %v6348_v54  ;;  %v3075_v18 = vpop.f32.mrb[49].mxu0 }
 0x2a9   : > { %v3076_v40 = vadd.f32 %v3075_v18, %v6342_v21  ;;  %v4352_v9 = vpop.f32.mrb[50].mxu0  ;;  %v4273_v48 = vpop.f32.mrb[48].mxu1 }
 0x2aa   : > { %v3987_v7 = vpack.c.bf16 %v3084_v10, %v3084_v10  ;;  %v3087_v2 = vadd.f32 %v4352_v9, %v6350_v17  ;;  %v3078_v51 = vpop.f32.mrb[51].mxu0  ;;  %v4274_v27 = vpop.f32.mrb[49].mxu1  ;;  %v3433_v21 = vmul.f32 %v3084_v10, %v3084_v10  ;;  %v3365_v13 = vsel %vm2196_vm15, %v3084_v10, 0.0 }
 0x2ab   : > { %v3985_v47 = vpack.c.bf16 %v3076_v40, %v3076_v40  ;;  %v3431_v24 = vmul.f32 %v3076_v40, %v3076_v40  ;;  %v3079_v15 = vadd.f32 %v3078_v51, %v6344_v26  ;;  %v4276_v37 = vpop.f32.mrb[50].mxu1  ;;  %v3362_v17 = vsel %vm2196_vm15, %v3076_v40, 0.0 }
 0x2ac   : > { %3332 = vst.msk [vmem:[%s6414_s28 + $0x8] sm:$0xf] %vm1022_vm0, %v3987_v7  ;;  %v3988_v54 = vpack.c.bf16 %v3087_v2, %v3087_v2  ;;  %v4277_v42 = vpop.f32.mrb[51].mxu1  ;;  %v3434_v39 = vmul.f32 %v3087_v2, %v3087_v2  ;;  %v4275_v6 = vadd.f32 %v4274_v27, %v4273_v48  ;;  %v3466_v41 = vsel %vm2196_vm15, %v3433_v21, 0.0 }
 0x2ad   : > { %3330 = vst.msk [vmem:[%s6414_s28] sm:$0xf] %vm1022_vm0, %v3985_v47  ;;  %v3986_v34 = vpack.c.bf16 %v3079_v15, %v3079_v15  ;;  %v3363_v26 = vsel %vm2196_vm15, %v3079_v15, 0.0  ;;  %v3432_v29 = vmul.f32 %v3079_v15, %v3079_v15  ;;  %v4278_v44 = vadd.f32 %v4277_v42, %v4276_v37 }
 0x2ae   : > { %3333 = vst.msk [vmem:[%s6414_s28 + $0xc] sm:$0xf] %vm1022_vm0, %v3988_v54  ;;  %v3364_v35 = vadd.f32 %v3363_v26, %v3362_v17  ;;  %v3463_v43 = vsel %vm2196_vm15, %v3431_v24, 0.0  ;;  %v6431_v22 = vadd.f32 %v4275_v6, %v6369_v63  ;;  %v3367_v40 = vsel %vm2196_vm15, %v3087_v2, 0.0 }
 0x2af   : > { %3331 = vst.msk [vmem:[%s6414_s28 + $0x4] sm:$0xf] %vm1022_vm0, %v3986_v34  ;;  %v3464_v49 = vsel %vm2196_vm15, %v3432_v29, 0.0  ;;  %v4355_v8 = vpop.f32.mrb[52].mxu0  ;;  %v6436_v18 = vadd.f32 %v4278_v44, %v6371_v31  ;;  %v3468_v9 = vsel %vm2196_vm15, %v3434_v39, 0.0 }
 0x2b0   : > { %v3366_v59 = vadd.f32 %v3365_v13, %v3364_v35  ;;  %v3465_v28 = vadd.f32 %v3464_v49, %v3463_v43  ;;  %v3100_v56 = vadd.f32 %v4355_v8, %v6365_v61  ;;  %v3091_v62 = vpop.f32.mrb[53].mxu0 }
 0x2b1   : > { %v3092_v4 = vadd.f32 %v3091_v62, %v6356_v53  ;;  %v4356_v33 = vpop.f32.mrb[54].mxu0  ;;  %v4279_v10 = vpop.f32.mrb[52].mxu1 }
 0x2b2   : > { %v3467_v61 = vadd.f32 %v3466_v41, %v3465_v28  ;;  %v3991_v48 = vpack.c.bf16 %v3100_v56, %v3100_v56  ;;  %v3094_v7 = vpop.f32.mrb[55].mxu0  ;;  %v4280_v63 = vpop.f32.mrb[53].mxu1  ;;  %v3368_v27 = vadd.f32 %v3367_v40, %v3366_v59  ;;  %v3103_v31 = vadd.f32 %v4356_v33, %v6367_v36 }
 0x2b3   : > { %v3989_v51 = vpack.c.bf16 %v3092_v4, %v3092_v4  ;;  %v3369_v47 = vsel %vm2196_vm15, %v3092_v4, 0.0  ;;  %v3435_v24 = vmul.f32 %v3092_v4, %v3092_v4  ;;  %v4282_v53 = vpop.f32.mrb[54].mxu1  ;;  %v3095_v2 = vadd.f32 %v3094_v7, %v6358_v52 }
 0x2b4   : > { %3336 = vst.msk [vmem:[%s6414_s28 + $0x18] sm:$0xf] %vm1022_vm0, %v3991_v48  ;;  %v3469_v15 = vadd.f32 %v3468_v9, %v3467_v61  ;;  %v4283_v37 = vpop.f32.mrb[55].mxu1  ;;  %v3370_v21 = vadd.f32 %v3369_v47, %v3368_v27  ;;  %v4281_v42 = vadd.f32 %v4280_v63, %v4279_v10  ;;  %v3437_v34 = vmul.f32 %v3100_v56, %v3100_v56 }
 0x2b5   : > { %3334 = vst.msk [vmem:[%s6414_s28 + $0x10] sm:$0xf] %vm1022_vm0, %v3989_v51  ;;  %v3470_v54 = vsel %vm2196_vm15, %v3435_v24, 0.0  ;;  %v4284_v17 = vadd.f32 %v4283_v37, %v4282_v53  ;;  %v3992_v29 = vpack.c.bf16 %v3103_v31, %v3103_v31  ;;  %v3990_v39 = vpack.c.bf16 %v3095_v2, %v3095_v2 }
 0x2b6   : > { %v3471_v26 = vadd.f32 %v3470_v54, %v3469_v15  ;;  %v3371_v35 = vsel %vm2196_vm15, %v3095_v2, 0.0  ;;  %v3436_v6 = vmul.f32 %v3095_v2, %v3095_v2  ;;  %v6450_v44 = vadd.f32 %v4281_v42, %v6379_v30 }
 0x2b7   : > { %v4359_v36 = vpop.f32.mrb[56].mxu0  ;;  %3337 = vst.msk [vmem:[%s6414_s28 + $0x1c] sm:$0xf] %vm1022_vm0, %v3992_v29  ;;  %v3372_v52 = vadd.f32 %v3371_v35, %v3370_v21  ;;  %v6456_v49 = vadd.f32 %v4284_v17, %v6381_v3  ;;  %v3373_v8 = vsel %vm2196_vm15, %v3100_v56, 0.0  ;;  %v3438_v59 = vmul.f32 %v3103_v31, %v3103_v31  ;;  %3335 = vst.msk [vmem:[%s6414_s28 + $0x14] sm:$0xf] %vm1022_vm0, %v3990_v39 }
 0x2b8   : > { %v3116_v13 = vadd.f32 %v4359_v36, %v6384_v5  ;;  %v3107_v43 = vpop.f32.mrb[57].mxu0  ;;  %v3472_v28 = vsel %vm2196_vm15, %v3436_v6, 0.0  ;;  %v3474_v4 = vsel %vm2196_vm15, %v3437_v34, 0.0  ;;  %v3375_v56 = vsel %vm2196_vm15, %v3103_v31, 0.0 }
 0x2b9   : > { %v3108_v30 = vadd.f32 %v3107_v43, %v6374_v0  ;;  %v4360_v62 = vpop.f32.mrb[58].mxu0  ;;  %v4285_v41 = vpop.f32.mrb[56].mxu1  ;;  %v3374_v33 = vadd.f32 %v3373_v8, %v3372_v52  ;;  %v3473_v5 = vadd.f32 %v3472_v28, %v3471_v26  ;;  %v3476_v24 = vsel %vm2196_vm15, %v3438_v59, 0.0 }
 0x2ba   : > { %v3995_v10 = vpack.c.bf16 %v3116_v13, %v3116_v13  ;;  %v3110_v3 = vpop.f32.mrb[59].mxu0  ;;  %v4286_v40 = vpop.f32.mrb[57].mxu1  ;;  %v3119_v51 = vadd.f32 %v4360_v62, %v6386_v11  ;;  %v3441_v2 = vmul.f32 %v3116_v13, %v3116_v13  ;;  %v3381_v42 = vsel %vm2196_vm15, %v3116_v13, 0.0 }
 0x2bb   : > { %v3993_v9 = vpack.c.bf16 %v3108_v30, %v3108_v30  ;;  %v3377_v61 = vsel %vm2196_vm15, %v3108_v30, 0.0  ;;  %v3439_v48 = vmul.f32 %v3108_v30, %v3108_v30  ;;  %v4288_v7 = vpop.f32.mrb[58].mxu1  ;;  %v3475_v63 = vadd.f32 %v3474_v4, %v3473_v5 }
 0x2bc   : > { %3340 = vst.msk [vmem:[%s6414_s28 + $0x28] sm:$0xf] %vm1022_vm0, %v3995_v10  ;;  %v3376_v0 = vadd.f32 %v3375_v56, %v3374_v33  ;;  %v3111_v27 = vadd.f32 %v3110_v3, %v6377_v14  ;;  %v4289_v47 = vpop.f32.mrb[59].mxu1  ;;  %v4287_v15 = vadd.f32 %v4286_v40, %v4285_v41  ;;  %v3996_v54 = vpack.c.bf16 %v3119_v51, %v3119_v51 }
 0x2bd   : > { %3338 = vst.msk [vmem:[%s6414_s28 + $0x20] sm:$0xf] %vm1022_vm0, %v3993_v9  ;;  %v3478_v53 = vsel %vm2196_vm15, %v3439_v48, 0.0  ;;  %v4290_v31 = vadd.f32 %v4289_v47, %v4288_v7  ;;  %v3477_v21 = vadd.f32 %v3476_v24, %v3475_v63  ;;  %v3442_v36 = vmul.f32 %v3119_v51, %v3119_v51 }
 0x2be   : > { %v3378_v37 = vadd.f32 %v3377_v61, %v3376_v0  ;;  %v3994_v11 = vpack.c.bf16 %v3111_v27, %v3111_v27  ;;  %v3379_v14 = vsel %vm2196_vm15, %v3111_v27, 0.0  ;;  %v3440_v17 = vmul.f32 %v3111_v27, %v3111_v27  ;;  %3341 = vst.msk [vmem:[%s6414_s28 + $0x2c] sm:$0xf] %vm1022_vm0, %v3996_v54 }
 0x2bf   : > { %v4363_v34 = vpop.f32.mrb[60].mxu0  ;;  %v3479_v26 = vadd.f32 %v3478_v53, %v3477_v21  ;;  %v6480_v6 = vadd.f32 %v4287_v15, %v6388_v45  ;;  %v6487_v59 = vadd.f32 %v4290_v31, %v6390_v12  ;;  %v3482_v28 = vsel %vm2196_vm15, %v3441_v2, 0.0 }
 0x2c0   : > { %v3380_v29 = vadd.f32 %v3379_v14, %v3378_v37  ;;  %v3132_v39 = vadd.f32 %v4363_v34, %v6403_v20  ;;  %v3123_v35 = vpop.f32.mrb[61].mxu0  ;;  %3339 = vst.msk [vmem:[%s6414_s28 + $0x24] sm:$0xf] %vm1022_vm0, %v3994_v11  ;;  %v3480_v52 = vsel %vm2196_vm15, %v3440_v17, 0.0  ;;  %v3383_v4 = vsel %vm2196_vm15, %v3119_v51, 0.0 }
 0x2c1   : > { %v3124_v13 = vadd.f32 %v3123_v35, %v6393_v55  ;;  %v4364_v43 = vpop.f32.mrb[62].mxu0  ;;  %v4291_v8 = vpop.f32.mrb[60].mxu1  ;;  %v3481_v30 = vadd.f32 %v3480_v52, %v3479_v26  ;;  %v3484_v61 = vsel %vm2196_vm15, %v3442_v36, 0.0 }
 0x2c2   : > { %v3382_v20 = vadd.f32 %v3381_v42, %v3380_v29  ;;  %v3999_v45 = vpack.c.bf16 %v3132_v39, %v3132_v39  ;;  %v3126_v62 = vpop.f32.mrb[63].mxu0  ;;  %v4292_v41 = vpop.f32.mrb[61].mxu1  ;;  %v3135_v40 = vadd.f32 %v4364_v43, %v6406_v58  ;;  %v3445_v0 = vmul.f32 %v3132_v39, %v3132_v39 }
 0x2c3   : > { %v3997_v33 = vpack.c.bf16 %v3124_v13, %v3124_v13  ;;  %v3385_v5 = vsel %vm2196_vm15, %v3124_v13, 0.0  ;;  %v3443_v55 = vmul.f32 %v3124_v13, %v3124_v13  ;;  %v4294_v10 = vpop.f32.mrb[62].mxu1  ;;  %v3483_v3 = vadd.f32 %v3482_v28, %v3481_v30 }
 0x2c4   : > { %3344 = vst.msk [vmem:[%s6414_s28 + $0x38] sm:$0xf] %vm1022_vm0, %v3999_v45  ;;  %v3384_v12 = vadd.f32 %v3383_v4, %v3382_v20  ;;  %v3127_v56 = vadd.f32 %v3126_v62, %v6396_v38  ;;  %v4295_v9 = vpop.f32.mrb[63].mxu1  ;;  %v4293_v7 = vadd.f32 %v4292_v41, %v4291_v8  ;;  %v4000_v47 = vpack.c.bf16 %v3135_v40, %v3135_v40 }
 0x2c5   : > { %3342 = vst.msk [vmem:[%s6414_s28 + $0x30] sm:$0xf] %vm1022_vm0, %v3997_v33  ;;  %v3486_v48 = vsel %vm2196_vm15, %v3443_v55, 0.0  ;;  %v4296_v63 = vadd.f32 %v4295_v9, %v4294_v10  ;;  %v3485_v27 = vadd.f32 %v3484_v61, %v3483_v3  ;;  %v3389_v24 = vsel %vm2196_vm15, %v3132_v39, 0.0 }
 0x2c6   : > { %v3386_v51 = vadd.f32 %v3385_v5, %v3384_v12  ;;  %v3998_v58 = vpack.c.bf16 %v3127_v56, %v3127_v56  ;;  %v3387_v38 = vsel %vm2196_vm15, %v3127_v56, 0.0  ;;  %v3444_v53 = vmul.f32 %v3127_v56, %v3127_v56  ;;  %3345 = vst.msk [vmem:[%s6414_s28 + $0x3c] sm:$0xf] %vm1022_vm0, %v4000_v47 }
 0x2c7   : > { %v4367_v15 = vpop.f32.mrb[64].mxu0  ;;  %v3487_v31 = vadd.f32 %v3486_v48, %v3485_v27  ;;  %v3003_v54 = vadd.f32 %v4293_v7, %v6398_v60  ;;  %v3446_v42 = vmul.f32 %v3135_v40, %v3135_v40  ;;  %v3006_v26 = vadd.f32 %v4296_v63, %v6400_v1 }
 0x2c8   : > { %v3388_v2 = vadd.f32 %v3387_v38, %v3386_v51  ;;  %v3148_v37 = vadd.f32 %v4367_v15, %v6450_v44  ;;  %v3139_v21 = vpop.f32.mrb[65].mxu0  ;;  %3343 = vst.msk [vmem:[%s6414_s28 + $0x34] sm:$0xf] %vm1022_vm0, %v3998_v58  ;;  %v3488_v11 = vsel %vm2196_vm15, %v3444_v53, 0.0  ;;  %v3490_v29 = vsel %vm2196_vm15, %v3445_v0, 0.0 }
 0x2c9   : > { %v3140_v14 = vadd.f32 %v3139_v21, %v6431_v22  ;;  %v4368_v17 = vpop.f32.mrb[66].mxu0  ;;  %v4297_v34 = vpop.f32.mrb[64].mxu1  ;;  %v3489_v35 = vadd.f32 %v3488_v11, %v3487_v31  ;;  %v3391_v52 = vsel %vm2196_vm15, %v3135_v40, 0.0  ;;  %v3492_v62 = vsel %vm2196_vm15, %v3446_v42, 0.0 }
 0x2ca   : > { %v3390_v39 = vadd.f32 %v3389_v24, %v3388_v2  ;;  %v4003_v44 = vpack.c.bf16 %v3148_v37, %v3148_v37  ;;  %v3142_v36 = vpop.f32.mrb[67].mxu0  ;;  %v4298_v60 = vpop.f32.mrb[65].mxu1  ;;  %v3151_v1 = vadd.f32 %v4368_v17, %v6456_v49  ;;  %v3449_v5 = vmul.f32 %v3148_v37, %v3148_v37 }
 0x2cb   : > { %v4001_v13 = vpack.c.bf16 %v3140_v14, %v3140_v14  ;;  %v3393_v43 = vsel %vm2196_vm15, %v3140_v14, 0.0  ;;  %v3447_v8 = vmul.f32 %v3140_v14, %v3140_v14  ;;  %v4300_v22 = vpop.f32.mrb[66].mxu1  ;;  %v3491_v28 = vadd.f32 %v3490_v29, %v3489_v35 }
 0x2cc   : > { %3348 = vst.msk [vmem:[%s6414_s28 + $0x48] sm:$0xf] %vm1022_vm0, %v4003_v44  ;;  %v3392_v20 = vadd.f32 %v3391_v52, %v3390_v39  ;;  %v3143_v30 = vadd.f32 %v3142_v36, %v6436_v18  ;;  %v4301_v45 = vpop.f32.mrb[67].mxu1  ;;  %v4299_v4 = vadd.f32 %v4298_v60, %v4297_v34  ;;  %v4004_v3 = vpack.c.bf16 %v3151_v1, %v3151_v1 }
 0x2cd   : > { %3346 = vst.msk [vmem:[%s6414_s28 + $0x40] sm:$0xf] %vm1022_vm0, %v4001_v13  ;;  %v3494_v41 = vsel %vm2196_vm15, %v3447_v8, 0.0  ;;  %v4302_v33 = vadd.f32 %v4301_v45, %v4300_v22  ;;  %v3493_v10 = vadd.f32 %v3492_v62, %v3491_v28  ;;  %v3397_v12 = vsel %vm2196_vm15, %v3148_v37, 0.0 }
 0x2ce   : > { %v3394_v55 = vadd.f32 %v3393_v43, %v3392_v20  ;;  %v4002_v49 = vpack.c.bf16 %v3143_v30, %v3143_v30  ;;  %v3395_v18 = vsel %vm2196_vm15, %v3143_v30, 0.0  ;;  %v3448_v40 = vmul.f32 %v3143_v30, %v3143_v30  ;;  %3349 = vst.msk [vmem:[%s6414_s28 + $0x4c] sm:$0xf] %vm1022_vm0, %v4004_v3 }
 0x2cf   : > { %v4371_v56 = vpop.f32.mrb[68].mxu0  ;;  %v3495_v9 = vadd.f32 %v3494_v41, %v3493_v10  ;;  %v3011_v63 = vadd.f32 %v4299_v4, %v6320_v16  ;;  %v3450_v0 = vmul.f32 %v3151_v1, %v3151_v1  ;;  %v3014_v58 = vadd.f32 %v4302_v33, %v6322_v23 }
 0x2d0   : > { %v3396_v61 = vadd.f32 %v3395_v18, %v3394_v55  ;;  %v3164_v48 = vadd.f32 %v4371_v56, %v3003_v54  ;;  %v3155_v7 = vpop.f32.mrb[69].mxu0  ;;  %3347 = vst.msk [vmem:[%s6414_s28 + $0x44] sm:$0xf] %vm1022_vm0, %v4002_v49  ;;  %v3496_v51 = vsel %vm2196_vm15, %v3448_v40, 0.0  ;;  %v3498_v38 = vsel %vm2196_vm15, %v3449_v5, 0.0 }
 0x2d1   : > { %v3156_v27 = vadd.f32 %v3155_v7, %v6480_v6  ;;  %v4372_v47 = vpop.f32.mrb[70].mxu0  ;;  %v4303_v24 = vpop.f32.mrb[68].mxu1  ;;  %v3497_v15 = vadd.f32 %v3496_v51, %v3495_v9  ;;  %v3399_v37 = vsel %vm2196_vm15, %v3151_v1, 0.0  ;;  %v3500_v29 = vsel %vm2196_vm15, %v3450_v0, 0.0 }
 0x2d2   : > { %v3398_v53 = vadd.f32 %v3397_v12, %v3396_v61  ;;  %v4007_v31 = vpack.c.bf16 %v3164_v48, %v3164_v48  ;;  %v3158_v2 = vpop.f32.mrb[71].mxu0  ;;  %v4304_v16 = vpop.f32.mrb[69].mxu1  ;;  %v3167_v23 = vadd.f32 %v4372_v47, %v3006_v26  ;;  %v3453_v13 = vmul.f32 %v3164_v48, %v3164_v48 }
 0x2d3   : > { %v4005_v21 = vpack.c.bf16 %v3156_v27, %v3156_v27  ;;  %v3401_v54 = vsel %vm2196_vm15, %v3156_v27, 0.0  ;;  %v3451_v42 = vmul.f32 %v3156_v27, %v3156_v27  ;;  %v4306_v6 = vpop.f32.mrb[70].mxu1  ;;  %v3499_v11 = vadd.f32 %v3498_v38, %v3497_v15 }
 0x2d4   : > { %3352 = vst.msk [vmem:[%s6414_s28 + $0x58] sm:$0xf] %vm1022_vm0, %v4007_v31  ;;  %v3400_v14 = vadd.f32 %v3399_v37, %v3398_v53  ;;  %v3159_v17 = vadd.f32 %v3158_v2, %v6487_v59  ;;  %v4307_v34 = vpop.f32.mrb[71].mxu1  ;;  %v4305_v35 = vadd.f32 %v4304_v16, %v4303_v24  ;;  %v4008_v52 = vpack.c.bf16 %v3167_v23, %v3167_v23 }
 0x2d5   : > { %3350 = vst.msk [vmem:[%s6414_s28 + $0x50] sm:$0xf] %vm1022_vm0, %v4005_v21  ;;  %v3502_v39 = vsel %vm2196_vm15, %v3451_v42, 0.0  ;;  %v4308_v44 = vadd.f32 %v4307_v34, %v4306_v6  ;;  %v3501_v60 = vadd.f32 %v3500_v29, %v3499_v11  ;;  %v3405_v45 = vsel %vm2196_vm15, %v3164_v48, 0.0 }
 0x2d6   : > { %v3402_v36 = vadd.f32 %v3401_v54, %v3400_v14  ;;  %v4006_v43 = vpack.c.bf16 %v3159_v17, %v3159_v17  ;;  %v3403_v26 = vsel %vm2196_vm15, %v3159_v17, 0.0  ;;  %v3452_v8 = vmul.f32 %v3159_v17, %v3159_v17  ;;  %3353 = vst.msk [vmem:[%s6414_s28 + $0x5c] sm:$0xf] %vm1022_vm0, %v4008_v52 }
 0x2d7   : > { %v4375_v59 = vpop.f32.mrb[72].mxu0  ;;  %v3503_v22 = vadd.f32 %v3502_v39, %v3501_v60  ;;  %v3019_v20 = vadd.f32 %v4305_v35, %v6324_v46  ;;  %v3022_v30 = vadd.f32 %v4308_v44, %v6326_v19  ;;  %v3454_v62 = vmul.f32 %v3167_v23, %v3167_v23 }
 0x2d8   : > { %v3404_v28 = vadd.f32 %v3403_v26, %v3402_v36  ;;  %v3171_v1 = vpop.f32.mrb[73].mxu0  ;;  %3351 = vst.msk [vmem:[%s6414_s28 + $0x54] sm:$0xf] %vm1022_vm0, %v4006_v43  ;;  %v3504_v41 = vsel %vm2196_vm15, %v3452_v8, 0.0  ;;  %v3506_v19 = vsel %vm2196_vm15, %v3453_v13, 0.0  ;;  %v3407_v61 = vsel %vm2196_vm15, %v3167_v23, 0.0 }
 0x2d9   : > { %v3172_v4 = vadd.f32 %v3171_v1, %v3011_v63  ;;  %v4376_v33 = vpop.f32.mrb[74].mxu0  ;;  %v4309_v5 = vpop.f32.mrb[72].mxu1  ;;  %v3505_v10 = vadd.f32 %v3504_v41, %v3503_v22  ;;  %v3180_v3 = vadd.f32 %v4375_v59, %v3019_v20  ;;  %v3508_v51 = vsel %vm2196_vm15, %v3454_v62, 0.0 }
 0x2da   : > { %v3406_v55 = vadd.f32 %v3405_v45, %v3404_v28  ;;  %v3183_v12 = vadd.f32 %v4376_v33, %v3022_v30  ;;  %v3174_v49 = vpop.f32.mrb[75].mxu0  ;;  %v4310_v46 = vpop.f32.mrb[73].mxu1 }
 0x2db   : > { %v4009_v18 = vpack.c.bf16 %v3172_v4, %v3172_v4  ;;  %v3455_v40 = vmul.f32 %v3172_v4, %v3172_v4  ;;  %v3175_v56 = vadd.f32 %v3174_v49, %v3014_v58  ;;  %v4312_v9 = vpop.f32.mrb[74].mxu1  ;;  %v3507_v48 = vadd.f32 %v3506_v19, %v3505_v10 }
 0x2dc   : > { %v4011_v7 = vpack.c.bf16 %v3180_v3, %v3180_v3  ;;  %v3409_v63 = vsel %vm2196_vm15, %v3172_v4, 0.0  ;;  %v4313_v0 = vpop.f32.mrb[75].mxu1  ;;  %v3408_v27 = vadd.f32 %v3407_v61, %v3406_v55  ;;  %v4012_v24 = vpack.c.bf16 %v3183_v12, %v3183_v12 }
 0x2dd   : > { %3354 = vst.msk [vmem:[%s6414_s28 + $0x60] sm:$0xf] %vm1022_vm0, %v4009_v18  ;;  %v3510_v47 = vsel %vm2196_vm15, %v3455_v40, 0.0  ;;  %v3457_v58 = vmul.f32 %v3180_v3, %v3180_v3  ;;  %v3509_v38 = vadd.f32 %v3508_v51, %v3507_v48  ;;  %v4010_v53 = vpack.c.bf16 %v3175_v56, %v3175_v56 }
 0x2de   : > { %3356 = vst.msk [vmem:[%s6414_s28 + $0x68] sm:$0xf] %vm1022_vm0, %v4011_v7  ;;  %v3410_v15 = vadd.f32 %v3409_v63, %v3408_v27  ;;  %3357 = vst.msk [vmem:[%s6414_s28 + $0x6c] sm:$0xf] %vm1022_vm0, %v4012_v24  ;;  %v3411_v31 = vsel %vm2196_vm15, %v3175_v56, 0.0  ;;  %v3456_v2 = vmul.f32 %v3175_v56, %v3175_v56  ;;  %v4311_v16 = vadd.f32 %v4310_v46, %v4309_v5 }
 0x2df   : > { %v4379_v37 = vpop.f32.mrb[76].mxu0  ;;  %v3511_v21 = vadd.f32 %v3510_v47, %v3509_v38  ;;  %v3458_v54 = vmul.f32 %v3183_v12, %v3183_v12  ;;  %3355 = vst.msk [vmem:[%s6414_s28 + $0x64] sm:$0xf] %vm1022_vm0, %v4010_v53  ;;  %v4314_v42 = vadd.f32 %v4313_v0, %v4312_v9  ;;  %v3413_v29 = vsel %vm2196_vm15, %v3180_v3, 0.0 }
 0x2e0   : > { %v3187_v6 = vpop.f32.mrb[77].mxu0  ;;  %v3412_v11 = vadd.f32 %v3411_v31, %v3410_v15  ;;  %v3512_v14 = vsel %vm2196_vm15, %v3456_v2, 0.0  ;;  %v3027_v23 = vadd.f32 %v4311_v16, %v6328_v50  ;;  %v3514_v60 = vsel %vm2196_vm15, %v3457_v58, 0.0 }
 0x2e1   : > { %v4380_v17 = vpop.f32.mrb[78].mxu0  ;;  %v4315_v34 = vpop.f32.mrb[76].mxu1  ;;  %v3513_v39 = vadd.f32 %v3512_v14, %v3511_v21  ;;  %v3030_v35 = vadd.f32 %v4314_v42, %v6330_v32  ;;  %v3415_v8 = vsel %vm2196_vm15, %v3183_v12, 0.0  ;;  %v3516_v50 = vsel %vm2196_vm15, %v3458_v54, 0.0 }
 0x2e2   : > { %v3190_v44 = vpop.f32.mrb[79].mxu0  ;;  %v4316_v36 = vpop.f32.mrb[77].mxu1  ;;  %v3414_v52 = vadd.f32 %v3413_v29, %v3412_v11  ;;  %v3188_v13 = vadd.f32 %v3187_v6, %v3027_v23 }
 0x2e3   : > { %v4317_v43 = vadd.f32 %v4316_v36, %v4315_v34  ;;  %v4318_v26 = vpop.f32.mrb[78].mxu1  ;;  %v3515_v59 = vadd.f32 %v3514_v60, %v3513_v39  ;;  %v3191_v22 = vadd.f32 %v3190_v44, %v3030_v35 }
 0x2e4   : > { %v4319_v28 = vpop.f32.mrb[79].mxu1  ;;  %v4013_v20 = vpack.c.bf16 %v3188_v13, %v3188_v13  ;;  %v3416_v1 = vadd.f32 %v3415_v8, %v3414_v52  ;;  %v3417_v32 = vsel %vm2196_vm15, %v3188_v13, 0.0  ;;  %v3459_v30 = vmul.f32 %v3188_v13, %v3188_v13 }
 0x2e5   : > { %v3517_v45 = vadd.f32 %v3516_v50, %v3515_v59  ;;  %v4014_v62 = vpack.c.bf16 %v3191_v22, %v3191_v22  ;;  %v3419_v41 = vsel %vm2196_vm15, %v3191_v22, 0.0  ;;  %v3460_v4 = vmul.f32 %v3191_v22, %v3191_v22 }
 0x2e6   : > { %3358 = vst.msk [vmem:[%s6414_s28 + $0x70] sm:$0xf] %vm1022_vm0, %v4013_v20  ;;  %v3418_v33 = vadd.f32 %v3417_v32, %v3416_v1  ;;  %v3518_v5 = vsel %vm2196_vm15, %v3459_v30, 0.0  ;;  %v3035_v55 = vadd.f32 %v4317_v43, %v6334_v25  ;;  %v4320_v10 = vadd.f32 %v4319_v28, %v4318_v26 }
 0x2e7   : > { %v3519_v3 = vadd.f32 %v3518_v5, %v3517_v45  ;;  %3359 = vst.msk [vmem:[%s6414_s28 + $0x74] sm:$0xf] %vm1022_vm0, %v4014_v62  ;;  %v3520_v12 = vsel %vm2196_vm15, %v3460_v4, 0.0 }
 0x2e8   : > { %v3420_v49 = vadd.f32 %v3419_v41, %v3418_v33  ;;  %v3196_v46 = vadd.f32 %v4379_v37, %v3035_v55  ;;  %v3038_v19 = vadd.f32 %v4320_v10, %v6336_v57 }
 0x2e9   : > { %v3521_v18 = vadd.f32 %v3520_v12, %v3519_v3 }
 0x2ea   : > { %v4015_v40 = vpack.c.bf16 %v3196_v46, %v3196_v46  ;;  %v3421_v56 = vsel %vm2196_vm15, %v3196_v46, 0.0  ;;  %v3461_v9 = vmul.f32 %v3196_v46, %v3196_v46  ;;  %v3199_v25 = vadd.f32 %v4380_v17, %v3038_v19 }
 0x2eb   : > { %v3422_v61 = vadd.f32 %v3421_v56, %v3420_v49 }
 0x2ec   : > { %3360 = vst.msk [vmem:[%s6414_s28 + $0x78] sm:$0xf] %vm1022_vm0, %v4015_v40  ;;  %v3522_v57 = vsel %vm2196_vm15, %v3461_v9, 0.0  ;;  %v4016_v48 = vpack.c.bf16 %v3199_v25, %v3199_v25  ;;  %v3423_v7 = vsel %vm2196_vm15, %v3199_v25, 0.0  ;;  %v3462_v63 = vmul.f32 %v3199_v25, %v3199_v25 }
 0x2ed   : > { %v3523_v0 = vadd.f32 %v3522_v57, %v3521_v18  ;;  %v3424_v51 = vadd.f32 %v3423_v7, %v3422_v61 }
 0x2ee   : > { %3361 = vst.msk [vmem:[%s6414_s28 + $0x7c] sm:$0xf] %vm1022_vm0, %v4016_v48  ;;  %v3524_v27 = vsel %vm2196_vm15, %v3462_v63, 0.0 }
 0x2ef   : > { %v3425_v47 = vrot.slane %v3424_v51, 4  ;;  %v3525_v24 = vadd.f32 %v3524_v27, %v3523_v0 }
 0x2f0   : > { %4699 = shalt.err (!%p4696_p0)
}
 0x2f1   : > { %s4700_s12 = scalar_lea.hbm %s6588_s10, 2048  ;;  %s4704_s18 = scalar_lea.hbm %s6683_s4, 4096 }
 0x2f2   : > { %p4701_p4 = scmp.ne.s32.totalorder %s6588_s10, %s4700_s12  ;;  %p4705_p12 = scmp.lt.u32.totalorder %s6588_s10, %s6683_s4 }
 0x2f3   : > { %p4706_p1 = scmp.lt.u32.totalorder %s4704_s18, %s4700_s12  ;;  %p4708_p13 = scmp.lt.u32.totalorder %s4700_s12, %s6588_s10 }
 0x2f4   : > { %p4702_p2 = pnand %p4701_p4, %p5006_p10 }
 0x2f5   : > { %p4707_p11 = por %p4706_p1, %p4705_p12 }
 0x2f6   : > { %p4703_p8 = pneg %p4702_p2 }
 0x2f7   : > { %p4709_p6 = por %p4708_p13, %p4707_p11 }
 0x2f9   : > { %p4710_p3 = pnand %p4709_p6, %p4703_p8 }
 0x2fb   : > { %4713 = shalt.err (!%p4710_p3)
}
 0x2fc   : > { %s4819_s13 = smov 4   ;;  %v3426_v58 = vadd.f32 %v3425_v47, %v3424_v51  ;;  %v3526_v38 = vrot.slane %v3525_v24, 4  ;;  %s3742_s27 = sshll.u32 %s5067_s24, 1  ;;  %vm3532_vm0 = vcmask 1040384   ;;  %vm3534_vm1 = vcmask 517120  }
 0x2fd   : > { %4411 = dma.vmem_to_hbm [thread:$0]  (%p5006_p10), %s6594_s11, 2048, %s6588_s10, %s3537_s29, %s4817_s26, %s4817_s26, %s4819_s13  }
 0x2fe   : > { %v3427_v53 = vrot.slane %v3426_v58, 2  ;;  %v3527_v15 = vadd.f32 %v3526_v38, %v3525_v24  ;;  %s3945_s7 = sshll.u32 %s4800_s21, 5  ;;  %s309_s16 = scalar_lea.vmem [#allocation12], %s3742_s27 }
 0x2ff   : > { %s3575_s14 = sshll.u32 %s309_s16, 4  ;;  %s6630_s10 = scalar_lea.hbm %s6684_s5, %s3945_s7  ;;  %s6632_s14 = int_to_ptr.vmem [resolvable:$true] %s3575_s14 }
 0x300   : > { %v3428_v31 = vadd.f32 %v3427_v53, %v3426_v58  ;;  %v3528_v2 = vrot.slane %v3527_v15, 2  ;;  %s3542_s29 = scalar_lea.sflag [#allocation13], %s5067_s24  ;;  %s4714_s21 = scalar_lea.vmem %s6632_s14, 32 }
 0x301   : > { %p4715_p5 = scmp.ne.s32.totalorder %s6632_s14, %s4714_s21  ;;  %s4820_s17 = smov [#allocation12]  }
 0x302   : > { %v3429_v16 = vrot.slane %v3428_v31, 1  ;;  %v3529_v37 = vadd.f32 %v3528_v2, %v3527_v15  ;;  %s4718_s12 = sshll.u32 %s4820_s17, 4  ;;  %s4719_s12 = int_to_ptr.vmem [resolvable:$false] %s4718_s12 }
 0x303   : > { %p4716_p7 = pnand %p4715_p5, %p5006_p10  ;;  %s4720_s25 = scalar_lea.vmem %s4719_s12, 64 }
 0x304   : > { %v3530_v21 = vrot.slane %v3529_v37, 1  ;;  %v3430_v54 = vadd.f32 %v3429_v16, %v3428_v31  ;;  %p4721_p0 = scmp.lt.s32.totalorder %s6632_s14, %s4719_s12  ;;  %p4722_p4 = scmp.lt.s32.totalorder %s4720_s25, %s4714_s21 }
 0x305   : > { %p4717_p9 = pneg %p4716_p7 }
 0x306   : > { %v3531_v42 = vadd.f32 %v3530_v21, %v3529_v37  ;;  %p4723_p2 = por %p4722_p4, %p4721_p0 }
 0x308   : > { %v3533_v6 = vsel %vm3532_vm0, %v3430_v54, %v3531_v42  ;;  %p4724_p8 = pnand %p4723_p2, %p4717_p9 }
 0x309   : > { %3535 = vst.msk [vmem:[%s309_s16] sm:$0x3] %vm3534_vm1, %v3533_v6 }
 0x30a   : > { %4727 = shalt.err (!%p4724_p8)
}
 0x30b   : > { %s4728_s24 = scalar_lea.hbm %s6630_s10, 32  ;;  %s4732_s28 = scalar_lea.hbm %s6684_s5, 64 }
 0x30c   : > { %p4729_p12 = scmp.ne.s32.totalorder %s6630_s10, %s4728_s24  ;;  %p4733_p13 = scmp.lt.u32.totalorder %s6630_s10, %s6684_s5 }
 0x30d   : > { %p4734_p6 = scmp.lt.u32.totalorder %s4732_s28, %s4728_s24  ;;  %p4736_p5 = scmp.lt.u32.totalorder %s4728_s24, %s6630_s10 }
 0x30e   : > { %p4730_p1 = pnand %p4729_p12, %p5006_p10 }
 0x30f   : > { %p4735_p3 = por %p4734_p6, %p4733_p13 }
 0x310   : > { %p4731_p11 = pneg %p4730_p1 }
 0x311   : > { %p4737_p7 = por %p4736_p5, %p4735_p3 }
 0x313   : > { %p4738_p9 = pnand %p4737_p7, %p4731_p11 }
 0x315   : > { %4741 = shalt.err (!%p4738_p9)
}
 0x316   : > { %4412 = dma.vmem_to_hbm [thread:$0]  (%p5006_p10), %s6632_s14, 32, %s6630_s10, %s3542_s29  }
 0x317 PF: > { %s6770_s27 = sld [smem:[#allocation19_spill]]  ;;  %s6771_s7 = sld [smem:[#allocation20_spill]] }
 0x318   : > { %p6773_p4 = scmp.ge.s32.totalorder %s4808_s23, 2 }
 0x31d   : > { %s3587_s16 = sand.u32 1, %s6770_s27   ;;  %p6772_p0 = scmp.ne.s32.totalorder %s6771_s7, 0 }
 0x31e   : > { %s3588_s26 = scalar_lea.sflag [#allocation5], %s3587_s16 }
 0x31f   : > { %p4430_p2 = pnand %p6773_p4, %p6772_p0 }
 0x321   : > { %4779 = dma.done.wait (!%p4430_p2), %s3588_s26, 2048  }
 0x322   : > { %4781 = vsyncadd (!%p4430_p2), %s3588_s26, 4294965248  ;;  %s3597_s11 = scalar_lea.sflag [#allocation13], %s3587_s16 }
 0x323   : > { %4783 = dma.done.wait (!%p4430_p2), %s3597_s11, 32  }
 0x324   : > { %4785 = vsyncadd (!%p4430_p2), %s3597_s11, 4294967264  ;;  %s27_s23 = sadd.s32 1, %s4808_s23   ;;  %s6774_s18 = smov %s4792_s19 }
 0x325   : > { %p24_p8 = scmp.ge.s32.totalorder %s27_s23, 4   ;;  %s6775_s19 = smov %s4796_s20 }
 0x326   : > { %s6776_s20 = smov %s5018_s6  ;;  %s6777_s21 = smov %s4804_s22 }
 0x327   : > { %s6778_s22 = smov %s6780_s15  ;;  %26 = sbr.rel (!%p24_p8) target bundleno = 10 (0xa), region = 132 }
 0x32e   :  { %3602 = vsyncpa [#allocation4], 1 }
 0x32f   :  { %3604 = vsyncpa [#allocation4 + $0x1], 1 }
 0x330   :  { %3605 = vsyncpa [#allocation7], 1 }
 0x331   :  { %3606 = vsyncpa [#allocation10], 1 }
 0x332   :  { %3607 = vsyncpa [#allocation5], 1 }
 0x333   :  { %3609 = vsyncpa [#allocation5 + $0x1], 1 }
 0x334   :  { %3610 = vsyncpa [#allocation13], 1 }
 0x335   :  { %3612 = vsyncpa [#allocation13 + $0x1], 1 }

// kernel: _lambda_.9
= control target key start
LH: loop header
LB: loop body
LE: loop exit
PB: predicated region body
PF: predicated region fallthrough
CT: control target
= control target key end

     0   :  { %11 = vsyncpa [#allocation4], 0  ;;  %s6485_s0 = inlined_call_operand.hbm [shape: bf16[2,16,16,64], index: 0, kind: input, shape index: {}]   ;;  %s6486_s1 = inlined_call_operand.hbm [shape: bf16[576,4], index: 1, kind: input, shape index: {}]   ;;  %s6487_s2 = inlined_call_operand.hbm [shape: f32[1,64], index: 2, kind: input, shape index: {}]   ;;  %s6488_s3 = inlined_call_operand.hbm [shape: f32[1,64], index: 3, kind: input, shape index: {}]   ;;  %s6489_s4 = inlined_call_operand.hbm [shape: f32[2,16,16,4], index: 4, kind: output, shape index: {0}]   ;;  %s6490_s5 = inlined_call_operand.hbm [shape: f32[2,1,2,4], index: 5, kind: output, shape index: {1}]  }
   0x1   :  { %13 = vsyncpa [#allocation4 + $0x1], 0 }
   0x2   :  { %14 = vsyncpa [#allocation7], 0 }
   0x3   :  { %15 = vsyncpa [#allocation10], 0 }
   0x4   :  { %16 = vsyncpa [#allocation5], 0 }
   0x5   :  { %18 = vsyncpa [#allocation5 + $0x1], 0 }
   0x6   :  { %19 = vsyncpa [#allocation13], 0 }
   0x7   :  { %21 = vsyncpa [#allocation13 + $0x1], 0  ;;  %s4662_s18 = smov 0   ;;  %s4664_s19 = smov 0  }
   0x8   :  { %s4666_s20 = smov 0   ;;  %s4668_s21 = smov 0  }
   0x9   :  { %s4670_s22 = smov 0   ;;  %s4672_s23 = smov 0  }
   0xa LB: > { %6514 = sst [smem:[#allocation19_spill]] %s4598_s18  ;;  %s3599_s24 = sadd.s32 4294967295, %s4618_s23   ;;  %s4618_s23 = sphi %s4672_s23, %s27_s23   ;;  %s4614_s22 = sphi %s4670_s22, %s6584_s22   ;;  %s4610_s21 = sphi %s4668_s21, %s6583_s21   ;;  %s4606_s20 = sphi %s4666_s20, %s6582_s20   ;;  %s4602_s19 = sphi %s4664_s19, %s6581_s19   ;;  %s4598_s18 = sphi %s4662_s18, %s6580_s18  }
   0xb   : > { %s3600_s25 = sadd.s32 4294967294, %s4618_s23   ;;  %p59_p0 = scmp.ne.s32.totalorder %s4602_s19, %s4598_s18 }
   0xc   : > { %p4696_p1 = scmp.eq.s32.totalorder %s3599_s24, 0  ;;  %p4700_p2 = scmp.eq.s32.totalorder %s3599_s24, 1 }
   0xd   : > { %p154_p3 = scmp.eq.s32.totalorder %s3600_s25, 1  ;;  %p3601_p5 = scmp.ge.s32.totalorder %s4618_s23, 1 }
   0xe   : > { %s6515_s26 = scalar_select %p4696_p1, 1, 0 }
   0xf   : > { %s6516_s27 = scalar_select %p4700_p2, 1, 0 }
  0x10   : > { %p4706_p4 = por %p4696_p1, %p59_p0  ;;  %p4711_p6 = por %p154_p3, %p59_p0 }
  0x11   : > { %p189_p7 = scmp.lt.s32.totalorder %s4618_s23, 3  ;;  %s4620_s6 = smov [#allocation6]  }
  0x12   : > { %s6517_s28 = scalar_select %p4706_p4, 1, 0 }
  0x13   : > { %s6518_s29 = scalar_select %p4711_p6, 1, 0 }
  0x14   : > { %p4716_p8 = pnand %p3601_p5, %p189_p7  ;;  %s201_s7 = sshll.u32 %s4620_s6, 4  ;;  %s4720_s7 = int_to_ptr.vmem [resolvable:$true] %s201_s7 }
  0x15   : > { %6519 = sst [smem:[#allocation20_spill]] %s6518_s29  ;;  %s4621_s9 = smov [#allocation8]  }
  0x16   : > { %s6520_s30 = scalar_select %p4716_p8, 1, 0 }
  0x17   : > { %p4224_p9 = pneg %p4716_p8  ;;  %s215_s10 = sshll.u32 %s4621_s9, 4  ;;  %s4731_s10 = int_to_ptr.vmem [resolvable:$true] %s215_s10 }
  0x18   : > { %s4622_s11 = smov [#allocation9]   ;;  %s4382_s15 = scalar_lea.hbm %s6486_s1, 4608 }
  0x19   : > { %p4727_p11 = pnand %p4224_p9, %p4696_p1  ;;  %s4733_s12 = sshll.u32 %s4622_s11, 4  ;;  %s227_s12 = int_to_ptr.vmem [resolvable:$true] %s4733_s12 }
  0x1a   : > { %p4383_p12 = scmp.ne.s32.totalorder %s6486_s1, %s4382_s15  ;;  %p4389_p5 = scmp.lt.u32.totalorder %s4382_s15, %s6486_s1 }
  0x1b   : > { %p4743_p13 = pneg %p4727_p11 }
  0x1d   : > { %p4385_p0 = pnand %p4743_p13, %p4383_p12 }
  0x1f   : > { %p4386_p3 = pneg %p4385_p0 }
  0x21   : > { %p4391_p7 = pnand %p4389_p5, %p4386_p3 }
  0x23   : > { %4394 = shalt.err (!%p4391_p7)
}
  0x24   : > { %s4395_s9 = scalar_lea.vmem %s4720_s7, 4608  ;;  %p4403_p1 = scmp.lt.s32.totalorder %s4720_s7, %s4720_s7 }
  0x25   : > { %p4396_p9 = scmp.ne.s32.totalorder %s4720_s7, %s4395_s9  ;;  %p4404_p4 = scmp.lt.s32.totalorder %s4395_s9, %s4395_s9 }
  0x27   : > { %p4398_p10 = pnand %p4396_p9, %p4743_p13  ;;  %p4405_p12 = por %p4404_p4, %p4403_p1 }
  0x29   : > { %p4399_p6 = pneg %p4398_p10 }
  0x2b   : > { %p4406_p0 = pnand %p4405_p12, %p4399_p6 }
  0x2d   : > { %4409 = shalt.err (!%p4406_p0)
}
  0x2e   : > { %s4623_s11 = smov 64   ;;  %s4624_s13 = smov 4  }
  0x2f   : > { %4227 = dma.hbm_to_vmem [thread:$0]  (!%p4727_p11), %s6486_s1, 4608, %s4720_s7, [#allocation7], %s4623_s11, %s4623_s11, %s4624_s13  }
  0x30   : > { %s4410_s25 = scalar_lea.hbm %s6487_s2, 16 }
  0x31   : > { %p4411_p1 = scmp.ne.s32.totalorder %s6487_s2, %s4410_s25  ;;  %p4417_p10 = scmp.lt.u32.totalorder %s4410_s25, %s6487_s2 }
  0x33   : > { %p4413_p4 = pnand %p4411_p1, %p4743_p13 }
  0x35   : > { %p4414_p6 = pneg %p4413_p4 }
  0x37   : > { %p4419_p3 = pnand %p4417_p10, %p4414_p6 }
  0x39   : > { %4422 = shalt.err (!%p4419_p3)
}
  0x3a   : > { %s4423_s7 = scalar_lea.vmem %s4731_s10, 16  ;;  %s4430_s14 = scalar_lea.vmem %s4731_s10, 32 }
  0x3b   : > { %p4424_p5 = scmp.ne.s32.totalorder %s4731_s10, %s4423_s7  ;;  %p4431_p12 = scmp.lt.s32.totalorder %s4731_s10, %s4731_s10 }
  0x3c   : > { %p4432_p0 = scmp.lt.s32.totalorder %s4430_s14, %s4423_s7 }
  0x3d   : > { %p4426_p7 = pnand %p4424_p5, %p4743_p13 }
  0x3e   : > { %p4433_p1 = por %p4432_p0, %p4431_p12 }
  0x3f   : > { %p4427_p9 = pneg %p4426_p7 }
  0x41   : > { %p4434_p4 = pnand %p4433_p1, %p4427_p9 }
  0x43   : > { %4437 = shalt.err (!%p4434_p4)
}
  0x44   : > { %4230 = dma.hbm_to_vmem [thread:$0]  (!%p4727_p11), %s6487_s2, 16, %s4731_s10, [#allocation7]  }
  0x45   : > { %s4438_s17 = scalar_lea.hbm %s6488_s3, 16 }
  0x46   : > { %p4439_p6 = scmp.ne.s32.totalorder %s6488_s3, %s4438_s17  ;;  %p4445_p5 = scmp.lt.u32.totalorder %s4438_s17, %s6488_s3 }
  0x48   : > { %p4441_p10 = pnand %p4439_p6, %p4743_p13 }
  0x4a   : > { %p4442_p3 = pneg %p4441_p10 }
  0x4c   : > { %p4447_p7 = pnand %p4445_p5, %p4442_p3 }
  0x4e   : > { %4450 = shalt.err (!%p4447_p7)
}
  0x4f   : > { %s4451_s14 = scalar_lea.vmem %s227_s12, 16  ;;  %s4458_s10 = scalar_lea.vmem %s227_s12, 32 }
  0x50   : > { %p4452_p9 = scmp.ne.s32.totalorder %s227_s12, %s4451_s14  ;;  %p4459_p1 = scmp.lt.s32.totalorder %s227_s12, %s227_s12 }
  0x51   : > { %p4460_p4 = scmp.lt.s32.totalorder %s4458_s10, %s4451_s14 }
  0x52   : > { %p4454_p12 = pnand %p4452_p9, %p4743_p13 }
  0x53   : > { %p4461_p8 = por %p4460_p4, %p4459_p1 }
  0x54   : > { %p4455_p0 = pneg %p4454_p12 }
  0x56   : > { %p4462_p2 = pnand %p4461_p8, %p4455_p0 }
  0x58   : > { %4465 = shalt.err (!%p4462_p2)
}
  0x59   : > { %4233 = dma.hbm_to_vmem [thread:$0]  (!%p4727_p11), %s6488_s3, 16, %s227_s12, [#allocation10]  }
  0x5a   : > { %s46_s24 = sadd.s32 1, %s4606_s20  ;;  %s39_s15 = sadd.s32 1, %s4614_s22 }
  0x5b   : > { %p53_p2 = scmp.ne.s32.totalorder %s4606_s20, %s4602_s19  ;;  %p41_p8 = scmp.ge.s32.totalorder %s39_s15, 2 }
  0x5c   : > { %p54_p13 = scmp.eq.s32.totalorder %s4618_s23, 0  ;;  %p6523_p6 = scmp.ne.s32.totalorder %s6516_s27, 0 }
  0x5d   : > { %p4248_p3 = scmp.lt.s32.totalorder %s4618_s23, 2  ;;  %s6586_s15 = smov (%p41_p8, %s39_s15), 0 }
  0x5e   : > { %p4817_p10 = por %p6523_p6, %p53_p2  ;;  %p55_p5 = por %p54_p13, %p53_p2 }
  0x5f   : > { %s237_s16 = sand.u32 1, %s4606_s20   ;;  %s43_s17 = ssub.s32 %s4614_s22, %s6586_s15 }
  0x60   : > { %p44_p7 = scmp.eq.s32.totalorder %s43_s17, 0  ;;  %s3606_s12 = sshll.u32 %s237_s16, 7 }
  0x61   : > { %s3789_s25 = sshll.u32 %s4614_s22, 11  ;;  %s241_s14 = scalar_lea.vmem [#allocation3], %s3606_s12 }
  0x62   : > { %s4829_s6 = scalar_select %p44_p7, %s4606_s20, %s46_s24  }
  0x63   : > { %s4834_s27 = scalar_lea.hbm %s6485_s0, %s3789_s25  ;;  %s248_s10 = sshll.u32 %s241_s14, 4  ;;  %s4836_s10 = int_to_ptr.vmem [resolvable:$true] %s248_s10 }
  0x64   : > { %p4840_p11 = pnand %p4248_p3, %p55_p5  ;;  %s4844_s29 = scalar_lea.sflag [#allocation4], %s237_s16 }
  0x65   : > { %s4466_s24 = scalar_lea.hbm %s4834_s27, 2048  ;;  %s4471_s25 = scalar_lea.hbm %s6485_s0, 4096 }
  0x66   : > { %p4467_p9 = scmp.ne.s32.totalorder %s4834_s27, %s4466_s24  ;;  %p4468_p12 = pneg %p4840_p11 }
  0x67   : > { %p4472_p4 = scmp.lt.u32.totalorder %s4834_s27, %s6485_s0  ;;  %p4473_p2 = scmp.lt.u32.totalorder %s4471_s25, %s4466_s24 }
  0x68   : > { %p4469_p0 = pnand %p4468_p12, %p4467_p9  ;;  %p4475_p13 = scmp.lt.u32.totalorder %s4466_s24, %s4834_s27 }
  0x69   : > { %p4474_p8 = por %p4473_p2, %p4472_p4 }
  0x6a   : > { %p4470_p1 = pneg %p4469_p0 }
  0x6b   : > { %p4476_p6 = por %p4475_p13, %p4474_p8 }
  0x6d   : > { %p4477_p3 = pnand %p4476_p6, %p4470_p1 }
  0x6f   : > { %4480 = shalt.err (!%p4477_p3)
}
  0x70   : > { %s4481_s16 = scalar_lea.vmem %s4836_s10, 2048  ;;  %s4625_s14 = smov [#allocation3]  }
  0x71   : > { %p4482_p5 = scmp.ne.s32.totalorder %s4836_s10, %s4481_s16  ;;  %s4486_s17 = sshll.u32 %s4625_s14, 4  ;;  %s4487_s17 = int_to_ptr.vmem [resolvable:$false] %s4486_s17 }
  0x72   : > { %s4488_s12 = scalar_lea.vmem %s4487_s17, 4096  ;;  %p4489_p0 = scmp.lt.s32.totalorder %s4836_s10, %s4487_s17 }
  0x73   : > { %p4484_p7 = pnand %p4482_p5, %p4468_p12  ;;  %p4490_p4 = scmp.lt.s32.totalorder %s4488_s12, %s4481_s16 }
  0x75   : > { %p4485_p9 = pneg %p4484_p7  ;;  %p4491_p2 = por %p4490_p4, %p4489_p0 }
  0x77   : > { %p4492_p8 = pnand %p4491_p2, %p4485_p9 }
  0x79   : > { %4495 = shalt.err (!%p4492_p8)
}
  0x7a   : > { %4237 = dma.hbm_to_vmem [thread:$0]  (!%p4840_p11), %s4834_s27, 2048, %s4836_s10, %s4844_s29, %s4623_s11, %s4623_s11, %s4624_s13  }
  0x7b   : > { %p6526_p12 = scmp.ne.s32.totalorder %s6520_s30, 0 }
  0x7d   : > { %260 = sbr.rel (%p6526_p12) target bundleno = 792 (0x318), region = 36 }
  0x84   : > { %s4878_s24 = sand.u32 1, %s4602_s19   ;;  %p6527_p1 = scmp.ne.s32.totalorder %s6517_s28, 0 }
  0x85   : > { %s3610_s25 = sshll.u32 %s4878_s24, 7  ;;  %s263_s9 = scalar_lea.sflag [#allocation4], %s4878_s24 }
  0x86   : > { %s4882_s7 = scalar_lea.vmem [#allocation3], %s3610_s25 }
  0x87   : > { %4577 = dma.done.wait (%p6527_p1), %s263_s9, 2048  }
  0x88   : > { %4579 = vsyncadd (%p6527_p1), %s263_s9, 4294965248  ;;  %p6528_p11 = scmp.ne.s32.totalorder %s6515_s26, 0 }
  0x8a   : > { %4581 = dma.done.wait (%p6528_p11), [#allocation7], 4624  }
  0x8b   : > { %4583 = vsyncadd (%p6528_p11), [#allocation7], 4294962672 }
  0x8c   : > { %4585 = dma.done.wait (%p6528_p11), [#allocation10], 16  }
  0x8d   : > { %4587 = vsyncadd (%p6528_p11), [#allocation10], 4294967280  ;;  %vm1022_vm0 = vcmask 519168   ;;  %vm314_vm1 = vcmask 516096   ;;  %vm315_vm2 = vsmask.f32 256 }
  0x8e   : > { %v4626_v0 = vmov 0   ;;  %vm371_vm3 = vsmask.f32 7938  ;;  %vm4899_vm4 = vmand %vm314_vm1, %vm315_vm2  ;;  %v4908_v3 = vld [vmem:[#allocation8] ss:$0 sm:$0xff]  ;;  %v3901_v26 = vld [vmem:[%s4882_s7 + $0x58] sm:$0xff]  }
  0x8f   : > { %1144 = vst.msk [vmem:[#allocation2 + $0x4] sm:$0xf] %vm1022_vm0, %v4626_v0  ;;  %1206 = vst.msk [vmem:[#allocation2 + $0xd0] sm:$0xf] %vm1022_vm0, %v4626_v0  ;;  %v320_v4 = vld [vmem:[#allocation2 + $0xc] sm:$0x1]  ;;  %v3873_v37 = vunpack.c.l.bf16 %v3901_v26  ;;  %v3874_v38 = vunpack.c.h.bf16 %v3901_v26 }
  0x90   : > { %vm4904_vm5 = vmand %vm314_vm1, %vm371_vm3  ;;  %v4910_v5 = vld [vmem:[#allocation9] ss:$0 sm:$0xff]  ;;  %v321_v6 = vsel %vm4899_vm4, 0, %v320_v4  ;;  %v317_v8 = vld [vmem:[#allocation2] sm:$0x1]  ;;  %s4627_s26 = smov 64  }
  0x91   : > { %v3828_v7 = vld [vmem:[%s4882_s7] sm:$0xff]   ;;  %v373_v9 = vld [vmem:[#allocation2 + $0x8] sm:$0x1]  ;;  %322 = vst [vmem:[#allocation2 + $0xc] sm:$0x1] %v321_v6  ;;  %v318_v12 = vsel %vm4899_vm4, 0, %v317_v8  ;;  %vm4940_vm7 = vmand %vm1022_vm0, %vm371_vm3  ;;  %v523_v46 = vmul.f32 %v3873_v37, %v4908_v3  ;;  %v524_v47 = vmul.f32 %v3874_v38, %v4908_v3 }
  0x92   : > { %v3829_v10 = vunpack.c.l.bf16 %v3828_v7  ;;  %v3830_v11 = vunpack.c.h.bf16 %v3828_v7  ;;  %v374_v13 = vsel %vm4904_vm5, 0, %v373_v9  ;;  %v356_v15 = vld [vmem:[#allocation2 + $0x9c] sm:$0x1]  ;;  %319 = vst [vmem:[#allocation2] sm:$0x1] %v318_v12  ;;  %v3891_v36 = vld [vmem:[%s4882_s7 + $0x8] sm:$0xff]  }
  0x93   : > { %375 = vst [vmem:[#allocation2 + $0x8] sm:$0x1] %v374_v13  ;;  %v357_v18 = vsel %vm4899_vm4, 0, %v356_v15  ;;  %v3902_v19 = vld [vmem:[%s4882_s7 + $0x60] sm:$0xff]   ;;  %v353_v20 = vld [vmem:[#allocation2 + $0x90] sm:$0x1]  ;;  %v3833_v48 = vunpack.c.l.bf16 %v3891_v36  ;;  %v561_v57 = vadd.f32 %v4910_v5, %v523_v46  ;;  %v562_v58 = vadd.f32 %v4910_v5, %v524_v47 }
  0x94   : > { %v501_v21 = vmul.f32 %v3829_v10, %v4908_v3  ;;  %v502_v22 = vmul.f32 %v3830_v11, %v4908_v3  ;;  %358 = vst [vmem:[#allocation2 + $0x9c] sm:$0x1] %v357_v18  ;;  %v3877_v23 = vunpack.c.l.bf16 %v3902_v19  ;;  %v3878_v24 = vunpack.c.h.bf16 %v3902_v19  ;;  %v409_v25 = vld [vmem:[#allocation2 + $0x98] sm:$0x1]  ;;  %v4352_v42 = vld [vmem:[#allocation6 + $0xe8] sm:$0xff]   ;;  %s3614_s28 = sshll.u32 %s4878_s24, 8 }
  0x95   : > { %v323_v27 = vld [vmem:[#allocation2 + $0x18] sm:$0x1]  ;;  %v354_v30 = vsel %vm4899_vm4, 0, %v353_v20  ;;  %v410_v31 = vsel %vm4904_vm5, 0, %v409_v25  ;;  %vm699_vm6 = vsmask.f32 4368  ;;  %v3834_v9 = vunpack.c.h.bf16 %v3891_v36 }
  0x96   : > { %v1263_v14 = vld [vmem:[#allocation2 + $0x4] sm:$0xf]  ;;  %v539_v32 = vadd.f32 %v4910_v5, %v501_v21  ;;  %v540_v33 = vadd.f32 %v4910_v5, %v502_v22  ;;  %v525_v34 = vmul.f32 %v3877_v23, %v4908_v3  ;;  %v526_v35 = vmul.f32 %v3878_v24, %v4908_v3  ;;  %355 = vst [vmem:[#allocation2 + $0x90] sm:$0x1] %v354_v30  ;;  %vm4960_vm9 = vmor %vm315_vm2, %vm699_vm6  ;;  %s6220_s30 = scalar_lea.vmem [#allocation11], %s3614_s28  ;;  %s3826_s11 = sshll.u32 %s4610_s21, 12 }
  0x97   : > { %v1329_v16 = vshll.u32 %v1263_v14, 16  ;;  %v1333_v17 = vshrl.u32 %v1263_v14, 16  ;;  %411 = vst [vmem:[#allocation2 + $0x98] sm:$0x1] %v410_v31  ;;  %v324_v39 = vsel %vm4899_vm4, 0, %v323_v27  ;;  %v593_v4 = vmax.f32 %v561_v57, 0.0  ;;  %s6395_s18 = scalar_lea.hbm %s6489_s4, %s3826_s11 }
  0x98   : > { %v571_v40 = vmax.f32 %v539_v32, 0.0  ;;  %v572_v41 = vmax.f32 %v540_v33, 0.0  ;;  %v563_v43 = vadd.f32 %v4910_v5, %v525_v34  ;;  %v564_v44 = vadd.f32 %v4910_v5, %v526_v35  ;;  %325 = vst [vmem:[#allocation2 + $0x18] sm:$0x1] %v324_v39  ;;  %v1024_v12 = vld [vmem:[#allocation2 + $0xc] sm:$0xf] }
  0x99   : > { %v4925_v28 = vrot.slane %v1329_v16, 5  ;;  %v1335_v29 = vrot.slane %v1333_v17, 4  ;;  %v1141_v51 = vld [vmem:[#allocation2] sm:$0xf]  ;;  %vm1316_vm8 = vsmask.f32 3328  ;;  %v503_v10 = vmul.f32 %v3833_v48, %v4908_v3 }
  0x9a   : > { %v3790_v49 = vpack.c.bf16 %v571_v40, %v571_v40  ;;  %v3791_v50 = vpack.c.bf16 %v572_v41, %v572_v41  ;;  %v1145_v52 = vld [vmem:[#allocation2 + $0x8] sm:$0x1]  ;;  %v595_v53 = vmax.f32 %v563_v43, 0.0  ;;  %v596_v54 = vmax.f32 %v564_v44, 0.0  ;;  %s3431_s13 = sshll.u32 %s6220_s30, 4  ;;  %s3410_s29 = scalar_lea.sflag [#allocation5], %s4878_s24  ;;  %s6397_s13 = int_to_ptr.vmem [resolvable:$true] %s3431_s13 }
  0x9b   : > { %v1336_v45 = vor.u32 %v1335_v29, %v4925_v28  ;;  %v1142_v55 = vsel %vm4940_vm7, 0, %v1141_v51  ;;  %v1146_v56 = vsel %vm4899_vm4, 0, %v1145_v52  ;;  %v594_v6 = vmax.f32 %v562_v58, 0.0  ;;  %v1109_v26 = vld [vmem:[#allocation2 + $0x9c] sm:$0xf]  ;;  %s4496_s16 = scalar_lea.vmem %s6397_s13, 4096 }
  0x9c   : > { %v702_v59 = vshrl.u32 %v3790_v49, 16  ;;  %v705_v60 = vshll.u32 %v3790_v49, 16  ;;  %v710_v61 = vshrl.u32 %v3791_v50, 16  ;;  %v713_v62 = vshll.u32 %v3791_v50, 16  ;;  %1143 = vst [vmem:[#allocation2] sm:$0xf] %v1142_v55  ;;  %p4497_p13 = scmp.ne.s32.totalorder %s6397_s13, %s4496_s16 }
  0x9d   : > { %1147 = vst [vmem:[#allocation2 + $0x8] sm:$0x1] %v1146_v56  ;;  %v3814_v63 = vpack.c.bf16 %v595_v53, %v595_v53  ;;  %v3815_v0 = vpack.c.bf16 %v596_v54, %v596_v54  ;;  %vm1317_vm10 = vsmask.f32 7440  ;;  %v4965_v20 = vrot.slane %v1336_v45, 4  ;;  %s4628_s14 = smov [#allocation11]  }
  0x9e   : > { %v704_v7 = vrot.slane %v702_v59, 7  ;;  %v4955_v8 = vrot.slane %v710_v61, 7  ;;  %v3812_v23 = vpack.c.bf16 %v593_v4, %v593_v4  ;;  %v3813_v27 = vpack.c.bf16 %v594_v6, %v594_v6  ;;  %v359_v45 = vld [vmem:[#allocation2 + $0xa8] sm:$0x1]  ;;  %vm4984_vm11 = vmor %vm1316_vm8, %vm1317_vm10  ;;  %v1102_v53 = vld [vmem:[#allocation2 + $0x90] sm:$0xf]  ;;  %p4498_p6 = pnand %p4497_p13, %p4817_p10 }
  0x9f   : > { %v906_v13 = vshrl.u32 %v3814_v63, 16  ;;  %v909_v14 = vshll.u32 %v3814_v63, 16  ;;  %v914_v15 = vshrl.u32 %v3815_v0, 16  ;;  %v917_v16 = vshll.u32 %v3815_v0, 16  ;;  %v1106_v59 = vld [vmem:[#allocation2 + $0x98] sm:$0x1] }
  0xa0   : > { %v707_v17 = vor.u32 %v705_v60, %v704_v7  ;;  %v708_v18 = vrot.slane %v704_v7, 4  ;;  %v715_v19 = vor.u32 %v713_v62, %v4955_v8  ;;  %v504_v29 = vmul.f32 %v3834_v9, %v4908_v3  ;;  %v3903_v61 = vld [vmem:[%s4882_s7 + $0x68] sm:$0xff]   ;;  %p4499_p3 = pneg %p4498_p6  ;;  %s4500_s17 = sshll.u32 %s4628_s14, 4  ;;  %s4501_s17 = int_to_ptr.vmem [resolvable:$false] %s4500_s17 }
  0xa1   : > { %v908_v21 = vrot.slane %v906_v13, 7  ;;  %v4967_v22 = vrot.slane %v914_v15, 7  ;;  %v541_v35 = vadd.f32 %v4910_v5, %v503_v10  ;;  %v717_v36 = vrot.slane %v4955_v8, 4  ;;  %v326_v8 = vld [vmem:[#allocation2 + $0x24] sm:$0x1]  ;;  %s4502_s12 = scalar_lea.vmem %s4501_s17, 8192  ;;  %p4503_p5 = scmp.lt.s32.totalorder %s6397_s13, %s4501_s17 }
  0xa2   : > { %v716_v24 = vsel %vm4960_vm9, %v708_v18, %v715_v19  ;;  %v1025_v25 = vsel %vm4940_vm7, %v707_v17, %v1024_v12  ;;  %v889_v43 = vshrl.u32 %v3812_v23, 16  ;;  %v892_v44 = vshll.u32 %v3812_v23, 16  ;;  %v376_v18 = vld [vmem:[#allocation2 + $0x14] sm:$0x1]  ;;  %p4504_p7 = scmp.lt.s32.totalorder %s4502_s12, %s4496_s16 }
  0xa3   : > { %1026 = vst [vmem:[#allocation2 + $0xc] sm:$0xf] %v1025_v25  ;;  %1028 = vst.msk [vmem:[#allocation2 + $0x10] sm:$0xf] %vm1022_vm0, %v716_v24  ;;  %v1262_v30 = vld [vmem:[#allocation2] sm:$0xf]  ;;  %v911_v32 = vor.u32 %v909_v14, %v908_v21  ;;  %v919_v34 = vor.u32 %v917_v16, %v4967_v22  ;;  %v542_v54 = vadd.f32 %v4910_v5, %v504_v29  ;;  %v3881_v17 = vunpack.c.l.bf16 %v3903_v61 }
  0xa4   : > { %v1264_v31 = vld [vmem:[#allocation2 + $0x8] sm:$0x1]  ;;  %v912_v33 = vrot.slane %v908_v21, 4  ;;  %v1320_v37 = vshrl.u32 %v1262_v30, 16  ;;  %v1323_v38 = vshll.u32 %v1262_v30, 16  ;;  %v897_v50 = vshrl.u32 %v3813_v27, 16  ;;  %p4505_p9 = por %p4504_p7, %p4503_p5 }
  0xa5   : > { %v1339_v39 = vshll.u32 %v1264_v31, 16  ;;  %v1110_v41 = vsel %vm4940_vm7, %v911_v32, %v1109_v26  ;;  %v891_v51 = vrot.slane %v889_v43, 7  ;;  %v900_v52 = vshll.u32 %v3813_v27, 16 }
  0xa6   : > { %v920_v40 = vsel %vm4960_vm9, %v912_v33, %v919_v34  ;;  %v1322_v47 = vrot.slane %v1320_v37, 4  ;;  %v1325_v48 = vrot.slane %v1323_v38, 5  ;;  %1111 = vst [vmem:[#allocation2 + $0x9c] sm:$0xf] %v1110_v41  ;;  %v573_v55 = vmax.f32 %v541_v35, 0.0  ;;  %p4506_p0 = pnand %p4505_p9, %p4499_p3 }
  0xa7   : > { %v1341_v49 = vrot.slane %v1339_v39, 5  ;;  %1112 = vst.msk [vmem:[#allocation2 + $0xa0] sm:$0xf] %vm1022_vm0, %v920_v40  ;;  %v921_v57 = vrot.slane %v4967_v22, 4  ;;  %v899_v58 = vrot.slane %v897_v50, 7  ;;  %v360_v60 = vsel %vm4899_vm4, 0, %v359_v45 }
  0xa8   : > { %v1326_v56 = vor.u32 %v1325_v48, %v1322_v47  ;;  %v894_v63 = vor.u32 %v892_v44, %v891_v51  ;;  %v895_v0 = vrot.slane %v891_v51, 4  ;;  %v574_v4 = vmax.f32 %v542_v54, 0.0  ;;  %361 = vst [vmem:[#allocation2 + $0xa8] sm:$0x1] %v360_v60  ;;  %v412_v39 = vld [vmem:[#allocation2 + $0xa4] sm:$0x1] }
  0xa9   : > { %v1342_v62 = vsel %vm4984_vm11, %v4965_v20, %v1341_v49  ;;  %v902_v10 = vor.u32 %v900_v52, %v899_v58  ;;  %v904_v12 = vrot.slane %v899_v58, 4  ;;  %v3792_v13 = vpack.c.bf16 %v573_v55, %v573_v55  ;;  %v1032_v49 = vld [vmem:[#allocation2 + $0x18] sm:$0xf] }
  0xaa   : > { %v4997_v6 = vld [vmem:[#allocation2 + $0xc] sm:$0xf]  ;;  %v4999_v7 = vld [vmem:[#allocation2 + $0x10] sm:$0xf]  ;;  %v1327_v9 = vrot.slane %v1326_v56, 4  ;;  %v1103_v23 = vsel %vm4940_vm7, %v894_v63, %v1102_v53  ;;  %v3793_v35 = vpack.c.bf16 %v574_v4, %v574_v4  ;;  %v3882_v40 = vunpack.c.h.bf16 %v3903_v61 }
  0xab   : > { %v1357_v14 = vshrl.u32 %v4999_v7, 16  ;;  %v5004_v15 = vcombine.low %v4997_v6, %v4999_v7  ;;  %v1344_v16 = vshrl.u32 %v4997_v6, 16  ;;  %v1347_v19 = vshll.u32 %v4997_v6, 16  ;;  %1104 = vst [vmem:[#allocation2 + $0x90] sm:$0xf] %v1103_v23 }
  0xac   : > { %v1332_v20 = vsel %vm4984_vm11, %v1327_v9, %v4925_v28  ;;  %v903_v21 = vsel %vm4960_vm9, %v895_v0, %v902_v10  ;;  %v1353_v24 = vshll.u32 %v4999_v7, 16  ;;  %v1107_v28 = vsel %vm4899_vm4, %v904_v12, %v1106_v59 }
  0xad   : > { %2113 = vrot.lane.b32.xlu0 %v5004_v15, %s4627_s26  ;;  %v1346_v25 = vrot.slane %v1344_v16, 4  ;;  %v3692_v26 = vcombine.low %v1332_v20, %v1342_v62  ;;  %v5018_v27 = vld [vmem:[#allocation2 + $0x9c] sm:$0xf]  ;;  %1105 = vst.msk [vmem:[#allocation2 + $0x94] sm:$0xf] %vm1022_vm0, %v903_v21  ;;  %v5025_v30 = vrot.slane %v1357_v14, 4  ;;  %v527_v41 = vmul.f32 %v3881_v17, %v4908_v3 }
  0xae   : > { %v5020_v29 = vld [vmem:[#allocation2 + $0xa0] sm:$0xf]  ;;  %v1349_v31 = vrot.slane %v1347_v19, 5  ;;  %v1632_v32 = vshrl.u32 %v5018_v27, 16  ;;  %v1635_v33 = vshll.u32 %v5018_v27, 16  ;;  %v719_v37 = vshrl.u32 %v3792_v13, 16 }
  0xaf   : > { %1108 = vst [vmem:[#allocation2 + $0x98] sm:$0x1] %v1107_v28  ;;  %2030 = vrot.lane.b32.xlu1 %v3692_v26, %s4627_s26  ;;  %v5032_v34 = vcombine.low %v5018_v27, %v5020_v29  ;;  %v722_v38 = vshll.u32 %v3792_v13, 16  ;;  %v377_v43 = vsel %vm4904_vm5, 0, %v376_v18  ;;  %v1645_v45 = vshrl.u32 %v5020_v29, 16 }
  0xb0   : > { %v1350_v44 = vor.u32 %v1349_v31, %v1346_v25  ;;  %v721_v47 = vrot.slane %v719_v37, 7  ;;  %v727_v48 = vshrl.u32 %v3793_v35, 16  ;;  %378 = vst [vmem:[#allocation2 + $0x14] sm:$0x1] %v377_v43  ;;  %v5040_v50 = vrot.slane %v1353_v24, 5 }
  0xb1   : > { %2137 = vrot.lane.b32.xlu0 %v5032_v34, %s4627_s26  ;;  %v730_v51 = vshll.u32 %v3793_v35, 16  ;;  %v528_v52 = vmul.f32 %v3882_v40, %v4908_v3  ;;  %v565_v53 = vadd.f32 %v4910_v5, %v527_v41  ;;  %v413_v54 = vsel %vm4904_vm5, 0, %v412_v39 }
  0xb2   : > { %v724_v55 = vor.u32 %v722_v38, %v721_v47  ;;  %v5046_v56 = vrot.slane %v727_v48, 7  ;;  %v5048_v58 = vrot.slane %v1350_v44, 4  ;;  %414 = vst [vmem:[#allocation2 + $0xa4] sm:$0x1] %v413_v54  ;;  %v1298_v59 = vld [vmem:[#allocation2 + $0x90] sm:$0xf]  ;;  %v1360_v0 = vor.u32 %v5025_v30, %v5040_v50 }
  0xb3   : > { %v725_v61 = vrot.slane %v721_v47, 4  ;;  %v566_v62 = vadd.f32 %v4910_v5, %v528_v52  ;;  %v597_v63 = vmax.f32 %v565_v53, 0.0  ;;  %v1608_v9 = vshrl.u32 %v1298_v59, 16  ;;  %v1116_v54 = vld [vmem:[#allocation2 + $0xa8] sm:$0xf] }
  0xb4   : > { %v1299_v60 = vld [vmem:[#allocation2 + $0x94] sm:$0xf]  ;;  %v1611_v10 = vshll.u32 %v1298_v59, 16  ;;  %v732_v16 = vor.u32 %v730_v51, %v5046_v56  ;;  %v1033_v17 = vsel %vm4940_vm7, %v724_v55, %v1032_v49  ;;  %v1634_v18 = vrot.slane %v1632_v32, 4  ;;  %v3892_v55 = vld [vmem:[%s4882_s7 + $0x10] sm:$0xff]  }
  0xb5   : > { %v1617_v12 = vshll.u32 %v1299_v60, 16  ;;  %v1621_v13 = vshrl.u32 %v1299_v60, 16  ;;  %v1610_v19 = vrot.slane %v1608_v9, 4  ;;  %1034 = vst [vmem:[#allocation2 + $0x18] sm:$0xf] %v1033_v17  ;;  %v734_v25 = vrot.slane %v5046_v56, 4 }
  0xb6   : > { %v1300_v4 = vld [vmem:[#allocation2 + $0x98] sm:$0x1]  ;;  %v1613_v20 = vrot.slane %v1611_v10, 5  ;;  %v733_v24 = vsel %vm4960_vm9, %v725_v61, %v732_v16  ;;  %v598_v26 = vmax.f32 %v566_v62, 0.0  ;;  %v3816_v27 = vpack.c.bf16 %v597_v63, %v597_v63  ;;  %v379_v9 = vld [vmem:[#allocation2 + $0x20] sm:$0x1] }
  0xb7   : > { %v1627_v14 = vshll.u32 %v1300_v4, 16  ;;  %v1619_v21 = vrot.slane %v1617_v12, 5  ;;  %v1623_v23 = vrot.slane %v1621_v13, 4  ;;  %v1029_v28 = vld [vmem:[#allocation2 + $0x14] sm:$0x1]  ;;  %v1637_v41 = vrot.slane %v1635_v33, 5 }
  0xb8   : > { %v1614_v30 = vor.u32 %v1613_v20, %v1610_v19  ;;  %1035 = vst.msk [vmem:[#allocation2 + $0x1c] sm:$0xf] %vm1022_vm0, %v733_v24  ;;  %v1030_v32 = vsel %vm4899_vm4, %v717_v36, %v1029_v28  ;;  %v3817_v37 = vpack.c.bf16 %v598_v26, %v598_v26  ;;  %v923_v38 = vshrl.u32 %v3816_v27, 16  ;;  %v362_v4 = vld [vmem:[#allocation2 + $0xb4] sm:$0x1] }
  0xb9   : > { %v1624_v31 = vor.u32 %v1623_v23, %v1619_v21  ;;  %v1629_v35 = vrot.slane %v1627_v14, 5  ;;  %v926_v39 = vshll.u32 %v3816_v27, 16  ;;  %1031 = vst [vmem:[#allocation2 + $0x14] sm:$0x1] %v1030_v32  ;;  %v1113_v40 = vld [vmem:[#allocation2 + $0xa4] sm:$0x1]  ;;  %v1638_v52 = vor.u32 %v1637_v41, %v1634_v18 }
  0xba   : > { %v1615_v43 = vrot.slane %v1614_v30, 4  ;;  %v1114_v47 = vsel %vm4899_vm4, %v921_v57, %v1113_v40  ;;  %v1641_v48 = vshll.u32 %v5020_v29, 16  ;;  %v925_v49 = vrot.slane %v923_v38, 7  ;;  %v3904_v29 = vld [vmem:[%s4882_s7 + $0x70] sm:$0xff]  }
  0xbb   : > { %v1625_v44 = vrot.slane %v1624_v31, 4  ;;  %v931_v51 = vshrl.u32 %v3817_v37, 16  ;;  %v934_v36 = vshll.u32 %v3817_v37, 16  ;;  %1115 = vst [vmem:[#allocation2 + $0xa4] sm:$0x1] %v1114_v47  ;;  %v1647_v57 = vrot.slane %v1645_v45, 4 }
  0xbc   : > { %v1620_v53 = vsel %vm4984_vm11, %v1615_v43, %v1619_v21  ;;  %v5073_v22 = vrot.slane %v1641_v48, 5  ;;  %v5080_v60 = vld [vmem:[#allocation2 + $0x18] sm:$0xf]  ;;  %v928_v61 = vor.u32 %v926_v39, %v925_v49  ;;  %v929_v62 = vrot.slane %v925_v49, 4 }
  0xbd   : > { %v1630_v33 = vsel %vm4984_vm11, %v1625_v44, %v1629_v35  ;;  %v5082_v63 = vrot.slane %v931_v51, 7  ;;  %v1368_v10 = vshrl.u32 %v5080_v60, 16  ;;  %v1371_v12 = vshll.u32 %v5080_v60, 16 }
  0xbe   : > { %v5078_v59 = vcombine.low %v1620_v53, %v1630_v33  ;;  %v1361_v13 = vrot.slane %v1360_v0, 4  ;;  %v1648_v14 = vor.u32 %v1647_v57, %v5073_v22  ;;  %v1117_v17 = vsel %vm4940_vm7, %v928_v61, %v1116_v54 }
  0xbf   : > { %v5090_v45 = vld [vmem:[#allocation2 + $0x1c] sm:$0xf]  ;;  %v936_v16 = vor.u32 %v934_v36, %v5082_v63  ;;  %v1639_v18 = vrot.slane %v1638_v52, 4  ;;  %v327_v19 = vsel %vm4899_vm4, 0, %v326_v8  ;;  %v938_v20 = vrot.slane %v5082_v63, 4 }
  0xc0   : > { %6539 = vst [vmem:[#allocation21_spill] sm:$0xff] %v5078_v59  ;;  %2054 = vrot.lane.b32.xlu1 %v5078_v59, %s4627_s26  ;;  %v5099_v0 = vcombine.low %v5080_v60, %v5090_v45  ;;  %1118 = vst [vmem:[#allocation2 + $0xa8] sm:$0xf] %v1117_v17  ;;  %v5102_v21 = vld [vmem:[#allocation2 + $0x14] sm:$0x1]  ;;  %v1356_v23 = vsel %vm4984_vm11, %v5048_v58, %v5040_v50  ;;  %v1649_v24 = vrot.slane %v1648_v14, 4  ;;  %v3837_v28 = vunpack.c.l.bf16 %v3892_v55 }
  0xc1   : > { %328 = vst [vmem:[#allocation2 + $0x24] sm:$0x1] %v327_v19  ;;  %v937_v26 = vsel %vm4960_vm9, %v929_v62, %v936_v16  ;;  %v1363_v27 = vshll.u32 %v5102_v21, 16  ;;  %v3838_v30 = vunpack.c.h.bf16 %v3892_v55  ;;  %v363_v35 = vsel %vm4899_vm4, 0, %v362_v4 }
  0xc2   : > { %2115 = vrot.lane.b32.xlu0 %v5099_v0, %s4627_s26  ;;  %1119 = vst.msk [vmem:[#allocation2 + $0xac] sm:$0xf] %vm1022_vm0, %v937_v26  ;;  %v1303_v31 = vld [vmem:[#allocation2 + $0xa4] sm:$0x1]  ;;  %v3885_v32 = vunpack.c.l.bf16 %v3904_v29  ;;  %v3886_v50 = vunpack.c.h.bf16 %v3904_v29  ;;  %v380_v58 = vsel %vm4904_vm5, 0, %v379_v9  ;;  %v505_v39 = vmul.f32 %v3837_v28, %v4908_v3 }
  0xc3   : > { %v1365_v37 = vrot.slane %v1363_v27, 5  ;;  %v1651_v38 = vshll.u32 %v1303_v31, 16  ;;  %v506_v40 = vmul.f32 %v3838_v30, %v4908_v3  ;;  %364 = vst [vmem:[#allocation2 + $0xb4] sm:$0x1] %v363_v35  ;;  %381 = vst [vmem:[#allocation2 + $0x20] sm:$0x1] %v380_v58  ;;  %v1644_v54 = vsel %vm4984_vm11, %v1639_v18, %v5073_v22 }
  0xc4   : > { %v529_v41 = vmul.f32 %v3885_v32, %v4908_v3  ;;  %v530_v43 = vmul.f32 %v3886_v50, %v4908_v3  ;;  %v5122_v44 = vrot.slane %v1368_v10, 4  ;;  %v5124_v47 = vrot.slane %v1371_v12, 5  ;;  %v5158_v31 = vld [vmem:[%s4882_s7 + $0x18] sm:$0xff]  }
  0xc5   : > { %v1366_v48 = vsel %vm4984_vm11, %v1361_v13, %v1365_v37  ;;  %v1653_v8 = vrot.slane %v1651_v38, 5  ;;  %v543_v49 = vadd.f32 %v4910_v5, %v505_v39  ;;  %v544_v51 = vadd.f32 %v4910_v5, %v506_v40 }
  0xc6   : > { %v5130_v36 = vcombine.low %v1356_v23, %v1366_v48  ;;  %v567_v52 = vadd.f32 %v4910_v5, %v529_v41  ;;  %v568_v53 = vadd.f32 %v4910_v5, %v530_v43  ;;  %v1381_v62 = vshrl.u32 %v5090_v45, 16  ;;  %v4325_v48 = vld [vmem:[#allocation6 + $0x40] sm:$0xff]  }
  0xc7   : > { %v5134_v33 = vld [vmem:[#allocation2 + $0xa8] sm:$0xf]  ;;  %v1654_v57 = vsel %vm4984_vm11, %v1649_v24, %v1653_v8  ;;  %v575_v55 = vmax.f32 %v543_v49, 0.0  ;;  %v576_v61 = vmax.f32 %v544_v51, 0.0  ;;  %v1374_v10 = vor.u32 %v5124_v47, %v5122_v44  ;;  %v415_v24 = vld [vmem:[#allocation2 + $0xb0] sm:$0x1]  ;;  %3906 = vmatprep.subr.bf16.mxu0 %v4325_v48  ;;  %4190 = vmatprep.subr.bf16.mxu1 %v4325_v48 }
  0xc8   : > { %v1656_v4 = vshrl.u32 %v5134_v33, 16  ;;  %2032 = vrot.lane.b32.xlu0 %v5130_v36, %s4627_s26  ;;  %v599_v9 = vmax.f32 %v567_v52, 0.0  ;;  %v1659_v22 = vshll.u32 %v5134_v33, 16  ;;  %v600_v29 = vmax.f32 %v568_v53, 0.0  ;;  %v1039_v35 = vld [vmem:[#allocation2 + $0x24] sm:$0xf] }
  0xc9   : > { %v5147_v12 = vld [vmem:[#allocation2 + $0xac] sm:$0xf]  ;;  %v3794_v13 = vpack.c.bf16 %v575_v55, %v575_v55  ;;  %v3795_v14 = vpack.c.bf16 %v576_v61, %v576_v61  ;;  %v5154_v17 = vcombine.low %v1644_v54, %v1654_v57  ;;  %v1377_v23 = vshll.u32 %v5090_v45, 16  ;;  %v4326_v8 = vld [vmem:[#allocation6] sm:$0xff]   ;;  %v329_v53 = vld [vmem:[#allocation2 + $0x30] sm:$0x1] }
  0xca   : > { %v5152_v16 = vcombine.low %v5134_v33, %v5147_v12  ;;  %v3818_v18 = vpack.c.bf16 %v599_v9, %v599_v9  ;;  %v1036_v19 = vld [vmem:[#allocation2 + $0x20] sm:$0x1]  ;;  %v3819_v32 = vpack.c.bf16 %v600_v29, %v600_v29  ;;  %v1123_v40 = vld [vmem:[#allocation2 + $0xb4] sm:$0xf]  ;;  %v1383_v43 = vrot.slane %v1381_v62, 4  ;;  %3907 = vmatpush3.bf16.msra.mxu0 %v4326_v8  ;;  %4198 = vmatpush3.bf16.msra.mxu1 %v4326_v8 }
  0xcb   : > { %6540 = vst [vmem:[#allocation22_spill] sm:$0xff] %v5154_v17  ;;  %v736_v26 = vshrl.u32 %v3794_v13, 16  ;;  %v739_v27 = vshll.u32 %v3794_v13, 16  ;;  %v744_v28 = vshrl.u32 %v3795_v14, 16  ;;  %v747_v30 = vshll.u32 %v3795_v14, 16  ;;  %v3905_v14 = vld [vmem:[%s4882_s7 + $0x78] sm:$0xff]  }
  0xcc   : > { %2139 = vrot.lane.b32.xlu1 %v5152_v16, %s4627_s26  ;;  %v940_v50 = vshrl.u32 %v3818_v18, 16  ;;  %v943_v58 = vshll.u32 %v3818_v18, 16  ;;  %v1037_v37 = vsel %vm4899_vm4, %v734_v25, %v1036_v19  ;;  %v5168_v41 = vrot.slane %v1377_v23, 5  ;;  %v365_v13 = vld [vmem:[#allocation2 + $0xc0] sm:$0x1] }
  0xcd   : > { %v738_v38 = vrot.slane %v736_v26, 7  ;;  %v5166_v39 = vrot.slane %v744_v28, 7  ;;  %1038 = vst [vmem:[#allocation2 + $0x20] sm:$0x1] %v1037_v37  ;;  %v948_v51 = vshrl.u32 %v3819_v32, 16  ;;  %v951_v52 = vshll.u32 %v3819_v32, 16 }
  0xce   : > { %v942_v49 = vrot.slane %v940_v50, 7  ;;  %v416_v56 = vsel %vm4904_vm5, 0, %v415_v24  ;;  %v1669_v25 = vshrl.u32 %v5147_v12, 16  ;;  %v3841_v9 = vunpack.c.l.bf16 %v5158_v31  ;;  %v4327_v24 = vld [vmem:[#allocation6 + $0x48] sm:$0xff]  }
  0xcf   : > { %v741_v33 = vor.u32 %v739_v27, %v738_v38  ;;  %v742_v54 = vrot.slane %v738_v38, 4  ;;  %v749_v57 = vor.u32 %v747_v30, %v5166_v39  ;;  %417 = vst [vmem:[#allocation2 + $0xb0] sm:$0x1] %v416_v56  ;;  %v5176_v62 = vrot.slane %v948_v51, 7  ;;  %v4328_v26 = vld [vmem:[#allocation6 + $0x8] sm:$0xff]   ;;  %3908 = vmatprep.subr.bf16.mxu0 %v4327_v24  ;;  %4191 = vmatprep.subr.bf16.mxu1 %v4327_v24  ;;  %v4329_v56 = vld [vmem:[#allocation6 + $0x50] sm:$0xff]  }
  0xd0   : > { %2056 = vrot.lane.b32.xlu1 %v5154_v17, %s4627_s26  ;;  %v945_v55 = vor.u32 %v943_v58, %v942_v49  ;;  %v946_v61 = vrot.slane %v942_v49, 4  ;;  %v1384_v19 = vor.u32 %v1383_v43, %v5168_v41  ;;  %v1658_v23 = vrot.slane %v1656_v4, 4  ;;  %3909 = vmatpush3.bf16.msra.mxu0 %v4328_v26 }
  0xd1   : > { %v750_v29 = vsel %vm4960_vm9, %v742_v54, %v749_v57  ;;  %v1040_v18 = vsel %vm4940_vm7, %v741_v33, %v1039_v35  ;;  %v953_v27 = vor.u32 %v951_v52, %v5176_v62  ;;  %v5192_v30 = vrot.slane %v1374_v10, 4  ;;  %4199 = vmatpush3.bf16.msra.mxu1 %v4328_v26  ;;  %v4330_v57 = vld [vmem:[#allocation6 + $0x10] sm:$0xff]   ;;  %3910 = vmatprep.subr.bf16.mxu0 %v4329_v56 }
  0xd2   : > { %1041 = vst [vmem:[#allocation2 + $0x24] sm:$0xf] %v1040_v18  ;;  %1042 = vst.msk [vmem:[#allocation2 + $0x28] sm:$0xf] %vm1022_vm0, %v750_v29  ;;  %v1124_v28 = vsel %vm4940_vm7, %v945_v55, %v1123_v40  ;;  %v1661_v35 = vrot.slane %v1659_v22, 5  ;;  %v5194_v32 = vrot.slane %v1384_v19, 4  ;;  %v3842_v47 = vunpack.c.h.bf16 %v5158_v31  ;;  %4192 = vmatprep.subr.bf16.mxu1 %v4329_v56 }
  0xd3   : > { %1125 = vst [vmem:[#allocation2 + $0xb4] sm:$0xf] %v1124_v28  ;;  %v1665_v4 = vshll.u32 %v5147_v12, 16  ;;  %v1671_v50 = vrot.slane %v1669_v25, 4  ;;  %v330_v58 = vsel %vm4899_vm4, 0, %v329_v53  ;;  %v954_v37 = vsel %vm4960_vm9, %v946_v61, %v953_v27  ;;  %v4331_v55 = vld [vmem:[#allocation6 + $0x58] sm:$0xff]  }
  0xd4   : > { %v5201_v38 = vld [vmem:[#allocation2 + $0x20] sm:$0x1]  ;;  %v1662_v44 = vor.u32 %v1661_v35, %v1658_v23  ;;  %331 = vst [vmem:[#allocation2 + $0x30] sm:$0x1] %v330_v58  ;;  %v507_v10 = vmul.f32 %v3841_v9, %v4908_v3  ;;  %v382_v22 = vld [vmem:[#allocation2 + $0x2c] sm:$0x1]  ;;  %v3889_v48 = vunpack.c.l.bf16 %v3905_v14  ;;  %v508_v31 = vmul.f32 %v3842_v47, %v4908_v3  ;;  %3911 = vmatpush3.bf16.msra.mxu0 %v4330_v57 }
  0xd5   : > { %1126 = vst.msk [vmem:[#allocation2 + $0xb8] sm:$0xf] %vm1022_vm0, %v954_v37  ;;  %v1387_v12 = vshll.u32 %v5201_v38, 16  ;;  %v5207_v40 = vrot.slane %v1665_v4, 5  ;;  %v366_v43 = vsel %vm4899_vm4, 0, %v365_v13  ;;  %v3890_v52 = vunpack.c.h.bf16 %v3905_v14  ;;  %v4332_v23 = vld [vmem:[#allocation6 + $0x18] sm:$0xff]   ;;  %4200 = vmatpush3.bf16.msra.mxu1 %v4330_v57  ;;  %3912 = vmatprep.subr.bf16.mxu0 %v4331_v55 }
  0xd6   : > { %v1120_v8 = vld [vmem:[#allocation2 + $0xb0] sm:$0x1]  ;;  %v5211_v49 = vrot.slane %v1662_v44, 4  ;;  %v545_v51 = vadd.f32 %v4910_v5, %v507_v10  ;;  %367 = vst [vmem:[#allocation2 + $0xc0] sm:$0x1] %v366_v43  ;;  %v531_v54 = vmul.f32 %v3889_v48, %v4908_v3  ;;  %v751_v61 = vrot.slane %v5166_v39, 4  ;;  %4193 = vmatprep.subr.bf16.mxu1 %v4331_v55 }
  0xd7   : > { %v1389_v53 = vrot.slane %v1387_v12, 5  ;;  %v1121_v25 = vsel %vm4899_vm4, %v938_v20, %v1120_v8  ;;  %v1672_v33 = vor.u32 %v1671_v50, %v5207_v40  ;;  %v546_v9 = vadd.f32 %v4910_v5, %v508_v31  ;;  %v4334_v8 = vld [vmem:[#allocation6 + $0x20] sm:$0xff]  }
  0xd8   : > { %1122 = vst [vmem:[#allocation2 + $0xb0] sm:$0x1] %v1121_v25  ;;  %v577_v13 = vmax.f32 %v545_v51, 0.0  ;;  %v532_v14 = vmul.f32 %v3890_v52, %v4908_v3  ;;  %v1380_v20 = vsel %vm4984_vm11, %v5192_v30, %v5168_v41  ;;  %v569_v19 = vadd.f32 %v4910_v5, %v531_v54  ;;  %v4333_v30 = vld [vmem:[#allocation6 + $0x60] sm:$0xff]   ;;  %3913 = vmatpush3.bf16.msra.mxu0 %v4332_v23 }
  0xd9   : > { %v5224_v63 = vld [vmem:[#allocation2 + $0x24] sm:$0xf]  ;;  %v5226_v29 = vld [vmem:[#allocation2 + $0x28] sm:$0xf]  ;;  %v1390_v18 = vsel %vm4984_vm11, %v5194_v32, %v1389_v53  ;;  %v383_v3 = vsel %vm4904_vm5, 0, %v382_v22  ;;  %v1668_v28 = vsel %vm4984_vm11, %v5211_v49, %v5207_v40  ;;  %v5252_v4 = vrot.slane %v1672_v33, 4  ;;  %4201 = vmatpush3.bf16.msra.mxu1 %v4332_v23  ;;  %3914 = vmatprep.subr.bf16.mxu0 %v4333_v30 }
  0xda   : > { %v1392_v24 = vshrl.u32 %v5224_v63, 16  ;;  %v1395_v26 = vshll.u32 %v5224_v63, 16  ;;  %v5242_v27 = vcombine.low %v5224_v63, %v5226_v29  ;;  %v5244_v41 = vld [vmem:[#allocation2 + $0xb4] sm:$0xf]  ;;  %384 = vst [vmem:[#allocation2 + $0x2c] sm:$0x1] %v383_v3  ;;  %v5258_v37 = vcombine.low %v1380_v20, %v1390_v18  ;;  %4194 = vmatprep.subr.bf16.mxu1 %v4333_v30 }
  0xdb   : > { %v1405_v35 = vshrl.u32 %v5226_v29, 16  ;;  %v1680_v32 = vshrl.u32 %v5244_v41, 16  ;;  %v578_v50 = vmax.f32 %v546_v9, 0.0  ;;  %v3796_v44 = vpack.c.bf16 %v577_v13, %v577_v13  ;;  %v4335_v53 = vld [vmem:[#allocation6 + $0x68] sm:$0xff]   ;;  %v1046_v13 = vld [vmem:[#allocation2 + $0x30] sm:$0xf] }
  0xdc   : > { %2117 = vrot.lane.b32.xlu0 %v5242_v27, %s4627_s26  ;;  %v5256_v58 = vld [vmem:[#allocation2 + $0xb8] sm:$0xf]  ;;  %v570_v47 = vadd.f32 %v4910_v5, %v532_v14  ;;  %v601_v10 = vmax.f32 %v569_v19, 0.0  ;;  %v5265_v43 = vrot.slane %v1392_v24, 4  ;;  %v5267_v48 = vrot.slane %v1395_v26, 5  ;;  %3915 = vmatpush3.bf16.msra.mxu0 %v4334_v8  ;;  %v4336_v30 = vld [vmem:[#allocation6 + $0x28] sm:$0xff]  }
  0xdd   : > { %v5263_v22 = vcombine.low %v5244_v41, %v5256_v58  ;;  %v3797_v12 = vpack.c.bf16 %v578_v50, %v578_v50  ;;  %v753_v31 = vshrl.u32 %v3796_v44, 16  ;;  %v756_v51 = vshll.u32 %v3796_v44, 16  ;;  %v1130_v23 = vld [vmem:[#allocation2 + $0xc0] sm:$0xf]  ;;  %v418_v26 = vld [vmem:[#allocation2 + $0xbc] sm:$0x1]  ;;  %4202 = vmatpush3.bf16.msra.mxu1 %v4334_v8  ;;  %3916 = vmatprep.subr.bf16.mxu0 %v4335_v53 }
  0xde   : > { %v602_v52 = vmax.f32 %v570_v47, 0.0  ;;  %v3820_v56 = vpack.c.bf16 %v601_v10, %v601_v10  ;;  %v1683_v5 = vshll.u32 %v5244_v41, 16  ;;  %v1401_v57 = vshll.u32 %v5226_v29, 16  ;;  %4195 = vmatprep.subr.bf16.mxu1 %v4335_v53  ;;  %v4341_v41 = vld [vmem:[#allocation6 + $0xc0] sm:$0xff]  }
  0xdf   : > { %2141 = vrot.lane.b32.xlu1 %v5263_v22, %s4627_s26  ;;  %v1306_v25 = vld [vmem:[#allocation2 + $0xb0] sm:$0x1]  ;;  %v761_v33 = vshrl.u32 %v3797_v12, 16  ;;  %v764_v54 = vshll.u32 %v3797_v12, 16  ;;  %v755_v9 = vrot.slane %v753_v31, 7  ;;  %v1693_v18 = vshrl.u32 %v5256_v58, 16 }
  0xe0   : > { %2034 = vrot.lane.b32.xlu0 %v5258_v37, %s4627_s26  ;;  %v1675_v55 = vshll.u32 %v1306_v25, 16  ;;  %v3821_v14 = vpack.c.bf16 %v602_v52, %v602_v52  ;;  %v957_v20 = vshrl.u32 %v3820_v56, 16  ;;  %v960_v3 = vshll.u32 %v3820_v56, 16  ;;  %v4337_v31 = vld [vmem:[#allocation6 + $0x70] sm:$0xff]   ;;  %3917 = vmatpush3.bf16.msra.mxu0 %v4336_v30 }
  0xe1   : > { %v5276_v19 = vrot.slane %v761_v33, 7  ;;  %v1398_v24 = vor.u32 %v5267_v48, %v5265_v43  ;;  %v758_v44 = vor.u32 %v756_v51, %v755_v9  ;;  %v759_v47 = vrot.slane %v755_v9, 4  ;;  %v1043_v12 = vld [vmem:[#allocation2 + $0x2c] sm:$0x1]  ;;  %v332_v43 = vld [vmem:[#allocation2 + $0x3c] sm:$0x1]  ;;  %4203 = vmatpush3.bf16.msra.mxu1 %v4336_v30  ;;  %3918 = vmatprep.subr.bf16.mxu0 %v4337_v31 }
  0xe2   : > { %v1677_v50 = vrot.slane %v1675_v55, 5  ;;  %v959_v10 = vrot.slane %v957_v20, 7  ;;  %v965_v56 = vshrl.u32 %v3821_v14, 16  ;;  %v968_v25 = vshll.u32 %v3821_v14, 16  ;;  %v3894_v9 = vld [vmem:[%s4882_s7 + $0x20] sm:$0xff]   ;;  %v4338_v14 = vld [vmem:[#allocation6 + $0x30] sm:$0xff]   ;;  %4196 = vmatprep.subr.bf16.mxu1 %v4337_v31 }
  0xe3   : > { %v766_v52 = vor.u32 %v764_v54, %v5276_v19  ;;  %v5281_v33 = vrot.slane %v1401_v57, 5  ;;  %v1047_v8 = vsel %vm4940_vm7, %v758_v44, %v1046_v13  ;;  %vm1751_vm12 = vcmask 1042432   ;;  %v385_v13 = vld [vmem:[#allocation2 + $0x38] sm:$0x1]  ;;  %v335_v30 = vld [vmem:[#allocation2 + $0x48] sm:$0x1] }
  0xe4   : > { %v1678_v48 = vsel %vm4984_vm11, %v5252_v4, %v1677_v50  ;;  %v962_v51 = vor.u32 %v960_v3, %v959_v10  ;;  %v963_v55 = vrot.slane %v959_v10, 4  ;;  %vm1752_vm13 = vcmask 1046532   ;;  %1048 = vst [vmem:[#allocation2 + $0x30] sm:$0xf] %v1047_v8  ;;  %v4340_v10 = vld [vmem:[#allocation6 + $0x38] sm:$0xff]   ;;  %3919 = vmatpush3.bf16.msra.mxu0 %v4338_v14  ;;  %v5344_v8 = vld [vmem:[%s4882_s7 + $0x28] sm:$0xff]  }
  0xe5   : > { %v5294_v53 = vcombine.low %v1668_v28, %v1678_v48  ;;  %v767_v54 = vsel %vm4960_vm9, %v759_v47, %v766_v52  ;;  %v5298_v4 = vrot.slane %v965_v56, 7  ;;  %v1044_v57 = vsel %vm4899_vm4, %v751_v61, %v1043_v12  ;;  %v4339_v61 = vld [vmem:[#allocation6 + $0x78] sm:$0xff]   ;;  %4204 = vmatpush3.bf16.msra.mxu1 %v4338_v14  ;;  %v4342_v52 = vld [vmem:[#allocation6 + $0x100] sm:$0xff]   ;;  %vm5379_vm14 = vmor %vm1751_vm12, %vm1752_vm13 }
  0xe6   : > { %v955_v20 = vrot.slane %v5176_v62, 4  ;;  %1049 = vst.msk [vmem:[#allocation2 + $0x34] sm:$0xf] %vm1022_vm0, %v767_v54  ;;  %v1131_v40 = vsel %vm4940_vm7, %v962_v51, %v1130_v23  ;;  %1045 = vst [vmem:[#allocation2 + $0x2c] sm:$0x1] %v1044_v57  ;;  %v1407_v49 = vrot.slane %v1405_v35, 4  ;;  %v3845_v31 = vunpack.c.l.bf16 %v3894_v9  ;;  %3920 = vmatprep.subr.bf16.mxu0 %v4339_v61  ;;  %4197 = vmatprep.subr.bf16.mxu1 %v4339_v61 }
  0xe7   : > { %6541 = vst [vmem:[#allocation23_spill] sm:$0xff] %v5294_v53  ;;  %v419_v39 = vsel %vm4904_vm5, 0, %v418_v26  ;;  %2058 = vrot.lane.b32.xlu1 %v5294_v53, %s4627_s26  ;;  %v970_v28 = vor.u32 %v968_v25, %v5298_v4  ;;  %1132 = vst [vmem:[#allocation2 + $0xc0] sm:$0xf] %v1131_v40  ;;  %v5315_v3 = vrot.slane %v1398_v24, 4  ;;  %v1682_v23 = vrot.slane %v1680_v32, 4 }
  0xe8   : > { %420 = vst [vmem:[#allocation2 + $0xbc] sm:$0x1] %v419_v39  ;;  %v1685_v35 = vrot.slane %v1683_v5, 5  ;;  %v1408_v26 = vor.u32 %v1407_v49, %v5281_v33  ;;  %v1689_v50 = vshll.u32 %v5256_v58, 16  ;;  %v1695_v44 = vrot.slane %v1693_v18, 4  ;;  %3921 = vmatpush3.bf16.msra.mxu0 %v4340_v10 }
  0xe9   : > { %v333_v47 = vsel %vm4899_vm4, 0, %v332_v43  ;;  %v971_v24 = vsel %vm4960_vm9, %v963_v55, %v970_v28  ;;  %v3846_v32 = vunpack.c.h.bf16 %v3894_v9  ;;  %v768_v5 = vrot.slane %v5276_v19, 4  ;;  %v5339_v43 = vld [vmem:[#allocation8] ss:$0 sm:$0xff]  ;;  %v5359_v39 = vld [vmem:[#allocation9] ss:$0 sm:$0xff]  ;;  %4205 = vmatpush3.bf16.msra.mxu1 %v4340_v10  ;;  %4150 = vmatprep.subr.bf16.mxu0 %v4342_v52 }
  0xea   : > { %v1686_v12 = vor.u32 %v1685_v35, %v1682_v23  ;;  %334 = vst [vmem:[#allocation2 + $0x3c] sm:$0x1] %v333_v47  ;;  %1133 = vst.msk [vmem:[#allocation2 + $0xc4] sm:$0xf] %vm1022_vm0, %v971_v24  ;;  %v5329_v58 = vrot.slane %v1689_v50, 5  ;;  %v386_v18 = vsel %vm4904_vm5, 0, %v385_v13  ;;  %v1404_v56 = vsel %vm4984_vm11, %v5315_v3, %v5281_v33  ;;  %4018 = vmatprep.subr.bf16.mxu1 %v4341_v41 }
  0xeb   : > { %v509_v19 = vmul.f32 %v5339_v43, %v3845_v31  ;;  %v510_v48 = vmul.f32 %v5339_v43, %v3846_v32  ;;  %387 = vst [vmem:[#allocation2 + $0x38] sm:$0x1] %v386_v18  ;;  %v5346_v51 = vld [vmem:[#allocation2 + $0x30] sm:$0xf]  ;;  %v1409_v55 = vrot.slane %v1408_v26, 4  ;;  %v3659_v9 = vrot.slane %v4997_v6, 9 }
  0xec   : > { %v5337_v25 = vrot.slane %v1686_v12, 4  ;;  %v1763_v54 = vrot.slane %v4999_v7, 5  ;;  %v336_v33 = vsel %vm4899_vm4, 0, %v335_v30  ;;  %v1416_v13 = vshrl.u32 %v5346_v51, 16 }
  0xed   : > { %v5352_v57 = vld [vmem:[#allocation2 + $0x34] sm:$0xf]  ;;  %v1419_v14 = vshll.u32 %v5346_v51, 16  ;;  %v5356_v40 = vld [vmem:[#allocation2 + $0x2c] sm:$0x1]  ;;  %v1696_v49 = vor.u32 %v1695_v44, %v5329_v58  ;;  %v547_v61 = vadd.f32 %v5359_v39, %v509_v19  ;;  %v548_v23 = vadd.f32 %v5359_v39, %v510_v48 }
  0xee   : > { %337 = vst [vmem:[#allocation2 + $0x48] sm:$0x1] %v336_v33  ;;  %v1429_v6 = vshrl.u32 %v5352_v57, 16  ;;  %v5365_v7 = vcombine.low %v5346_v51, %v5352_v57  ;;  %v1411_v28 = vshll.u32 %v5356_v40, 16  ;;  %v1310_v35 = vld [vmem:[#allocation2 + $0xc0] sm:$0xf]  ;;  %v1692_v26 = vsel %vm4984_vm11, %v5337_v25, %v5329_v58 }
  0xef   : > { %v1127_v3 = vld [vmem:[#allocation2 + $0xbc] sm:$0x1]  ;;  %v1766_v44 = vrot.slane %v5102_v21, 5  ;;  %v3849_v47 = vunpack.c.l.bf16 %v5344_v8  ;;  %v580_v10 = vmax.f32 %v548_v23, 0.0  ;;  %v1418_v24 = vrot.slane %v1416_v13, 4 }
  0xf0   : > { %v1128_v30 = vsel %vm4899_vm4, %v955_v20, %v1127_v3  ;;  %2119 = vrot.lane.b32.xlu0 %v5365_v7, %s4627_s26  ;;  %v1413_v62 = vrot.slane %v1411_v28, 5  ;;  %v579_v20 = vmax.f32 %v547_v61, 0.0  ;;  %v1697_v31 = vrot.slane %v1696_v49, 4  ;;  %v391_v58 = vld [vmem:[#allocation2 + $0x50] sm:$0x1] }
  0xf1   : > { %1129 = vst [vmem:[#allocation2 + $0xbc] sm:$0x1] %v1128_v30  ;;  %v1311_v12 = vld [vmem:[#allocation2 + $0xc4] sm:$0xf]  ;;  %v1421_v32 = vrot.slane %v1419_v14, 5  ;;  %v1425_v41 = vshll.u32 %v5352_v57, 16  ;;  %v1764_v33 = vsel %vm5379_vm14, %v3659_v9, %v1763_v54  ;;  %v3799_v61 = vpack.c.bf16 %v580_v10, %v580_v10 }
  0xf2   : > { %v1431_v18 = vrot.slane %v1429_v6, 4  ;;  %v5388_v52 = vcombine.low %v1310_v35, %v1311_v12  ;;  %v1414_v21 = vsel %vm4984_vm11, %v1409_v55, %v1413_v62  ;;  %v3798_v19 = vpack.c.bf16 %v579_v20, %v579_v20  ;;  %v1050_v48 = vld [vmem:[#allocation2 + $0x38] sm:$0x1]  ;;  %v388_v10 = vld [vmem:[#allocation2 + $0x44] sm:$0x1] }
  0xf3   : > { %v5394_v28 = vcombine.low %v1404_v56, %v1414_v21  ;;  %v1051_v13 = vsel %vm4899_vm4, %v768_v5, %v1050_v48  ;;  %v1422_v14 = vor.u32 %v1421_v32, %v1418_v24  ;;  %v5400_v3 = vrot.slane %v1425_v41, 5 }
  0xf4   : > { %6544 = vst [vmem:[#allocation24_spill] sm:$0xff] %v5388_v52  ;;  %2143 = vrot.lane.b32.xlu1 %v5388_v52, %s4627_s26  ;;  %v770_v49 = vshrl.u32 %v3798_v19, 16  ;;  %v773_v6 = vshll.u32 %v3798_v19, 16  ;;  %1052 = vst [vmem:[#allocation2 + $0x38] sm:$0x1] %v1051_v13  ;;  %v1765_v55 = vrot.slane %v1763_v54, 4  ;;  %v3850_v35 = vunpack.c.h.bf16 %v5344_v8 }
  0xf5   : > { %2036 = vrot.lane.b32.xlu0 %v5394_v28, %s4627_s26  ;;  %v778_v9 = vshrl.u32 %v3799_v61, 16  ;;  %v781_v56 = vshll.u32 %v3799_v61, 16  ;;  %v1423_v23 = vrot.slane %v1422_v14, 4  ;;  %v1432_v5 = vor.u32 %v1431_v18, %v5400_v3  ;;  %v1053_v54 = vld [vmem:[#allocation2 + $0x3c] sm:$0xf] }
  0xf6   : > { %v772_v30 = vrot.slane %v770_v49, 7  ;;  %v1767_v62 = vsel %vm5379_vm14, %v1765_v55, %v1766_v44  ;;  %v511_v20 = vmul.f32 %v5339_v43, %v3849_v47  ;;  %v512_v8 = vmul.f32 %v5339_v43, %v3850_v35  ;;  %v338_v14 = vld [vmem:[#allocation2 + $0x54] sm:$0x1] }
  0xf7   : > { %v5409_v12 = vrot.slane %v778_v9, 7  ;;  %v1428_v32 = vsel %vm4984_vm11, %v1423_v23, %v5400_v3  ;;  %v5414_v41 = vcombine.low %v1764_v33, %v1767_v62  ;;  %v1433_v48 = vrot.slane %v1432_v5, 4 }
  0xf8   : > { %v1309_v24 = vld [vmem:[#allocation2 + $0xbc] sm:$0x1]  ;;  %v775_v18 = vor.u32 %v773_v6, %v772_v30  ;;  %v776_v19 = vrot.slane %v772_v30, 4  ;;  %v549_v61 = vadd.f32 %v5359_v39, %v511_v20  ;;  %v550_v13 = vadd.f32 %v5359_v39, %v512_v8  ;;  %v3896_v30 = vld [vmem:[%s4882_s7 + $0x30] sm:$0xff]  }
  0xf9   : > { %v1699_v21 = vshll.u32 %v1309_v24, 16  ;;  %v783_v44 = vor.u32 %v781_v56, %v5409_v12  ;;  %v785_v47 = vrot.slane %v5409_v12, 4  ;;  %v389_v3 = vsel %vm4904_vm5, 0, %v388_v10 }
  0xfa   : > { %v1054_v33 = vsel %vm4940_vm7, %v775_v18, %v1053_v54  ;;  %v3660_v6 = vrot.slane %v5080_v60, 9  ;;  %v581_v56 = vmax.f32 %v549_v61, 0.0  ;;  %v582_v23 = vmax.f32 %v550_v13, 0.0  ;;  %390 = vst [vmem:[#allocation2 + $0x44] sm:$0x1] %v389_v3 }
  0xfb   : > { %v1701_v49 = vrot.slane %v1699_v21, 5  ;;  %v784_v55 = vsel %vm4960_vm9, %v776_v19, %v783_v44  ;;  %1055 = vst [vmem:[#allocation2 + $0x3c] sm:$0xf] %v1054_v33  ;;  %v5428_v9 = vld [vmem:[#allocation2 + $0x38] sm:$0x1]  ;;  %v1770_v35 = vrot.slane %v5090_v45, 5  ;;  %v3853_v8 = vunpack.c.l.bf16 %v3896_v30 }
  0xfc   : > { %1056 = vst.msk [vmem:[#allocation2 + $0x40] sm:$0xf] %vm1022_vm0, %v784_v55  ;;  %v1435_v62 = vshll.u32 %v5428_v9, 16  ;;  %v1773_v60 = vrot.slane %v5201_v38, 5  ;;  %v339_v20 = vsel %vm4899_vm4, 0, %v338_v14  ;;  %v3800_v45 = vpack.c.bf16 %v581_v56, %v581_v56 }
  0xfd   : > { %v1702_v5 = vsel %vm4984_vm11, %v1697_v31, %v1701_v49  ;;  %v3801_v24 = vpack.c.bf16 %v582_v23, %v582_v23  ;;  %v1771_v31 = vsel %vm5379_vm14, %v3660_v6, %v1770_v35  ;;  %340 = vst [vmem:[#allocation2 + $0x54] sm:$0x1] %v339_v20  ;;  %v1772_v54 = vrot.slane %v1770_v35, 4  ;;  %v1060_v3 = vld [vmem:[#allocation2 + $0x48] sm:$0xf] }
  0xfe   : > { %v5444_v10 = vcombine.low %v1692_v26, %v1702_v5  ;;  %v1437_v12 = vrot.slane %v1435_v62, 5  ;;  %v3854_v38 = vunpack.c.h.bf16 %v3896_v30  ;;  %v787_v21 = vshrl.u32 %v3800_v45, 16 }
  0xff   : > { %v790_v18 = vshll.u32 %v3800_v45, 16  ;;  %v795_v19 = vshrl.u32 %v3801_v24, 16  ;;  %v798_v44 = vshll.u32 %v3801_v24, 16  ;;  %v1774_v26 = vsel %vm5379_vm14, %v1772_v54, %v1773_v60 }
 0x100   : > { %6545 = vst [vmem:[#allocation25_spill] sm:$0xff] %v5444_v10  ;;  %2060 = vrot.lane.b32.xlu1 %v5444_v10, %s4627_s26  ;;  %v1438_v25 = vsel %vm4984_vm11, %v1433_v48, %v1437_v12  ;;  %v513_v61 = vmul.f32 %v5339_v43, %v3853_v8  ;;  %v514_v13 = vmul.f32 %v5339_v43, %v3854_v38  ;;  %v789_v49 = vrot.slane %v787_v21, 7  ;;  %v341_v38 = vld [vmem:[#allocation2 + $0x60] sm:$0x1] }
 0x101   : > { %v5456_v14 = vcombine.low %v1428_v32, %v1438_v25  ;;  %v797_v33 = vrot.slane %v795_v19, 7  ;;  %v5458_v6 = vcombine.low %v1771_v31, %v1774_v26  ;;  %v1057_v56 = vld [vmem:[#allocation2 + $0x44] sm:$0x1]  ;;  %v392_v35 = vsel %vm4904_vm5, 0, %v391_v58  ;;  %v3897_v58 = vld [vmem:[%s4882_s7 + $0x38] sm:$0xff]  }
 0x102   : > { %v5460_v55 = vld [vmem:[#allocation2 + $0x3c] sm:$0xf]  ;;  %v551_v23 = vadd.f32 %v5359_v39, %v513_v61  ;;  %v552_v48 = vadd.f32 %v5359_v39, %v514_v13  ;;  %v792_v62 = vor.u32 %v790_v18, %v789_v49  ;;  %v793_v60 = vrot.slane %v789_v49, 4  ;;  %393 = vst [vmem:[#allocation2 + $0x50] sm:$0x1] %v392_v35 }
 0x103   : > { %6546 = vst [vmem:[#allocation26_spill] sm:$0xff] %v5456_v14  ;;  %v5466_v30 = vld [vmem:[#allocation2 + $0x40] sm:$0xf]  ;;  %v1440_v32 = vshrl.u32 %v5460_v55, 16  ;;  %v1443_v5 = vshll.u32 %v5460_v55, 16  ;;  %v800_v24 = vor.u32 %v798_v44, %v797_v33  ;;  %v1058_v12 = vsel %vm4899_vm4, %v785_v47, %v1057_v56 }
 0x104   : > { %2038 = vrot.lane.b32.xlu1 %v5456_v14, %s4627_s26  ;;  %v1453_v20 = vshrl.u32 %v5466_v30, 16  ;;  %v5475_v45 = vcombine.low %v5460_v55, %v5466_v30  ;;  %v1061_v31 = vsel %vm4940_vm7, %v792_v62, %v1060_v3  ;;  %1059 = vst [vmem:[#allocation2 + $0x44] sm:$0x1] %v1058_v12  ;;  %v1449_v18 = vshll.u32 %v5466_v30, 16 }
 0x105   : > { %v1442_v54 = vrot.slane %v1440_v32, 4  ;;  %v1445_v8 = vrot.slane %v1443_v5, 5  ;;  %v801_v21 = vsel %vm4960_vm9, %v793_v60, %v800_v24  ;;  %1062 = vst [vmem:[#allocation2 + $0x48] sm:$0xf] %v1061_v31  ;;  %v583_v44 = vmax.f32 %v551_v23, 0.0 }
 0x106   : > { %2121 = vrot.lane.b32.xlu0 %v5475_v45, %s4627_s26  ;;  %v1455_v19 = vrot.slane %v1453_v20, 4  ;;  %v802_v25 = vrot.slane %v797_v33, 4  ;;  %1063 = vst.msk [vmem:[#allocation2 + $0x4c] sm:$0xf] %vm1022_vm0, %v801_v21  ;;  %v584_v26 = vmax.f32 %v552_v48, 0.0  ;;  %v3661_v61 = vrot.slane %v5224_v63, 9 }
 0x107   : > { %v1446_v47 = vor.u32 %v1445_v8, %v1442_v54  ;;  %v1451_v13 = vrot.slane %v1449_v18, 5  ;;  %v3802_v49 = vpack.c.bf16 %v583_v44, %v583_v44  ;;  %v1777_v3 = vrot.slane %v5226_v29, 5  ;;  %v394_v20 = vld [vmem:[#allocation2 + $0x5c] sm:$0x1] }
 0x108   : > { %v342_v56 = vsel %vm4899_vm4, 0, %v341_v38  ;;  %v3803_v32 = vpack.c.bf16 %v584_v26, %v584_v26  ;;  %v1780_v5 = vrot.slane %v5356_v40, 5  ;;  %v3857_v23 = vunpack.c.l.bf16 %v3897_v58  ;;  %v1067_v38 = vld [vmem:[#allocation2 + $0x54] sm:$0xf] }
 0x109   : > { %v1447_v35 = vrot.slane %v1446_v47, 4  ;;  %343 = vst [vmem:[#allocation2 + $0x60] sm:$0x1] %v342_v56  ;;  %v1456_v33 = vor.u32 %v1455_v19, %v1451_v13  ;;  %v804_v48 = vshrl.u32 %v3802_v49, 16  ;;  %v807_v62 = vshll.u32 %v3802_v49, 16 }
 0x10a   : > { %2151 = vrot.lane.b32.xlu0 %v5414_v41, %s4627_s26  ;;  %v1064_v63 = vld [vmem:[#allocation2 + $0x50] sm:$0x1]  ;;  %v3858_v60 = vunpack.c.h.bf16 %v3897_v58  ;;  %v812_v24 = vshrl.u32 %v3803_v32, 16  ;;  %v815_v29 = vshll.u32 %v3803_v32, 16  ;;  %v1778_v12 = vsel %vm5379_vm14, %v3661_v61, %v1777_v3 }
 0x10b   : > { %v1065_v31 = vsel %vm4899_vm4, %v802_v25, %v1064_v63  ;;  %v1452_v40 = vsel %vm4984_vm11, %v1447_v35, %v1451_v13  ;;  %v1457_v54 = vrot.slane %v1456_v33, 4  ;;  %v806_v8 = vrot.slane %v804_v48, 7  ;;  %v5503_v19 = vld [vmem:[#allocation2 + $0x44] sm:$0x1] }
 0x10c   : > { %1066 = vst [vmem:[#allocation2 + $0x50] sm:$0x1] %v1065_v31  ;;  %v1779_v21 = vrot.slane %v1777_v3, 4  ;;  %v5501_v18 = vld [vmem:[#allocation2 + $0x48] sm:$0xf]  ;;  %v814_v44 = vrot.slane %v812_v24, 7  ;;  %v515_v58 = vmul.f32 %v5339_v43, %v3857_v23  ;;  %v516_v25 = vmul.f32 %v5339_v43, %v3858_v60 }
 0x10d   : > { %v395_v47 = vsel %vm4904_vm5, 0, %v394_v20  ;;  %v5509_v26 = vld [vmem:[#allocation2 + $0x4c] sm:$0xf]  ;;  %v1464_v61 = vshrl.u32 %v5501_v18, 16  ;;  %v1467_v13 = vshll.u32 %v5501_v18, 16  ;;  %v1459_v49 = vshll.u32 %v5503_v19, 16 }
 0x10e   : > { %v809_v3 = vor.u32 %v807_v62, %v806_v8  ;;  %396 = vst [vmem:[#allocation2 + $0x5c] sm:$0x1] %v395_v47  ;;  %v1477_v56 = vshrl.u32 %v5509_v26, 16  ;;  %v5517_v35 = vcombine.low %v5501_v18, %v5509_v26  ;;  %v810_v32 = vrot.slane %v806_v8, 4 }
 0x10f   : > { %v817_v23 = vor.u32 %v815_v29, %v814_v44  ;;  %v1461_v33 = vrot.slane %v1459_v49, 5  ;;  %v1466_v63 = vrot.slane %v1464_v61, 4  ;;  %v1781_v60 = vsel %vm5379_vm14, %v1779_v21, %v1780_v5 }
 0x110   : > { %v1068_v48 = vsel %vm4940_vm7, %v809_v3, %v1067_v38  ;;  %2123 = vrot.lane.b32.xlu1 %v5517_v35, %s4627_s26  ;;  %v1469_v20 = vrot.slane %v1467_v13, 5  ;;  %v1473_v24 = vshll.u32 %v5509_v26, 16  ;;  %v1479_v31 = vrot.slane %v1477_v56, 4 }
 0x111   : > { %v818_v62 = vsel %vm4960_vm9, %v810_v32, %v817_v23  ;;  %1069 = vst [vmem:[#allocation2 + $0x54] sm:$0xf] %v1068_v48  ;;  %v1462_v29 = vsel %vm4984_vm11, %v1457_v54, %v1461_v33  ;;  %v819_v8 = vrot.slane %v814_v44, 4  ;;  %v553_v38 = vadd.f32 %v5359_v39, %v515_v58  ;;  %v344_v44 = vld [vmem:[#allocation2 + $0x6c] sm:$0x1] }
 0x112   : > { %1070 = vst.msk [vmem:[#allocation2 + $0x58] sm:$0xf] %vm1022_vm0, %v818_v62  ;;  %v554_v5 = vadd.f32 %v5359_v39, %v516_v25  ;;  %v5533_v21 = vcombine.low %v1452_v40, %v1462_v29  ;;  %v1470_v61 = vor.u32 %v1469_v20, %v1466_v63  ;;  %v1475_v49 = vrot.slane %v1473_v24, 5 }
 0x113   : > { %v5535_v47 = vld [vmem:[#allocation2 + $0x50] sm:$0x1]  ;;  %v3662_v13 = vrot.slane %v5346_v51, 9  ;;  %v585_v56 = vmax.f32 %v553_v38, 0.0  ;;  %v1784_v54 = vrot.slane %v5352_v57, 5  ;;  %v5544_v25 = vcombine.low %v1778_v12, %v1781_v60 }
 0x114   : > { %6547 = vst [vmem:[#allocation27_spill] sm:$0xff] %v5533_v21  ;;  %v1483_v3 = vshll.u32 %v5535_v47, 16  ;;  %v586_v32 = vmax.f32 %v554_v5, 0.0  ;;  %2040 = vrot.lane.b32.xlu0 %v5533_v21, %s4627_s26  ;;  %2153 = vrot.lane.b32.xlu1 %v5458_v6, %s4627_s26  ;;  %v1471_v40 = vrot.slane %v1470_v61, 4  ;;  %v1480_v58 = vor.u32 %v1479_v31, %v1475_v49 }
 0x115   : > { %v1071_v23 = vld [vmem:[#allocation2 + $0x5c] sm:$0x1]  ;;  %v1787_v51 = vrot.slane %v5428_v9, 5  ;;  %v3804_v48 = vpack.c.bf16 %v585_v56, %v585_v56  ;;  %v5553_v24 = vsel %vm5379_vm14, %v3662_v13, %v1784_v54  ;;  %v345_v12 = vsel %vm4899_vm4, 0, %v344_v44 }
 0x116   : > { %v1485_v33 = vrot.slane %v1483_v3, 5  ;;  %v3805_v63 = vpack.c.bf16 %v586_v32, %v586_v32  ;;  %v1072_v57 = vsel %vm4899_vm4, %v819_v8, %v1071_v23  ;;  %v1476_v62 = vsel %vm4984_vm11, %v1471_v40, %v1475_v49  ;;  %346 = vst [vmem:[#allocation2 + $0x6c] sm:$0x1] %v345_v12  ;;  %v3898_v3 = vld [vmem:[%s4882_s7 + $0x40] sm:$0xff]   ;;  %v397_v40 = vld [vmem:[#allocation2 + $0x68] sm:$0x1] }
 0x117   : > { %v1481_v20 = vrot.slane %v1480_v58, 4  ;;  %1073 = vst [vmem:[#allocation2 + $0x5c] sm:$0x1] %v1072_v57  ;;  %v821_v60 = vshrl.u32 %v3804_v48, 16  ;;  %v824_v31 = vshll.u32 %v3804_v48, 16  ;;  %v1786_v38 = vrot.slane %v1784_v54, 4 }
 0x118   : > { %v5557_v9 = vld [vmem:[#allocation2 + $0x54] sm:$0xf]  ;;  %v829_v29 = vshrl.u32 %v3805_v63, 16  ;;  %v832_v13 = vshll.u32 %v3805_v63, 16  ;;  %v1074_v23 = vld [vmem:[#allocation2 + $0x60] sm:$0xf]  ;;  %v3862_v52 = vunpack.c.h.bf16 %v3898_v3 }
 0x119   : > { %v5559_v8 = vld [vmem:[#allocation2 + $0x58] sm:$0xf]  ;;  %v1488_v5 = vshrl.u32 %v5557_v9, 16  ;;  %v1491_v61 = vshll.u32 %v5557_v9, 16  ;;  %v1486_v49 = vsel %vm4984_vm11, %v1481_v20, %v1485_v33  ;;  %v823_v54 = vrot.slane %v821_v60, 7 }
 0x11a   : > { %v1501_v56 = vshrl.u32 %v5559_v8, 16  ;;  %v5569_v32 = vcombine.low %v5557_v9, %v5559_v8  ;;  %v5571_v44 = vcombine.low %v1476_v62, %v1486_v49  ;;  %v5573_v58 = vrot.slane %v829_v29, 7 }
 0x11b   : > { %v1490_v48 = vrot.slane %v1488_v5, 4  ;;  %v1493_v57 = vrot.slane %v1491_v61, 5  ;;  %v1497_v12 = vshll.u32 %v5559_v8, 16  ;;  %v826_v33 = vor.u32 %v824_v31, %v823_v54 }
 0x11c   : > { %6548 = vst [vmem:[#allocation28_spill] sm:$0xff] %v5569_v32  ;;  %6549 = vst [vmem:[#allocation29_spill] sm:$0xff] %v5571_v44  ;;  %2125 = vrot.lane.b32.xlu0 %v5569_v32, %s4627_s26  ;;  %2042 = vrot.lane.b32.xlu1 %v5571_v44, %s4627_s26  ;;  %v827_v63 = vrot.slane %v823_v54, 4  ;;  %v1503_v20 = vrot.slane %v1501_v56, 4  ;;  %v3861_v62 = vunpack.c.l.bf16 %v3898_v3  ;;  %v834_v60 = vor.u32 %v832_v13, %v5573_v58 }
 0x11d   : > { %v1494_v49 = vor.u32 %v1493_v57, %v1490_v48  ;;  %v1499_v29 = vrot.slane %v1497_v12, 5  ;;  %v1788_v5 = vsel %vm5379_vm14, %v1786_v38, %v1787_v51  ;;  %v1075_v61 = vsel %vm4940_vm7, %v826_v33, %v1074_v23  ;;  %v347_v48 = vld [vmem:[#allocation2 + $0x78] sm:$0x1]  ;;  %v3899_v57 = vld [vmem:[%s4882_s7 + $0x48] sm:$0xff]  }
 0x11e   : > { %v5585_v10 = vld [vmem:[#allocation2 + $0x5c] sm:$0x1]  ;;  %v517_v53 = vmul.f32 %v5339_v43, %v3861_v62  ;;  %v398_v31 = vsel %vm4904_vm5, 0, %v397_v40  ;;  %v835_v13 = vsel %vm4960_vm9, %v827_v63, %v834_v60  ;;  %1076 = vst [vmem:[#allocation2 + $0x60] sm:$0xf] %v1075_v61  ;;  %v518_v38 = vmul.f32 %v5339_v43, %v3862_v52 }
 0x11f   : > { %v1495_v56 = vrot.slane %v1494_v49, 4  ;;  %v1504_v54 = vor.u32 %v1503_v20, %v1499_v29  ;;  %v1507_v51 = vshll.u32 %v5585_v10, 16  ;;  %399 = vst [vmem:[#allocation2 + $0x68] sm:$0x1] %v398_v31  ;;  %1077 = vst.msk [vmem:[#allocation2 + $0x64] sm:$0xf] %vm1022_vm0, %v835_v13  ;;  %v3865_v61 = vunpack.c.l.bf16 %v3899_v57 }
 0x120   : > { %2155 = vrot.lane.b32.xlu0 %v5544_v25, %s4627_s26  ;;  %v555_v3 = vadd.f32 %v5359_v39, %v517_v53  ;;  %v3663_v40 = vrot.slane %v5460_v55, 9  ;;  %v1791_v23 = vrot.slane %v5466_v30, 5  ;;  %v1794_v20 = vrot.slane %v5503_v19, 5  ;;  %v400_v53 = vld [vmem:[#allocation2 + $0x74] sm:$0x1] }
 0x121   : > { %v1500_v12 = vsel %vm4984_vm11, %v1495_v56, %v1499_v29  ;;  %v1505_v33 = vrot.slane %v1504_v54, 4  ;;  %v1509_v63 = vrot.slane %v1507_v51, 5  ;;  %v836_v62 = vrot.slane %v5573_v58, 4 }
 0x122   : > { %v556_v60 = vadd.f32 %v5359_v39, %v518_v38  ;;  %v587_v52 = vmax.f32 %v555_v3, 0.0  ;;  %v1793_v49 = vrot.slane %v1791_v23, 4  ;;  %v348_v30 = vsel %vm4899_vm4, 0, %v347_v48 }
 0x123   : > { %v1510_v55 = vsel %vm4984_vm11, %v1505_v33, %v1509_v63  ;;  %v3866_v31 = vunpack.c.h.bf16 %v3899_v57  ;;  %v5613_v13 = vcombine.low %v5553_v24, %v1788_v5  ;;  %349 = vst [vmem:[#allocation2 + $0x78] sm:$0x1] %v348_v30  ;;  %v1792_v56 = vsel %vm5379_vm14, %v3663_v40, %v1791_v23  ;;  %v1081_v30 = vld [vmem:[#allocation2 + $0x6c] sm:$0xf] }
 0x124   : > { %v5610_v29 = vcombine.low %v1500_v12, %v1510_v55  ;;  %v588_v19 = vmax.f32 %v556_v60, 0.0  ;;  %v3806_v58 = vpack.c.bf16 %v587_v52, %v587_v52  ;;  %v1795_v54 = vsel %vm5379_vm14, %v1793_v49, %v1794_v20 }
 0x125   : > { %v519_v51 = vmul.f32 %v5339_v43, %v3865_v61  ;;  %v401_v38 = vsel %vm4904_vm5, 0, %v400_v53  ;;  %v5622_v3 = vld [vmem:[#allocation2 + $0x60] sm:$0xf]  ;;  %v520_v12 = vmul.f32 %v5339_v43, %v3866_v31  ;;  %v5646_v44 = vcombine.low %v1792_v56, %v1795_v54 }
 0x126   : > { %6550 = vst [vmem:[#allocation30_spill] sm:$0xff] %v5610_v29  ;;  %2044 = vrot.lane.b32.xlu0 %v5610_v29, %s4627_s26  ;;  %v3807_v24 = vpack.c.bf16 %v588_v19, %v588_v19  ;;  %v838_v5 = vshrl.u32 %v3806_v58, 16  ;;  %v841_v48 = vshll.u32 %v3806_v58, 16  ;;  %v1078_v57 = vld [vmem:[#allocation2 + $0x68] sm:$0x1]  ;;  %v1512_v23 = vshrl.u32 %v5622_v3, 16 }
 0x127   : > { %402 = vst [vmem:[#allocation2 + $0x74] sm:$0x1] %v401_v38  ;;  %v5627_v40 = vld [vmem:[#allocation2 + $0x64] sm:$0xf]  ;;  %v1515_v33 = vshll.u32 %v5622_v3, 16  ;;  %v1079_v63 = vsel %vm4899_vm4, %v836_v62, %v1078_v57  ;;  %v557_v20 = vadd.f32 %v5359_v39, %v519_v51  ;;  %v3900_v29 = vld [vmem:[%s4882_s7 + $0x50] sm:$0xff]  }
 0x128   : > { %v1525_v60 = vshrl.u32 %v5627_v40, 16  ;;  %v5637_v52 = vcombine.low %v5622_v3, %v5627_v40  ;;  %v840_v49 = vrot.slane %v838_v5, 7  ;;  %v846_v53 = vshrl.u32 %v3807_v24, 16  ;;  %1080 = vst [vmem:[#allocation2 + $0x68] sm:$0x1] %v1079_v63 }
 0x129   : > { %v849_v55 = vshll.u32 %v3807_v24, 16  ;;  %v1514_v61 = vrot.slane %v1512_v23, 4  ;;  %v1517_v31 = vrot.slane %v1515_v33, 5  ;;  %v1521_v19 = vshll.u32 %v5627_v40, 16 }
 0x12a   : > { %6551 = vst [vmem:[#allocation31_spill] sm:$0xff] %v5637_v52  ;;  %2127 = vrot.lane.b32.xlu1 %v5637_v52, %s4627_s26  ;;  %v843_v62 = vor.u32 %v841_v48, %v840_v49  ;;  %v844_v58 = vrot.slane %v840_v49, 4  ;;  %v848_v51 = vrot.slane %v846_v53, 7  ;;  %v1527_v38 = vrot.slane %v1525_v60, 4  ;;  %v350_v53 = vld [vmem:[#allocation2 + $0x84] sm:$0x1] }
 0x12b   : > { %v1518_v57 = vor.u32 %v1517_v31, %v1514_v61  ;;  %v1523_v17 = vrot.slane %v1521_v19, 5  ;;  %v558_v5 = vadd.f32 %v5359_v39, %v520_v12  ;;  %v589_v59 = vmax.f32 %v557_v20, 0.0  ;;  %v4368_v52 = vld [vmem:[#allocation2 + $0x4] sm:$0xf] }
 0x12c   : > { %v851_v63 = vor.u32 %v849_v55, %v848_v51  ;;  %v853_v24 = vrot.slane %v848_v51, 4  ;;  %v1082_v23 = vsel %vm4940_vm7, %v843_v62, %v1081_v30  ;;  %v3869_v55 = vunpack.c.l.bf16 %v3900_v29 }
 0x12d   : > { %1083 = vst [vmem:[#allocation2 + $0x6c] sm:$0xf] %v1082_v23  ;;  %v1528_v33 = vor.u32 %v1527_v38, %v1523_v17  ;;  %v590_v21 = vmax.f32 %v558_v5, 0.0  ;;  %v3808_v48 = vpack.c.bf16 %v589_v59, %v589_v59  ;;  %v1519_v20 = vrot.slane %v1518_v57, 4 }
 0x12e   : > { %v1085_v49 = vld [vmem:[#allocation2 + $0x74] sm:$0x1]  ;;  %2157 = vrot.lane.b32.xlu1 %v5613_v13, %s4627_s26  ;;  %v852_v12 = vsel %vm4960_vm9, %v844_v58, %v851_v63  ;;  %v3664_v59 = vrot.slane %v5501_v18, 9  ;;  %v1798_v61 = vrot.slane %v5509_v26, 5  ;;  %v1801_v58 = vrot.slane %v5535_v47, 5 }
 0x12f   : > { %v1086_v60 = vsel %vm4899_vm4, %v853_v24, %v1085_v49  ;;  %1084 = vst.msk [vmem:[#allocation2 + $0x70] sm:$0xf] %vm1022_vm0, %v852_v12  ;;  %v5655_v30 = vld [vmem:[#allocation2 + $0x68] sm:$0x1]  ;;  %v3809_v56 = vpack.c.bf16 %v590_v21, %v590_v21  ;;  %v855_v54 = vshrl.u32 %v3808_v48, 16  ;;  %v1529_v31 = vrot.slane %v1528_v33, 4 }
 0x130   : > { %1087 = vst [vmem:[#allocation2 + $0x74] sm:$0x1] %v1086_v60  ;;  %v1531_v19 = vshll.u32 %v5655_v30, 16  ;;  %v858_v62 = vshll.u32 %v3808_v48, 16  ;;  %v351_v5 = vsel %vm4899_vm4, 0, %v350_v53  ;;  %v1524_v21 = vsel %vm4984_vm11, %v1519_v20, %v1523_v17 }
 0x131   : > { %v857_v51 = vrot.slane %v855_v54, 7  ;;  %v863_v38 = vshrl.u32 %v3809_v56, 16  ;;  %v866_v57 = vshll.u32 %v3809_v56, 16  ;;  %v403_v63 = vld [vmem:[#allocation2 + $0x80] sm:$0x1]  ;;  %v3870_v18 = vunpack.c.h.bf16 %v3900_v29 }
 0x132   : > { %v1533_v24 = vrot.slane %v1531_v19, 5  ;;  %352 = vst [vmem:[#allocation2 + $0x84] sm:$0x1] %v351_v5  ;;  %v521_v26 = vmul.f32 %v5339_v43, %v3869_v55  ;;  %v1088_v49 = vld [vmem:[#allocation2 + $0x78] sm:$0xf]  ;;  %v5668_v47 = vsel %vm5379_vm14, %v3664_v59, %v1798_v61  ;;  %v404_v29 = vsel %vm4904_vm5, 0, %v403_v63 }
 0x133   : > { %v860_v23 = vor.u32 %v858_v62, %v857_v51  ;;  %v861_v33 = vrot.slane %v857_v51, 4  ;;  %v865_v48 = vrot.slane %v863_v38, 7  ;;  %v522_v17 = vmul.f32 %v5339_v43, %v3870_v18  ;;  %405 = vst [vmem:[#allocation2 + $0x80] sm:$0x1] %v404_v29 }
 0x134   : > { %v5670_v12 = vld [vmem:[#allocation2 + $0x6c] sm:$0xf]  ;;  %v1534_v60 = vsel %vm4984_vm11, %v1529_v31, %v1533_v24  ;;  %v559_v20 = vadd.f32 %v5359_v39, %v521_v26  ;;  %v1800_v43 = vrot.slane %v1798_v61, 4  ;;  %v1812_v11 = vrot.slane %v5627_v40, 5  ;;  %v5762_v40 = vpop.permute.xlu1 %2030 }
 0x135   : > { %v1536_v53 = vshrl.u32 %v5670_v12, 16  ;;  %v1539_v55 = vshll.u32 %v5670_v12, 16  ;;  %v5680_v56 = vcombine.low %v1524_v21, %v1534_v60  ;;  %v868_v54 = vor.u32 %v866_v57, %v865_v48 }
 0x136   : > { %v5682_v59 = vld [vmem:[#allocation2 + $0x70] sm:$0xf]  ;;  %v1089_v31 = vsel %vm4940_vm7, %v860_v23, %v1088_v49  ;;  %v560_v62 = vadd.f32 %v5359_v39, %v522_v17  ;;  %v591_v51 = vmax.f32 %v559_v20, 0.0  ;;  %v870_v18 = vrot.slane %v865_v48, 4 }
 0x137   : > { %6552 = vst [vmem:[#allocation32_spill] sm:$0xff] %v5680_v56  ;;  %v5686_v19 = vld [vmem:[#allocation2 + $0x74] sm:$0x1]  ;;  %v1549_v38 = vshrl.u32 %v5682_v59, 16  ;;  %v5692_v5 = vcombine.low %v5670_v12, %v5682_v59  ;;  %2046 = vrot.lane.b32.xlu1 %v5680_v56, %s4627_s26  ;;  %v869_v57 = vsel %vm4960_vm9, %v861_v33, %v868_v54  ;;  %1090 = vst [vmem:[#allocation2 + $0x78] sm:$0xf] %v1089_v31 }
 0x138   : > { %v1538_v63 = vrot.slane %v1536_v53, 4  ;;  %1091 = vst.msk [vmem:[#allocation2 + $0x7c] sm:$0xf] %vm1022_vm0, %v869_v57  ;;  %v1541_v61 = vrot.slane %v1539_v55, 5  ;;  %v1545_v39 = vshll.u32 %v5682_v59, 16  ;;  %v1555_v21 = vshll.u32 %v5686_v19, 16 }
 0x139   : > { %6553 = vst [vmem:[#allocation33_spill] sm:$0xff] %v5692_v5  ;;  %v592_v24 = vmax.f32 %v560_v62, 0.0  ;;  %2129 = vrot.lane.b32.xlu0 %v5692_v5, %s4627_s26  ;;  %v1551_v26 = vrot.slane %v1549_v38, 4  ;;  %v3810_v23 = vpack.c.bf16 %v591_v51, %v591_v51  ;;  %v1805_v49 = vrot.slane %v5559_v8, 5  ;;  %v406_v31 = vld [vmem:[#allocation2 + $0x8c] sm:$0x1] }
 0x13a   : > { %v1542_v60 = vor.u32 %v1541_v61, %v1538_v63  ;;  %v1547_v33 = vrot.slane %v1545_v39, 5  ;;  %v1802_v17 = vsel %vm5379_vm14, %v1800_v43, %v1801_v58  ;;  %v1557_v29 = vrot.slane %v1555_v21, 5  ;;  %v1092_v38 = vld [vmem:[#allocation2 + $0x80] sm:$0x1]  ;;  %v1095_v51 = vld [vmem:[#allocation2 + $0x84] sm:$0xf] }
 0x13b   : > { %v3811_v20 = vpack.c.bf16 %v592_v24, %v592_v24  ;;  %v872_v53 = vshrl.u32 %v3810_v23, 16  ;;  %v875_v55 = vshll.u32 %v3810_v23, 16  ;;  %v3665_v54 = vrot.slane %v5557_v9, 9 }
 0x13c   : > { %v1543_v62 = vrot.slane %v1542_v60, 4  ;;  %v1552_v57 = vor.u32 %v1551_v26, %v1547_v33  ;;  %v1093_v58 = vsel %vm4899_vm4, %v870_v18, %v1092_v38  ;;  %v1807_v43 = vrot.slane %v1805_v49, 4  ;;  %v5718_v26 = vpop.permute.xlu0 %2113 }
 0x13d   : > { %v880_v56 = vshrl.u32 %v3811_v20, 16  ;;  %v883_v48 = vshll.u32 %v3811_v20, 16  ;;  %2159 = vrot.lane.b32.xlu0 %v5646_v44, %s4627_s26  ;;  %v874_v8 = vrot.slane %v872_v53, 7  ;;  %v1808_v63 = vrot.slane %v5585_v10, 5  ;;  %1094 = vst [vmem:[#allocation2 + $0x80] sm:$0x1] %v1093_v58 }
 0x13e   : > { %v5712_v61 = vld [vmem:[#allocation2 + $0x78] sm:$0xf]  ;;  %v1548_v9 = vsel %vm4984_vm11, %v1543_v62, %v1547_v33  ;;  %v1553_v39 = vrot.slane %v1552_v57, 4  ;;  %v407_v24 = vsel %vm4904_vm5, 0, %v406_v31  ;;  %v5734_v57 = vcombine.low %v5668_v47, %v1802_v17 }
 0x13f   : > { %v882_v21 = vrot.slane %v880_v56, 7  ;;  %v5720_v23 = vld [vmem:[#allocation2 + $0x7c] sm:$0xf]  ;;  %v1560_v18 = vshrl.u32 %v5712_v61, 16  ;;  %v1563_v60 = vshll.u32 %v5712_v61, 16  ;;  %v877_v10 = vor.u32 %v875_v55, %v874_v8 }
 0x140   : > { %v878_v20 = vrot.slane %v874_v8, 4  ;;  %408 = vst [vmem:[#allocation2 + $0x8c] sm:$0x1] %v407_v24  ;;  %v1573_v53 = vshrl.u32 %v5720_v23, 16  ;;  %v5727_v56 = vcombine.low %v5712_v61, %v5720_v23  ;;  %v1558_v33 = vsel %vm4984_vm11, %v1553_v39, %v1557_v29 }
 0x141   : > { %v885_v31 = vor.u32 %v883_v48, %v882_v21  ;;  %v5731_v62 = vcombine.low %v1548_v9, %v1558_v33  ;;  %v1096_v55 = vsel %vm4940_vm7, %v877_v10, %v1095_v51  ;;  %v1562_v38 = vrot.slane %v1560_v18, 4  ;;  %v5743_v9 = vld [vmem:[#allocation2 + $0x8] sm:$0x1]  ;;  %v5755_v10 = vpop.permute.xlu0 %2137 }
 0x142   : > { %6554 = vst [vmem:[#allocation34_spill] sm:$0xff] %v5727_v56  ;;  %2131 = vrot.lane.b32.xlu1 %v5727_v56, %s4627_s26  ;;  %1097 = vst [vmem:[#allocation2 + $0x84] sm:$0xf] %v1096_v55  ;;  %v1565_v58 = vrot.slane %v1563_v60, 5  ;;  %v1569_v29 = vshll.u32 %v5720_v23, 16  ;;  %v1575_v48 = vrot.slane %v1573_v53, 4  ;;  %v1806_v18 = vsel %vm5379_vm14, %v3665_v54, %v1805_v49 }
 0x143   : > { %6555 = vst [vmem:[#allocation35_spill] sm:$0xff] %v5731_v62  ;;  %v886_v8 = vsel %vm4960_vm9, %v878_v20, %v885_v31  ;;  %2048 = vrot.lane.b32.xlu0 %v5731_v62, %s4627_s26  ;;  %v887_v17 = vrot.slane %v882_v21, 4  ;;  %v3666_v51 = vrot.slane %v5622_v3, 9  ;;  %v1809_v60 = vsel %vm5379_vm14, %v1807_v43, %v1808_v63  ;;  %v5767_v63 = vld [vmem:[#allocation2 + $0x90] sm:$0xf] }
 0x144   : > { %1098 = vst.msk [vmem:[#allocation2 + $0x88] sm:$0xf] %vm1022_vm0, %v886_v8  ;;  %v1566_v39 = vor.u32 %v1565_v58, %v1562_v38  ;;  %v1571_v24 = vrot.slane %v1569_v29, 5  ;;  %v5757_v20 = vld [vmem:[#allocation2 + $0x80] sm:$0x1]  ;;  %v1814_v53 = vrot.slane %v1812_v11, 4  ;;  %v5775_v55 = vcombine.low %v1806_v18, %v1809_v60 }
 0x145   : > { %v1815_v21 = vrot.slane %v5655_v30, 5  ;;  %v3667_v33 = vrot.slane %v5670_v12, 9  ;;  %v1819_v3 = vrot.slane %v5682_v59, 5  ;;  %v1579_v43 = vshll.u32 %v5757_v20, 16  ;;  %v5769_v31 = vld [vmem:[#allocation2 + $0x94] sm:$0xf] }
 0x146   : > { %2161 = vrot.lane.b32.xlu1 %v5734_v57, %s4627_s26  ;;  %v1567_v49 = vrot.slane %v1566_v39, 4  ;;  %v1576_v54 = vor.u32 %v1575_v48, %v1571_v24  ;;  %v5773_v30 = vcombine.low %v5767_v63, %v5769_v31  ;;  %v1813_v38 = vsel %vm5379_vm14, %v3666_v51, %v1812_v11  ;;  %v5794_v11 = vpop.permute.xlu1 %2054 }
 0x147   : > { %v1099_v12 = vld [vmem:[#allocation2 + $0x8c] sm:$0x1]  ;;  %v1822_v8 = vrot.slane %v5686_v19, 5  ;;  %v1581_v48 = vrot.slane %v1579_v43, 5  ;;  %v3668_v39 = vrot.slane %v5712_v61, 9  ;;  %v1816_v18 = vsel %vm5379_vm14, %v1814_v53, %v1815_v21  ;;  %v2116_v21 = vpop.permute.xlu0 %2115 }
 0x148   : > { %v1100_v59 = vsel %vm4899_vm4, %v887_v17, %v1099_v12  ;;  %v1572_v58 = vsel %vm4984_vm11, %v1567_v49, %v1571_v24  ;;  %v1577_v29 = vrot.slane %v1576_v54, 4  ;;  %v5791_v17 = vsel %vm5379_vm14, %v3667_v33, %v1819_v3  ;;  %v4367_v54 = vld [vmem:[#allocation2] sm:$0xf] }
 0x149   : > { %1101 = vst [vmem:[#allocation2 + $0x8c] sm:$0x1] %v1100_v59  ;;  %v5785_v47 = vld [vmem:[#allocation2 + $0x84] sm:$0xf]  ;;  %v1821_v51 = vrot.slane %v1819_v3, 4  ;;  %v1826_v19 = vrot.slane %v5720_v23, 5  ;;  %v5815_v5 = vcombine.low %v1813_v38, %v1816_v18 }
 0x14a   : > { %v1584_v60 = vshrl.u32 %v5785_v47, 16  ;;  %v1587_v61 = vshll.u32 %v5785_v47, 16  ;;  %v1582_v49 = vsel %vm4984_vm11, %v1577_v29, %v1581_v48  ;;  %v3658_v53 = vrot.slane %v4367_v54, 9 }
 0x14b   : > { %v5796_v24 = vld [vmem:[#allocation2 + $0x88] sm:$0xf]  ;;  %v5807_v23 = vcombine.low %v1572_v58, %v1582_v49  ;;  %v1828_v62 = vrot.slane %v1826_v19, 4  ;;  %v1829_v56 = vrot.slane %v5757_v20, 5  ;;  %v1756_v58 = vrot.slane %v4368_v52, 5 }
 0x14c   : > { %v1597_v33 = vshrl.u32 %v5796_v24, 16  ;;  %v5805_v3 = vcombine.low %v5785_v47, %v5796_v24  ;;  %v1593_v43 = vshll.u32 %v5796_v24, 16  ;;  %v1586_v12 = vrot.slane %v1584_v60, 4 }
 0x14d   : > { %6557 = vst [vmem:[#allocation37_spill] sm:$0xff] %v5807_v23  ;;  %v1589_v59 = vrot.slane %v1587_v61, 5  ;;  %2050 = vrot.lane.b32.xlu1 %v5807_v23, %s4627_s26  ;;  %v1823_v60 = vsel %vm5379_vm14, %v1821_v51, %v1822_v8  ;;  %v1827_v61 = vsel %vm5379_vm14, %v3668_v39, %v1826_v19  ;;  %v3676_v20 = vcombine.low %v4367_v54, %v4368_v52  ;;  %v2033_v51 = vpop.permute.xlu0 %2032 }
 0x14e   : > { %6556 = vst [vmem:[#allocation36_spill] sm:$0xff] %v5805_v3  ;;  %2133 = vrot.lane.b32.xlu0 %v5805_v3, %s4627_s26  ;;  %v1595_v29 = vrot.slane %v1593_v43, 5  ;;  %v1599_v48 = vrot.slane %v1597_v33, 4  ;;  %v1757_v3 = vsel %vm5379_vm14, %v3658_v53, %v1756_v58  ;;  %v1758_v23 = vrot.slane %v1756_v58, 4  ;;  %v5823_v33 = vpop.permute.xlu1 %2139 }
 0x14f   : > { %v1590_v49 = vor.u32 %v1589_v59, %v1586_v12  ;;  %vm2196_vm15 = vcmask 523264   ;;  %v1830_v43 = vsel %vm5379_vm14, %v1828_v62, %v1829_v56  ;;  %v1833_v8 = vrot.slane %v5796_v24, 5 }
 0x150   : > { %v1297_v14 = vld [vmem:[#allocation2 + $0x8c] sm:$0x1]  ;;  %v1600_v32 = vor.u32 %v1599_v48, %v1595_v29  ;;  %v6558_v39 = vrot.slane %v5743_v9, 5  ;;  %v3669_v54 = vrot.slane %v5785_v47, 9  ;;  %v3670_v53 = vrot.slane %v5767_v63, 9 }
 0x151   : > { %v1591_v38 = vrot.slane %v1590_v49, 4  ;;  %v1603_v18 = vshll.u32 %v1297_v14, 16  ;;  %2135 = vrot.lane.b32.xlu1 %v5773_v30, %s4627_s26  ;;  %v2199_v12 = vsel %vm2196_vm15, %v3676_v20, %v5762_v40  ;;  %v1835_v59 = vrot.slane %v1833_v8, 4  ;;  %v4369_v9 = vld [vmem:[#allocation2 + $0x98] sm:$0x1] }
 0x152   : > { %2163 = vrot.lane.b32.xlu0 %v5775_v55, %s4627_s26  ;;  %v1601_v52 = vrot.slane %v1600_v32, 4  ;;  %v1760_v19 = vsel %vm5379_vm14, %v1758_v23, %v6558_v39  ;;  %v1836_v48 = vrot.slane %v1297_v14, 5  ;;  %v1840_v32 = vrot.slane %v5769_v31, 5  ;;  %v2118_v39 = vpop.permute.xlu0 %2117 }
 0x153   : > { %v1596_v56 = vsel %vm4984_vm11, %v1591_v38, %v1595_v29  ;;  %v1605_v62 = vrot.slane %v1603_v18, 5  ;;  %v3708_v24 = vcombine.low %v1757_v3, %v1760_v19  ;;  %v1843_v58 = vrot.slane %v4369_v9, 5  ;;  %v4355_v29 = vld [vmem:[#allocation6 + $0x108] sm:$0xff]   ;;  %v5857_v3 = vpop.permute.xlu1 %2056  ;;  %v5881_v9 = vld [vmem:[#allocation2 + $0xb8] sm:$0xf] }
 0x154   : > { %v5845_v47 = vcombine.low %v1827_v61, %v1830_v43  ;;  %v1841_v14 = vsel %vm5379_vm14, %v3670_v53, %v1840_v32  ;;  %v1842_v40 = vrot.slane %v1840_v32, 4  ;;  %v2267_v31 = vsel %vm2196_vm15, %v5414_v41, %v2116_v21  ;;  %v4371_v38 = vld [vmem:[#allocation2 + $0xa0] sm:$0xf]  ;;  %v4372_v43 = vld [vmem:[#allocation2 + $0xa4] sm:$0x1]  ;;  %v4373_v21 = vld [vmem:[#allocation6 + $0x100] sm:$0xff]  }
 0x155   : > { %v1606_v23 = vsel %vm4984_vm11, %v1601_v52, %v1605_v62  ;;  %v2263_v63 = vsel %vm2196_vm15, %v3708_v24, %v5718_v26  ;;  %2165 = vrot.lane.b32.xlu1 %v5815_v5, %s4627_s26  ;;  %v5860_v61 = vcombine.low %v5791_v17, %v1823_v60  ;;  %v4370_v26 = vld [vmem:[#allocation2 + $0x9c] sm:$0xf]  ;;  %v1847_v18 = vrot.slane %v4371_v38, 5  ;;  %v4374_v60 = vld [vmem:[#allocation2 + $0xa8] sm:$0xf] }
 0x156   : > { %v5849_v49 = vcombine.low %v1596_v56, %v1606_v23  ;;  %2751 = vmatprep.mubr.bf16.mxu0 %v2263_v63  ;;  %v3671_v20 = vrot.slane %v4370_v26, 9  ;;  %v1850_v52 = vrot.slane %v4372_v43, 5  ;;  %v1834_v19 = vsel %vm5379_vm14, %v3669_v54, %v1833_v8  ;;  %v4343_v54 = vld [vmem:[#allocation6 + $0x80] sm:$0xff]   ;;  %v421_v23 = vld [vmem:[#allocation2 + $0xc8] sm:$0x1] }
 0x157   : > { %2752 = vmatmul.mubr.bf16.vlgmr.msra.gmra.mrb[0].mxu0 %v2199_v12  ;;  %v1837_v41 = vsel %vm5379_vm14, %v1835_v59, %v1836_v48  ;;  %v1844_v17 = vsel %vm5379_vm14, %v1842_v40, %v1843_v58  ;;  %v3672_v53 = vrot.slane %v4374_v60, 9  ;;  %v1849_v24 = vrot.slane %v1847_v18, 4  ;;  %v4375_v12 = vld [vmem:[#allocation2 + $0xac] sm:$0xf]  ;;  %v4376_v59 = vld [vmem:[#allocation2 + $0xb0] sm:$0x1] }
 0x158   : > { %2052 = vrot.lane.b32.xlu0 %v5849_v49, %s4627_s26  ;;  %4151 = vmatpush3.bf16.msra.mxu0 %v4373_v21  ;;  %v5870_v56 = vcombine.low %v1841_v14, %v1844_v17  ;;  %v1848_v62 = vsel %vm5379_vm14, %v3671_v20, %v1847_v18  ;;  %v1854_v32 = vrot.slane %v4375_v12, 5  ;;  %v5879_v8 = vsel %vm2196_vm15, %v5773_v30, %v5794_v11  ;;  %v4344_v14 = vld [vmem:[#allocation6 + $0xc8] sm:$0xff]   ;;  %v2142_v20 = vpop.permute.xlu1 %2141  ;;  %v368_v38 = vld [vmem:[#allocation2 + $0xcc] sm:$0x1]  ;;  %v424_v18 = vld [vmem:[#allocation2 + $0xd4] sm:$0x1] }
 0x159   : > { %2759 = vmatprep.mubr.bf16.mxu0 %v2267_v31  ;;  %4152 = vmatprep.subr.bf16.mxu0 %v4355_v29  ;;  %v1857_v48 = vrot.slane %v4376_v59, 5  ;;  %v1861_v58 = vrot.slane %v5881_v9, 5  ;;  %v2203_v40 = vsel %vm2196_vm15, %v5004_v15, %v2033_v51  ;;  %v1851_v30 = vsel %vm5379_vm14, %v1849_v24, %v1850_v52  ;;  %v2035_v15 = vpop.permute.xlu0 %2034  ;;  %v4359_v52 = vld [vmem:[#allocation6 + $0x110] sm:$0xff]   ;;  %v4378_v21 = vld [vmem:[#allocation2 + $0xb4] sm:$0xf] }
 0x15a   : > { %2169 = vrot.lane.b32.xlu1 %v5845_v47, %s4627_s26  ;;  %v2311_v63 = vsel %vm2196_vm15, %v5870_v56, %v5755_v10  ;;  %v1856_v11 = vrot.slane %v1854_v32, 4  ;;  %v5893_v31 = vcombine.low %v1834_v19, %v1837_v41  ;;  %v5895_v26 = vcombine.low %v1848_v62, %v1851_v30  ;;  %v4345_v41 = vld [vmem:[#allocation6 + $0x88] sm:$0xff]   ;;  %v4379_v24 = vld [vmem:[#allocation2 + $0xbc] sm:$0x1]  ;;  %v4348_v30 = vld [vmem:[#allocation6 + $0xd8] sm:$0xff]  }
 0x15b   : > { %2847 = vmatprep.mubr.bf16.mxu1 %v2311_v63  ;;  %v1855_v10 = vsel %vm5379_vm14, %v3672_v53, %v1854_v32  ;;  %v422_v43 = vsel %vm4904_vm5, 0, %v421_v23  ;;  %v2271_v17 = vsel %vm2196_vm15, %v5458_v6, %v2118_v39  ;;  %v3673_v60 = vrot.slane %v4378_v21, 9  ;;  %v5924_v23 = vld [vmem:[#allocation2 + $0xc4] sm:$0xf] }
 0x15c   : > { %2167 = vrot.lane.b32.xlu0 %v5860_v61, %s4627_s26  ;;  %2848 = vmatmul.mubr.bf16.vlgmr.msra.gmra.mrb[0].mxu1 %v5879_v8  ;;  %v1858_v51 = vsel %vm5379_vm14, %v1856_v11, %v1857_v48  ;;  %v2315_v19 = vsel %vm2196_vm15, %v5895_v26, %v5823_v33  ;;  %v1863_v53 = vrot.slane %v1861_v58, 4  ;;  %423 = vst [vmem:[#allocation2 + $0xc8] sm:$0x1] %v422_v43  ;;  %v1864_v12 = vrot.slane %v4379_v24, 5  ;;  %v4360_v48 = vld [vmem:[#allocation6 + $0x118] sm:$0xff]  }
 0x15d   : > { %4153 = vmatpush3.bf16.msra.mxu0 %v4355_v29  ;;  %4019 = vmatpush3.bf16.msra.mxu1 %v4343_v54  ;;  %v4346_v29 = vld [vmem:[#allocation6 + $0xd0] sm:$0xff]   ;;  %v5911_v62 = vcombine.low %v1855_v10, %v1858_v51  ;;  %v369_v32 = vsel %vm4899_vm4, 0, %v368_v38  ;;  %v425_v33 = vsel %vm4904_vm5, 0, %v424_v18  ;;  %v5917_v54 = vld [vmem:[#allocation2 + $0xc0] sm:$0xf]  ;;  %v972_v9 = vrot.slane %v5298_v4, 4 }
 0x15e   : > { %2173 = vrot.lane.b32.xlu1 %v5870_v56, %s4627_s26  ;;  %4020 = vmatprep.subr.bf16.mxu1 %v4344_v14  ;;  %v1867_v39 = vshrl.u32 %v5917_v54, 16  ;;  %v1870_v59 = vshll.u32 %v5917_v54, 16  ;;  %370 = vst [vmem:[#allocation2 + $0xcc] sm:$0x1] %v369_v32  ;;  %426 = vst [vmem:[#allocation2 + $0xd4] sm:$0x1] %v425_v33  ;;  %v5930_v63 = vsel %vm2196_vm15, %v5032_v34, %v5857_v3 }
 0x15f   : > { %2760 = vmatmul.mubr.bf16.gmra.mrb[4].mxu0 %v2203_v40  ;;  %2855 = vmatprep.mubr.bf16.mxu1 %v2315_v19  ;;  %v1880_v2 = vshrl.u32 %v5924_v23, 16  ;;  %v4347_v14 = vld [vmem:[#allocation6 + $0x90] sm:$0xff]   ;;  %v2059_v40 = vpop.permute.xlu1 %2058  ;;  %v2319_v4 = vsel %vm2196_vm15, %v5911_v62, %v2142_v20  ;;  %v1862_v10 = vsel %vm5379_vm14, %v3673_v60, %v1861_v58  ;;  %v1865_v38 = vsel %vm5379_vm14, %v1863_v53, %v1864_v12  ;;  %v5941_v3 = vld [vmem:[#allocation2 + $0xd0] sm:$0xf] }
 0x160   : > { %2171 = vrot.lane.b32.xlu0 %v5893_v31, %s4627_s26  ;;  %2767 = vmatprep.mubr.bf16.mxu0 %v2271_v17  ;;  %v1876_v34 = vshll.u32 %v5924_v23, 16  ;;  %v5947_v18 = vsel %vm2196_vm15, %v5099_v0, %v2035_v15  ;;  %v1869_v20 = vrot.slane %v1867_v39, 4  ;;  %v1872_v51 = vrot.slane %v1870_v59, 5  ;;  %v4349_v19 = vld [vmem:[#allocation6 + $0x98] sm:$0xff]  }
 0x161   : > { %4154 = vmatprep.subr.bf16.mxu0 %v4359_v52  ;;  %4021 = vmatpush3.bf16.msra.mxu1 %v4345_v41  ;;  %v5952_v41 = vcombine.low %v1862_v10, %v1865_v38  ;;  %v1910_v0 = vshll.u32 %v5941_v3, 16  ;;  %v1914_v15 = vshrl.u32 %v5941_v3, 16  ;;  %v1882_v60 = vrot.slane %v1880_v2, 4 }
 0x162   : > { %2177 = vrot.lane.b32.xlu1 %v5911_v62, %s4627_s26  ;;  %4022 = vmatprep.subr.bf16.mxu1 %v4346_v29  ;;  %v2120_v11 = vpop.permute.xlu0 %2119  ;;  %v1878_v21 = vrot.slane %v1876_v34, 5  ;;  %v1873_v12 = vor.u32 %v1872_v51, %v1869_v20  ;;  %v5967_v59 = vsel %vm2196_vm15, %v5152_v16, %v2059_v40  ;;  %v3674_v10 = vrot.slane %v5917_v54, 9  ;;  %v4353_v16 = vld [vmem:[#allocation6 + $0xa8] sm:$0xff]   ;;  %v4354_v34 = vld [vmem:[#allocation6 + $0xf0] sm:$0xff]  }
 0x163   : > { %4155 = vmatpush3.bf16.msra.mxu0 %v4359_v52  ;;  %v2275_v58 = vsel %vm2196_vm15, %v5544_v25, %v2120_v11  ;;  %v1134_v43 = vld [vmem:[#allocation2 + $0xc8] sm:$0x1]  ;;  %v4350_v52 = vld [vmem:[#allocation6 + $0xe0] sm:$0xff]   ;;  %v1912_v2 = vrot.slane %v1910_v0, 5  ;;  %vm3202_vm0 = vcmask 31744  }
 0x164   : > { %2175 = vrot.lane.b32.xlu0 %v5895_v26, %s4627_s26  ;;  %4156 = vmatprep.subr.bf16.mxu0 %v4360_v48  ;;  %v1135_v17 = vsel %vm4899_vm4, %v972_v9, %v1134_v43  ;;  %v4351_v9 = vld [vmem:[#allocation6 + $0xa0] sm:$0xff]  }
 0x165   : > { %2856 = vmatmul.mubr.bf16.gmra.mrb[4].mxu1 %v5930_v63  ;;  %1136 = vst [vmem:[#allocation2 + $0xc8] sm:$0x1] %v1135_v17  ;;  %v1203_v53 = vld [vmem:[#allocation2 + $0xcc] sm:$0xf]  ;;  %v1207_v29 = vld [vmem:[#allocation2 + $0xd4] sm:$0x1] }
 0x166   : > { %4023 = vmatpush3.bf16.msra.mxu1 %v4347_v14  ;;  %2863 = vmatprep.mubr.bf16.mxu1 %v2319_v4  ;;  %v2144_v24 = vpop.permute.xlu1 %2143  ;;  %v1204_v32 = vsel %vm4940_vm7, 0, %v1203_v53  ;;  %v1208_v33 = vsel %vm4899_vm4, 0, %v1207_v29  ;;  %v1916_v14 = vrot.slane %v1914_v15, 4  ;;  %v1883_v4 = vor.u32 %v1882_v60, %v1878_v21  ;;  %v4356_v53 = vld [vmem:[#allocation6 + $0xb0] sm:$0xff]  }
 0x167   : > { %4024 = vmatprep.subr.bf16.mxu1 %v4348_v30  ;;  %2768 = vmatmul.mubr.bf16.gmra.mrb[8].mxu0 %v5947_v18  ;;  %v2037_v39 = vpop.permute.xlu0 %2036  ;;  %1205 = vst [vmem:[#allocation2 + $0xcc] sm:$0xf] %v1204_v32  ;;  %1209 = vst [vmem:[#allocation2 + $0xd4] sm:$0x1] %v1208_v33  ;;  %v1895_v30 = vrot.slane %v5924_v23, 5  ;;  %v2323_v1 = vsel %vm2196_vm15, %v5952_v41, %v2144_v24 }
 0x168   : > { %2775 = vmatprep.mubr.bf16.mxu0 %v2275_v58  ;;  %2179 = vrot.lane.b32.xlu1 %v5952_v41, %s4627_s26  ;;  %v2211_v11 = vsel %vm2196_vm15, %v5242_v27, %v2037_v39  ;;  %v1917_v38 = vor.u32 %v1916_v14, %v1912_v2  ;;  %v1884_v20 = vrot.slane %v1883_v4, 4 }
 0x169   : > { %4157 = vmatpush3.bf16.msra.mxu0 %v4360_v48  ;;  %v1874_v48 = vrot.slane %v1873_v12, 4  ;;  %v1897_v23 = vrot.slane %v1895_v30, 4  ;;  %v4357_v12 = vld [vmem:[#allocation6 + $0xf8] sm:$0xff]  }
 0x16a   : > { %4025 = vmatpush3.bf16.msra.mxu1 %v4349_v19  ;;  %v1896_v19 = vsel %vm5379_vm14, %v3674_v10, %v1895_v30  ;;  %v1918_v29 = vrot.slane %v1917_v38, 4 }
 0x16b   : > { %4026 = vmatprep.subr.bf16.mxu1 %v4350_v52  ;;  %v1879_v27 = vsel %vm4984_vm11, %v1874_v48, %v1878_v21 }
 0x16c   : > { %v1312_v40 = vld [vmem:[#allocation2 + $0xc8] sm:$0x1] }
 0x16d   : > { %2864 = vmatmul.mubr.bf16.gmra.mrb[8].mxu1 %v5967_v59  ;;  %v1886_v51 = vshll.u32 %v1312_v40, 16  ;;  %v1898_v58 = vrot.slane %v1312_v40, 5 }
 0x16e   : > { %4027 = vmatpush3.bf16.msra.mxu1 %v4351_v9  ;;  %2871 = vmatprep.mubr.bf16.mxu1 %v2323_v1  ;;  %v5978_v43 = vld [vmem:[#allocation2 + $0xcc] sm:$0xf]  ;;  %v1315_v54 = vld [vmem:[#allocation2 + $0xd4] sm:$0x1] }
 0x16f   : > { %4028 = vmatprep.subr.bf16.mxu1 %v4352_v42  ;;  %2776 = vmatmul.mubr.bf16.gmra.mrb[12].mxu0 %v2211_v11  ;;  %v1888_v52 = vrot.slane %v1886_v51, 5  ;;  %v1901_v17 = vshrl.u32 %v5978_v43, 16  ;;  %v1904_v0 = vshll.u32 %v5978_v43, 16  ;;  %v1920_v15 = vshll.u32 %v1315_v54, 16 }
 0x170   : > { %v1899_v24 = vsel %vm5379_vm14, %v1897_v23, %v1898_v58  ;;  %v3675_v51 = vrot.slane %v5978_v43, 9 }
 0x171   : > { %v1889_v32 = vsel %vm4984_vm11, %v1884_v20, %v1888_v52  ;;  %v1903_v33 = vrot.slane %v1901_v17, 4  ;;  %v1906_v39 = vrot.slane %v1904_v0, 5  ;;  %v1922_v14 = vrot.slane %v1920_v15, 5 }
 0x172   : > { %4029 = vmatpush3.bf16.msra.mxu1 %v4353_v16  ;;  %v2061_v60 = vpop.permute.xlu1 %2060  ;;  %v5992_v9 = vcombine.low %v1879_v27, %v1889_v32  ;;  %v5994_v30 = vcombine.low %v1896_v19, %v1899_v24  ;;  %v3727_v0 = vcombine.low %v5978_v43, %v5941_v3 }
 0x173   : > { %4030 = vmatprep.subr.bf16.mxu1 %v4354_v34  ;;  %v5988_v21 = vsel %vm2196_vm15, %v5263_v22, %v2061_v60  ;;  %v1907_v42 = vor.u32 %v1906_v39, %v1903_v33  ;;  %v4358_v22 = vld [vmem:[#allocation6 + $0xb8] sm:$0xff]   ;;  %v1923_v48 = vsel %vm4984_vm11, %v1918_v29, %v1922_v14 }
 0x174   : > { %2189 = vrot.lane.b32.xlu0 %v5992_v9, %s4627_s26  ;;  %2181 = vrot.lane.b32.xlu1 %v5994_v30, %s4627_s26 }
 0x175   : > { %2872 = vmatmul.mubr.bf16.gmra.mrb[12].mxu1 %v5988_v21  ;;  %v1908_v4 = vrot.slane %v1907_v42, 4 }
 0x176   : > { %4031 = vmatpush3.bf16.msra.mxu1 %v4356_v53  ;;  %2912 = vmatprep.mubr.bf16.mxu1 %v5947_v18  ;;  %v2039_v1 = vpop.permute.xlu1 %2038 }
 0x177   : > { %4032 = vmatprep.subr.bf16.mxu1 %v4357_v12  ;;  %v2215_v16 = vsel %vm2196_vm15, %v5365_v7, %v2039_v1  ;;  %v1913_v18 = vsel %vm4984_vm11, %v1908_v4, %v1912_v2  ;;  %v1932_v7 = vrot.slane %v1315_v54, 5  ;;  %v1929_v2 = vrot.slane %v5941_v3, 5  ;;  %v6559_v12 = vld [vmem:[#allocation28_spill] sm:$0xff]  ;;  %v6561_v1 = vld [vmem:[#allocation31_spill] sm:$0xff] }
 0x178   : > { %v2122_v10 = vpop.permute.xlu0 %2121  ;;  %v3728_v38 = vcombine.low %v1913_v18, %v1923_v48 }
 0x179   : > { %v2279_v40 = vsel %vm2196_vm15, %v5613_v13, %v2122_v10  ;;  %v1931_v58 = vrot.slane %v1929_v2, 4  ;;  %v6019_v52 = vsel %vm5379_vm14, %v3675_v51, %v1929_v2  ;;  %v6562_v10 = vld [vmem:[#allocation27_spill] sm:$0xff] }
 0x17a   : > { %4033 = vmatpush3.bf16.msra.mxu1 %v4358_v22  ;;  %2783 = vmatprep.mubr.bf16.mxu0 %v2279_v40 }
 0x17b   : > { %2784 = vmatmul.mubr.bf16.gmra.mrb[16].mxu0 %v2215_v16  ;;  %2191 = vrot.lane.b32.xlu0 %v3728_v38, %s4627_s26  ;;  %v6027_v54 = vsel %vm5379_vm14, %v1931_v58, %v1932_v7  ;;  %v6564_v7 = vld [vmem:[#allocation29_spill] sm:$0xff] }
 0x17c   : > { %v2152_v23 = vpop.permute.xlu0 %2151  ;;  %v3729_v17 = vcombine.low %v6019_v52, %v6027_v54 }
 0x17d   : > { %v2327_v34 = vsel %vm2196_vm15, %v5130_v36, %v2152_v23  ;;  %v6563_v23 = vld [vmem:[#allocation33_spill] sm:$0xff] }
 0x17e   : > { %2913 = vmatmul.mubr.bf16.vlgmr.msra.gmra.mrb[16].mxu1 %v2327_v34 }
 0x17f   : > { %2920 = vmatprep.mubr.bf16.mxu1 %v2211_v11 }
 0x182   : > { %v2124_v20 = vpop.permute.xlu1 %2123 }
 0x183   : > { %v2283_v46 = vsel %vm2196_vm15, %v5646_v44, %v2124_v20 }
 0x184   : > { %2791 = vmatprep.mubr.bf16.mxu0 %v2283_v46 }
 0x186   : > { %v2041_v27 = vpop.permute.xlu0 %2040  ;;  %v2154_v19 = vpop.permute.xlu1 %2153 }
 0x187   : > { %v2219_v36 = vsel %vm2196_vm15, %v5475_v45, %v2041_v27  ;;  %v2331_v11 = vsel %vm2196_vm15, %v5258_v37, %v2154_v19  ;;  %v6565_v27 = vld [vmem:[#allocation34_spill] sm:$0xff] }
 0x188   : > { %2792 = vmatmul.mubr.bf16.gmra.mrb[20].mxu0 %v2219_v36  ;;  %2921 = vmatmul.mubr.bf16.gmra.mrb[20].mxu1 %v2331_v11 }
 0x189   : > { %2928 = vmatprep.mubr.bf16.mxu1 %v2215_v16 }
 0x18e   : > { %v2126_v15 = vpop.permute.xlu0 %2125  ;;  %v2043_v60 = vpop.permute.xlu1 %2042 }
 0x18f   : > { %v2287_v45 = vsel %vm2196_vm15, %v5734_v57, %v2126_v15  ;;  %v2223_v37 = vsel %vm2196_vm15, %v5517_v35, %v2043_v60  ;;  %v6560_v35 = vld [vmem:[#allocation26_spill] sm:$0xff] }
 0x190   : > { %2799 = vmatprep.mubr.bf16.mxu0 %v2287_v45  ;;  %v6566_v15 = vld [vmem:[#allocation30_spill] sm:$0xff] }
 0x191   : > { %2800 = vmatmul.mubr.bf16.gmra.mrb[24].mxu0 %v2223_v37 }
 0x192   : > { %v2156_v50 = vpop.permute.xlu0 %2155 }
 0x193   : > { %v2335_v53 = vsel %vm2196_vm15, %v5394_v28, %v2156_v50 }
 0x194   : > { %2929 = vmatmul.mubr.bf16.gmra.mrb[24].mxu1 %v2335_v53  ;;  %v6567_v53 = vld [vmem:[#allocation36_spill] sm:$0xff] }
 0x195   : > { %2936 = vmatprep.mubr.bf16.mxu1 %v2219_v36 }
 0x198   : > { %v2045_v29 = vpop.permute.xlu0 %2044 }
 0x199   : > { %v2227_v32 = vsel %vm2196_vm15, %v6559_v12, %v2045_v29 }
 0x19c   : > { %v2128_v24 = vpop.permute.xlu1 %2127 }
 0x19d   : > { %v2291_v33 = vsel %vm2196_vm15, %v5775_v55, %v2128_v24  ;;  %v6568_v24 = vld [vmem:[#allocation32_spill] sm:$0xff] }
 0x19e   : > { %2807 = vmatprep.mubr.bf16.mxu0 %v2291_v33  ;;  %v6569_v33 = vld [vmem:[#allocation35_spill] sm:$0xff] }
 0x19f   : > { %2808 = vmatmul.mubr.bf16.gmra.mrb[28].mxu0 %v2227_v32 }
 0x1a0   : > { %v2158_v39 = vpop.permute.xlu1 %2157 }
 0x1a1   : > { %v2339_v14 = vsel %vm2196_vm15, %v6560_v35, %v2158_v39 }
 0x1a2   : > { %2937 = vmatmul.mubr.bf16.gmra.mrb[28].mxu1 %v2339_v14  ;;  %v6570_v14 = vld [vmem:[#allocation37_spill] sm:$0xff] }
 0x1a3   : > { %2944 = vmatprep.mubr.bf16.mxu1 %v2223_v37 }
 0x1a9   : > { %v2047_v42 = vpop.permute.xlu1 %2046 }
 0x1aa   : > { %v2231_v22 = vsel %vm2196_vm15, %v6561_v1, %v2047_v42  ;;  %v6575_v1 = vld [vmem:[#allocation25_spill] sm:$0xff] }
 0x1ab   : > { %v2130_v28 = vpop.permute.xlu0 %2129 }
 0x1ac   : > { %v2295_v4 = vsel %vm2196_vm15, %v5815_v5, %v2130_v28 }
 0x1ad   : > { %2815 = vmatprep.mubr.bf16.mxu0 %v2295_v4 }
 0x1ae   : > { %2816 = vmatmul.mubr.bf16.gmra.mrb[32].mxu0 %v2231_v22 }
 0x1af   : > { %v2160_v48 = vpop.permute.xlu0 %2159 }
 0x1b0   : > { %v2343_v16 = vsel %vm2196_vm15, %v6562_v10, %v2160_v48 }
 0x1b1   : > { %2945 = vmatmul.mubr.bf16.gmra.mrb[32].mxu1 %v2343_v16 }
 0x1b2   : > { %2952 = vmatprep.mubr.bf16.mxu1 %v2227_v32 }
 0x1b4   : > { %v2132_v18 = vpop.permute.xlu1 %2131 }
 0x1b5   : > { %v2049_v40 = vpop.permute.xlu0 %2048  ;;  %v2299_v38 = vsel %vm2196_vm15, %v5860_v61, %v2132_v18 }
 0x1b6   : > { %2823 = vmatprep.mubr.bf16.mxu0 %v2299_v38  ;;  %v2235_v34 = vsel %vm2196_vm15, %v6563_v23, %v2049_v40 }
 0x1b7   : > { %2824 = vmatmul.mubr.bf16.gmra.mrb[36].mxu0 %v2235_v34 }
 0x1b8   : > { %v2162_v20 = vpop.permute.xlu1 %2161 }
 0x1b9   : > { %v2347_v46 = vsel %vm2196_vm15, %v6564_v7, %v2162_v20 }
 0x1ba   : > { %2953 = vmatmul.mubr.bf16.gmra.mrb[36].mxu1 %v2347_v46 }
 0x1bb   : > { %2960 = vmatprep.mubr.bf16.mxu1 %v2231_v22 }
 0x1bf   : > { %v2051_v51 = vpop.permute.xlu1 %2050 }
 0x1c0   : > { %v2134_v2 = vpop.permute.xlu0 %2133  ;;  %v2239_v19 = vsel %vm2196_vm15, %v6565_v27, %v2051_v51 }
 0x1c1   : > { %v2303_v58 = vsel %vm2196_vm15, %v5845_v47, %v2134_v2 }
 0x1c2   : > { %2831 = vmatprep.mubr.bf16.mxu0 %v2303_v58 }
 0x1c3   : > { %2832 = vmatmul.mubr.bf16.gmra.mrb[40].mxu0 %v2239_v19  ;;  %v2136_v11 = vpop.permute.xlu1 %2135 }
 0x1c4   : > { %v2164_v36 = vpop.permute.xlu0 %2163  ;;  %v2307_v45 = vsel %vm2196_vm15, %v5893_v31, %v2136_v11 }
 0x1c5   : > { %v2351_v60 = vsel %vm2196_vm15, %v6566_v15, %v2164_v36  ;;  %2839 = vmatprep.mubr.bf16.mxu0 %v2307_v45 }
 0x1c6   : > { %2961 = vmatmul.mubr.bf16.gmra.mrb[40].mxu1 %v2351_v60 }
 0x1c7   : > { %2968 = vmatprep.mubr.bf16.mxu1 %v2235_v34  ;;  %v2166_v37 = vpop.permute.xlu1 %2165 }
 0x1c8   : > { %v2355_v12 = vsel %vm2196_vm15, %v6568_v24, %v2166_v37 }
 0x1ca   : > { %v2053_v50 = vpop.permute.xlu0 %2052 }
 0x1cb   : > { %v2243_v29 = vsel %vm2196_vm15, %v6567_v53, %v2053_v50 }
 0x1cc   : > { %2840 = vmatmul.mubr.bf16.gmra.mrb[44].mxu0 %v2243_v29  ;;  %v2170_v35 = vpop.permute.xlu1 %2169 }
 0x1cd   : > { %4158 = vmatprep.mubr.msk.bf16.mxu0 %vm2196_vm15, %v5458_v6  ;;  %v2363_v42 = vsel %vm2196_vm15, %v6570_v14, %v2170_v35 }
 0x1ce   : > { %2969 = vmatmul.mubr.bf16.gmra.mrb[44].mxu1 %v2355_v12  ;;  %v2168_v32 = vpop.permute.xlu0 %2167 }
 0x1cf   : > { %2976 = vmatprep.mubr.bf16.mxu1 %v2239_v19  ;;  %v2359_v39 = vsel %vm2196_vm15, %v6569_v33, %v2168_v32 }
 0x1d2   : > { %v2172_v6 = vpop.permute.xlu0 %2171 }
 0x1d4   : > { %4159 = vmatmul.mubr.msk.bf16.vlgmr.msra.gmra.mrb[48].mxu0 %vm2196_vm15, %v5544_v25  ;;  %v2367_v25 = vsel %vm2196_vm15, %v5849_v49, %v2172_v6  ;;  %v6572_v49 = vld [vmem:[#allocation22_spill] sm:$0xff] }
 0x1d5   : > { %4162 = vmatprep.mubr.msk.bf16.mxu0 %vm2196_vm15, %v5613_v13  ;;  %v6571_v13 = vld [vmem:[#allocation21_spill] sm:$0xff] }
 0x1d6   : > { %2977 = vmatmul.mubr.bf16.gmra.mrb[48].mxu1 %v2359_v39 }
 0x1d7   : > { %2984 = vmatprep.mubr.bf16.mxu1 %v2243_v29 }
 0x1dc   : > { %4163 = vmatmul.mubr.msk.bf16.gmra.mrb[52].mxu0 %vm2196_vm15, %v5646_v44  ;;  %v2174_v44 = vpop.permute.xlu1 %2173 }
 0x1dd   : > { %4166 = vmatprep.mubr.msk.bf16.mxu0 %vm2196_vm15, %v5734_v57  ;;  %v2371_v57 = vsel %vm2196_vm15, %v6571_v13, %v2174_v44 }
 0x1de   : > { %2985 = vmatmul.mubr.bf16.gmra.mrb[52].mxu1 %v2363_v42 }
 0x1df   : > { %2992 = vmatprep.mubr.bf16.mxu1 %v5879_v8 }
 0x1e4   : > { %4167 = vmatmul.mubr.msk.bf16.gmra.mrb[56].mxu0 %vm2196_vm15, %v5775_v55  ;;  %v2176_v55 = vpop.permute.xlu0 %2175 }
 0x1e5   : > { %4170 = vmatprep.mubr.msk.bf16.mxu0 %vm2196_vm15, %v5815_v5  ;;  %v2375_v5 = vsel %vm2196_vm15, %v6572_v49, %v2176_v55 }
 0x1e6   : > { %2993 = vmatmul.mubr.bf16.gmra.mrb[56].mxu1 %v2367_v25 }
 0x1e7   : > { %3000 = vmatprep.mubr.bf16.mxu1 %v5930_v63  ;;  %v6573_v63 = vld [vmem:[#allocation23_spill] sm:$0xff] }
 0x1e8   : > { %v2190_v8 = vpop.permute.xlu0 %2189 }
 0x1ec   : > { %4171 = vmatmul.mubr.msk.bf16.gmra.mrb[60].mxu0 %vm2196_vm15, %v5860_v61  ;;  %v2178_v61 = vpop.permute.xlu1 %2177 }
 0x1ed   : > { %4174 = vmatprep.mubr.msk.bf16.mxu0 %vm2196_vm15, %v5845_v47  ;;  %v2379_v47 = vsel %vm2196_vm15, %v6573_v63, %v2178_v61 }
 0x1ee   : > { %3001 = vmatmul.mubr.bf16.gmra.mrb[60].mxu1 %v2371_v57 }
 0x1ef   : > { %3008 = vmatprep.mubr.bf16.mxu1 %v5967_v59  ;;  %v6574_v59 = vld [vmem:[#allocation24_spill] sm:$0xff] }
 0x1f0   : > { %v2391_v28 = vsel %vm2196_vm15, %v6574_v59, %v2190_v8 }
 0x1f4   : > { %4175 = vmatmul.mubr.msk.bf16.gmra.mrb[64].mxu0 %vm2196_vm15, %v5893_v31  ;;  %v2192_v31 = vpop.permute.xlu0 %2191 }
 0x1f5   : > { %4178 = vmatprep.mubr.msk.bf16.mxu0 %vm2196_vm15, %v5870_v56  ;;  %v2180_v56 = vpop.permute.xlu1 %2179 }
 0x1f6   : > { %3009 = vmatmul.mubr.bf16.gmra.mrb[64].mxu1 %v2375_v5 }
 0x1f7   : > { %3016 = vmatprep.mubr.bf16.mxu1 %v5988_v21  ;;  %v2383_v21 = vsel %vm2196_vm15, %v6575_v1, %v2180_v56 }
 0x1fc   : > { %4179 = vmatmul.mubr.msk.bf16.gmra.mrb[68].mxu0 %vm2196_vm15, %v5895_v26  ;;  %v2395_v26 = vsel %vm2196_vm15, %v3727_v0, %v2192_v31 }
 0x1fd   : > { %4182 = vmatprep.mubr.msk.bf16.mxu0 %vm2196_vm15, %v5911_v62  ;;  %v2182_v62 = vpop.permute.xlu1 %2181 }
 0x1fe   : > { %3017 = vmatmul.mubr.bf16.gmra.mrb[68].mxu1 %v2379_v47  ;;  %v2387_v22 = vsel %vm2196_vm15, %v5992_v9, %v2182_v62 }
 0x1ff   : > { %3024 = vmatprep.mubr.bf16.mxu1 %v2391_v28 }
 0x204   : > { %4183 = vmatmul.mubr.msk.bf16.gmra.mrb[72].mxu0 %vm2196_vm15, %v5952_v41 }
 0x205   : > { %4186 = vmatprep.mubr.msk.bf16.mxu0 %vm2196_vm15, %v5994_v30 }
 0x206   : > { %3025 = vmatmul.mubr.bf16.gmra.mrb[72].mxu1 %v2383_v21 }
 0x207   : > { %3032 = vmatprep.mubr.bf16.mxu1 %v2395_v26 }
 0x20c   : > { %4187 = vmatmul.mubr.msk.bf16.gmra.mrb[76].mxu0 %vm2196_vm15, %v3729_v17 }
 0x20e   : > { %3033 = vmatmul.mubr.bf16.gmra.mrb[76].mxu1 %v2387_v22 }
 0x22a   : > { %v3922_v41 = vpop.f32.mrb[0].mxu0 }
 0x22b   : > { %v3923_v4 = vpop.f32.mrb[1].mxu0 }
 0x22c   : > { %v3924_v3 = vadd.f32 %v3923_v4, %v3922_v41  ;;  %v3925_v43 = vpop.f32.mrb[2].mxu0 }
 0x22d   : > { %v3926_v0 = vpop.f32.mrb[3].mxu0 }
 0x22e   : > { %v3927_v48 = vadd.f32 %v3926_v0, %v3925_v43 }
 0x22f   : > { %v3994_v10 = vpop.f32.mrb[0].mxu1 }
 0x230   : > { %v3995_v30 = vpop.f32.mrb[1].mxu1 }
 0x231   : > { %v6129_v16 = vadd.f32 %v3995_v30, %v3994_v10  ;;  %v3997_v18 = vpop.f32.mrb[2].mxu1 }
 0x232   : > { %v3928_v40 = vpop.f32.mrb[4].mxu0  ;;  %v3998_v38 = vpop.f32.mrb[3].mxu1 }
 0x233   : > { %v3929_v9 = vpop.f32.mrb[5].mxu0  ;;  %v6131_v23 = vadd.f32 %v3998_v38, %v3997_v18 }
 0x234   : > { %v3930_v52 = vadd.f32 %v3929_v9, %v3928_v40  ;;  %v3931_v54 = vpop.f32.mrb[6].mxu0 }
 0x235   : > { %v3932_v17 = vpop.f32.mrb[7].mxu0 }
 0x236   : > { %v3933_v34 = vadd.f32 %v3932_v17, %v3931_v54 }
 0x238   : > { %v4000_v20 = vpop.f32.mrb[4].mxu1 }
 0x239   : > { %v4001_v7 = vpop.f32.mrb[5].mxu1 }
 0x23a   : > { %v6133_v46 = vadd.f32 %v4001_v7, %v4000_v20  ;;  %v4003_v2 = vpop.f32.mrb[6].mxu1  ;;  %v3934_v51 = vpop.f32.mrb[8].mxu0 }
 0x23b   : > { %v4004_v58 = vpop.f32.mrb[7].mxu1  ;;  %v3935_v27 = vpop.f32.mrb[9].mxu0 }
 0x23c   : > { %v6135_v19 = vadd.f32 %v4004_v58, %v4003_v2  ;;  %v3936_v36 = vadd.f32 %v3935_v27, %v3934_v51  ;;  %v3937_v11 = vpop.f32.mrb[10].mxu0 }
 0x23d   : > { %v3938_v15 = vpop.f32.mrb[11].mxu0 }
 0x23e   : > { %v3939_v60 = vadd.f32 %v3938_v15, %v3937_v11 }
 0x240   : > { %v4006_v45 = vpop.f32.mrb[8].mxu1 }
 0x241   : > { %v4007_v37 = vpop.f32.mrb[9].mxu1 }
 0x242   : > { %v6137_v50 = vadd.f32 %v4007_v37, %v4006_v45  ;;  %v4009_v53 = vpop.f32.mrb[10].mxu1  ;;  %v3940_v29 = vpop.f32.mrb[12].mxu0 }
 0x243   : > { %v4010_v24 = vpop.f32.mrb[11].mxu1  ;;  %v3941_v12 = vpop.f32.mrb[13].mxu0 }
 0x244   : > { %v6139_v32 = vadd.f32 %v4010_v24, %v4009_v53  ;;  %v6141_v33 = vadd.f32 %v3941_v12, %v3940_v29  ;;  %v3943_v39 = vpop.f32.mrb[14].mxu0 }
 0x245   : > { %v3944_v35 = vpop.f32.mrb[15].mxu0 }
 0x246   : > { %v3945_v14 = vadd.f32 %v3944_v35, %v3943_v39 }
 0x248   : > { %v4012_v42 = vpop.f32.mrb[12].mxu1 }
 0x249   : > { %v4013_v6 = vpop.f32.mrb[13].mxu1 }
 0x24a   : > { %v6143_v25 = vadd.f32 %v4013_v6, %v4012_v42  ;;  %v4015_v44 = vpop.f32.mrb[14].mxu1 }
 0x24b   : > { %v4016_v13 = vpop.f32.mrb[15].mxu1 }
 0x24c   : > { %v6145_v57 = vadd.f32 %v4016_v13, %v4015_v44 }
 0x24e   : > { %v3946_v55 = vpop.f32.mrb[16].mxu0 }
 0x24f   : > { %v3947_v49 = vpop.f32.mrb[17].mxu0 }
 0x250   : > { %v6147_v5 = vadd.f32 %v3947_v49, %v3946_v55  ;;  %v3949_v61 = vpop.f32.mrb[18].mxu0 }
 0x251   : > { %v3950_v8 = vpop.f32.mrb[19].mxu0  ;;  %v4034_v63 = vpop.f32.mrb[16].mxu1 }
 0x252   : > { %v6149_v47 = vadd.f32 %v3950_v8, %v3949_v61  ;;  %v4035_v59 = vpop.f32.mrb[17].mxu1 }
 0x253   : > { %v4036_v28 = vadd.f32 %v4035_v59, %v4034_v63  ;;  %v4037_v56 = vpop.f32.mrb[18].mxu1 }
 0x254   : > { %v4038_v31 = vpop.f32.mrb[19].mxu1 }
 0x255   : > { %v4039_v1 = vadd.f32 %v4038_v31, %v4037_v56  ;;  %v6151_v21 = vadd.f32 %v4036_v28, %v3924_v3 }
 0x257   : > { %v6153_v26 = vadd.f32 %v4039_v1, %v3927_v48 }
 0x25b   : > { %v3952_v62 = vpop.f32.mrb[20].mxu0  ;;  %v4040_v22 = vpop.f32.mrb[20].mxu1 }
 0x25c   : > { %v3953_v41 = vpop.f32.mrb[21].mxu0  ;;  %v4041_v4 = vpop.f32.mrb[21].mxu1 }
 0x25d   : > { %v6155_v43 = vadd.f32 %v3953_v41, %v3952_v62  ;;  %v3955_v0 = vpop.f32.mrb[22].mxu0  ;;  %v4042_v10 = vadd.f32 %v4041_v4, %v4040_v22  ;;  %v4043_v30 = vpop.f32.mrb[22].mxu1 }
 0x25e   : > { %v3956_v18 = vpop.f32.mrb[23].mxu0  ;;  %v4044_v40 = vpop.f32.mrb[23].mxu1 }
 0x25f   : > { %v3957_v38 = vadd.f32 %v3956_v18, %v3955_v0  ;;  %v4045_v9 = vadd.f32 %v4044_v40, %v4043_v30  ;;  %v6157_v54 = vadd.f32 %v4042_v10, %v3930_v52 }
 0x261   : > { %v6159_v17 = vadd.f32 %v4045_v9, %v3933_v34 }
 0x264   : > { %v3958_v3 = vpop.f32.mrb[24].mxu0 }
 0x265   : > { %v3959_v48 = vpop.f32.mrb[25].mxu0 }
 0x266   : > { %v6161_v20 = vadd.f32 %v3959_v48, %v3958_v3  ;;  %v3961_v7 = vpop.f32.mrb[26].mxu0 }
 0x267   : > { %v3962_v2 = vpop.f32.mrb[27].mxu0  ;;  %v4046_v51 = vpop.f32.mrb[24].mxu1 }
 0x268   : > { %v6163_v58 = vadd.f32 %v3962_v2, %v3961_v7  ;;  %v4047_v27 = vpop.f32.mrb[25].mxu1 }
 0x269   : > { %v4048_v11 = vadd.f32 %v4047_v27, %v4046_v51  ;;  %v4049_v15 = vpop.f32.mrb[26].mxu1 }
 0x26a   : > { %v4050_v45 = vpop.f32.mrb[27].mxu1 }
 0x26b   : > { %v4051_v37 = vadd.f32 %v4050_v45, %v4049_v15  ;;  %v6165_v53 = vadd.f32 %v4048_v11, %v3936_v36 }
 0x26d   : > { %v6167_v52 = vadd.f32 %v4051_v37, %v3939_v60 }
 0x272   : > { %v3964_v34 = vpop.f32.mrb[28].mxu0 }
 0x273   : > { %v3965_v29 = vpop.f32.mrb[29].mxu0 }
 0x274   : > { %v6169_v24 = vadd.f32 %v3965_v29, %v3964_v34  ;;  %v3967_v12 = vpop.f32.mrb[30].mxu0 }
 0x275   : > { %v3968_v39 = vpop.f32.mrb[31].mxu0  ;;  %v4052_v35 = vpop.f32.mrb[28].mxu1 }
 0x276   : > { %v6171_v42 = vadd.f32 %v3968_v39, %v3967_v12  ;;  %v4053_v6 = vpop.f32.mrb[29].mxu1 }
 0x277   : > { %v4054_v44 = vadd.f32 %v4053_v6, %v4052_v35  ;;  %v4055_v13 = vpop.f32.mrb[30].mxu1 }
 0x278   : > { %v4056_v55 = vpop.f32.mrb[31].mxu1 }
 0x279   : > { %v4057_v49 = vadd.f32 %v4056_v55, %v4055_v13  ;;  %v6174_v61 = vadd.f32 %v4054_v44, %v6141_v33 }
 0x27b   : > { %v6176_v36 = vadd.f32 %v4057_v49, %v3945_v14 }
 0x281   : > { %v3970_v60 = vpop.f32.mrb[32].mxu0 }
 0x282   : > { %v3971_v8 = vpop.f32.mrb[33].mxu0 }
 0x283   : > { %v6178_v63 = vadd.f32 %v3971_v8, %v3970_v60  ;;  %v3973_v59 = vpop.f32.mrb[34].mxu0 }
 0x284   : > { %v3974_v28 = vpop.f32.mrb[35].mxu0  ;;  %v4058_v56 = vpop.f32.mrb[32].mxu1 }
 0x285   : > { %v6180_v31 = vadd.f32 %v3974_v28, %v3973_v59  ;;  %v4059_v1 = vpop.f32.mrb[33].mxu1 }
 0x286   : > { %v4060_v62 = vadd.f32 %v4059_v1, %v4058_v56  ;;  %v4061_v22 = vpop.f32.mrb[34].mxu1 }
 0x287   : > { %v4062_v41 = vpop.f32.mrb[35].mxu1 }
 0x288   : > { %v4063_v4 = vadd.f32 %v4062_v41, %v4061_v22  ;;  %v6183_v0 = vadd.f32 %v4060_v62, %v6147_v5 }
 0x28a   : > { %v3976_v33 = vpop.f32.mrb[36].mxu0  ;;  %v6186_v14 = vadd.f32 %v4063_v4, %v6149_v47 }
 0x28b   : > { %v3977_v10 = vpop.f32.mrb[37].mxu0 }
 0x28c   : > { %v6188_v30 = vadd.f32 %v3977_v10, %v3976_v33  ;;  %v3979_v18 = vpop.f32.mrb[38].mxu0 }
 0x28d   : > { %v3980_v40 = vpop.f32.mrb[39].mxu0  ;;  %v4064_v9 = vpop.f32.mrb[36].mxu1 }
 0x28e   : > { %v6190_v3 = vadd.f32 %v3980_v40, %v3979_v18  ;;  %v4065_v48 = vpop.f32.mrb[37].mxu1 }
 0x28f   : > { %v4066_v7 = vadd.f32 %v4065_v48, %v4064_v9  ;;  %v4067_v2 = vpop.f32.mrb[38].mxu1 }
 0x290   : > { %v4068_v51 = vpop.f32.mrb[39].mxu1 }
 0x291   : > { %v4069_v27 = vadd.f32 %v4068_v51, %v4067_v2  ;;  %v6193_v5 = vadd.f32 %v4066_v7, %v6155_v43 }
 0x293   : > { %v6195_v11 = vadd.f32 %v4069_v27, %v3957_v38 }
 0x296   : > { %v3982_v47 = vpop.f32.mrb[40].mxu0 }
 0x297   : > { %v3983_v15 = vpop.f32.mrb[41].mxu0 }
 0x298   : > { %v6197_v45 = vadd.f32 %v3983_v15, %v3982_v47  ;;  %v3985_v37 = vpop.f32.mrb[42].mxu0 }
 0x299   : > { %v3986_v34 = vpop.f32.mrb[43].mxu0  ;;  %v4070_v29 = vpop.f32.mrb[40].mxu1 }
 0x29a   : > { %v6199_v12 = vadd.f32 %v3986_v34, %v3985_v37  ;;  %v4071_v39 = vpop.f32.mrb[41].mxu1 }
 0x29b   : > { %v4072_v35 = vadd.f32 %v4071_v39, %v4070_v29  ;;  %v4073_v6 = vpop.f32.mrb[42].mxu1 }
 0x29c   : > { %v4074_v44 = vpop.f32.mrb[43].mxu1 }
 0x29d   : > { %v4075_v13 = vadd.f32 %v4074_v44, %v4073_v6  ;;  %v6202_v43 = vadd.f32 %v4072_v35, %v6161_v20 }
 0x29f   : > { %v3988_v38 = vpop.f32.mrb[44].mxu0  ;;  %v6205_v55 = vadd.f32 %v4075_v13, %v6163_v58 }
 0x2a0   : > { %v3989_v49 = vpop.f32.mrb[45].mxu0 }
 0x2a1   : > { %v6207_v60 = vadd.f32 %v3989_v49, %v3988_v38  ;;  %v3991_v8 = vpop.f32.mrb[46].mxu0  ;;  %v4076_v59 = vpop.f32.mrb[44].mxu1 }
 0x2a2   : > { %v3992_v28 = vpop.f32.mrb[47].mxu0  ;;  %v4077_v56 = vpop.f32.mrb[45].mxu1 }
 0x2a3   : > { %v6209_v1 = vadd.f32 %v3992_v28, %v3991_v8  ;;  %v4078_v62 = vadd.f32 %v4077_v56, %v4076_v59  ;;  %v4079_v22 = vpop.f32.mrb[46].mxu1 }
 0x2a4   : > { %v4080_v41 = vpop.f32.mrb[47].mxu1 }
 0x2a5   : > { %v4081_v4 = vadd.f32 %v4080_v41, %v4079_v22  ;;  %v6213_v20 = vadd.f32 %v4078_v62, %v6169_v24 }
 0x2a7   : > { %v4160_v33 = vpop.f32.mrb[48].mxu0  ;;  %v6216_v58 = vadd.f32 %v4081_v4, %v6171_v42 }
 0x2a8   : > { %v3084_v10 = vadd.f32 %v4160_v33, %v6157_v54  ;;  %v3075_v18 = vpop.f32.mrb[49].mxu0 }
 0x2a9   : > { %v3076_v40 = vadd.f32 %v3075_v18, %v6151_v21  ;;  %v4161_v9 = vpop.f32.mrb[50].mxu0  ;;  %v4082_v48 = vpop.f32.mrb[48].mxu1 }
 0x2aa   : > { %3205 = vst.msk [vmem:[%s6220_s30 + $0x10] sm:$0xff] %vm3202_vm0, %v3084_v10  ;;  %v3087_v24 = vadd.f32 %v4161_v9, %v6159_v17  ;;  %v3078_v7 = vpop.f32.mrb[51].mxu0  ;;  %v4083_v42 = vpop.f32.mrb[49].mxu1  ;;  %v3306_v27 = vmul.f32 %v3084_v10, %v3084_v10 }
 0x2ab   : > { %3203 = vst.msk [vmem:[%s6220_s30] sm:$0xff] %vm3202_vm0, %v3076_v40  ;;  %v3304_v54 = vmul.f32 %v3076_v40, %v3076_v40  ;;  %v3079_v2 = vadd.f32 %v3078_v7, %v6153_v26  ;;  %v4084_v21 = vadd.f32 %v4083_v42, %v4082_v48  ;;  %v4085_v51 = vpop.f32.mrb[50].mxu1  ;;  %v3235_v15 = vsel %vm3202_vm0, %v3076_v40, 0.0 }
 0x2ac   : > { %3206 = vst.msk [vmem:[%s6220_s30 + $0x18] sm:$0xff] %vm3202_vm0, %v3087_v24  ;;  %v4086_v47 = vpop.f32.mrb[51].mxu1  ;;  %v3307_v29 = vmul.f32 %v3087_v24, %v3087_v24  ;;  %v3238_v26 = vsel %vm3202_vm0, %v3084_v10, 0.0  ;;  %v3240_v56 = vsel %vm3202_vm0, %v3087_v24, 0.0 }
 0x2ad   : > { %3204 = vst.msk [vmem:[%s6220_s30 + $0x8] sm:$0xff] %vm3202_vm0, %v3079_v2  ;;  %v3236_v37 = vsel %vm3202_vm0, %v3079_v2, 0.0  ;;  %v3305_v17 = vmul.f32 %v3079_v2, %v3079_v2  ;;  %v4087_v34 = vadd.f32 %v4086_v47, %v4085_v51  ;;  %v6235_v35 = vadd.f32 %v4084_v21, %v6178_v63 }
 0x2ae   : > { %v3237_v39 = vadd.f32 %v3236_v37, %v3235_v15  ;;  %v3336_v6 = vsel %vm3202_vm0, %v3304_v54, 0.0  ;;  %v3339_v63 = vsel %vm3202_vm0, %v3306_v27, 0.0  ;;  %v3341_v4 = vsel %vm3202_vm0, %v3307_v29, 0.0 }
 0x2af   : > { %v3337_v44 = vsel %vm3202_vm0, %v3305_v17, 0.0  ;;  %v4164_v13 = vpop.f32.mrb[52].mxu0  ;;  %v6241_v38 = vadd.f32 %v4087_v34, %v6180_v31 }
 0x2b0   : > { %v3239_v49 = vadd.f32 %v3238_v26, %v3237_v39  ;;  %v3338_v8 = vadd.f32 %v3337_v44, %v3336_v6  ;;  %v3100_v59 = vadd.f32 %v4164_v13, %v6174_v61  ;;  %v3091_v28 = vpop.f32.mrb[53].mxu0 }
 0x2b1   : > { %v3092_v62 = vadd.f32 %v3091_v28, %v6165_v53  ;;  %v4165_v22 = vpop.f32.mrb[54].mxu0  ;;  %v4088_v41 = vpop.f32.mrb[52].mxu1 }
 0x2b2   : > { %v3340_v33 = vadd.f32 %v3339_v63, %v3338_v8  ;;  %3209 = vst.msk [vmem:[%s6220_s30 + $0x30] sm:$0xff] %vm3202_vm0, %v3100_v59  ;;  %v3241_v31 = vadd.f32 %v3240_v56, %v3239_v49  ;;  %v3094_v10 = vpop.f32.mrb[55].mxu0  ;;  %v4089_v18 = vpop.f32.mrb[53].mxu1  ;;  %v3103_v9 = vadd.f32 %v4165_v22, %v6176_v36  ;;  %v3310_v2 = vmul.f32 %v3100_v59, %v3100_v59 }
 0x2b3   : > { %3207 = vst.msk [vmem:[%s6220_s30 + $0x20] sm:$0xff] %vm3202_vm0, %v3092_v62  ;;  %v3242_v61 = vsel %vm3202_vm0, %v3092_v62, 0.0  ;;  %v3308_v40 = vmul.f32 %v3092_v62, %v3092_v62  ;;  %v3095_v53 = vadd.f32 %v3094_v10, %v6167_v52  ;;  %v4091_v48 = vpop.f32.mrb[54].mxu1  ;;  %v4090_v42 = vadd.f32 %v4089_v18, %v4088_v41 }
 0x2b4   : > { %v3243_v24 = vadd.f32 %v3242_v61, %v3241_v31  ;;  %v3342_v7 = vadd.f32 %v3341_v4, %v3340_v33  ;;  %v4092_v54 = vpop.f32.mrb[55].mxu1  ;;  %3210 = vst.msk [vmem:[%s6220_s30 + $0x38] sm:$0xff] %vm3202_vm0, %v3103_v9  ;;  %v3246_v52 = vsel %vm3202_vm0, %v3100_v59, 0.0  ;;  %v3311_v37 = vmul.f32 %v3103_v9, %v3103_v9 }
 0x2b5   : > { %v3343_v21 = vsel %vm3202_vm0, %v3308_v40, 0.0  ;;  %3208 = vst.msk [vmem:[%s6220_s30 + $0x28] sm:$0xff] %vm3202_vm0, %v3095_v53  ;;  %v3244_v51 = vsel %vm3202_vm0, %v3095_v53, 0.0  ;;  %v3309_v15 = vmul.f32 %v3095_v53, %v3095_v53  ;;  %v4093_v36 = vadd.f32 %v4092_v54, %v4091_v48 }
 0x2b6   : > { %v3344_v27 = vadd.f32 %v3343_v21, %v3342_v7  ;;  %v3245_v47 = vadd.f32 %v3244_v51, %v3243_v24  ;;  %v6263_v34 = vadd.f32 %v4090_v42, %v6188_v30  ;;  %v3248_v13 = vsel %vm3202_vm0, %v3103_v9, 0.0 }
 0x2b7   : > { %v4168_v17 = vpop.f32.mrb[56].mxu0  ;;  %v3345_v39 = vsel %vm3202_vm0, %v3309_v15, 0.0  ;;  %v6268_v44 = vadd.f32 %v4093_v36, %v6190_v3  ;;  %v3347_v30 = vsel %vm3202_vm0, %v3310_v2, 0.0  ;;  %v3349_v33 = vsel %vm3202_vm0, %v3311_v37, 0.0 }
 0x2b8   : > { %v3247_v29 = vadd.f32 %v3246_v52, %v3245_v47  ;;  %v3116_v26 = vadd.f32 %v4168_v17, %v6193_v5  ;;  %v3107_v6 = vpop.f32.mrb[57].mxu0  ;;  %v3346_v49 = vadd.f32 %v3345_v39, %v3344_v27 }
 0x2b9   : > { %v3108_v8 = vadd.f32 %v3107_v6, %v6183_v0  ;;  %v4169_v59 = vpop.f32.mrb[58].mxu0  ;;  %v4094_v28 = vpop.f32.mrb[56].mxu1 }
 0x2ba   : > { %3213 = vst.msk [vmem:[%s6220_s30 + $0x50] sm:$0xff] %vm3202_vm0, %v3116_v26  ;;  %v3249_v63 = vadd.f32 %v3248_v13, %v3247_v29  ;;  %v3119_v5 = vadd.f32 %v4169_v59, %v6195_v11  ;;  %v3110_v56 = vpop.f32.mrb[59].mxu0  ;;  %v4095_v62 = vpop.f32.mrb[57].mxu1  ;;  %v3348_v3 = vadd.f32 %v3347_v30, %v3346_v49  ;;  %v3314_v9 = vmul.f32 %v3116_v26, %v3116_v26 }
 0x2bb   : > { %3211 = vst.msk [vmem:[%s6220_s30 + $0x40] sm:$0xff] %vm3202_vm0, %v3108_v8  ;;  %v3250_v22 = vsel %vm3202_vm0, %v3108_v8, 0.0  ;;  %v3312_v41 = vmul.f32 %v3108_v8, %v3108_v8  ;;  %v3111_v0 = vadd.f32 %v3110_v56, %v6186_v14  ;;  %v4097_v4 = vpop.f32.mrb[58].mxu1  ;;  %v4096_v48 = vadd.f32 %v4095_v62, %v4094_v28 }
 0x2bc   : > { %v3251_v31 = vadd.f32 %v3250_v22, %v3249_v63  ;;  %3214 = vst.msk [vmem:[%s6220_s30 + $0x58] sm:$0xff] %vm3202_vm0, %v3119_v5  ;;  %v4098_v10 = vpop.f32.mrb[59].mxu1  ;;  %v3350_v18 = vadd.f32 %v3349_v33, %v3348_v3  ;;  %v3254_v14 = vsel %vm3202_vm0, %v3116_v26, 0.0  ;;  %v3315_v42 = vmul.f32 %v3119_v5, %v3119_v5 }
 0x2bd   : > { %v3351_v11 = vsel %vm3202_vm0, %v3312_v41, 0.0  ;;  %3212 = vst.msk [vmem:[%s6220_s30 + $0x48] sm:$0xff] %vm3202_vm0, %v3111_v0  ;;  %v3252_v61 = vsel %vm3202_vm0, %v3111_v0, 0.0  ;;  %v3313_v40 = vmul.f32 %v3111_v0, %v3111_v0  ;;  %v4099_v24 = vadd.f32 %v4098_v10, %v4097_v4 }
 0x2be   : > { %v3253_v53 = vadd.f32 %v3252_v61, %v3251_v31  ;;  %v3352_v7 = vadd.f32 %v3351_v11, %v3350_v18  ;;  %v6291_v47 = vadd.f32 %v4096_v48, %v6197_v45  ;;  %v3256_v36 = vsel %vm3202_vm0, %v3119_v5, 0.0 }
 0x2bf   : > { %v3353_v54 = vsel %vm3202_vm0, %v3313_v40, 0.0  ;;  %v4172_v2 = vpop.f32.mrb[60].mxu0  ;;  %v6294_v15 = vadd.f32 %v4099_v24, %v6199_v12  ;;  %v3355_v39 = vsel %vm3202_vm0, %v3314_v9, 0.0  ;;  %v3357_v59 = vsel %vm3202_vm0, %v3315_v42, 0.0 }
 0x2c0   : > { %v3255_v21 = vadd.f32 %v3254_v14, %v3253_v53  ;;  %v3132_v51 = vadd.f32 %v4172_v2, %v6213_v20  ;;  %v3123_v27 = vpop.f32.mrb[61].mxu0  ;;  %v3354_v52 = vadd.f32 %v3353_v54, %v3352_v7 }
 0x2c1   : > { %v3124_v37 = vadd.f32 %v3123_v27, %v6202_v43  ;;  %v4173_v17 = vpop.f32.mrb[62].mxu0  ;;  %v4100_v29 = vpop.f32.mrb[60].mxu1 }
 0x2c2   : > { %3217 = vst.msk [vmem:[%s6220_s30 + $0x70] sm:$0xff] %vm3202_vm0, %v3132_v51  ;;  %v3257_v20 = vadd.f32 %v3256_v36, %v3255_v21  ;;  %v3135_v45 = vadd.f32 %v4173_v17, %v6216_v58  ;;  %v3126_v26 = vpop.f32.mrb[63].mxu0  ;;  %v4101_v6 = vpop.f32.mrb[61].mxu1  ;;  %v3356_v12 = vadd.f32 %v3355_v39, %v3354_v52  ;;  %v3318_v62 = vmul.f32 %v3132_v51, %v3132_v51 }
 0x2c3   : > { %3215 = vst.msk [vmem:[%s6220_s30 + $0x60] sm:$0xff] %vm3202_vm0, %v3124_v37  ;;  %v3258_v13 = vsel %vm3202_vm0, %v3124_v37, 0.0  ;;  %v3316_v49 = vmul.f32 %v3124_v37, %v3124_v37  ;;  %v3127_v43 = vadd.f32 %v3126_v26, %v6205_v55  ;;  %v4103_v8 = vpop.f32.mrb[62].mxu1  ;;  %v4102_v22 = vadd.f32 %v4101_v6, %v4100_v29 }
 0x2c4   : > { %v3259_v28 = vadd.f32 %v3258_v13, %v3257_v20  ;;  %3218 = vst.msk [vmem:[%s6220_s30 + $0x78] sm:$0xff] %vm3202_vm0, %v3135_v45  ;;  %v4104_v30 = vpop.f32.mrb[63].mxu1  ;;  %v3358_v63 = vadd.f32 %v3357_v59, %v3356_v12  ;;  %v3262_v55 = vsel %vm3202_vm0, %v3132_v51, 0.0  ;;  %v3319_v4 = vmul.f32 %v3135_v45, %v3135_v45 }
 0x2c5   : > { %v3359_v58 = vsel %vm3202_vm0, %v3316_v49, 0.0  ;;  %3216 = vst.msk [vmem:[%s6220_s30 + $0x68] sm:$0xff] %vm3202_vm0, %v3127_v43  ;;  %v3260_v5 = vsel %vm3202_vm0, %v3127_v43, 0.0  ;;  %v3317_v56 = vmul.f32 %v3127_v43, %v3127_v43  ;;  %v4105_v41 = vadd.f32 %v4104_v30, %v4103_v8 }
 0x2c6   : > { %v3261_v3 = vadd.f32 %v3260_v5, %v3259_v28  ;;  %v3360_v0 = vadd.f32 %v3359_v58, %v3358_v63  ;;  %v3003_v61 = vadd.f32 %v4102_v22, %v6207_v60  ;;  %v3264_v9 = vsel %vm3202_vm0, %v3135_v45, 0.0 }
 0x2c7   : > { %v3361_v33 = vsel %vm3202_vm0, %v3317_v56, 0.0  ;;  %v4176_v31 = vpop.f32.mrb[64].mxu0  ;;  %v3006_v40 = vadd.f32 %v4105_v41, %v6209_v1  ;;  %v3363_v7 = vsel %vm3202_vm0, %v3318_v62, 0.0  ;;  %v3365_v27 = vsel %vm3202_vm0, %v3319_v4, 0.0 }
 0x2c8   : > { %v3263_v10 = vadd.f32 %v3262_v55, %v3261_v3  ;;  %v3148_v18 = vadd.f32 %v4176_v31, %v6263_v34  ;;  %v3139_v11 = vpop.f32.mrb[65].mxu0  ;;  %v3362_v53 = vadd.f32 %v3361_v33, %v3360_v0 }
 0x2c9   : > { %v3140_v48 = vadd.f32 %v3139_v11, %v6235_v35  ;;  %v4177_v24 = vpop.f32.mrb[66].mxu0  ;;  %v4106_v14 = vpop.f32.mrb[64].mxu1 }
 0x2ca   : > { %3221 = vst.msk [vmem:[%s6220_s30 + $0x90] sm:$0xff] %vm3202_vm0, %v3148_v18  ;;  %v3265_v42 = vadd.f32 %v3264_v9, %v3263_v10  ;;  %v3151_v34 = vadd.f32 %v4177_v24, %v6268_v44  ;;  %v3142_v54 = vpop.f32.mrb[67].mxu0  ;;  %v4107_v60 = vpop.f32.mrb[65].mxu1  ;;  %v3364_v2 = vadd.f32 %v3363_v7, %v3362_v53  ;;  %v3322_v39 = vmul.f32 %v3148_v18, %v3148_v18 }
 0x2cb   : > { %3219 = vst.msk [vmem:[%s6220_s30 + $0x80] sm:$0xff] %vm3202_vm0, %v3140_v48  ;;  %v3266_v1 = vsel %vm3202_vm0, %v3140_v48, 0.0  ;;  %v3320_v21 = vmul.f32 %v3140_v48, %v3140_v48  ;;  %v3143_v35 = vadd.f32 %v3142_v54, %v6241_v38  ;;  %v4109_v51 = vpop.f32.mrb[66].mxu1  ;;  %v4108_v45 = vadd.f32 %v4107_v60, %v4106_v14 }
 0x2cc   : > { %v3267_v36 = vadd.f32 %v3266_v1, %v3265_v42  ;;  %3222 = vst.msk [vmem:[%s6220_s30 + $0x98] sm:$0xff] %vm3202_vm0, %v3151_v34  ;;  %v4110_v52 = vpop.f32.mrb[67].mxu1  ;;  %v3366_v37 = vadd.f32 %v3365_v27, %v3364_v2  ;;  %v3270_v38 = vsel %vm3202_vm0, %v3148_v18, 0.0  ;;  %v3323_v12 = vmul.f32 %v3151_v34, %v3151_v34 }
 0x2cd   : > { %v3367_v44 = vsel %vm3202_vm0, %v3320_v21, 0.0  ;;  %3220 = vst.msk [vmem:[%s6220_s30 + $0x88] sm:$0xff] %vm3202_vm0, %v3143_v35  ;;  %v3268_v17 = vsel %vm3202_vm0, %v3143_v35, 0.0  ;;  %v3321_v29 = vmul.f32 %v3143_v35, %v3143_v35  ;;  %v4111_v26 = vadd.f32 %v4110_v52, %v4109_v51 }
 0x2ce   : > { %v3269_v20 = vadd.f32 %v3268_v17, %v3267_v36  ;;  %v3368_v6 = vadd.f32 %v3367_v44, %v3366_v37  ;;  %v3011_v28 = vadd.f32 %v4108_v45, %v6129_v16  ;;  %v3272_v63 = vsel %vm3202_vm0, %v3151_v34, 0.0 }
 0x2cf   : > { %v3369_v13 = vsel %vm3202_vm0, %v3321_v29, 0.0  ;;  %v4180_v49 = vpop.f32.mrb[68].mxu0  ;;  %v3014_v30 = vadd.f32 %v4111_v26, %v6131_v23  ;;  %v3371_v3 = vsel %vm3202_vm0, %v3322_v39, 0.0  ;;  %v3373_v31 = vsel %vm3202_vm0, %v3323_v12, 0.0 }
 0x2d0   : > { %v3271_v43 = vadd.f32 %v3270_v38, %v3269_v20  ;;  %v3164_v8 = vadd.f32 %v4180_v49, %v3003_v61  ;;  %v3155_v59 = vpop.f32.mrb[69].mxu0  ;;  %v3370_v58 = vadd.f32 %v3369_v13, %v3368_v6 }
 0x2d1   : > { %v3156_v5 = vadd.f32 %v3155_v59, %v6291_v47  ;;  %v4181_v56 = vpop.f32.mrb[70].mxu0  ;;  %v4112_v62 = vpop.f32.mrb[68].mxu1 }
 0x2d2   : > { %3225 = vst.msk [vmem:[%s6220_s30 + $0xb0] sm:$0xff] %vm3202_vm0, %v3164_v8  ;;  %v3273_v22 = vadd.f32 %v3272_v63, %v3271_v43  ;;  %v3167_v41 = vadd.f32 %v4181_v56, %v3006_v40  ;;  %v3158_v55 = vpop.f32.mrb[71].mxu0  ;;  %v4113_v0 = vpop.f32.mrb[69].mxu1  ;;  %v3372_v16 = vadd.f32 %v3371_v3, %v3370_v58  ;;  %v3326_v53 = vmul.f32 %v3164_v8, %v3164_v8 }
 0x2d3   : > { %3223 = vst.msk [vmem:[%s6220_s30 + $0xa0] sm:$0xff] %vm3202_vm0, %v3156_v5  ;;  %v3274_v23 = vsel %vm3202_vm0, %v3156_v5, 0.0  ;;  %v3324_v4 = vmul.f32 %v3156_v5, %v3156_v5  ;;  %v3159_v47 = vadd.f32 %v3158_v55, %v6294_v15  ;;  %v4115_v33 = vpop.f32.mrb[70].mxu1  ;;  %v4114_v24 = vadd.f32 %v4113_v0, %v4112_v62 }
 0x2d4   : > { %v3275_v10 = vadd.f32 %v3274_v23, %v3273_v22  ;;  %3226 = vst.msk [vmem:[%s6220_s30 + $0xb8] sm:$0xff] %vm3202_vm0, %v3167_v41  ;;  %v4116_v18 = vpop.f32.mrb[71].mxu1  ;;  %v3374_v11 = vadd.f32 %v3373_v31, %v3372_v16  ;;  %v3278_v15 = vsel %vm3202_vm0, %v3164_v8, 0.0  ;;  %v3327_v54 = vmul.f32 %v3167_v41, %v3167_v41 }
 0x2d5   : > { %v3375_v61 = vsel %vm3202_vm0, %v3324_v4, 0.0  ;;  %3224 = vst.msk [vmem:[%s6220_s30 + $0xa8] sm:$0xff] %vm3202_vm0, %v3159_v47  ;;  %v3276_v40 = vsel %vm3202_vm0, %v3159_v47, 0.0  ;;  %v3325_v9 = vmul.f32 %v3159_v47, %v3159_v47  ;;  %v4117_v14 = vadd.f32 %v4116_v18, %v4115_v33 }
 0x2d6   : > { %v3277_v48 = vadd.f32 %v3276_v40, %v3275_v10  ;;  %v3376_v7 = vadd.f32 %v3375_v61, %v3374_v11  ;;  %v3019_v2 = vadd.f32 %v4114_v24, %v6133_v46  ;;  %v3280_v35 = vsel %vm3202_vm0, %v3167_v41, 0.0 }
 0x2d7   : > { %v3377_v42 = vsel %vm3202_vm0, %v3325_v9, 0.0  ;;  %v4184_v34 = vpop.f32.mrb[72].mxu0  ;;  %v3022_v21 = vadd.f32 %v4117_v14, %v6135_v19  ;;  %v3379_v37 = vsel %vm3202_vm0, %v3326_v53, 0.0  ;;  %v3381_v6 = vsel %vm3202_vm0, %v3327_v54, 0.0 }
 0x2d8   : > { %v3279_v60 = vadd.f32 %v3278_v15, %v3277_v48  ;;  %v3171_v1 = vpop.f32.mrb[73].mxu0  ;;  %v3378_v51 = vadd.f32 %v3377_v42, %v3376_v7  ;;  %v3180_v44 = vadd.f32 %v4184_v34, %v3019_v2 }
 0x2d9   : > { %v3172_v27 = vadd.f32 %v3171_v1, %v3011_v28  ;;  %v4185_v36 = vpop.f32.mrb[74].mxu0  ;;  %v4118_v52 = vpop.f32.mrb[72].mxu1 }
 0x2da   : > { %v3281_v17 = vadd.f32 %v3280_v35, %v3279_v60  ;;  %v3183_v29 = vadd.f32 %v4185_v36, %v3022_v21  ;;  %v3174_v39 = vpop.f32.mrb[75].mxu0  ;;  %v4119_v20 = vpop.f32.mrb[73].mxu1  ;;  %v3380_v46 = vadd.f32 %v3379_v37, %v3378_v51  ;;  %3229 = vst.msk [vmem:[%s6220_s30 + $0xd0] sm:$0xff] %vm3202_vm0, %v3180_v44  ;;  %v3330_v59 = vmul.f32 %v3180_v44, %v3180_v44 }
 0x2db   : > { %3227 = vst.msk [vmem:[%s6220_s30 + $0xc0] sm:$0xff] %vm3202_vm0, %v3172_v27  ;;  %v3282_v19 = vsel %vm3202_vm0, %v3172_v27, 0.0  ;;  %v3328_v45 = vmul.f32 %v3172_v27, %v3172_v27  ;;  %v3175_v26 = vadd.f32 %v3174_v39, %v3014_v30  ;;  %v4121_v38 = vpop.f32.mrb[74].mxu1  ;;  %v4120_v30 = vadd.f32 %v4119_v20, %v4118_v52 }
 0x2dc   : > { %v3283_v12 = vadd.f32 %v3282_v19, %v3281_v17  ;;  %3230 = vst.msk [vmem:[%s6220_s30 + $0xd8] sm:$0xff] %vm3202_vm0, %v3183_v29  ;;  %v4122_v13 = vpop.f32.mrb[75].mxu1  ;;  %v3382_v49 = vadd.f32 %v3381_v6, %v3380_v46  ;;  %v3286_v58 = vsel %vm3202_vm0, %v3180_v44, 0.0  ;;  %v3331_v3 = vmul.f32 %v3183_v29, %v3183_v29 }
 0x2dd   : > { %v3383_v43 = vsel %vm3202_vm0, %v3328_v45, 0.0  ;;  %3228 = vst.msk [vmem:[%s6220_s30 + $0xc8] sm:$0xff] %vm3202_vm0, %v3175_v26  ;;  %v3284_v8 = vsel %vm3202_vm0, %v3175_v26, 0.0  ;;  %v3329_v63 = vmul.f32 %v3175_v26, %v3175_v26  ;;  %v4123_v56 = vadd.f32 %v4122_v13, %v4121_v38 }
 0x2de   : > { %v3285_v28 = vadd.f32 %v3284_v8, %v3283_v12  ;;  %v3384_v5 = vadd.f32 %v3383_v43, %v3382_v49  ;;  %v3027_v55 = vadd.f32 %v4120_v30, %v6137_v50  ;;  %v3288_v16 = vsel %vm3202_vm0, %v3183_v29, 0.0 }
 0x2df   : > { %v4188_v62 = vpop.f32.mrb[76].mxu0  ;;  %v3385_v41 = vsel %vm3202_vm0, %v3329_v63, 0.0  ;;  %v3030_v47 = vadd.f32 %v4123_v56, %v6139_v32  ;;  %v3387_v31 = vsel %vm3202_vm0, %v3330_v59, 0.0  ;;  %v3389_v48 = vsel %vm3202_vm0, %v3331_v3, 0.0 }
 0x2e0   : > { %v3287_v22 = vadd.f32 %v3286_v58, %v3285_v28  ;;  %v3187_v0 = vpop.f32.mrb[77].mxu0  ;;  %v3386_v23 = vadd.f32 %v3385_v41, %v3384_v5 }
 0x2e1   : > { %v4189_v4 = vpop.f32.mrb[78].mxu0  ;;  %v4124_v33 = vpop.f32.mrb[76].mxu1  ;;  %v3188_v10 = vadd.f32 %v3187_v0, %v3027_v55 }
 0x2e2   : > { %v3289_v18 = vadd.f32 %v3288_v16, %v3287_v22  ;;  %v3190_v11 = vpop.f32.mrb[79].mxu0  ;;  %v4125_v61 = vpop.f32.mrb[77].mxu1  ;;  %v3388_v40 = vadd.f32 %v3387_v31, %v3386_v23 }
 0x2e3   : > { %v3191_v9 = vadd.f32 %v3190_v11, %v3030_v47  ;;  %v4126_v50 = vadd.f32 %v4125_v61, %v4124_v33  ;;  %v4127_v53 = vpop.f32.mrb[78].mxu1  ;;  %3231 = vst.msk [vmem:[%s6220_s30 + $0xe0] sm:$0xff] %vm3202_vm0, %v3188_v10  ;;  %v3290_v32 = vsel %vm3202_vm0, %v3188_v10, 0.0  ;;  %v3332_v24 = vmul.f32 %v3188_v10, %v3188_v10 }
 0x2e4   : > { %v4128_v14 = vpop.f32.mrb[79].mxu1  ;;  %v3291_v15 = vadd.f32 %v3290_v32, %v3289_v18  ;;  %v3390_v7 = vadd.f32 %v3389_v48, %v3388_v40 }
 0x2e5   : > { %3232 = vst.msk [vmem:[%s6220_s30 + $0xe8] sm:$0xff] %vm3202_vm0, %v3191_v9  ;;  %v3292_v42 = vsel %vm3202_vm0, %v3191_v9, 0.0  ;;  %v3333_v34 = vmul.f32 %v3191_v9, %v3191_v9  ;;  %v3391_v54 = vsel %vm3202_vm0, %v3332_v24, 0.0  ;;  %v3035_v60 = vadd.f32 %v4126_v50, %v6143_v25 }
 0x2e6   : > { %v4129_v2 = vadd.f32 %v4128_v14, %v4127_v53  ;;  %v3392_v1 = vadd.f32 %v3391_v54, %v3390_v7  ;;  %v3293_v21 = vadd.f32 %v3292_v42, %v3291_v15 }
 0x2e7   : > { %v3393_v35 = vsel %vm3202_vm0, %v3333_v34, 0.0  ;;  %v3196_v51 = vadd.f32 %v4188_v62, %v3035_v60 }
 0x2e8   : > { %v3038_v27 = vadd.f32 %v4129_v2, %v6145_v57  ;;  %v3394_v36 = vadd.f32 %v3393_v35, %v3392_v1 }
 0x2e9   : > { %3233 = vst.msk [vmem:[%s6220_s30 + $0xf0] sm:$0xff] %vm3202_vm0, %v3196_v51  ;;  %v3294_v25 = vsel %vm3202_vm0, %v3196_v51, 0.0  ;;  %v3334_v52 = vmul.f32 %v3196_v51, %v3196_v51 }
 0x2ea   : > { %v3199_v37 = vadd.f32 %v4189_v4, %v3038_v27  ;;  %v3295_v44 = vadd.f32 %v3294_v25, %v3293_v21 }
 0x2eb   : > { %v3395_v57 = vsel %vm3202_vm0, %v3334_v52, 0.0 }
 0x2ec   : > { %3234 = vst.msk [vmem:[%s6220_s30 + $0xf8] sm:$0xff] %vm3202_vm0, %v3199_v37  ;;  %v3296_v17 = vsel %vm3202_vm0, %v3199_v37, 0.0  ;;  %v3335_v29 = vmul.f32 %v3199_v37, %v3199_v37  ;;  %v3396_v39 = vadd.f32 %v3395_v57, %v3394_v36 }
 0x2ed   : > { %v3297_v20 = vadd.f32 %v3296_v17, %v3295_v44 }
 0x2ee   : > { %4509 = shalt.err (!%p4506_p0)
}
 0x2ef   : > { %s4510_s25 = scalar_lea.hbm %s6395_s18, 4096  ;;  %s4514_s26 = scalar_lea.hbm %s6489_s4, 8192 }
 0x2f0   : > { %p4511_p4 = scmp.ne.s32.totalorder %s6395_s18, %s4510_s25  ;;  %p4515_p12 = scmp.lt.u32.totalorder %s6395_s18, %s6489_s4 }
 0x2f1   : > { %p4516_p1 = scmp.lt.u32.totalorder %s4514_s26, %s4510_s25  ;;  %p4518_p13 = scmp.lt.u32.totalorder %s4510_s25, %s6395_s18 }
 0x2f2   : > { %p4512_p2 = pnand %p4511_p4, %p4817_p10 }
 0x2f3   : > { %p4517_p11 = por %p4516_p1, %p4515_p12 }
 0x2f4   : > { %p4513_p8 = pneg %p4512_p2 }
 0x2f5   : > { %p4519_p6 = por %p4518_p13, %p4517_p11 }
 0x2f7   : > { %p4520_p3 = pnand %p4519_p6, %p4513_p8 }
 0x2f9   : > { %4523 = shalt.err (!%p4520_p3)
}
 0x2fa   : > { %s4629_s11 = smov 128   ;;  %s4630_s27 = smov 8   ;;  %v3397_v46 = vsel %vm3202_vm0, %v3335_v29, 0.0  ;;  %v3298_v19 = vrot.slane %v3297_v20, 4  ;;  %vm3405_vm1 = vcmask 1040384   ;;  %vm3407_vm2 = vcmask 25600  }
 0x2fb   : > { %4220 = dma.vmem_to_hbm [thread:$0]  (%p4817_p10), %s6397_s13, 4096, %s6395_s18, %s3410_s29, %s4629_s11, %s4629_s11, %s4630_s27   ;;  %v3398_v45 = vadd.f32 %v3397_v46, %v3396_v39 }
 0x2fc   : > { %v3299_v26 = vadd.f32 %v3298_v19, %v3297_v20  ;;  %s3615_s10 = sshll.u32 %s4878_s24, 1  ;;  %s3786_s16 = sshll.u32 %s4610_s21, 5 }
 0x2fd   : > { %v3399_v38 = vrot.slane %v3398_v45, 4  ;;  %s309_s14 = scalar_lea.vmem [#allocation12], %s3615_s10  ;;  %s6436_s29 = scalar_lea.hbm %s6490_s5, %s3786_s16 }
 0x2fe   : > { %v3300_v6 = vrot.slane %v3299_v26, 2  ;;  %s3448_s17 = sshll.u32 %s309_s14, 4  ;;  %s3415_s12 = scalar_lea.sflag [#allocation13], %s4878_s24  ;;  %s6438_s17 = int_to_ptr.vmem [resolvable:$true] %s3448_s17 }
 0x2ff   : > { %v3400_v12 = vadd.f32 %v3399_v38, %v3398_v45  ;;  %s4524_s21 = scalar_lea.vmem %s6438_s17, 32  ;;  %s4631_s25 = smov [#allocation12]  }
 0x300   : > { %v3301_v13 = vadd.f32 %v3300_v6, %v3299_v26  ;;  %p4525_p5 = scmp.ne.s32.totalorder %s6438_s17, %s4524_s21  ;;  %s4528_s9 = sshll.u32 %s4631_s25, 4  ;;  %s4529_s9 = int_to_ptr.vmem [resolvable:$false] %s4528_s9 }
 0x301   : > { %v3401_v49 = vrot.slane %v3400_v12, 2  ;;  %s4530_s7 = scalar_lea.vmem %s4529_s9, 64  ;;  %p4531_p0 = scmp.lt.s32.totalorder %s6438_s17, %s4529_s9 }
 0x302   : > { %v3302_v43 = vrot.slane %v3301_v13, 1  ;;  %p4526_p7 = pnand %p4525_p5, %p4817_p10  ;;  %p4532_p4 = scmp.lt.s32.totalorder %s4530_s7, %s4524_s21 }
 0x303   : > { %v3402_v8 = vadd.f32 %v3401_v49, %v3400_v12 }
 0x304   : > { %v3303_v28 = vadd.f32 %v3302_v43, %v3301_v13  ;;  %p4527_p9 = pneg %p4526_p7  ;;  %p4533_p2 = por %p4532_p4, %p4531_p0 }
 0x305   : > { %v3403_v59 = vrot.slane %v3402_v8, 1 }
 0x306   : > { %p4534_p8 = pnand %p4533_p2, %p4527_p9 }
 0x307   : > { %v3404_v63 = vadd.f32 %v3403_v59, %v3402_v8 }
 0x309   : > { %v3406_v30 = vsel %vm3405_vm1, %v3303_v28, %v3404_v63 }
 0x30a   : > { %3408 = vst.msk [vmem:[%s309_s14] sm:$0x3] %vm3407_vm2, %v3406_v30 }
 0x30b   : > { %4537 = shalt.err (!%p4534_p8)
}
 0x30c   : > { %s4538_s24 = scalar_lea.hbm %s6436_s29, 32  ;;  %s4542_s30 = scalar_lea.hbm %s6490_s5, 64 }
 0x30d   : > { %p4539_p12 = scmp.ne.s32.totalorder %s6436_s29, %s4538_s24  ;;  %p4543_p13 = scmp.lt.u32.totalorder %s6436_s29, %s6490_s5 }
 0x30e   : > { %p4544_p6 = scmp.lt.u32.totalorder %s4542_s30, %s4538_s24  ;;  %p4546_p5 = scmp.lt.u32.totalorder %s4538_s24, %s6436_s29 }
 0x30f   : > { %p4540_p1 = pnand %p4539_p12, %p4817_p10 }
 0x310   : > { %p4545_p3 = por %p4544_p6, %p4543_p13 }
 0x311   : > { %p4541_p11 = pneg %p4540_p1 }
 0x312   : > { %p4547_p7 = por %p4546_p5, %p4545_p3 }
 0x314   : > { %p4548_p9 = pnand %p4547_p7, %p4541_p11 }
 0x316   : > { %4551 = shalt.err (!%p4548_p9)
}
 0x317   : > { %4221 = dma.vmem_to_hbm [thread:$0]  (%p4817_p10), %s6438_s17, 32, %s6436_s29, %s3415_s12  }
 0x318 PF: > { %s6576_s10 = sld [smem:[#allocation19_spill]]  ;;  %s6577_s16 = sld [smem:[#allocation20_spill]] }
 0x319   : > { %p6579_p4 = scmp.ge.s32.totalorder %s4618_s23, 2 }
 0x31e   : > { %s3460_s14 = sand.u32 1, %s6576_s10   ;;  %p6578_p0 = scmp.ne.s32.totalorder %s6577_s16, 0 }
 0x31f   : > { %s3461_s13 = scalar_lea.sflag [#allocation5], %s3460_s14 }
 0x320   : > { %p4239_p2 = pnand %p6579_p4, %p6578_p0 }
 0x322   : > { %4589 = dma.done.wait (!%p4239_p2), %s3461_s13, 4096  }
 0x323   : > { %4591 = vsyncadd (!%p4239_p2), %s3461_s13, 4294963200  ;;  %s3470_s18 = scalar_lea.sflag [#allocation13], %s3460_s14 }
 0x324   : > { %4593 = dma.done.wait (!%p4239_p2), %s3470_s18, 32  }
 0x325   : > { %4595 = vsyncadd (!%p4239_p2), %s3470_s18, 4294967264  ;;  %s27_s23 = sadd.s32 1, %s4618_s23   ;;  %s6580_s18 = smov %s4602_s19 }
 0x326   : > { %p24_p8 = scmp.ge.s32.totalorder %s27_s23, 4   ;;  %s6581_s19 = smov %s4606_s20 }
 0x327   : > { %s6582_s20 = smov %s4829_s6  ;;  %s6583_s21 = smov %s4614_s22 }
 0x328   : > { %s6584_s22 = smov %s6586_s15  ;;  %26 = sbr.rel (!%p24_p8) target bundleno = 10 (0xa), region = 132 }
 0x32f   :  { %3475 = vsyncpa [#allocation4], 1 }
 0x330   :  { %3477 = vsyncpa [#allocation4 + $0x1], 1 }
 0x331   :  { %3478 = vsyncpa [#allocation7], 1 }
 0x332   :  { %3479 = vsyncpa [#allocation10], 1 }
 0x333   :  { %3480 = vsyncpa [#allocation5], 1 }
 0x334   :  { %3482 = vsyncpa [#allocation5 + $0x1], 1 }
 0x335   :  { %3483 = vsyncpa [#allocation13], 1 }
 0x336   :  { %3485 = vsyncpa [#allocation13 + $0x1], 1 }

</bundles_post_ra>
